<compile_context>
chip_gen: v7x
topology: tpu7x:2x2x1
jax: 0.10.0
libtpu: 0.0.40
codegen_flags: <defaults>
</compile_context>

<pallas_src>
import functools
import math

import jax
import jax.numpy as jnp
from jax.experimental import pallas as pl
from jax.experimental.pallas import tpu as pltpu


_VMEM_LIMIT = 32 * 1024 * 1024


# --------------------------- tiled matmul kernel ----------------------------

def _matmul_kernel(x_ref, w_ref, b_ref, o_ref, *, relu_out):
    acc = jnp.dot(x_ref[...], w_ref[...], preferred_element_type=jnp.float32)
    acc = acc + b_ref[...]
    if relu_out:
        acc = jnp.maximum(acc, 0.0)
    o_ref[...] = acc.astype(o_ref.dtype)


def matmul_bias(x, w, b, *, relu_out=False, block_m=256):
    """y = x @ w + b (optional ReLU), row-tiled with a parallel grid axis."""
    M, K = x.shape
    N = w.shape[1]
    bm = block_m if (M % block_m == 0) else M
    grid = (M // bm,)
    return pl.pallas_call(
        functools.partial(_matmul_kernel, relu_out=relu_out),
        out_shape=jax.ShapeDtypeStruct((M, N), jnp.float32),
        grid=grid,
        in_specs=[
            pl.BlockSpec((bm, K), lambda i: (i, 0)),
            pl.BlockSpec((K, N), lambda i: (0, 0)),
            pl.BlockSpec((1, N), lambda i: (0, 0)),
        ],
        out_specs=pl.BlockSpec((bm, N), lambda i: (i, 0)),
        compiler_params=pltpu.CompilerParams(
            dimension_semantics=("parallel",),
            vmem_limit_bytes=_VMEM_LIMIT),
    )(x, w, b)


# ----------------------- fused transformer encoder layer --------------------

def _encoder_layer_kernel(x_ref, wq_ref, wk_ref, wv_ref, bq_ref, bk_ref, bv_ref,
                          hp_ref, hb_ref, wo_ref, bo_ref, g1_ref, be1_ref,
                          w1_ref, f1b_ref, w2_ref, f2b_ref, g2_ref, be2_ref,
                          *rest, L, N, nhead, eps, first_proj, final_head):
    idx = 0
    if first_proj:
        fc1w_ref, fc1b_ref = rest[idx], rest[idx + 1]
        idx += 2
    if final_head:
        fc2w_ref, fc2b_ref = rest[idx], rest[idx + 1]
        idx += 2
    o_ref = rest[idx]

    f32 = jnp.float32
    x = x_ref[...]                                   # (L*N, E) or (L*N, num_fc_first)
    if first_proj:
        # fc1 fused into the first encoder layer (no extra launch / HBM trip).
        x = jnp.dot(x, fc1w_ref[...], preferred_element_type=f32) + fc1b_ref[...]

    E = wq_ref.shape[0]
    dh = E // nhead
    scale = 1.0 / math.sqrt(dh)

    q = jnp.dot(x, wq_ref[...], preferred_element_type=f32) + bq_ref[...]
    k = jnp.dot(x, wk_ref[...], preferred_element_type=f32) + bk_ref[...]
    v = jnp.dot(x, wv_ref[...], preferred_element_type=f32) + bv_ref[...]

    head_pool = hp_ref[...]                          # (E, nhead) one-hot
    head_bcast = hb_ref[...]                         # (nhead, E) one-hot

    qs = [q[l * N:(l + 1) * N, :] for l in range(L)]
    ks = [k[l * N:(l + 1) * N, :] for l in range(L)]
    vs = [v[l * N:(l + 1) * N, :] for l in range(L)]

    # Attention over the L axis (batch_first=False: sequence axis is B),
    # unrolled since L is tiny.  Per-head scores come from elementwise q*k
    # followed by a one-hot "pool over dh" matmul, so no degenerate per-head
    # (L, dh) MXU matmuls and no padded-vreg blowup.
    outs = []
    for lq in range(L):
        s = [jnp.dot(qs[lq] * ks[lk], head_pool,
                     preferred_element_type=f32) * scale
             for lk in range(L)]                     # each (N, nhead)
        m = s[0]
        for t in s[1:]:
            m = jnp.maximum(m, t)
        e = [jnp.exp(t - m) for t in s]
        den = e[0]
        for t in e[1:]:
            den = den + t
        inv = pl.reciprocal(den, approx=True)        # EUP slot
        o = None
        for lk in range(L):
            a_full = jnp.dot(e[lk] * inv, head_bcast,
                             preferred_element_type=f32)    # (N, E)
            contrib = a_full * vs[lk]
            o = contrib if o is None else o + contrib
        outs.append(o)
    attn = jnp.concatenate(outs, axis=0) if L > 1 else outs[0]   # (L*N, E)

    attn = jnp.dot(attn, wo_ref[...], preferred_element_type=f32) + bo_ref[...]

    # residual + LayerNorm 1 (post-norm, PyTorch default)
    y = x + attn
    mu = jnp.mean(y, axis=-1, keepdims=True)
    var = jnp.mean(jnp.square(y - mu), axis=-1, keepdims=True)
    y = (y - mu) * jax.lax.rsqrt(var + eps) * g1_ref[...] + be1_ref[...]

    # feed-forward, fully VMEM-resident
    h = jnp.dot(y, w1_ref[...], preferred_element_type=f32) + f1b_ref[...]
    h = jnp.maximum(h, 0.0)
    h = jnp.dot(h, w2_ref[...], preferred_element_type=f32) + f2b_ref[...]

    # residual + LayerNorm 2
    z = y + h
    mu2 = jnp.mean(z, axis=-1, keepdims=True)
    var2 = jnp.mean(jnp.square(z - mu2), axis=-1, keepdims=True)
    z = (z - mu2) * jax.lax.rsqrt(var2 + eps) * g2_ref[...] + be2_ref[...]

    if final_head:
        # F.relu + fc2 fused: VPU multiply + lane reduce (no (E,1) MXU matmul).
        r = jnp.maximum(z, 0.0)
        head = jnp.sum(r * fc2w_ref[...], axis=-1, keepdims=True) + fc2b_ref[...]
        o_ref[...] = head.astype(o_ref.dtype)
    else:
        o_ref[...] = z.astype(o_ref.dtype)


def encoder_layer_fused(x2, p, *, L, N, nhead, head_pool, head_bcast,
                        fc1_w=None, fc1_b=None, fc2_w=None, fc2_b=None,
                        eps=1e-5):
    LN = x2.shape[0]
    E = p["out_proj_w"].shape[0]
    first = fc1_w is not None
    final = fc2_w is not None

    wq = p["in_proj_w"][:, 0:E]
    wk = p["in_proj_w"][:, E:2 * E]
    wv = p["in_proj_w"][:, 2 * E:3 * E]
    bq = p["in_proj_b"][:, 0:E]
    bk = p["in_proj_b"][:, E:2 * E]
    bv = p["in_proj_b"][:, 2 * E:3 * E]

    inputs = [x2, wq, wk, wv, bq, bk, bv, head_pool, head_bcast,
              p["out_proj_w"], p["out_proj_b"], p["ln1_g"], p["ln1_b"],
              p["ff1_w"], p["ff1_b"], p["ff2_w"], p["ff2_b"],
              p["ln2_g"], p["ln2_b"]]
    if first:
        inputs += [fc1_w, fc1_b]
    if final:
        inputs += [fc2_w, fc2_b]

    out_dim = 1 if final else E
    in_specs = [pl.BlockSpec(a.shape, lambda i: (0, 0)) for a in inputs]

    kernel = functools.partial(_encoder_layer_kernel, L=L, N=N, nhead=nhead,
                               eps=eps, first_proj=first, final_head=final)
    return pl.pallas_call(
        kernel,
        out_shape=jax.ShapeDtypeStruct((LN, out_dim), jnp.float32),
        grid=(1,),
        in_specs=in_specs,
        out_specs=pl.BlockSpec((LN, out_dim), lambda i: (0, 0)),
        compiler_params=pltpu.CompilerParams(
            dimension_semantics=("arbitrary",),
            vmem_limit_bytes=_VMEM_LIMIT),
    )(*inputs)


# ------------------------------- conv path ----------------------------------

def conv2d_relu_nhwc(x_nhwc, w, b, *, stride=2, pad=1, block_m=256):
    """Conv2d(k=3, stride, pad) + ReLU on NHWC input via im2col + Pallas matmul.

    Patches are built with strided slices + a single channel-axis concatenate
    (no 5-D stack/transpose), and the result stays in the (B, Ho, Wo, Cout)
    layout the next conv's im2col consumes.
    """
    B, H, W, Cin = x_nhwc.shape
    Cout, _, kh, kw = w.shape
    xp = jnp.pad(x_nhwc, ((0, 0), (pad, pad), (pad, pad), (0, 0)))
    Ho = (H + 2 * pad - kh) // stride + 1
    Wo = (W + 2 * pad - kw) // stride + 1
    cols = [xp[:, i:i + stride * Ho:stride, j:j + stride * Wo:stride, :]
            for i in range(kh) for j in range(kw)]
    patches = jnp.concatenate(cols, axis=-1).reshape(B * Ho * Wo, kh * kw * Cin)
    # column order is (i, j, c) -> weight rows must match.
    w_flat = w.transpose(2, 3, 1, 0).reshape(kh * kw * Cin, Cout)
    y = matmul_bias(patches, w_flat, b.reshape(1, Cout),
                    relu_out=True, block_m=block_m)
    return y.reshape(B, Ho, Wo, Cout)


# ------------------------------- full model ---------------------------------

def cifar10trans_forward(x, params, *, num_fc_first, num_last, nhead=8):
    x_shape = x.shape
    assert len(x_shape) == 5, "expected (B, S, C, H, W) jigsaw input"
    B, S = x_shape[0], x_shape[1]
    x = x.reshape(B * S, *x_shape[-3:])                 # (B*S, 3, H, W)
    x = x.transpose(0, 2, 3, 1)                         # NHWC (lane-friendly)

    x = conv2d_relu_nhwc(x, params["conv1_w"], params["conv1_b"])
    x = conv2d_relu_nhwc(x, params["conv2_w"], params["conv2_b"])

    BS, H2, W2, C2 = x.shape
    assert H2 * W2 * C2 == num_fc_first
    x = x.reshape(BS, H2 * W2 * C2)                     # flatten in (h, w, c)

    # fc1 weight rows are stored in PyTorch's (c, h, w) flatten order; permute
    # once to (h, w, c) so x @ fc1_w matches nn.Linear on the NCHW .view().
    fc1_w = params["fc1_w"].reshape(C2, H2, W2, num_last)
    fc1_w = fc1_w.transpose(1, 2, 0, 3).reshape(num_fc_first, num_last)
    fc1_b = params["fc1_b"]

    E = num_last
    dh = E // nhead
    head_idx = jnp.arange(E, dtype=jnp.int32) // dh
    head_pool = (head_idx[:, None] ==
                 jnp.arange(nhead, dtype=jnp.int32)[None, :]).astype(jnp.float32)
    head_bcast = head_pool.T

    L, N = B, S                              # batch_first=False: attn over B
    layers = params["layers"]
    assert len(layers) >= 1
    for li, lp in enumerate(layers):
        is_first = li == 0
        is_last = li == len(layers) - 1
        x = encoder_layer_fused(
            x, lp, L=L, N=N, nhead=nhead,
            head_pool=head_pool, head_bcast=head_bcast,
            fc1_w=fc1_w if is_first else None,
            fc1_b=fc1_b if is_first else None,
            fc2_w=params["fc2_w"].T if is_last else None,
            fc2_b=params["fc2_b"] if is_last else None)
    return x.reshape(B, S, 1)


# ------------------------------ param init ----------------------------------

def init_params(key, num_fc_first, num_last, num_layers, dim_ff=2048):
    keys = iter(jax.random.split(key, 16 + 12 * num_layers))

    def w(shape, scale=0.05):
        return scale * jax.random.normal(next(keys), shape, dtype=jnp.float32)

    E = num_last
    params = {
        "conv1_w": w((32, 3, 3, 3)),
        "conv1_b": w((32,)),
        "conv2_w": w((32, 32, 3, 3)),
        "conv2_b": w((32,)),
        "fc1_w": w((num_fc_first, E)),     # rows in PyTorch (c, h, w) order
        "fc1_b": w((1, E)),
        "fc2_w": w((E, 1)),
        "fc2_b": w((1, 1)),
        "layers": [],
    }
    for _ in range(num_layers):
        params["layers"].append({
            "in_proj_w": w((E, 3 * E)),
            "in_proj_b": w((1, 3 * E)),
            "out_proj_w": w((E, E)),
            "out_proj_b": w((1, E)),
            "ff1_w": w((E, dim_ff)),
            "ff1_b": w((1, dim_ff)),
            "ff2_w": w((dim_ff, E)),
            "ff2_b": w((1, E)),
            "ln1_g": jnp.ones((1, E), jnp.float32),
            "ln1_b": jnp.zeros((1, E), jnp.float32),
            "ln2_g": jnp.ones((1, E), jnp.float32),
            "ln2_b": jnp.zeros((1, E), jnp.float32),
        })
    return params


if __name__ == "__main__":
    B, S, C, H, W = 2, 8, 3, 16, 16          # jigsaw: B batches of S pieces
    num_fc_first = 32 * (H // 4) * (W // 4)  # 32 * 4 * 4 = 512 after two stride-2 convs
    num_last = 32                            # d_model, divisible by nhead=8
    num_layers = 2

    key = jax.random.PRNGKey(0)
    kx, kp = jax.random.split(key)
    x = jax.random.normal(kx, (B, S, C, H, W), dtype=jnp.float32)
    params = init_params(kp, num_fc_first, num_last, num_layers)

    fwd = jax.jit(functools.partial(cifar10trans_forward,
                                    num_fc_first=num_fc_first,
                                    num_last=num_last))
    out = fwd(x, params)
    jax.block_until_ready(out)
    assert out.shape == (B, S, 1), out.shape
    assert bool(jnp.all(jnp.isfinite(out)))
    print("KERNEL_OK")
</pallas_src>

<mosaic_0001>
module attributes {stable_mosaic.version = 11 : i64} {
  func.func @_matmul_kernel(%arg0: i32, %arg1: memref<256x27xf32, #tpu.memory_space<vmem>>, %arg2: memref<27x32xf32, #tpu.memory_space<vmem>>, %arg3: memref<1x32xf32, #tpu.memory_space<vmem>>, %arg4: memref<256x32xf32, #tpu.memory_space<vmem>>) attributes {dimension_semantics = [#tpu.dimension_semantics<parallel>], iteration_bounds = array<i64: 4>, scalar_prefetch = 0 : i64, scratch_operands = 0 : i64, tpu.core_type = #tpu.core_type<tc>, window_params = [{transform_indices = @transform_0, window_bounds = array<i64: 256, 27>}, {pipeline_mode = #tpu.pipeline_mode<synchronous>, transform_indices = @transform_1, window_bounds = array<i64: 27, 32>}, {pipeline_mode = #tpu.pipeline_mode<synchronous>, transform_indices = @transform_2, window_bounds = array<i64: 1, 32>}, {transform_indices = @transform_3, window_bounds = array<i64: 256, 32>}]} {
    %c0 = arith.constant 0 : index
    %c0_0 = arith.constant 0 : index
    %0 = vector.load %arg1[%c0, %c0_0] : memref<256x27xf32, #tpu.memory_space<vmem>>, vector<256x27xf32>
    %c0_1 = arith.constant 0 : index
    %c0_2 = arith.constant 0 : index
    %1 = vector.load %arg2[%c0_1, %c0_2] : memref<27x32xf32, #tpu.memory_space<vmem>>, vector<27x32xf32>
    %cst = arith.constant dense<0.000000e+00> : vector<256x32xf32>
    %2 = tpu.matmul %0, %1, %cst {dimension_numbers = #tpu.dot_dimension_numbers<[1], [0], [0], [1], [0, 0, 1, 1], [], []>} : vector<256x27xf32>, vector<27x32xf32>, vector<256x32xf32> -> vector<256x32xf32>
    %c0_3 = arith.constant 0 : index
    %c0_4 = arith.constant 0 : index
    %3 = vector.load %arg3[%c0_3, %c0_4] : memref<1x32xf32, #tpu.memory_space<vmem>>, vector<1x32xf32>
    %4 = vector.broadcast %3 : vector<1x32xf32> to vector<256x32xf32>
    %5 = arith.addf %2, %4 : vector<256x32xf32>
    %cst_5 = arith.constant 0.000000e+00 : f32
    %6 = vector.broadcast %cst_5 : f32 to vector<256x32xf32>
    %7 = arith.maximumf %5, %6 : vector<256x32xf32>
    %c0_6 = arith.constant 0 : index
    %c0_7 = arith.constant 0 : index
    %8 = vector.load %arg4[%c0_6, %c0_7] : memref<256x32xf32, #tpu.memory_space<vmem>>, vector<256x32xf32>
    tpu.vector_store %arg4[%c0_6, %c0_7], %7 {strides = array<i32>} : memref<256x32xf32, #tpu.memory_space<vmem>>, vector<256x32xf32>,
    return
  }
  func.func @transform_0(%arg0: i32) -> (i32, i32) {
    %c0_i32 = arith.constant 0 : i32
    %c0_i32_0 = arith.constant 0 : i32
    return %arg0, %c0_i32 : i32, i32
  }
  func.func @transform_1(%arg0: i32) -> (i32, i32) {
    %c0_i32 = arith.constant 0 : i32
    %c0_i32_0 = arith.constant 0 : i32
    %c0_i32_1 = arith.constant 0 : i32
    return %c0_i32, %c0_i32_0 : i32, i32
  }
  func.func @transform_2(%arg0: i32) -> (i32, i32) {
    %c0_i32 = arith.constant 0 : i32
    %c0_i32_0 = arith.constant 0 : i32
    %c0_i32_1 = arith.constant 0 : i32
    return %c0_i32, %c0_i32_0 : i32, i32
  }
  func.func @transform_3(%arg0: i32) -> (i32, i32) {
    %c0_i32 = arith.constant 0 : i32
    %c0_i32_0 = arith.constant 0 : i32
    return %arg0, %c0_i32 : i32, i32
  }
}

module attributes {stable_mosaic.version = 11 : i64} {
  func.func @_matmul_kernel(%arg0: i32, %arg1: memref<256x288xf32, #tpu.memory_space<vmem>>, %arg2: memref<288x32xf32, #tpu.memory_space<vmem>>, %arg3: memref<1x32xf32, #tpu.memory_space<vmem>>, %arg4: memref<256x32xf32, #tpu.memory_space<vmem>>) attributes {dimension_semantics = [#tpu.dimension_semantics<parallel>], iteration_bounds = array<i64: 1>, scalar_prefetch = 0 : i64, scratch_operands = 0 : i64, tpu.core_type = #tpu.core_type<tc>, window_params = [{transform_indices = @transform_0, window_bounds = array<i64: 256, 288>}, {pipeline_mode = #tpu.pipeline_mode<synchronous>, transform_indices = @transform_1, window_bounds = array<i64: 288, 32>}, {pipeline_mode = #tpu.pipeline_mode<synchronous>, transform_indices = @transform_2, window_bounds = array<i64: 1, 32>}, {transform_indices = @transform_3, window_bounds = array<i64: 256, 32>}]} {
    %c0 = arith.constant 0 : index
    %c0_0 = arith.constant 0 : index
    %0 = vector.load %arg1[%c0, %c0_0] : memref<256x288xf32, #tpu.memory_space<vmem>>, vector<256x288xf32>
    %c0_1 = arith.constant 0 : index
    %c0_2 = arith.constant 0 : index
    %1 = vector.load %arg2[%c0_1, %c0_2] : memref<288x32xf32, #tpu.memory_space<vmem>>, vector<288x32xf32>
    %cst = arith.constant dense<0.000000e+00> : vector<256x32xf32>
    %2 = tpu.matmul %0, %1, %cst {dimension_numbers = #tpu.dot_dimension_numbers<[1], [0], [0], [1], [0, 0, 1, 1], [], []>} : vector<256x288xf32>, vector<288x32xf32>, vector<256x32xf32> -> vector<256x32xf32>
    %c0_3 = arith.constant 0 : index
    %c0_4 = arith.constant 0 : index
    %3 = vector.load %arg3[%c0_3, %c0_4] : memref<1x32xf32, #tpu.memory_space<vmem>>, vector<1x32xf32>
    %4 = vector.broadcast %3 : vector<1x32xf32> to vector<256x32xf32>
    %5 = arith.addf %2, %4 : vector<256x32xf32>
    %cst_5 = arith.constant 0.000000e+00 : f32
    %6 = vector.broadcast %cst_5 : f32 to vector<256x32xf32>
    %7 = arith.maximumf %5, %6 : vector<256x32xf32>
    %c0_6 = arith.constant 0 : index
    %c0_7 = arith.constant 0 : index
    %8 = vector.load %arg4[%c0_6, %c0_7] : memref<256x32xf32, #tpu.memory_space<vmem>>, vector<256x32xf32>
    tpu.vector_store %arg4[%c0_6, %c0_7], %7 {strides = array<i32>} : memref<256x32xf32, #tpu.memory_space<vmem>>, vector<256x32xf32>,
    return
  }
  func.func @transform_0(%arg0: i32) -> (i32, i32) {
    %c0_i32 = arith.constant 0 : i32
    %c0_i32_0 = arith.constant 0 : i32
    return %arg0, %c0_i32 : i32, i32
  }
  func.func @transform_1(%arg0: i32) -> (i32, i32) {
    %c0_i32 = arith.constant 0 : i32
    %c0_i32_0 = arith.constant 0 : i32
    %c0_i32_1 = arith.constant 0 : i32
    return %c0_i32, %c0_i32_0 : i32, i32
  }
  func.func @transform_2(%arg0: i32) -> (i32, i32) {
    %c0_i32 = arith.constant 0 : i32
    %c0_i32_0 = arith.constant 0 : i32
    %c0_i32_1 = arith.constant 0 : i32
    return %c0_i32, %c0_i32_0 : i32, i32
  }
  func.func @transform_3(%arg0: i32) -> (i32, i32) {
    %c0_i32 = arith.constant 0 : i32
    %c0_i32_0 = arith.constant 0 : i32
    return %arg0, %c0_i32 : i32, i32
  }
}

module attributes {stable_mosaic.version = 11 : i64} {
  func.func @_encoder_layer_kernel(%arg0: i32, %arg1: memref<16x512xf32, #tpu.memory_space<vmem>>, %arg2: memref<32x32xf32, #tpu.memory_space<vmem>>, %arg3: memref<32x32xf32, #tpu.memory_space<vmem>>, %arg4: memref<32x32xf32, #tpu.memory_space<vmem>>, %arg5: memref<1x32xf32, #tpu.memory_space<vmem>>, %arg6: memref<1x32xf32, #tpu.memory_space<vmem>>, %arg7: memref<1x32xf32, #tpu.memory_space<vmem>>, %arg8: memref<32x8xf32, #tpu.memory_space<vmem>>, %arg9: memref<8x32xf32, #tpu.memory_space<vmem>>, %arg10: memref<32x32xf32, #tpu.memory_space<vmem>>, %arg11: memref<1x32xf32, #tpu.memory_space<vmem>>, %arg12: memref<1x32xf32, #tpu.memory_space<vmem>>, %arg13: memref<1x32xf32, #tpu.memory_space<vmem>>, %arg14: memref<32x2048xf32, #tpu.memory_space<vmem>>, %arg15: memref<1x2048xf32, #tpu.memory_space<vmem>>, %arg16: memref<2048x32xf32, #tpu.memory_space<vmem>>, %arg17: memref<1x32xf32, #tpu.memory_space<vmem>>, %arg18: memref<1x32xf32, #tpu.memory_space<vmem>>, %arg19: memref<1x32xf32, #tpu.memory_space<vmem>>, %arg20: memref<512x32xf32, #tpu.memory_space<vmem>>, %arg21: memref<1x32xf32, #tpu.memory_space<vmem>>, %arg22: memref<16x32xf32, #tpu.memory_space<vmem>>) attributes {dimension_semantics = [#tpu.dimension_semantics<arbitrary>], iteration_bounds = array<i64: 1>, scalar_prefetch = 0 : i64, scratch_operands = 0 : i64, tpu.core_type = #tpu.core_type<tc>, window_params = [{pipeline_mode = #tpu.pipeline_mode<synchronous>, transform_indices = @transform_0, window_bounds = array<i64: 16, 512>}, {pipeline_mode = #tpu.pipeline_mode<synchronous>, transform_indices = @transform_1, window_bounds = array<i64: 32, 32>}, {pipeline_mode = #tpu.pipeline_mode<synchronous>, transform_indices = @transform_2, window_bounds = array<i64: 32, 32>}, {pipeline_mode = #tpu.pipeline_mode<synchronous>, transform_indices = @transform_3, window_bounds = array<i64: 32, 32>}, {pipeline_mode = #tpu.pipeline_mode<synchronous>, transform_indices = @transform_4, window_bounds = array<i64: 1, 32>}, {pipeline_mode = #tpu.pipeline_mode<synchronous>, transform_indices = @transform_5, window_bounds = array<i64: 1, 32>}, {pipeline_mode = #tpu.pipeline_mode<synchronous>, transform_indices = @transform_6, window_bounds = array<i64: 1, 32>}, {pipeline_mode = #tpu.pipeline_mode<synchronous>, transform_indices = @transform_7, window_bounds = array<i64: 32, 8>}, {pipeline_mode = #tpu.pipeline_mode<synchronous>, transform_indices = @transform_8, window_bounds = array<i64: 8, 32>}, {pipeline_mode = #tpu.pipeline_mode<synchronous>, transform_indices = @transform_9, window_bounds = array<i64: 32, 32>}, {pipeline_mode = #tpu.pipeline_mode<synchronous>, transform_indices = @transform_10, window_bounds = array<i64: 1, 32>}, {pipeline_mode = #tpu.pipeline_mode<synchronous>, transform_indices = @transform_11, window_bounds = array<i64: 1, 32>}, {pipeline_mode = #tpu.pipeline_mode<synchronous>, transform_indices = @transform_12, window_bounds = array<i64: 1, 32>}, {pipeline_mode = #tpu.pipeline_mode<synchronous>, transform_indices = @transform_13, window_bounds = array<i64: 32, 2048>}, {pipeline_mode = #tpu.pipeline_mode<synchronous>, transform_indices = @transform_14, window_bounds = array<i64: 1, 2048>}, {pipeline_mode = #tpu.pipeline_mode<synchronous>, transform_indices = @transform_15, window_bounds = array<i64: 2048, 32>}, {pipeline_mode = #tpu.pipeline_mode<synchronous>, transform_indices = @transform_16, window_bounds = array<i64: 1, 32>}, {pipeline_mode = #tpu.pipeline_mode<synchronous>, transform_indices = @transform_17, window_bounds = array<i64: 1, 32>}, {pipeline_mode = #tpu.pipeline_mode<synchronous>, transform_indices = @transform_18, window_bounds = array<i64: 1, 32>}, {pipeline_mode = #tpu.pipeline_mode<synchronous>, transform_indices = @transform_19, window_bounds = array<i64: 512, 32>}, {pipeline_mode = #tpu.pipeline_mode<synchronous>, transform_indices = @transform_20, window_bounds = array<i64: 1, 32>}, {pipeline_mode = #tpu.pipeline_mode<synchronous>, transform_indices = @transform_21, window_bounds = array<i64: 16, 32>}]} {
    %c0 = arith.constant 0 : index
    %c0_0 = arith.constant 0 : index
    %0 = vector.load %arg1[%c0, %c0_0] : memref<16x512xf32, #tpu.memory_space<vmem>>, vector<16x512xf32>
    %c0_1 = arith.constant 0 : index
    %c0_2 = arith.constant 0 : index
    %1 = vector.load %arg20[%c0_1, %c0_2] : memref<512x32xf32, #tpu.memory_space<vmem>>, vector<512x32xf32>
    %cst = arith.constant dense<0.000000e+00> : vector<16x32xf32>
    %2 = tpu.matmul %0, %1, %cst {dimension_numbers = #tpu.dot_dimension_numbers<[1], [0], [0], [1], [0, 0, 1, 1], [], []>} : vector<16x512xf32>, vector<512x32xf32>, vector<16x32xf32> -> vector<16x32xf32>
    %c0_3 = arith.constant 0 : index
    %c0_4 = arith.constant 0 : index
    %3 = vector.load %arg21[%c0_3, %c0_4] : memref<1x32xf32, #tpu.memory_space<vmem>>, vector<1x32xf32>
    %4 = vector.broadcast %3 : vector<1x32xf32> to vector<16x32xf32>
    %5 = arith.addf %2, %4 : vector<16x32xf32>
    %c0_5 = arith.constant 0 : index
    %c0_6 = arith.constant 0 : index
    %6 = vector.load %arg2[%c0_5, %c0_6] : memref<32x32xf32, #tpu.memory_space<vmem>>, vector<32x32xf32>
    %cst_7 = arith.constant dense<0.000000e+00> : vector<16x32xf32>
    %7 = tpu.matmul %5, %6, %cst_7 {dimension_numbers = #tpu.dot_dimension_numbers<[1], [0], [0], [1], [0, 0, 1, 1], [], []>} : vector<16x32xf32>, vector<32x32xf32>, vector<16x32xf32> -> vector<16x32xf32>
    %c0_8 = arith.constant 0 : index
    %c0_9 = arith.constant 0 : index
    %8 = vector.load %arg5[%c0_8, %c0_9] : memref<1x32xf32, #tpu.memory_space<vmem>>, vector<1x32xf32>
    %9 = vector.broadcast %8 : vector<1x32xf32> to vector<16x32xf32>
    %10 = arith.addf %7, %9 : vector<16x32xf32>
    %c0_10 = arith.constant 0 : index
    %c0_11 = arith.constant 0 : index
    %11 = vector.load %arg3[%c0_10, %c0_11] : memref<32x32xf32, #tpu.memory_space<vmem>>, vector<32x32xf32>
    %cst_12 = arith.constant dense<0.000000e+00> : vector<16x32xf32>
    %12 = tpu.matmul %5, %11, %cst_12 {dimension_numbers = #tpu.dot_dimension_numbers<[1], [0], [0], [1], [0, 0, 1, 1], [], []>} : vector<16x32xf32>, vector<32x32xf32>, vector<16x32xf32> -> vector<16x32xf32>
    %c0_13 = arith.constant 0 : index
    %c0_14 = arith.constant 0 : index
    %13 = vector.load %arg6[%c0_13, %c0_14] : memref<1x32xf32, #tpu.memory_space<vmem>>, vector<1x32xf32>
    %14 = vector.broadcast %13 : vector<1x32xf32> to vector<16x32xf32>
    %15 = arith.addf %12, %14 : vector<16x32xf32>
    %c0_15 = arith.constant 0 : index
    %c0_16 = arith.constant 0 : index
    %16 = vector.load %arg4[%c0_15, %c0_16] : memref<32x32xf32, #tpu.memory_space<vmem>>, vector<32x32xf32>
    %cst_17 = arith.constant dense<0.000000e+00> : vector<16x32xf32>
    %17 = tpu.matmul %5, %16, %cst_17 {dimension_numbers = #tpu.dot_dimension_numbers<[1], [0], [0], [1], [0, 0, 1, 1], [], []>} : vector<16x32xf32>, vector<32x32xf32>, vector<16x32xf32> -> vector<16x32xf32>
    %c0_18 = arith.constant 0 : index
    %c0_19 = arith.constant 0 : index
    %18 = vector.load %arg7[%c0_18, %c0_19] : memref<1x32xf32, #tpu.memory_space<vmem>>, vector<1x32xf32>
    %19 = vector.broadcast %18 : vector<1x32xf32> to vector<16x32xf32>
    %20 = arith.addf %17, %19 : vector<16x32xf32>
    %c0_20 = arith.constant 0 : index
    %c0_21 = arith.constant 0 : index
    %21 = vector.load %arg8[%c0_20, %c0_21] : memref<32x8xf32, #tpu.memory_space<vmem>>, vector<32x8xf32>
    %c0_22 = arith.constant 0 : index
    %c0_23 = arith.constant 0 : index
    %22 = vector.load %arg9[%c0_22, %c0_23] : memref<8x32xf32, #tpu.memory_space<vmem>>, vector<8x32xf32>
    %23 = vector.extract_strided_slice %10 {offsets = [0, 0], sizes = [8, 32], strides = [1, 1]} : vector<16x32xf32> to vector<8x32xf32>
    %24 = vector.extract_strided_slice %10 {offsets = [8, 0], sizes = [8, 32], strides = [1, 1]} : vector<16x32xf32> to vector<8x32xf32>
    %25 = vector.extract_strided_slice %15 {offsets = [0, 0], sizes = [8, 32], strides = [1, 1]} : vector<16x32xf32> to vector<8x32xf32>
    %26 = vector.extract_strided_slice %15 {offsets = [8, 0], sizes = [8, 32], strides = [1, 1]} : vector<16x32xf32> to vector<8x32xf32>
    %27 = vector.extract_strided_slice %20 {offsets = [0, 0], sizes = [8, 32], strides = [1, 1]} : vector<16x32xf32> to vector<8x32xf32>
    %28 = vector.extract_strided_slice %20 {offsets = [8, 0], sizes = [8, 32], strides = [1, 1]} : vector<16x32xf32> to vector<8x32xf32>
    %29 = arith.mulf %23, %25 : vector<8x32xf32>
    %cst_24 = arith.constant dense<0.000000e+00> : vector<8x8xf32>
    %30 = tpu.matmul %29, %21, %cst_24 {dimension_numbers = #tpu.dot_dimension_numbers<[1], [0], [0], [1], [0, 0, 1, 1], [], []>} : vector<8x32xf32>, vector<32x8xf32>, vector<8x8xf32> -> vector<8x8xf32>
    %cst_25 = arith.constant 5.000000e-01 : f32
    %31 = vector.broadcast %cst_25 : f32 to vector<8x8xf32>
    %32 = arith.mulf %30, %31 : vector<8x8xf32>
    %33 = arith.mulf %23, %26 : vector<8x32xf32>
    %cst_26 = arith.constant dense<0.000000e+00> : vector<8x8xf32>
    %34 = tpu.matmul %33, %21, %cst_26 {dimension_numbers = #tpu.dot_dimension_numbers<[1], [0], [0], [1], [0, 0, 1, 1], [], []>} : vector<8x32xf32>, vector<32x8xf32>, vector<8x8xf32> -> vector<8x8xf32>
    %cst_27 = arith.constant 5.000000e-01 : f32
    %35 = vector.broadcast %cst_27 : f32 to vector<8x8xf32>
    %36 = arith.mulf %34, %35 : vector<8x8xf32>
    %37 = arith.maximumf %32, %36 : vector<8x8xf32>
    %38 = arith.subf %32, %37 : vector<8x8xf32>
    %39 = math.exp %38 : vector<8x8xf32>
    %40 = arith.subf %36, %37 : vector<8x8xf32>
    %41 = math.exp %40 : vector<8x8xf32>
    %42 = arith.addf %39, %41 : vector<8x8xf32>
    %43 = tpu.reciprocal %42 {approx = true} : vector<8x8xf32> -> vector<8x8xf32>
    %44 = arith.mulf %39, %43 : vector<8x8xf32>
    %cst_28 = arith.constant dense<0.000000e+00> : vector<8x32xf32>
    %45 = tpu.matmul %44, %22, %cst_28 {dimension_numbers = #tpu.dot_dimension_numbers<[1], [0], [0], [1], [0, 0, 1, 1], [], []>} : vector<8x8xf32>, vector<8x32xf32>, vector<8x32xf32> -> vector<8x32xf32>
    %46 = arith.mulf %45, %27 : vector<8x32xf32>
    %47 = arith.mulf %41, %43 : vector<8x8xf32>
    %cst_29 = arith.constant dense<0.000000e+00> : vector<8x32xf32>
    %48 = tpu.matmul %47, %22, %cst_29 {dimension_numbers = #tpu.dot_dimension_numbers<[1], [0], [0], [1], [0, 0, 1, 1], [], []>} : vector<8x8xf32>, vector<8x32xf32>, vector<8x32xf32> -> vector<8x32xf32>
    %49 = arith.mulf %48, %28 : vector<8x32xf32>
    %50 = arith.addf %46, %49 : vector<8x32xf32>
    %51 = arith.mulf %24, %25 : vector<8x32xf32>
    %cst_30 = arith.constant dense<0.000000e+00> : vector<8x8xf32>
    %52 = tpu.matmul %51, %21, %cst_30 {dimension_numbers = #tpu.dot_dimension_numbers<[1], [0], [0], [1], [0, 0, 1, 1], [], []>} : vector<8x32xf32>, vector<32x8xf32>, vector<8x8xf32> -> vector<8x8xf32>
    %cst_31 = arith.constant 5.000000e-01 : f32
    %53 = vector.broadcast %cst_31 : f32 to vector<8x8xf32>
    %54 = arith.mulf %52, %53 : vector<8x8xf32>
    %55 = arith.mulf %24, %26 : vector<8x32xf32>
    %cst_32 = arith.constant dense<0.000000e+00> : vector<8x8xf32>
    %56 = tpu.matmul %55, %21, %cst_32 {dimension_numbers = #tpu.dot_dimension_numbers<[1], [0], [0], [1], [0, 0, 1, 1], [], []>} : vector<8x32xf32>, vector<32x8xf32>, vector<8x8xf32> -> vector<8x8xf32>
    %cst_33 = arith.constant 5.000000e-01 : f32
    %57 = vector.broadcast %cst_33 : f32 to vector<8x8xf32>
    %58 = arith.mulf %56, %57 : vector<8x8xf32>
    %59 = arith.maximumf %54, %58 : vector<8x8xf32>
    %60 = arith.subf %54, %59 : vector<8x8xf32>
    %61 = math.exp %60 : vector<8x8xf32>
    %62 = arith.subf %58, %59 : vector<8x8xf32>
    %63 = math.exp %62 : vector<8x8xf32>
    %64 = arith.addf %61, %63 : vector<8x8xf32>
    %65 = tpu.reciprocal %64 {approx = true} : vector<8x8xf32> -> vector<8x8xf32>
    %66 = arith.mulf %61, %65 : vector<8x8xf32>
    %cst_34 = arith.constant dense<0.000000e+00> : vector<8x32xf32>
    %67 = tpu.matmul %66, %22, %cst_34 {dimension_numbers = #tpu.dot_dimension_numbers<[1], [0], [0], [1], [0, 0, 1, 1], [], []>} : vector<8x8xf32>, vector<8x32xf32>, vector<8x32xf32> -> vector<8x32xf32>
    %68 = arith.mulf %67, %27 : vector<8x32xf32>
    %69 = arith.mulf %63, %65 : vector<8x8xf32>
    %cst_35 = arith.constant dense<0.000000e+00> : vector<8x32xf32>
    %70 = tpu.matmul %69, %22, %cst_35 {dimension_numbers = #tpu.dot_dimension_numbers<[1], [0], [0], [1], [0, 0, 1, 1], [], []>} : vector<8x8xf32>, vector<8x32xf32>, vector<8x32xf32> -> vector<8x32xf32>
    %71 = arith.mulf %70, %28 : vector<8x32xf32>
    %72 = arith.addf %68, %71 : vector<8x32xf32>
    %73 = tpu.concatenate %50, %72 in 0 : vector<8x32xf32>, vector<8x32xf32> -> vector<16x32xf32>
    %c0_36 = arith.constant 0 : index
    %c0_37 = arith.constant 0 : index
    %74 = vector.load %arg10[%c0_36, %c0_37] : memref<32x32xf32, #tpu.memory_space<vmem>>, vector<32x32xf32>
    %cst_38 = arith.constant dense<0.000000e+00> : vector<16x32xf32>
    %75 = tpu.matmul %73, %74, %cst_38 {dimension_numbers = #tpu.dot_dimension_numbers<[1], [0], [0], [1], [0, 0, 1, 1], [], []>} : vector<16x32xf32>, vector<32x32xf32>, vector<16x32xf32> -> vector<16x32xf32>
    %c0_39 = arith.constant 0 : index
    %c0_40 = arith.constant 0 : index
    %76 = vector.load %arg11[%c0_39, %c0_40] : memref<1x32xf32, #tpu.memory_space<vmem>>, vector<1x32xf32>
    %77 = vector.broadcast %76 : vector<1x32xf32> to vector<16x32xf32>
    %78 = arith.addf %75, %77 : vector<16x32xf32>
    %79 = arith.addf %5, %78 : vector<16x32xf32>
    %cst_41 = arith.constant dense<0.000000e+00> : vector<16xf32>
    %80 = vector.multi_reduction <add>, %79, %cst_41 [1] : vector<16x32xf32> to vector<16xf32>
    %81 = vector.shape_cast %80 : vector<16xf32> to vector<16x1xf32>
    %cst_42 = arith.constant 3.200000e+01 : f32
    %82 = vector.broadcast %cst_42 : f32 to vector<16x1xf32>
    %83 = arith.divf %81, %82 : vector<16x1xf32>
    %84 = vector.broadcast %83 : vector<16x1xf32> to vector<16x32xf32>
    %85 = arith.subf %79, %84 : vector<16x32xf32>
    %86 = arith.mulf %85, %85 : vector<16x32xf32>
    %cst_43 = arith.constant dense<0.000000e+00> : vector<16xf32>
    %87 = vector.multi_reduction <add>, %86, %cst_43 [1] : vector<16x32xf32> to vector<16xf32>
    %88 = vector.shape_cast %87 : vector<16xf32> to vector<16x1xf32>
    %cst_44 = arith.constant 3.200000e+01 : f32
    %89 = vector.broadcast %cst_44 : f32 to vector<16x1xf32>
    %90 = arith.divf %88, %89 : vector<16x1xf32>
    %91 = vector.broadcast %83 : vector<16x1xf32> to vector<16x32xf32>
    %92 = arith.subf %79, %91 : vector<16x32xf32>
    %cst_45 = arith.constant 9.99999974E-6 : f32
    %93 = vector.broadcast %cst_45 : f32 to vector<16x1xf32>
    %94 = arith.addf %90, %93 : vector<16x1xf32>
    %95 = math.rsqrt %94 : vector<16x1xf32>
    %96 = vector.broadcast %95 : vector<16x1xf32> to vector<16x32xf32>
    %97 = arith.mulf %92, %96 : vector<16x32xf32>
    %c0_46 = arith.constant 0 : index
    %c0_47 = arith.constant 0 : index
    %98 = vector.load %arg12[%c0_46, %c0_47] : memref<1x32xf32, #tpu.memory_space<vmem>>, vector<1x32xf32>
    %99 = vector.broadcast %98 : vector<1x32xf32> to vector<16x32xf32>
    %100 = arith.mulf %97, %99 : vector<16x32xf32>
    %c0_48 = arith.constant 0 : index
    %c0_49 = arith.constant 0 : index
    %101 = vector.load %arg13[%c0_48, %c0_49] : memref<1x32xf32, #tpu.memory_space<vmem>>, vector<1x32xf32>
    %102 = vector.broadcast %101 : vector<1x32xf32> to vector<16x32xf32>
    %103 = arith.addf %100, %102 : vector<16x32xf32>
    %c0_50 = arith.constant 0 : index
    %c0_51 = arith.constant 0 : index
    %104 = vector.load %arg14[%c0_50, %c0_51] : memref<32x2048xf32, #tpu.memory_space<vmem>>, vector<32x2048xf32>
    %cst_52 = arith.constant dense<0.000000e+00> : vector<16x2048xf32>
    %105 = tpu.matmul %103, %104, %cst_52 {dimension_numbers = #tpu.dot_dimension_numbers<[1], [0], [0], [1], [0, 0, 1, 1], [], []>} : vector<16x32xf32>, vector<32x2048xf32>, vector<16x2048xf32> -> vector<16x2048xf32>
    %c0_53 = arith.constant 0 : index
    %c0_54 = arith.constant 0 : index
    %106 = vector.load %arg15[%c0_53, %c0_54] : memref<1x2048xf32, #tpu.memory_space<vmem>>, vector<1x2048xf32>
    %107 = vector.broadcast %106 : vector<1x2048xf32> to vector<16x2048xf32>
    %108 = arith.addf %105, %107 : vector<16x2048xf32>
    %cst_55 = arith.constant 0.000000e+00 : f32
    %109 = vector.broadcast %cst_55 : f32 to vector<16x2048xf32>
    %110 = arith.maximumf %108, %109 : vector<16x2048xf32>
    %c0_56 = arith.constant 0 : index
    %c0_57 = arith.constant 0 : index
    %111 = vector.load %arg16[%c0_56, %c0_57] : memref<2048x32xf32, #tpu.memory_space<vmem>>, vector<2048x32xf32>
    %cst_58 = arith.constant dense<0.000000e+00> : vector<16x32xf32>
    %112 = tpu.matmul %110, %111, %cst_58 {dimension_numbers = #tpu.dot_dimension_numbers<[1], [0], [0], [1], [0, 0, 1, 1], [], []>} : vector<16x2048xf32>, vector<2048x32xf32>, vector<16x32xf32> -> vector<16x32xf32>
    %c0_59 = arith.constant 0 : index
    %c0_60 = arith.constant 0 : index
    %113 = vector.load %arg17[%c0_59, %c0_60] : memref<1x32xf32, #tpu.memory_space<vmem>>, vector<1x32xf32>
    %114 = vector.broadcast %113 : vector<1x32xf32> to vector<16x32xf32>
    %115 = arith.addf %112, %114 : vector<16x32xf32>
    %116 = arith.addf %103, %115 : vector<16x32xf32>
    %cst_61 = arith.constant dense<0.000000e+00> : vector<16xf32>
    %117 = vector.multi_reduction <add>, %116, %cst_61 [1] : vector<16x32xf32> to vector<16xf32>
    %118 = vector.shape_cast %117 : vector<16xf32> to vector<16x1xf32>
    %cst_62 = arith.constant 3.200000e+01 : f32
    %119 = vector.broadcast %cst_62 : f32 to vector<16x1xf32>
    %120 = arith.divf %118, %119 : vector<16x1xf32>
    %121 = vector.broadcast %120 : vector<16x1xf32> to vector<16x32xf32>
    %122 = arith.subf %116, %121 : vector<16x32xf32>
    %123 = arith.mulf %122, %122 : vector<16x32xf32>
    %cst_63 = arith.constant dense<0.000000e+00> : vector<16xf32>
    %124 = vector.multi_reduction <add>, %123, %cst_63 [1] : vector<16x32xf32> to vector<16xf32>
    %125 = vector.shape_cast %124 : vector<16xf32> to vector<16x1xf32>
    %cst_64 = arith.constant 3.200000e+01 : f32
    %126 = vector.broadcast %cst_64 : f32 to vector<16x1xf32>
    %127 = arith.divf %125, %126 : vector<16x1xf32>
    %128 = vector.broadcast %120 : vector<16x1xf32> to vector<16x32xf32>
    %129 = arith.subf %116, %128 : vector<16x32xf32>
    %cst_65 = arith.constant 9.99999974E-6 : f32
    %130 = vector.broadcast %cst_65 : f32 to vector<16x1xf32>
    %131 = arith.addf %127, %130 : vector<16x1xf32>
    %132 = math.rsqrt %131 : vector<16x1xf32>
    %133 = vector.broadcast %132 : vector<16x1xf32> to vector<16x32xf32>
    %134 = arith.mulf %129, %133 : vector<16x32xf32>
    %c0_66 = arith.constant 0 : index
    %c0_67 = arith.constant 0 : index
    %135 = vector.load %arg18[%c0_66, %c0_67] : memref<1x32xf32, #tpu.memory_space<vmem>>, vector<1x32xf32>
    %136 = vector.broadcast %135 : vector<1x32xf32> to vector<16x32xf32>
    %137 = arith.mulf %134, %136 : vector<16x32xf32>
    %c0_68 = arith.constant 0 : index
    %c0_69 = arith.constant 0 : index
    %138 = vector.load %arg19[%c0_68, %c0_69] : memref<1x32xf32, #tpu.memory_space<vmem>>, vector<1x32xf32>
    %139 = vector.broadcast %138 : vector<1x32xf32> to vector<16x32xf32>
    %140 = arith.addf %137, %139 : vector<16x32xf32>
    %c0_70 = arith.constant 0 : index
    %c0_71 = arith.constant 0 : index
    %141 = vector.load %arg22[%c0_70, %c0_71] : memref<16x32xf32, #tpu.memory_space<vmem>>, vector<16x32xf32>
    tpu.vector_store %arg22[%c0_70, %c0_71], %140 {strides = array<i32>} : memref<16x32xf32, #tpu.memory_space<vmem>>, vector<16x32xf32>,
    return
  }
  func.func @transform_0(%arg0: i32) -> (i32, i32) {
    %c0_i32 = arith.constant 0 : i32
    %c0_i32_0 = arith.constant 0 : i32
    %c0_i32_1 = arith.constant 0 : i32
    return %c0_i32, %c0_i32_0 : i32, i32
  }
  func.func @transform_1(%arg0: i32) -> (i32, i32) {
    %c0_i32 = arith.constant 0 : i32
    %c0_i32_0 = arith.constant 0 : i32
    %c0_i32_1 = arith.constant 0 : i32
    return %c0_i32, %c0_i32_0 : i32, i32
  }
  func.func @transform_2(%arg0: i32) -> (i32, i32) {
    %c0_i32 = arith.constant 0 : i32
    %c0_i32_0 = arith.constant 0 : i32
    %c0_i32_1 = arith.constant 0 : i32
    return %c0_i32, %c0_i32_0 : i32, i32
  }
  func.func @transform_3(%arg0: i32) -> (i32, i32) {
    %c0_i32 = arith.constant 0 : i32
    %c0_i32_0 = arith.constant 0 : i32
    %c0_i32_1 = arith.constant 0 : i32
    return %c0_i32, %c0_i32_0 : i32, i32
  }
  func.func @transform_4(%arg0: i32) -> (i32, i32) {
    %c0_i32 = arith.constant 0 : i32
    %c0_i32_0 = arith.constant 0 : i32
    %c0_i32_1 = arith.constant 0 : i32
    return %c0_i32, %c0_i32_0 : i32, i32
  }
  func.func @transform_5(%arg0: i32) -> (i32, i32) {
    %c0_i32 = arith.constant 0 : i32
    %c0_i32_0 = arith.constant 0 : i32
    %c0_i32_1 = arith.constant 0 : i32
    return %c0_i32, %c0_i32_0 : i32, i32
  }
  func.func @transform_6(%arg0: i32) -> (i32, i32) {
    %c0_i32 = arith.constant 0 : i32
    %c0_i32_0 = arith.constant 0 : i32
    %c0_i32_1 = arith.constant 0 : i32
    return %c0_i32, %c0_i32_0 : i32, i32
  }
  func.func @transform_7(%arg0: i32) -> (i32, i32) {
    %c0_i32 = arith.constant 0 : i32
    %c0_i32_0 = arith.constant 0 : i32
    %c0_i32_1 = arith.constant 0 : i32
    return %c0_i32, %c0_i32_0 : i32, i32
  }
  func.func @transform_8(%arg0: i32) -> (i32, i32) {
    %c0_i32 = arith.constant 0 : i32
    %c0_i32_0 = arith.constant 0 : i32
    %c0_i32_1 = arith.constant 0 : i32
    return %c0_i32, %c0_i32_0 : i32, i32
  }
  func.func @transform_9(%arg0: i32) -> (i32, i32) {
    %c0_i32 = arith.constant 0 : i32
    %c0_i32_0 = arith.constant 0 : i32
    %c0_i32_1 = arith.constant 0 : i32
    return %c0_i32, %c0_i32_0 : i32, i32
  }
  func.func @transform_10(%arg0: i32) -> (i32, i32) {
    %c0_i32 = arith.constant 0 : i32
    %c0_i32_0 = arith.constant 0 : i32
    %c0_i32_1 = arith.constant 0 : i32
    return %c0_i32, %c0_i32_0 : i32, i32
  }
  func.func @transform_11(%arg0: i32) -> (i32, i32) {
    %c0_i32 = arith.constant 0 : i32
    %c0_i32_0 = arith.constant 0 : i32
    %c0_i32_1 = arith.constant 0 : i32
    return %c0_i32, %c0_i32_0 : i32, i32
  }
  func.func @transform_12(%arg0: i32) -> (i32, i32) {
    %c0_i32 = arith.constant 0 : i32
    %c0_i32_0 = arith.constant 0 : i32
    %c0_i32_1 = arith.constant 0 : i32
    return %c0_i32, %c0_i32_0 : i32, i32
  }
  func.func @transform_13(%arg0: i32) -> (i32, i32) {
    %c0_i32 = arith.constant 0 : i32
    %c0_i32_0 = arith.constant 0 : i32
    %c0_i32_1 = arith.constant 0 : i32
    return %c0_i32, %c0_i32_0 : i32, i32
  }
  func.func @transform_14(%arg0: i32) -> (i32, i32) {
    %c0_i32 = arith.constant 0 : i32
    %c0_i32_0 = arith.constant 0 : i32
    %c0_i32_1 = arith.constant 0 : i32
    return %c0_i32, %c0_i32_0 : i32, i32
  }
  func.func @transform_15(%arg0: i32) -> (i32, i32) {
    %c0_i32 = arith.constant 0 : i32
    %c0_i32_0 = arith.constant 0 : i32
    %c0_i32_1 = arith.constant 0 : i32
    return %c0_i32, %c0_i32_0 : i32, i32
  }
  func.func @transform_16(%arg0: i32) -> (i32, i32) {
    %c0_i32 = arith.constant 0 : i32
    %c0_i32_0 = arith.constant 0 : i32
    %c0_i32_1 = arith.constant 0 : i32
    return %c0_i32, %c0_i32_0 : i32, i32
  }
  func.func @transform_17(%arg0: i32) -> (i32, i32) {
    %c0_i32 = arith.constant 0 : i32
    %c0_i32_0 = arith.constant 0 : i32
    %c0_i32_1 = arith.constant 0 : i32
    return %c0_i32, %c0_i32_0 : i32, i32
  }
  func.func @transform_18(%arg0: i32) -> (i32, i32) {
    %c0_i32 = arith.constant 0 : i32
    %c0_i32_0 = arith.constant 0 : i32
    %c0_i32_1 = arith.constant 0 : i32
    return %c0_i32, %c0_i32_0 : i32, i32
  }
  func.func @transform_19(%arg0: i32) -> (i32, i32) {
    %c0_i32 = arith.constant 0 : i32
    %c0_i32_0 = arith.constant 0 : i32
    %c0_i32_1 = arith.constant 0 : i32
    return %c0_i32, %c0_i32_0 : i32, i32
  }
  func.func @transform_20(%arg0: i32) -> (i32, i32) {
    %c0_i32 = arith.constant 0 : i32
    %c0_i32_0 = arith.constant 0 : i32
    %c0_i32_1 = arith.constant 0 : i32
    return %c0_i32, %c0_i32_0 : i32, i32
  }
  func.func @transform_21(%arg0: i32) -> (i32, i32) {
    %c0_i32 = arith.constant 0 : i32
    %c0_i32_0 = arith.constant 0 : i32
    %c0_i32_1 = arith.constant 0 : i32
    return %c0_i32, %c0_i32_0 : i32, i32
  }
}

module attributes {stable_mosaic.version = 11 : i64} {
  func.func @_encoder_layer_kernel(%arg0: i32, %arg1: memref<16x32xf32, #tpu.memory_space<vmem>>, %arg2: memref<32x32xf32, #tpu.memory_space<vmem>>, %arg3: memref<32x32xf32, #tpu.memory_space<vmem>>, %arg4: memref<32x32xf32, #tpu.memory_space<vmem>>, %arg5: memref<1x32xf32, #tpu.memory_space<vmem>>, %arg6: memref<1x32xf32, #tpu.memory_space<vmem>>, %arg7: memref<1x32xf32, #tpu.memory_space<vmem>>, %arg8: memref<32x8xf32, #tpu.memory_space<vmem>>, %arg9: memref<8x32xf32, #tpu.memory_space<vmem>>, %arg10: memref<32x32xf32, #tpu.memory_space<vmem>>, %arg11: memref<1x32xf32, #tpu.memory_space<vmem>>, %arg12: memref<1x32xf32, #tpu.memory_space<vmem>>, %arg13: memref<1x32xf32, #tpu.memory_space<vmem>>, %arg14: memref<32x2048xf32, #tpu.memory_space<vmem>>, %arg15: memref<1x2048xf32, #tpu.memory_space<vmem>>, %arg16: memref<2048x32xf32, #tpu.memory_space<vmem>>, %arg17: memref<1x32xf32, #tpu.memory_space<vmem>>, %arg18: memref<1x32xf32, #tpu.memory_space<vmem>>, %arg19: memref<1x32xf32, #tpu.memory_space<vmem>>, %arg20: memref<1x32xf32, #tpu.memory_space<vmem>>, %arg21: memref<1x1xf32, #tpu.memory_space<vmem>>, %arg22: memref<16x1xf32, #tpu.memory_space<vmem>>) attributes {dimension_semantics = [#tpu.dimension_semantics<arbitrary>], iteration_bounds = array<i64: 1>, scalar_prefetch = 0 : i64, scratch_operands = 0 : i64, tpu.core_type = #tpu.core_type<tc>, window_params = [{pipeline_mode = #tpu.pipeline_mode<synchronous>, transform_indices = @transform_0, window_bounds = array<i64: 16, 32>}, {pipeline_mode = #tpu.pipeline_mode<synchronous>, transform_indices = @transform_1, window_bounds = array<i64: 32, 32>}, {pipeline_mode = #tpu.pipeline_mode<synchronous>, transform_indices = @transform_2, window_bounds = array<i64: 32, 32>}, {pipeline_mode = #tpu.pipeline_mode<synchronous>, transform_indices = @transform_3, window_bounds = array<i64: 32, 32>}, {pipeline_mode = #tpu.pipeline_mode<synchronous>, transform_indices = @transform_4, window_bounds = array<i64: 1, 32>}, {pipeline_mode = #tpu.pipeline_mode<synchronous>, transform_indices = @transform_5, window_bounds = array<i64: 1, 32>}, {pipeline_mode = #tpu.pipeline_mode<synchronous>, transform_indices = @transform_6, window_bounds = array<i64: 1, 32>}, {pipeline_mode = #tpu.pipeline_mode<synchronous>, transform_indices = @transform_7, window_bounds = array<i64: 32, 8>}, {pipeline_mode = #tpu.pipeline_mode<synchronous>, transform_indices = @transform_8, window_bounds = array<i64: 8, 32>}, {pipeline_mode = #tpu.pipeline_mode<synchronous>, transform_indices = @transform_9, window_bounds = array<i64: 32, 32>}, {pipeline_mode = #tpu.pipeline_mode<synchronous>, transform_indices = @transform_10, window_bounds = array<i64: 1, 32>}, {pipeline_mode = #tpu.pipeline_mode<synchronous>, transform_indices = @transform_11, window_bounds = array<i64: 1, 32>}, {pipeline_mode = #tpu.pipeline_mode<synchronous>, transform_indices = @transform_12, window_bounds = array<i64: 1, 32>}, {pipeline_mode = #tpu.pipeline_mode<synchronous>, transform_indices = @transform_13, window_bounds = array<i64: 32, 2048>}, {pipeline_mode = #tpu.pipeline_mode<synchronous>, transform_indices = @transform_14, window_bounds = array<i64: 1, 2048>}, {pipeline_mode = #tpu.pipeline_mode<synchronous>, transform_indices = @transform_15, window_bounds = array<i64: 2048, 32>}, {pipeline_mode = #tpu.pipeline_mode<synchronous>, transform_indices = @transform_16, window_bounds = array<i64: 1, 32>}, {pipeline_mode = #tpu.pipeline_mode<synchronous>, transform_indices = @transform_17, window_bounds = array<i64: 1, 32>}, {pipeline_mode = #tpu.pipeline_mode<synchronous>, transform_indices = @transform_18, window_bounds = array<i64: 1, 32>}, {pipeline_mode = #tpu.pipeline_mode<synchronous>, transform_indices = @transform_19, window_bounds = array<i64: 1, 32>}, {pipeline_mode = #tpu.pipeline_mode<synchronous>, transform_indices = @transform_20, window_bounds = array<i64: 1, 1>}, {pipeline_mode = #tpu.pipeline_mode<synchronous>, transform_indices = @transform_21, window_bounds = array<i64: 16, 1>}]} {
    %c0 = arith.constant 0 : index
    %c0_0 = arith.constant 0 : index
    %0 = vector.load %arg1[%c0, %c0_0] : memref<16x32xf32, #tpu.memory_space<vmem>>, vector<16x32xf32>
    %c0_1 = arith.constant 0 : index
    %c0_2 = arith.constant 0 : index
    %1 = vector.load %arg2[%c0_1, %c0_2] : memref<32x32xf32, #tpu.memory_space<vmem>>, vector<32x32xf32>
    %cst = arith.constant dense<0.000000e+00> : vector<16x32xf32>
    %2 = tpu.matmul %0, %1, %cst {dimension_numbers = #tpu.dot_dimension_numbers<[1], [0], [0], [1], [0, 0, 1, 1], [], []>} : vector<16x32xf32>, vector<32x32xf32>, vector<16x32xf32> -> vector<16x32xf32>
    %c0_3 = arith.constant 0 : index
    %c0_4 = arith.constant 0 : index
    %3 = vector.load %arg5[%c0_3, %c0_4] : memref<1x32xf32, #tpu.memory_space<vmem>>, vector<1x32xf32>
    %4 = vector.broadcast %3 : vector<1x32xf32> to vector<16x32xf32>
    %5 = arith.addf %2, %4 : vector<16x32xf32>
    %c0_5 = arith.constant 0 : index
    %c0_6 = arith.constant 0 : index
    %6 = vector.load %arg3[%c0_5, %c0_6] : memref<32x32xf32, #tpu.memory_space<vmem>>, vector<32x32xf32>
    %cst_7 = arith.constant dense<0.000000e+00> : vector<16x32xf32>
    %7 = tpu.matmul %0, %6, %cst_7 {dimension_numbers = #tpu.dot_dimension_numbers<[1], [0], [0], [1], [0, 0, 1, 1], [], []>} : vector<16x32xf32>, vector<32x32xf32>, vector<16x32xf32> -> vector<16x32xf32>
    %c0_8 = arith.constant 0 : index
    %c0_9 = arith.constant 0 : index
    %8 = vector.load %arg6[%c0_8, %c0_9] : memref<1x32xf32, #tpu.memory_space<vmem>>, vector<1x32xf32>
    %9 = vector.broadcast %8 : vector<1x32xf32> to vector<16x32xf32>
    %10 = arith.addf %7, %9 : vector<16x32xf32>
    %c0_10 = arith.constant 0 : index
    %c0_11 = arith.constant 0 : index
    %11 = vector.load %arg4[%c0_10, %c0_11] : memref<32x32xf32, #tpu.memory_space<vmem>>, vector<32x32xf32>
    %cst_12 = arith.constant dense<0.000000e+00> : vector<16x32xf32>
    %12 = tpu.matmul %0, %11, %cst_12 {dimension_numbers = #tpu.dot_dimension_numbers<[1], [0], [0], [1], [0, 0, 1, 1], [], []>} : vector<16x32xf32>, vector<32x32xf32>, vector<16x32xf32> -> vector<16x32xf32>
    %c0_13 = arith.constant 0 : index
    %c0_14 = arith.constant 0 : index
    %13 = vector.load %arg7[%c0_13, %c0_14] : memref<1x32xf32, #tpu.memory_space<vmem>>, vector<1x32xf32>
    %14 = vector.broadcast %13 : vector<1x32xf32> to vector<16x32xf32>
    %15 = arith.addf %12, %14 : vector<16x32xf32>
    %c0_15 = arith.constant 0 : index
    %c0_16 = arith.constant 0 : index
    %16 = vector.load %arg8[%c0_15, %c0_16] : memref<32x8xf32, #tpu.memory_space<vmem>>, vector<32x8xf32>
    %c0_17 = arith.constant 0 : index
    %c0_18 = arith.constant 0 : index
    %17 = vector.load %arg9[%c0_17, %c0_18] : memref<8x32xf32, #tpu.memory_space<vmem>>, vector<8x32xf32>
    %18 = vector.extract_strided_slice %5 {offsets = [0, 0], sizes = [8, 32], strides = [1, 1]} : vector<16x32xf32> to vector<8x32xf32>
    %19 = vector.extract_strided_slice %5 {offsets = [8, 0], sizes = [8, 32], strides = [1, 1]} : vector<16x32xf32> to vector<8x32xf32>
    %20 = vector.extract_strided_slice %10 {offsets = [0, 0], sizes = [8, 32], strides = [1, 1]} : vector<16x32xf32> to vector<8x32xf32>
    %21 = vector.extract_strided_slice %10 {offsets = [8, 0], sizes = [8, 32], strides = [1, 1]} : vector<16x32xf32> to vector<8x32xf32>
    %22 = vector.extract_strided_slice %15 {offsets = [0, 0], sizes = [8, 32], strides = [1, 1]} : vector<16x32xf32> to vector<8x32xf32>
    %23 = vector.extract_strided_slice %15 {offsets = [8, 0], sizes = [8, 32], strides = [1, 1]} : vector<16x32xf32> to vector<8x32xf32>
    %24 = arith.mulf %18, %20 : vector<8x32xf32>
    %cst_19 = arith.constant dense<0.000000e+00> : vector<8x8xf32>
    %25 = tpu.matmul %24, %16, %cst_19 {dimension_numbers = #tpu.dot_dimension_numbers<[1], [0], [0], [1], [0, 0, 1, 1], [], []>} : vector<8x32xf32>, vector<32x8xf32>, vector<8x8xf32> -> vector<8x8xf32>
    %cst_20 = arith.constant 5.000000e-01 : f32
    %26 = vector.broadcast %cst_20 : f32 to vector<8x8xf32>
    %27 = arith.mulf %25, %26 : vector<8x8xf32>
    %28 = arith.mulf %18, %21 : vector<8x32xf32>
    %cst_21 = arith.constant dense<0.000000e+00> : vector<8x8xf32>
    %29 = tpu.matmul %28, %16, %cst_21 {dimension_numbers = #tpu.dot_dimension_numbers<[1], [0], [0], [1], [0, 0, 1, 1], [], []>} : vector<8x32xf32>, vector<32x8xf32>, vector<8x8xf32> -> vector<8x8xf32>
    %cst_22 = arith.constant 5.000000e-01 : f32
    %30 = vector.broadcast %cst_22 : f32 to vector<8x8xf32>
    %31 = arith.mulf %29, %30 : vector<8x8xf32>
    %32 = arith.maximumf %27, %31 : vector<8x8xf32>
    %33 = arith.subf %27, %32 : vector<8x8xf32>
    %34 = math.exp %33 : vector<8x8xf32>
    %35 = arith.subf %31, %32 : vector<8x8xf32>
    %36 = math.exp %35 : vector<8x8xf32>
    %37 = arith.addf %34, %36 : vector<8x8xf32>
    %38 = tpu.reciprocal %37 {approx = true} : vector<8x8xf32> -> vector<8x8xf32>
    %39 = arith.mulf %34, %38 : vector<8x8xf32>
    %cst_23 = arith.constant dense<0.000000e+00> : vector<8x32xf32>
    %40 = tpu.matmul %39, %17, %cst_23 {dimension_numbers = #tpu.dot_dimension_numbers<[1], [0], [0], [1], [0, 0, 1, 1], [], []>} : vector<8x8xf32>, vector<8x32xf32>, vector<8x32xf32> -> vector<8x32xf32>
    %41 = arith.mulf %40, %22 : vector<8x32xf32>
    %42 = arith.mulf %36, %38 : vector<8x8xf32>
    %cst_24 = arith.constant dense<0.000000e+00> : vector<8x32xf32>
    %43 = tpu.matmul %42, %17, %cst_24 {dimension_numbers = #tpu.dot_dimension_numbers<[1], [0], [0], [1], [0, 0, 1, 1], [], []>} : vector<8x8xf32>, vector<8x32xf32>, vector<8x32xf32> -> vector<8x32xf32>
    %44 = arith.mulf %43, %23 : vector<8x32xf32>
    %45 = arith.addf %41, %44 : vector<8x32xf32>
    %46 = arith.mulf %19, %20 : vector<8x32xf32>
    %cst_25 = arith.constant dense<0.000000e+00> : vector<8x8xf32>
    %47 = tpu.matmul %46, %16, %cst_25 {dimension_numbers = #tpu.dot_dimension_numbers<[1], [0], [0], [1], [0, 0, 1, 1], [], []>} : vector<8x32xf32>, vector<32x8xf32>, vector<8x8xf32> -> vector<8x8xf32>
    %cst_26 = arith.constant 5.000000e-01 : f32
    %48 = vector.broadcast %cst_26 : f32 to vector<8x8xf32>
    %49 = arith.mulf %47, %48 : vector<8x8xf32>
    %50 = arith.mulf %19, %21 : vector<8x32xf32>
    %cst_27 = arith.constant dense<0.000000e+00> : vector<8x8xf32>
    %51 = tpu.matmul %50, %16, %cst_27 {dimension_numbers = #tpu.dot_dimension_numbers<[1], [0], [0], [1], [0, 0, 1, 1], [], []>} : vector<8x32xf32>, vector<32x8xf32>, vector<8x8xf32> -> vector<8x8xf32>
    %cst_28 = arith.constant 5.000000e-01 : f32
    %52 = vector.broadcast %cst_28 : f32 to vector<8x8xf32>
    %53 = arith.mulf %51, %52 : vector<8x8xf32>
    %54 = arith.maximumf %49, %53 : vector<8x8xf32>
    %55 = arith.subf %49, %54 : vector<8x8xf32>
    %56 = math.exp %55 : vector<8x8xf32>
    %57 = arith.subf %53, %54 : vector<8x8xf32>
    %58 = math.exp %57 : vector<8x8xf32>
    %59 = arith.addf %56, %58 : vector<8x8xf32>
    %60 = tpu.reciprocal %59 {approx = true} : vector<8x8xf32> -> vector<8x8xf32>
    %61 = arith.mulf %56, %60 : vector<8x8xf32>
    %cst_29 = arith.constant dense<0.000000e+00> : vector<8x32xf32>
    %62 = tpu.matmul %61, %17, %cst_29 {dimension_numbers = #tpu.dot_dimension_numbers<[1], [0], [0], [1], [0, 0, 1, 1], [], []>} : vector<8x8xf32>, vector<8x32xf32>, vector<8x32xf32> -> vector<8x32xf32>
    %63 = arith.mulf %62, %22 : vector<8x32xf32>
    %64 = arith.mulf %58, %60 : vector<8x8xf32>
    %cst_30 = arith.constant dense<0.000000e+00> : vector<8x32xf32>
    %65 = tpu.matmul %64, %17, %cst_30 {dimension_numbers = #tpu.dot_dimension_numbers<[1], [0], [0], [1], [0, 0, 1, 1], [], []>} : vector<8x8xf32>, vector<8x32xf32>, vector<8x32xf32> -> vector<8x32xf32>
    %66 = arith.mulf %65, %23 : vector<8x32xf32>
    %67 = arith.addf %63, %66 : vector<8x32xf32>
    %68 = tpu.concatenate %45, %67 in 0 : vector<8x32xf32>, vector<8x32xf32> -> vector<16x32xf32>
    %c0_31 = arith.constant 0 : index
    %c0_32 = arith.constant 0 : index
    %69 = vector.load %arg10[%c0_31, %c0_32] : memref<32x32xf32, #tpu.memory_space<vmem>>, vector<32x32xf32>
    %cst_33 = arith.constant dense<0.000000e+00> : vector<16x32xf32>
    %70 = tpu.matmul %68, %69, %cst_33 {dimension_numbers = #tpu.dot_dimension_numbers<[1], [0], [0], [1], [0, 0, 1, 1], [], []>} : vector<16x32xf32>, vector<32x32xf32>, vector<16x32xf32> -> vector<16x32xf32>
    %c0_34 = arith.constant 0 : index
    %c0_35 = arith.constant 0 : index
    %71 = vector.load %arg11[%c0_34, %c0_35] : memref<1x32xf32, #tpu.memory_space<vmem>>, vector<1x32xf32>
    %72 = vector.broadcast %71 : vector<1x32xf32> to vector<16x32xf32>
    %73 = arith.addf %70, %72 : vector<16x32xf32>
    %74 = arith.addf %0, %73 : vector<16x32xf32>
    %cst_36 = arith.constant dense<0.000000e+00> : vector<16xf32>
    %75 = vector.multi_reduction <add>, %74, %cst_36 [1] : vector<16x32xf32> to vector<16xf32>
    %76 = vector.shape_cast %75 : vector<16xf32> to vector<16x1xf32>
    %cst_37 = arith.constant 3.200000e+01 : f32
    %77 = vector.broadcast %cst_37 : f32 to vector<16x1xf32>
    %78 = arith.divf %76, %77 : vector<16x1xf32>
    %79 = vector.broadcast %78 : vector<16x1xf32> to vector<16x32xf32>
    %80 = arith.subf %74, %79 : vector<16x32xf32>
    %81 = arith.mulf %80, %80 : vector<16x32xf32>
    %cst_38 = arith.constant dense<0.000000e+00> : vector<16xf32>
    %82 = vector.multi_reduction <add>, %81, %cst_38 [1] : vector<16x32xf32> to vector<16xf32>
    %83 = vector.shape_cast %82 : vector<16xf32> to vector<16x1xf32>
    %cst_39 = arith.constant 3.200000e+01 : f32
    %84 = vector.broadcast %cst_39 : f32 to vector<16x1xf32>
    %85 = arith.divf %83, %84 : vector<16x1xf32>
    %86 = vector.broadcast %78 : vector<16x1xf32> to vector<16x32xf32>
    %87 = arith.subf %74, %86 : vector<16x32xf32>
    %cst_40 = arith.constant 9.99999974E-6 : f32
    %88 = vector.broadcast %cst_40 : f32 to vector<16x1xf32>
    %89 = arith.addf %85, %88 : vector<16x1xf32>
    %90 = math.rsqrt %89 : vector<16x1xf32>
    %91 = vector.broadcast %90 : vector<16x1xf32> to vector<16x32xf32>
    %92 = arith.mulf %87, %91 : vector<16x32xf32>
    %c0_41 = arith.constant 0 : index
    %c0_42 = arith.constant 0 : index
    %93 = vector.load %arg12[%c0_41, %c0_42] : memref<1x32xf32, #tpu.memory_space<vmem>>, vector<1x32xf32>
    %94 = vector.broadcast %93 : vector<1x32xf32> to vector<16x32xf32>
    %95 = arith.mulf %92, %94 : vector<16x32xf32>
    %c0_43 = arith.constant 0 : index
    %c0_44 = arith.constant 0 : index
    %96 = vector.load %arg13[%c0_43, %c0_44] : memref<1x32xf32, #tpu.memory_space<vmem>>, vector<1x32xf32>
    %97 = vector.broadcast %96 : vector<1x32xf32> to vector<16x32xf32>
    %98 = arith.addf %95, %97 : vector<16x32xf32>
    %c0_45 = arith.constant 0 : index
    %c0_46 = arith.constant 0 : index
    %99 = vector.load %arg14[%c0_45, %c0_46] : memref<32x2048xf32, #tpu.memory_space<vmem>>, vector<32x2048xf32>
    %cst_47 = arith.constant dense<0.000000e+00> : vector<16x2048xf32>
    %100 = tpu.matmul %98, %99, %cst_47 {dimension_numbers = #tpu.dot_dimension_numbers<[1], [0], [0], [1], [0, 0, 1, 1], [], []>} : vector<16x32xf32>, vector<32x2048xf32>, vector<16x2048xf32> -> vector<16x2048xf32>
    %c0_48 = arith.constant 0 : index
    %c0_49 = arith.constant 0 : index
    %101 = vector.load %arg15[%c0_48, %c0_49] : memref<1x2048xf32, #tpu.memory_space<vmem>>, vector<1x2048xf32>
    %102 = vector.broadcast %101 : vector<1x2048xf32> to vector<16x2048xf32>
    %103 = arith.addf %100, %102 : vector<16x2048xf32>
    %cst_50 = arith.constant 0.000000e+00 : f32
    %104 = vector.broadcast %cst_50 : f32 to vector<16x2048xf32>
    %105 = arith.maximumf %103, %104 : vector<16x2048xf32>
    %c0_51 = arith.constant 0 : index
    %c0_52 = arith.constant 0 : index
    %106 = vector.load %arg16[%c0_51, %c0_52] : memref<2048x32xf32, #tpu.memory_space<vmem>>, vector<2048x32xf32>
    %cst_53 = arith.constant dense<0.000000e+00> : vector<16x32xf32>
    %107 = tpu.matmul %105, %106, %cst_53 {dimension_numbers = #tpu.dot_dimension_numbers<[1], [0], [0], [1], [0, 0, 1, 1], [], []>} : vector<16x2048xf32>, vector<2048x32xf32>, vector<16x32xf32> -> vector<16x32xf32>
    %c0_54 = arith.constant 0 : index
    %c0_55 = arith.constant 0 : index
    %108 = vector.load %arg17[%c0_54, %c0_55] : memref<1x32xf32, #tpu.memory_space<vmem>>, vector<1x32xf32>
    %109 = vector.broadcast %108 : vector<1x32xf32> to vector<16x32xf32>
    %110 = arith.addf %107, %109 : vector<16x32xf32>
    %111 = arith.addf %98, %110 : vector<16x32xf32>
    %cst_56 = arith.constant dense<0.000000e+00> : vector<16xf32>
    %112 = vector.multi_reduction <add>, %111, %cst_56 [1] : vector<16x32xf32> to vector<16xf32>
    %113 = vector.shape_cast %112 : vector<16xf32> to vector<16x1xf32>
    %cst_57 = arith.constant 3.200000e+01 : f32
    %114 = vector.broadcast %cst_57 : f32 to vector<16x1xf32>
    %115 = arith.divf %113, %114 : vector<16x1xf32>
    %116 = vector.broadcast %115 : vector<16x1xf32> to vector<16x32xf32>
    %117 = arith.subf %111, %116 : vector<16x32xf32>
    %118 = arith.mulf %117, %117 : vector<16x32xf32>
    %cst_58 = arith.constant dense<0.000000e+00> : vector<16xf32>
    %119 = vector.multi_reduction <add>, %118, %cst_58 [1] : vector<16x32xf32> to vector<16xf32>
    %120 = vector.shape_cast %119 : vector<16xf32> to vector<16x1xf32>
    %cst_59 = arith.constant 3.200000e+01 : f32
    %121 = vector.broadcast %cst_59 : f32 to vector<16x1xf32>
    %122 = arith.divf %120, %121 : vector<16x1xf32>
    %123 = vector.broadcast %115 : vector<16x1xf32> to vector<16x32xf32>
    %124 = arith.subf %111, %123 : vector<16x32xf32>
    %cst_60 = arith.constant 9.99999974E-6 : f32
    %125 = vector.broadcast %cst_60 : f32 to vector<16x1xf32>
    %126 = arith.addf %122, %125 : vector<16x1xf32>
    %127 = math.rsqrt %126 : vector<16x1xf32>
    %128 = vector.broadcast %127 : vector<16x1xf32> to vector<16x32xf32>
    %129 = arith.mulf %124, %128 : vector<16x32xf32>
    %c0_61 = arith.constant 0 : index
    %c0_62 = arith.constant 0 : index
    %130 = vector.load %arg18[%c0_61, %c0_62] : memref<1x32xf32, #tpu.memory_space<vmem>>, vector<1x32xf32>
    %131 = vector.broadcast %130 : vector<1x32xf32> to vector<16x32xf32>
    %132 = arith.mulf %129, %131 : vector<16x32xf32>
    %c0_63 = arith.constant 0 : index
    %c0_64 = arith.constant 0 : index
    %133 = vector.load %arg19[%c0_63, %c0_64] : memref<1x32xf32, #tpu.memory_space<vmem>>, vector<1x32xf32>
    %134 = vector.broadcast %133 : vector<1x32xf32> to vector<16x32xf32>
    %135 = arith.addf %132, %134 : vector<16x32xf32>
    %cst_65 = arith.constant 0.000000e+00 : f32
    %136 = vector.broadcast %cst_65 : f32 to vector<16x32xf32>
    %137 = arith.maximumf %135, %136 : vector<16x32xf32>
    %c0_66 = arith.constant 0 : index
    %c0_67 = arith.constant 0 : index
    %138 = vector.load %arg20[%c0_66, %c0_67] : memref<1x32xf32, #tpu.memory_space<vmem>>, vector<1x32xf32>
    %139 = vector.broadcast %138 : vector<1x32xf32> to vector<16x32xf32>
    %140 = arith.mulf %137, %139 : vector<16x32xf32>
    %cst_68 = arith.constant dense<0.000000e+00> : vector<16xf32>
    %141 = vector.multi_reduction <add>, %140, %cst_68 [1] : vector<16x32xf32> to vector<16xf32>
    %142 = vector.shape_cast %141 : vector<16xf32> to vector<16x1xf32>
    %c0_69 = arith.constant 0 : index
    %c0_70 = arith.constant 0 : index
    %143 = vector.load %arg21[%c0_69, %c0_70] : memref<1x1xf32, #tpu.memory_space<vmem>>, vector<1x1xf32>
    %144 = vector.broadcast %143 : vector<1x1xf32> to vector<16x1xf32>
    %145 = arith.addf %142, %144 : vector<16x1xf32>
    %c0_71 = arith.constant 0 : index
    %c0_72 = arith.constant 0 : index
    %146 = vector.load %arg22[%c0_71, %c0_72] : memref<16x1xf32, #tpu.memory_space<vmem>>, vector<16x1xf32>
    tpu.vector_store %arg22[%c0_71, %c0_72], %145 {strides = array<i32>} : memref<16x1xf32, #tpu.memory_space<vmem>>, vector<16x1xf32>,
    return
  }
  func.func @transform_0(%arg0: i32) -> (i32, i32) {
    %c0_i32 = arith.constant 0 : i32
    %c0_i32_0 = arith.constant 0 : i32
    %c0_i32_1 = arith.constant 0 : i32
    return %c0_i32, %c0_i32_0 : i32, i32
  }
  func.func @transform_1(%arg0: i32) -> (i32, i32) {
    %c0_i32 = arith.constant 0 : i32
    %c0_i32_0 = arith.constant 0 : i32
    %c0_i32_1 = arith.constant 0 : i32
    return %c0_i32, %c0_i32_0 : i32, i32
  }
  func.func @transform_2(%arg0: i32) -> (i32, i32) {
    %c0_i32 = arith.constant 0 : i32
    %c0_i32_0 = arith.constant 0 : i32
    %c0_i32_1 = arith.constant 0 : i32
    return %c0_i32, %c0_i32_0 : i32, i32
  }
  func.func @transform_3(%arg0: i32) -> (i32, i32) {
    %c0_i32 = arith.constant 0 : i32
    %c0_i32_0 = arith.constant 0 : i32
    %c0_i32_1 = arith.constant 0 : i32
    return %c0_i32, %c0_i32_0 : i32, i32
  }
  func.func @transform_4(%arg0: i32) -> (i32, i32) {
    %c0_i32 = arith.constant 0 : i32
    %c0_i32_0 = arith.constant 0 : i32
    %c0_i32_1 = arith.constant 0 : i32
    return %c0_i32, %c0_i32_0 : i32, i32
  }
  func.func @transform_5(%arg0: i32) -> (i32, i32) {
    %c0_i32 = arith.constant 0 : i32
    %c0_i32_0 = arith.constant 0 : i32
    %c0_i32_1 = arith.constant 0 : i32
    return %c0_i32, %c0_i32_0 : i32, i32
  }
  func.func @transform_6(%arg0: i32) -> (i32, i32) {
    %c0_i32 = arith.constant 0 : i32
    %c0_i32_0 = arith.constant 0 : i32
    %c0_i32_1 = arith.constant 0 : i32
    return %c0_i32, %c0_i32_0 : i32, i32
  }
  func.func @transform_7(%arg0: i32) -> (i32, i32) {
    %c0_i32 = arith.constant 0 : i32
    %c0_i32_0 = arith.constant 0 : i32
    %c0_i32_1 = arith.constant 0 : i32
    return %c0_i32, %c0_i32_0 : i32, i32
  }
  func.func @transform_8(%arg0: i32) -> (i32, i32) {
    %c0_i32 = arith.constant 0 : i32
    %c0_i32_0 = arith.constant 0 : i32
    %c0_i32_1 = arith.constant 0 : i32
    return %c0_i32, %c0_i32_0 : i32, i32
  }
  func.func @transform_9(%arg0: i32) -> (i32, i32) {
    %c0_i32 = arith.constant 0 : i32
    %c0_i32_0 = arith.constant 0 : i32
    %c0_i32_1 = arith.constant 0 : i32
    return %c0_i32, %c0_i32_0 : i32, i32
  }
  func.func @transform_10(%arg0: i32) -> (i32, i32) {
    %c0_i32 = arith.constant 0 : i32
    %c0_i32_0 = arith.constant 0 : i32
    %c0_i32_1 = arith.constant 0 : i32
    return %c0_i32, %c0_i32_0 : i32, i32
  }
  func.func @transform_11(%arg0: i32) -> (i32, i32) {
    %c0_i32 = arith.constant 0 : i32
    %c0_i32_0 = arith.constant 0 : i32
    %c0_i32_1 = arith.constant 0 : i32
    return %c0_i32, %c0_i32_0 : i32, i32
  }
  func.func @transform_12(%arg0: i32) -> (i32, i32) {
    %c0_i32 = arith.constant 0 : i32
    %c0_i32_0 = arith.constant 0 : i32
    %c0_i32_1 = arith.constant 0 : i32
    return %c0_i32, %c0_i32_0 : i32, i32
  }
  func.func @transform_13(%arg0: i32) -> (i32, i32) {
    %c0_i32 = arith.constant 0 : i32
    %c0_i32_0 = arith.constant 0 : i32
    %c0_i32_1 = arith.constant 0 : i32
    return %c0_i32, %c0_i32_0 : i32, i32
  }
  func.func @transform_14(%arg0: i32) -> (i32, i32) {
    %c0_i32 = arith.constant 0 : i32
    %c0_i32_0 = arith.constant 0 : i32
    %c0_i32_1 = arith.constant 0 : i32
    return %c0_i32, %c0_i32_0 : i32, i32
  }
  func.func @transform_15(%arg0: i32) -> (i32, i32) {
    %c0_i32 = arith.constant 0 : i32
    %c0_i32_0 = arith.constant 0 : i32
    %c0_i32_1 = arith.constant 0 : i32
    return %c0_i32, %c0_i32_0 : i32, i32
  }
  func.func @transform_16(%arg0: i32) -> (i32, i32) {
    %c0_i32 = arith.constant 0 : i32
    %c0_i32_0 = arith.constant 0 : i32
    %c0_i32_1 = arith.constant 0 : i32
    return %c0_i32, %c0_i32_0 : i32, i32
  }
  func.func @transform_17(%arg0: i32) -> (i32, i32) {
    %c0_i32 = arith.constant 0 : i32
    %c0_i32_0 = arith.constant 0 : i32
    %c0_i32_1 = arith.constant 0 : i32
    return %c0_i32, %c0_i32_0 : i32, i32
  }
  func.func @transform_18(%arg0: i32) -> (i32, i32) {
    %c0_i32 = arith.constant 0 : i32
    %c0_i32_0 = arith.constant 0 : i32
    %c0_i32_1 = arith.constant 0 : i32
    return %c0_i32, %c0_i32_0 : i32, i32
  }
  func.func @transform_19(%arg0: i32) -> (i32, i32) {
    %c0_i32 = arith.constant 0 : i32
    %c0_i32_0 = arith.constant 0 : i32
    %c0_i32_1 = arith.constant 0 : i32
    return %c0_i32, %c0_i32_0 : i32, i32
  }
  func.func @transform_20(%arg0: i32) -> (i32, i32) {
    %c0_i32 = arith.constant 0 : i32
    %c0_i32_0 = arith.constant 0 : i32
    %c0_i32_1 = arith.constant 0 : i32
    return %c0_i32, %c0_i32_0 : i32, i32
  }
  func.func @transform_21(%arg0: i32) -> (i32, i32) {
    %c0_i32 = arith.constant 0 : i32
    %c0_i32_0 = arith.constant 0 : i32
    %c0_i32_1 = arith.constant 0 : i32
    return %c0_i32, %c0_i32_0 : i32, i32
  }
}

</mosaic_0001>

<bundles_post_ra>
// kernel: cifar10trans_forward.4
= control target key start
LH: loop header
LB: loop body
LE: loop exit
PB: predicated region body
PF: predicated region fallthrough
CT: control target
= control target key end

     0   :  { %s853_s12 = smov 0   ;;  %s1058_s0 = inlined_call_operand.vmem [shape: f32[1024,27], index: 0, kind: input, shape index: {}]   ;;  %s1059_s1 = inlined_call_operand.vmem [shape: f32[27,32], index: 1, kind: input, shape index: {}]   ;;  %s1060_s2 = inlined_call_operand.vmem [shape: f32[1,32], index: 2, kind: input, shape index: {}]   ;;  %s1061_s3 = inlined_call_operand.vmem [shape: f32[1024,32], index: 3, kind: output, shape index: {}]  }
   0x1 LB: > { %s664_s13 = sadd.s32 4294967295, %s830_s12   ;;  %p668_p0 = scmp.ge.s32.totalorder %s830_s12, 1  ;;  %s830_s12 = sphi %s853_s12, %s13_s12  }
   0x2   : > { %p138_p1 = scmp.lt.s32.totalorder %s830_s12, 5 }
   0x4   : > { %p139_p2 = pnand %p668_p0, %p138_p1 }
   0x5   : > { %v206_v0 = vld [vmem:[%s1059_s1] sm:$0xff] (!%p139_p2)  ;;  %v207_v1 = vld [vmem:[%s1059_s1 + $0x8] sm:$0xff] (!%p139_p2)  ;;  %v208_v2 = vld [vmem:[%s1059_s1 + $0x10] sm:$0xff] (!%p139_p2)  ;;  %vm314_vm0 = vcmask (!%p139_p2), 1042432   ;;  %s669_s20 = sshll.u32 (!%p139_p2), %s664_s13, 5  ;;  %vm832_vm1 = vmmov (!%p139_p2), 1  }
   0x6   : > { %142 = sbr.rel (%p139_p2) target bundleno = 265 (0x109), region = 32  ;;  %v801_v3 = vpack.c.bf16 (!%p139_p2), %v207_v1, %v206_v0  ;;  %v209_v4 = vld [vmem:[%s1059_s1 + $0x18] sm:$0x7] (!%p139_p2)  ;;  %p163_p3 = scmp.lt.s32.totalorder (!%p139_p2), %s669_s20, 127  ;;  %vm806_vm2 = vmpackc.low (!%p139_p2), %vm314_vm0, %vm832_vm1  ;;  %vm217_vm3 = vcmask (!%p139_p2), 220160   ;;  %vm575_vm4 = vcmask (!%p139_p2), 261120  }
   0x7   : > { %v805_v5 = vpack.c.bf16 (!%p139_p2), %v209_v4, %v208_v2  ;;  %v950_v38 = vld [vmem:[%s1060_s2] ss:$0 sm:$0xff] (!%p139_p2) }
   0x8   : > { %802 = vmatprep.subr.bf16.mxu0 (!%p139_p2), %v801_v3  ;;  %811 = vmatprep.subr.bf16.mxu1 (!%p139_p2), %v801_v3 }
   0x9   : > { %804 = vmatpush3.bf16.msra.mxu0 (!%p139_p2), %v801_v3  ;;  %813 = vmatpush3.bf16.msra.mxu1 (!%p139_p2), %v801_v3 }
   0xa   : > { %807 = vmatprep.subr.msk.bf16.mxu0 (!%p139_p2), %vm806_vm2, %v805_v5  ;;  %812 = vmatprep.subr.msk.bf16.mxu1 (!%p139_p2), %vm806_vm2, %v805_v5 }
   0xd   : > { %s1063_s20 = smov (!%p163_p3, %s669_s20), 127  ;;  %810 = vmatpush3.bf16.msk.msra.mxu0 %vm806_vm2, %v805_v5  ;;  %814 = vmatpush3.bf16.msk.msra.mxu1 %vm806_vm2, %v805_v5 }
   0xe   : > { %s670_s23 = sshll.u32 %s1063_s20, 3 }
   0xf   : > { %s881_s26 = scalar_lea.vmem %s1058_s0, %s670_s23  ;;  %s959_s4 = scalar_lea.vmem %s1061_s3, %s670_s23 }
  0x10   : > { %v174_v6 = vld [vmem:[%s881_s26] sm:$0xff]  ;;  %v175_v8 = vld [vmem:[%s881_s26 + $0x8] sm:$0xff]  ;;  %v176_v10 = vld [vmem:[%s881_s26 + $0x10] sm:$0xff] }
  0x11   : > { %v190_v7 = vld [vmem:[%s881_s26 + $0x80] sm:$0xff]  ;;  %v191_v9 = vld [vmem:[%s881_s26 + $0x88] sm:$0xff]  ;;  %753 = vmatprep.mubr.msk.f32.mxu0 %vm217_vm3, %v174_v6  ;;  %v192_v11 = vld [vmem:[%s881_s26 + $0x90] sm:$0xff] }
  0x12   : > { %777 = vmatprep.mubr.msk.f32.mxu1 %vm217_vm3, %v190_v7  ;;  %754 = vmatmul.mubr.msk.f32.vlgmr.msra.gmra.mrb[0].mxu0 %vm217_vm3, %v175_v8  ;;  %v177_v12 = vld [vmem:[%s881_s26 + $0x18] sm:$0xff]  ;;  %v178_v14 = vld [vmem:[%s881_s26 + $0x20] sm:$0xff]  ;;  %v179_v16 = vld [vmem:[%s881_s26 + $0x28] sm:$0xff] }
  0x13   : > { %778 = vmatmul.mubr.msk.f32.vlgmr.msra.gmra.mrb[0].mxu1 %vm217_vm3, %v191_v9  ;;  %756 = vmatprep.mubr.msk.f32.mxu0 %vm217_vm3, %v176_v10  ;;  %v193_v13 = vld [vmem:[%s881_s26 + $0x98] sm:$0xff]  ;;  %v194_v15 = vld [vmem:[%s881_s26 + $0xa0] sm:$0xff]  ;;  %v195_v17 = vld [vmem:[%s881_s26 + $0xa8] sm:$0xff] }
  0x14   : > { %780 = vmatprep.mubr.msk.f32.mxu1 %vm217_vm3, %v192_v11  ;;  %v180_v18 = vld [vmem:[%s881_s26 + $0x30] sm:$0xff]  ;;  %v181_v20 = vld [vmem:[%s881_s26 + $0x38] sm:$0xff]  ;;  %v182_v22 = vld [vmem:[%s881_s26 + $0x40] sm:$0xff] }
  0x15   : > { %v196_v19 = vld [vmem:[%s881_s26 + $0xb0] sm:$0xff]  ;;  %v197_v21 = vld [vmem:[%s881_s26 + $0xb8] sm:$0xff]  ;;  %v198_v23 = vld [vmem:[%s881_s26 + $0xc0] sm:$0xff] }
  0x16   : > { %757 = vmatmul.mubr.msk.f32.gmra.mrb[2].mxu0 %vm217_vm3, %v177_v12  ;;  %v183_v24 = vld [vmem:[%s881_s26 + $0x48] sm:$0xff]  ;;  %v184_v26 = vld [vmem:[%s881_s26 + $0x50] sm:$0xff]  ;;  %v185_v28 = vld [vmem:[%s881_s26 + $0x58] sm:$0xff] }
  0x17   : > { %781 = vmatmul.mubr.msk.f32.gmra.mrb[2].mxu1 %vm217_vm3, %v193_v13  ;;  %759 = vmatprep.mubr.msk.f32.mxu0 %vm217_vm3, %v178_v14  ;;  %v199_v25 = vld [vmem:[%s881_s26 + $0xc8] sm:$0xff]  ;;  %v200_v27 = vld [vmem:[%s881_s26 + $0xd0] sm:$0xff]  ;;  %v201_v29 = vld [vmem:[%s881_s26 + $0xd8] sm:$0xff] }
  0x18   : > { %783 = vmatprep.mubr.msk.f32.mxu1 %vm217_vm3, %v194_v15  ;;  %v186_v30 = vld [vmem:[%s881_s26 + $0x60] sm:$0xff]  ;;  %v187_v32 = vld [vmem:[%s881_s26 + $0x68] sm:$0xff]  ;;  %v188_v34 = vld [vmem:[%s881_s26 + $0x70] sm:$0xff] }
  0x19   : > { %v202_v31 = vld [vmem:[%s881_s26 + $0xe0] sm:$0xff]  ;;  %v203_v33 = vld [vmem:[%s881_s26 + $0xe8] sm:$0xff]  ;;  %v204_v35 = vld [vmem:[%s881_s26 + $0xf0] sm:$0xff] }
  0x1a   : > { %760 = vmatmul.mubr.msk.f32.gmra.mrb[4].mxu0 %vm217_vm3, %v179_v16  ;;  %v189_v36 = vld [vmem:[%s881_s26 + $0x78] sm:$0xff] }
  0x1b   : > { %784 = vmatmul.mubr.msk.f32.gmra.mrb[4].mxu1 %vm217_vm3, %v195_v17  ;;  %762 = vmatprep.mubr.msk.f32.mxu0 %vm217_vm3, %v180_v18  ;;  %v205_v37 = vld [vmem:[%s881_s26 + $0xf8] sm:$0xff] }
  0x1c   : > { %786 = vmatprep.mubr.msk.f32.mxu1 %vm217_vm3, %v196_v19 }
  0x1e   : > { %763 = vmatmul.mubr.msk.f32.gmra.mrb[6].mxu0 %vm217_vm3, %v181_v20 }
  0x1f   : > { %787 = vmatmul.mubr.msk.f32.gmra.mrb[6].mxu1 %vm217_vm3, %v197_v21  ;;  %765 = vmatprep.mubr.msk.f32.mxu0 %vm217_vm3, %v182_v22 }
  0x20   : > { %789 = vmatprep.mubr.msk.f32.mxu1 %vm217_vm3, %v198_v23 }
  0x22   : > { %766 = vmatmul.mubr.msk.f32.gmra.mrb[8].mxu0 %vm217_vm3, %v183_v24 }
  0x23   : > { %790 = vmatmul.mubr.msk.f32.gmra.mrb[8].mxu1 %vm217_vm3, %v199_v25  ;;  %768 = vmatprep.mubr.msk.f32.mxu0 %vm217_vm3, %v184_v26 }
  0x24   : > { %792 = vmatprep.mubr.msk.f32.mxu1 %vm217_vm3, %v200_v27 }
  0x26   : > { %769 = vmatmul.mubr.msk.f32.gmra.mrb[10].mxu0 %vm217_vm3, %v185_v28 }
  0x27   : > { %793 = vmatmul.mubr.msk.f32.gmra.mrb[10].mxu1 %vm217_vm3, %v201_v29  ;;  %771 = vmatprep.mubr.msk.f32.mxu0 %vm217_vm3, %v186_v30 }
  0x28   : > { %795 = vmatprep.mubr.msk.f32.mxu1 %vm217_vm3, %v202_v31 }
  0x2a   : > { %772 = vmatmul.mubr.msk.f32.gmra.mrb[12].mxu0 %vm217_vm3, %v187_v32 }
  0x2b   : > { %796 = vmatmul.mubr.msk.f32.gmra.mrb[12].mxu1 %vm217_vm3, %v203_v33  ;;  %774 = vmatprep.mubr.msk.f32.mxu0 %vm217_vm3, %v188_v34 }
  0x2c   : > { %798 = vmatprep.mubr.msk.f32.mxu1 %vm217_vm3, %v204_v35 }
  0x2e   : > { %775 = vmatmul.mubr.msk.f32.gmra.mrb[14].mxu0 %vm217_vm3, %v189_v36 }
  0x2f   : > { %799 = vmatmul.mubr.msk.f32.gmra.mrb[14].mxu1 %vm217_vm3, %v205_v37 }
  0xe5   : > { %v755_v39 = vpop.f32.mrb[0].mxu0 }
  0xe6   : > { %v779_v40 = vpop.f32.mrb[0].mxu1  ;;  %v390_v41 = vadd.f32 %v755_v39, %v950_v38  ;;  %v384_v43 = vpop.f32.mrb[1].mxu0 }
  0xe7   : > { %v470_v42 = vadd.f32 %v779_v40, %v950_v38  ;;  %v464_v44 = vpop.f32.mrb[1].mxu1  ;;  %v385_v45 = vadd.f32 %v950_v38, %v384_v43 }
  0xe8   : > { %v465_v46 = vadd.f32 %v950_v38, %v464_v44  ;;  %v544_v47 = vmax.f32 %v390_v41, 0.0 }
  0xe9   : > { %v560_v48 = vmax.f32 %v470_v42, 0.0  ;;  %v543_v49 = vmax.f32 %v385_v45, 0.0  ;;  %v758_v51 = vpop.f32.mrb[2].mxu0 }
  0xea   : > { %v559_v50 = vmax.f32 %v465_v46, 0.0  ;;  %v782_v52 = vpop.f32.mrb[2].mxu1  ;;  %577 = vst.msk [vmem:[%s959_s4 + $0x8] sm:$0xff] %vm575_vm4, %v544_v47  ;;  %v400_v53 = vadd.f32 %v758_v51, %v950_v38  ;;  %v394_v55 = vpop.f32.mrb[3].mxu0 }
  0xeb   : > { %593 = vst.msk [vmem:[%s959_s4 + $0x88] sm:$0xff] %vm575_vm4, %v560_v48  ;;  %v480_v54 = vadd.f32 %v782_v52, %v950_v38  ;;  %v474_v56 = vpop.f32.mrb[3].mxu1  ;;  %576 = vst.msk [vmem:[%s959_s4] sm:$0xff] %vm575_vm4, %v543_v49  ;;  %v395_v57 = vadd.f32 %v950_v38, %v394_v55 }
  0xec   : > { %592 = vst.msk [vmem:[%s959_s4 + $0x80] sm:$0xff] %vm575_vm4, %v559_v50  ;;  %v475_v58 = vadd.f32 %v950_v38, %v474_v56  ;;  %v546_v59 = vmax.f32 %v400_v53, 0.0 }
  0xed   : > { %v562_v60 = vmax.f32 %v480_v54, 0.0  ;;  %v545_v61 = vmax.f32 %v395_v57, 0.0  ;;  %v761_v63 = vpop.f32.mrb[4].mxu0 }
  0xee   : > { %v561_v62 = vmax.f32 %v475_v58, 0.0  ;;  %v785_v0 = vpop.f32.mrb[4].mxu1  ;;  %579 = vst.msk [vmem:[%s959_s4 + $0x18] sm:$0xff] %vm575_vm4, %v546_v59  ;;  %v410_v1 = vadd.f32 %v761_v63, %v950_v38  ;;  %v404_v3 = vpop.f32.mrb[5].mxu0 }
  0xef   : > { %595 = vst.msk [vmem:[%s959_s4 + $0x98] sm:$0xff] %vm575_vm4, %v562_v60  ;;  %v490_v2 = vadd.f32 %v785_v0, %v950_v38  ;;  %v484_v4 = vpop.f32.mrb[5].mxu1  ;;  %578 = vst.msk [vmem:[%s959_s4 + $0x10] sm:$0xff] %vm575_vm4, %v545_v61  ;;  %v405_v5 = vadd.f32 %v950_v38, %v404_v3 }
  0xf0   : > { %594 = vst.msk [vmem:[%s959_s4 + $0x90] sm:$0xff] %vm575_vm4, %v561_v62  ;;  %v485_v6 = vadd.f32 %v950_v38, %v484_v4  ;;  %v548_v7 = vmax.f32 %v410_v1, 0.0 }
  0xf1   : > { %v564_v8 = vmax.f32 %v490_v2, 0.0  ;;  %v547_v9 = vmax.f32 %v405_v5, 0.0  ;;  %v764_v11 = vpop.f32.mrb[6].mxu0 }
  0xf2   : > { %v563_v10 = vmax.f32 %v485_v6, 0.0  ;;  %v788_v12 = vpop.f32.mrb[6].mxu1  ;;  %581 = vst.msk [vmem:[%s959_s4 + $0x28] sm:$0xff] %vm575_vm4, %v548_v7  ;;  %v420_v13 = vadd.f32 %v764_v11, %v950_v38  ;;  %v414_v15 = vpop.f32.mrb[7].mxu0 }
  0xf3   : > { %597 = vst.msk [vmem:[%s959_s4 + $0xa8] sm:$0xff] %vm575_vm4, %v564_v8  ;;  %v500_v14 = vadd.f32 %v788_v12, %v950_v38  ;;  %v494_v16 = vpop.f32.mrb[7].mxu1  ;;  %580 = vst.msk [vmem:[%s959_s4 + $0x20] sm:$0xff] %vm575_vm4, %v547_v9  ;;  %v415_v17 = vadd.f32 %v950_v38, %v414_v15 }
  0xf4   : > { %596 = vst.msk [vmem:[%s959_s4 + $0xa0] sm:$0xff] %vm575_vm4, %v563_v10  ;;  %v495_v18 = vadd.f32 %v950_v38, %v494_v16  ;;  %v550_v19 = vmax.f32 %v420_v13, 0.0 }
  0xf5   : > { %v566_v20 = vmax.f32 %v500_v14, 0.0  ;;  %v549_v21 = vmax.f32 %v415_v17, 0.0  ;;  %v767_v23 = vpop.f32.mrb[8].mxu0 }
  0xf6   : > { %v565_v22 = vmax.f32 %v495_v18, 0.0  ;;  %v791_v24 = vpop.f32.mrb[8].mxu1  ;;  %583 = vst.msk [vmem:[%s959_s4 + $0x38] sm:$0xff] %vm575_vm4, %v550_v19  ;;  %v430_v25 = vadd.f32 %v767_v23, %v950_v38  ;;  %v424_v27 = vpop.f32.mrb[9].mxu0 }
  0xf7   : > { %599 = vst.msk [vmem:[%s959_s4 + $0xb8] sm:$0xff] %vm575_vm4, %v566_v20  ;;  %v510_v26 = vadd.f32 %v791_v24, %v950_v38  ;;  %v504_v28 = vpop.f32.mrb[9].mxu1  ;;  %582 = vst.msk [vmem:[%s959_s4 + $0x30] sm:$0xff] %vm575_vm4, %v549_v21  ;;  %v425_v29 = vadd.f32 %v950_v38, %v424_v27 }
  0xf8   : > { %598 = vst.msk [vmem:[%s959_s4 + $0xb0] sm:$0xff] %vm575_vm4, %v565_v22  ;;  %v505_v30 = vadd.f32 %v950_v38, %v504_v28  ;;  %v552_v31 = vmax.f32 %v430_v25, 0.0 }
  0xf9   : > { %v568_v32 = vmax.f32 %v510_v26, 0.0  ;;  %v551_v33 = vmax.f32 %v425_v29, 0.0  ;;  %v770_v35 = vpop.f32.mrb[10].mxu0 }
  0xfa   : > { %v567_v34 = vmax.f32 %v505_v30, 0.0  ;;  %v794_v36 = vpop.f32.mrb[10].mxu1  ;;  %585 = vst.msk [vmem:[%s959_s4 + $0x48] sm:$0xff] %vm575_vm4, %v552_v31  ;;  %v440_v37 = vadd.f32 %v770_v35, %v950_v38  ;;  %v434_v40 = vpop.f32.mrb[11].mxu0 }
  0xfb   : > { %601 = vst.msk [vmem:[%s959_s4 + $0xc8] sm:$0xff] %vm575_vm4, %v568_v32  ;;  %v520_v39 = vadd.f32 %v794_v36, %v950_v38  ;;  %v514_v41 = vpop.f32.mrb[11].mxu1  ;;  %584 = vst.msk [vmem:[%s959_s4 + $0x40] sm:$0xff] %vm575_vm4, %v551_v33  ;;  %v435_v42 = vadd.f32 %v950_v38, %v434_v40 }
  0xfc   : > { %600 = vst.msk [vmem:[%s959_s4 + $0xc0] sm:$0xff] %vm575_vm4, %v567_v34  ;;  %v515_v43 = vadd.f32 %v950_v38, %v514_v41  ;;  %v554_v44 = vmax.f32 %v440_v37, 0.0 }
  0xfd   : > { %v570_v45 = vmax.f32 %v520_v39, 0.0  ;;  %v553_v46 = vmax.f32 %v435_v42, 0.0  ;;  %v773_v48 = vpop.f32.mrb[12].mxu0 }
  0xfe   : > { %v569_v47 = vmax.f32 %v515_v43, 0.0  ;;  %v797_v49 = vpop.f32.mrb[12].mxu1  ;;  %587 = vst.msk [vmem:[%s959_s4 + $0x58] sm:$0xff] %vm575_vm4, %v554_v44  ;;  %v450_v50 = vadd.f32 %v773_v48, %v950_v38  ;;  %v444_v52 = vpop.f32.mrb[13].mxu0 }
  0xff   : > { %603 = vst.msk [vmem:[%s959_s4 + $0xd8] sm:$0xff] %vm575_vm4, %v570_v45  ;;  %v530_v51 = vadd.f32 %v797_v49, %v950_v38  ;;  %v524_v53 = vpop.f32.mrb[13].mxu1  ;;  %586 = vst.msk [vmem:[%s959_s4 + $0x50] sm:$0xff] %vm575_vm4, %v553_v46  ;;  %v445_v54 = vadd.f32 %v950_v38, %v444_v52 }
 0x100   : > { %602 = vst.msk [vmem:[%s959_s4 + $0xd0] sm:$0xff] %vm575_vm4, %v569_v47  ;;  %v525_v55 = vadd.f32 %v950_v38, %v524_v53  ;;  %v556_v56 = vmax.f32 %v450_v50, 0.0 }
 0x101   : > { %v572_v57 = vmax.f32 %v530_v51, 0.0  ;;  %v555_v58 = vmax.f32 %v445_v54, 0.0  ;;  %v776_v60 = vpop.f32.mrb[14].mxu0 }
 0x102   : > { %v571_v59 = vmax.f32 %v525_v55, 0.0  ;;  %v800_v61 = vpop.f32.mrb[14].mxu1  ;;  %589 = vst.msk [vmem:[%s959_s4 + $0x68] sm:$0xff] %vm575_vm4, %v556_v56  ;;  %v460_v62 = vadd.f32 %v776_v60, %v950_v38  ;;  %v454_v0 = vpop.f32.mrb[15].mxu0 }
 0x103   : > { %605 = vst.msk [vmem:[%s959_s4 + $0xe8] sm:$0xff] %vm575_vm4, %v572_v57  ;;  %v540_v63 = vadd.f32 %v800_v61, %v950_v38  ;;  %v534_v1 = vpop.f32.mrb[15].mxu1  ;;  %588 = vst.msk [vmem:[%s959_s4 + $0x60] sm:$0xff] %vm575_vm4, %v555_v58  ;;  %v455_v2 = vadd.f32 %v950_v38, %v454_v0 }
 0x104   : > { %604 = vst.msk [vmem:[%s959_s4 + $0xe0] sm:$0xff] %vm575_vm4, %v571_v59  ;;  %v535_v3 = vadd.f32 %v950_v38, %v534_v1  ;;  %v558_v4 = vmax.f32 %v460_v62, 0.0 }
 0x105   : > { %v574_v5 = vmax.f32 %v540_v63, 0.0  ;;  %v557_v6 = vmax.f32 %v455_v2, 0.0 }
 0x106   : > { %v573_v7 = vmax.f32 %v535_v3, 0.0  ;;  %591 = vst.msk [vmem:[%s959_s4 + $0x78] sm:$0xff] %vm575_vm4, %v558_v4 }
 0x107   : > { %607 = vst.msk [vmem:[%s959_s4 + $0xf8] sm:$0xff] %vm575_vm4, %v574_v5  ;;  %590 = vst.msk [vmem:[%s959_s4 + $0x70] sm:$0xff] %vm575_vm4, %v557_v6 }
 0x108   : > { %606 = vst.msk [vmem:[%s959_s4 + $0xf0] sm:$0xff] %vm575_vm4, %v573_v7 }
 0x109 PF: > { %s13_s12 = sadd.s32 1, %s830_s12  }
 0x10a   : > { %p10_p4 = scmp.ge.s32.totalorder %s13_s12, 6  }
 0x10c   :  { %12 = sbr.rel (!%p10_p4) target bundleno = 1 (0x1), region = 62 }

// kernel: cifar10trans_forward.5
= control target key start
LH: loop header
LB: loop body
LE: loop exit
PB: predicated region body
PF: predicated region fallthrough
CT: control target
= control target key end

     0   :  { %v982_v0 = vmov 0.0|0.0   ;;  %vm153_vm0 = vcmask 261120   ;;  %s1655_s1 = inlined_call_operand.vmem [shape: f32[288,32], index: 1, kind: input, shape index: {}]   ;;  %s1656_s0 = inlined_call_operand.vmem [shape: f32[256,288], index: 0, kind: input, shape index: {}]   ;;  %s1657_s2 = inlined_call_operand.vmem [shape: f32[1,32], index: 2, kind: input, shape index: {}]   ;;  %s1658_s3 = inlined_call_operand.vmem [shape: f32[256,32], index: 3, kind: output, shape index: {}]  }
   0x1   :  { %893 = vmatprep.subr.bf16.mxu0 %v982_v0  ;;  %949 = vmatprep.subr.bf16.mxu1 %v982_v0  ;;  %v110_v1 = vld [vmem:[%s1655_s1] sm:$0xff]  ;;  %v111_v2 = vld [vmem:[%s1655_s1 + $0x8] sm:$0xff]  ;;  %v112_v3 = vld [vmem:[%s1655_s1 + $0x10] sm:$0xff] }
   0x2   :  { %v894_v4 = vpack.c.bf16 %v111_v2, %v110_v1  ;;  %v113_v5 = vld [vmem:[%s1655_s1 + $0x18] sm:$0xff]  ;;  %v114_v7 = vld [vmem:[%s1655_s1 + $0x20] sm:$0xff]  ;;  %v115_v8 = vld [vmem:[%s1655_s1 + $0x28] sm:$0xff] }
   0x3   :  { %v897_v6 = vpack.c.bf16 %v113_v5, %v112_v3  ;;  %v900_v9 = vpack.c.bf16 %v115_v8, %v114_v7  ;;  %v116_v10 = vld [vmem:[%s1655_s1 + $0x30] sm:$0xff]  ;;  %v117_v11 = vld [vmem:[%s1655_s1 + $0x38] sm:$0xff]  ;;  %v15_v12 = vld [vmem:[%s1656_s0 + $0x8] sm:$0xff] }
   0x4   :  { %895 = vmatpush1.bf16.msra.mxu0 %v894_v4  ;;  %965 = vmatpush1.bf16.msra.mxu1 %v894_v4  ;;  %v903_v13 = vpack.c.bf16 %v117_v11, %v116_v10  ;;  %v87_v14 = vld [vmem:[%s1656_s0 + $0x248] sm:$0xff]  ;;  %v118_v15 = vld [vmem:[%s1655_s1 + $0x40] sm:$0xff]  ;;  %v120_v18 = vld [vmem:[%s1655_s1 + $0x50] sm:$0xff] }
   0x5   :  { %896 = vmatprep.subr.bf16.mxu0 %v982_v0  ;;  %950 = vmatprep.subr.bf16.mxu1 %v982_v0  ;;  %v119_v16 = vld [vmem:[%s1655_s1 + $0x48] sm:$0xff]  ;;  %v121_v19 = vld [vmem:[%s1655_s1 + $0x58] sm:$0xff]  ;;  %v122_v21 = vld [vmem:[%s1655_s1 + $0x60] sm:$0xff] }
   0x6   :  { %314 = vmatprep.mubr.f32.mxu0 %v15_v12  ;;  %434 = vmatprep.mubr.f32.mxu1 %v87_v14  ;;  %v906_v17 = vpack.c.bf16 %v119_v16, %v118_v15  ;;  %v909_v20 = vpack.c.bf16 %v121_v19, %v120_v18  ;;  %v123_v22 = vld [vmem:[%s1655_s1 + $0x68] sm:$0xff]  ;;  %v124_v24 = vld [vmem:[%s1655_s1 + $0x70] sm:$0xff]  ;;  %v125_v25 = vld [vmem:[%s1655_s1 + $0x78] sm:$0xff] }
   0x7   :  { %v912_v23 = vpack.c.bf16 %v123_v22, %v122_v21  ;;  %v915_v26 = vpack.c.bf16 %v125_v25, %v124_v24  ;;  %v126_v27 = vld [vmem:[%s1655_s1 + $0x80] sm:$0xff]  ;;  %v127_v28 = vld [vmem:[%s1655_s1 + $0x88] sm:$0xff]  ;;  %v128_v30 = vld [vmem:[%s1655_s1 + $0x90] sm:$0xff] }
   0x8   :  { %898 = vmatpush1.bf16.msra.mxu0 %v897_v6  ;;  %966 = vmatpush1.bf16.msra.mxu1 %v897_v6  ;;  %v918_v29 = vpack.c.bf16 %v127_v28, %v126_v27  ;;  %v129_v31 = vld [vmem:[%s1655_s1 + $0x98] sm:$0xff]  ;;  %v130_v33 = vld [vmem:[%s1655_s1 + $0xa0] sm:$0xff]  ;;  %v131_v34 = vld [vmem:[%s1655_s1 + $0xa8] sm:$0xff] }
   0x9   :  { %899 = vmatprep.subr.bf16.mxu0 %v982_v0  ;;  %951 = vmatprep.subr.bf16.mxu1 %v982_v0  ;;  %v921_v32 = vpack.c.bf16 %v129_v31, %v128_v30  ;;  %v924_v35 = vpack.c.bf16 %v131_v34, %v130_v33  ;;  %v132_v36 = vld [vmem:[%s1655_s1 + $0xb0] sm:$0xff]  ;;  %v133_v37 = vld [vmem:[%s1655_s1 + $0xb8] sm:$0xff]  ;;  %v134_v39 = vld [vmem:[%s1655_s1 + $0xc0] sm:$0xff] }
   0xa   :  { %v927_v38 = vpack.c.bf16 %v133_v37, %v132_v36  ;;  %v135_v40 = vld [vmem:[%s1655_s1 + $0xc8] sm:$0xff]  ;;  %v136_v42 = vld [vmem:[%s1655_s1 + $0xd0] sm:$0xff]  ;;  %v137_v43 = vld [vmem:[%s1655_s1 + $0xd8] sm:$0xff] }
   0xb   :  { %v930_v41 = vpack.c.bf16 %v135_v40, %v134_v39  ;;  %v933_v44 = vpack.c.bf16 %v137_v43, %v136_v42  ;;  %v138_v45 = vld [vmem:[%s1655_s1 + $0xe0] sm:$0xff]  ;;  %v139_v46 = vld [vmem:[%s1655_s1 + $0xe8] sm:$0xff]  ;;  %v140_v48 = vld [vmem:[%s1655_s1 + $0xf0] sm:$0xff] }
   0xc   :  { %901 = vmatpush1.bf16.msra.mxu0 %v900_v9  ;;  %967 = vmatpush1.bf16.msra.mxu1 %v900_v9  ;;  %v936_v47 = vpack.c.bf16 %v139_v46, %v138_v45  ;;  %v141_v49 = vld [vmem:[%s1655_s1 + $0xf8] sm:$0xff]  ;;  %v142_v50 = vld [vmem:[%s1655_s1 + $0x100] sm:$0xff]  ;;  %v143_v51 = vld [vmem:[%s1655_s1 + $0x108] sm:$0xff] }
   0xd   :  { %902 = vmatprep.subr.bf16.mxu0 %v982_v0  ;;  %952 = vmatprep.subr.bf16.mxu1 %v982_v0  ;;  %v939_v52 = vpack.c.bf16 %v141_v49, %v140_v48  ;;  %v941_v53 = vpack.c.bf16 %v143_v51, %v142_v50  ;;  %v144_v54 = vld [vmem:[%s1655_s1 + $0x110] sm:$0xff]  ;;  %v145_v55 = vld [vmem:[%s1655_s1 + $0x118] sm:$0xff]  ;;  %v14_v56 = vld [vmem:[%s1656_s0] sm:$0xff] }
   0xe   :  { %v86_v57 = vld [vmem:[%s1656_s0 + $0x240] sm:$0xff]  ;;  %v945_v59 = vpack.c.bf16 %v145_v55, %v144_v54  ;;  %v17_v61 = vld [vmem:[%s1656_s0 + $0x18] sm:$0xff]  ;;  %v20_v1 = vld [vmem:[%s1656_s0 + $0x30] sm:$0xff] }
   0xf   :  { %v18_v58 = vld [vmem:[%s1656_s0 + $0x20] sm:$0xff]  ;;  %v89_v62 = vld [vmem:[%s1656_s0 + $0x258] sm:$0xff]  ;;  %v92_v2 = vld [vmem:[%s1656_s0 + $0x270] sm:$0xff] }
  0x10   :  { %904 = vmatpush1.bf16.msra.mxu0 %v903_v13  ;;  %968 = vmatpush1.bf16.msra.mxu1 %v903_v13  ;;  %v90_v60 = vld [vmem:[%s1656_s0 + $0x260] sm:$0xff]  ;;  %v21_v63 = vld [vmem:[%s1656_s0 + $0x38] sm:$0xff]  ;;  %v24_v3 = vld [vmem:[%s1656_s0 + $0x50] sm:$0xff] }
  0x11   :  { %905 = vmatprep.subr.bf16.mxu0 %v982_v0  ;;  %953 = vmatprep.subr.bf16.mxu1 %v982_v0  ;;  %v96_v4 = vld [vmem:[%s1656_s0 + $0x290] sm:$0xff]  ;;  %v23_v5 = vld [vmem:[%s1656_s0 + $0x48] sm:$0xff]  ;;  %v26_v9 = vld [vmem:[%s1656_s0 + $0x60] sm:$0xff] }
  0x12   :  { %v95_v6 = vld [vmem:[%s1656_s0 + $0x288] sm:$0xff]  ;;  %v98_v10 = vld [vmem:[%s1656_s0 + $0x2a0] sm:$0xff]  ;;  %v29_v13 = vld [vmem:[%s1656_s0 + $0x78] sm:$0xff] }
  0x13   :  { %v27_v7 = vld [vmem:[%s1656_s0 + $0x68] sm:$0xff]  ;;  %v30_v11 = vld [vmem:[%s1656_s0 + $0x80] sm:$0xff]  ;;  %v101_v14 = vld [vmem:[%s1656_s0 + $0x2b8] sm:$0xff] }
  0x14   :  { %907 = vmatpush1.bf16.msra.mxu0 %v906_v17  ;;  %969 = vmatpush1.bf16.msra.mxu1 %v906_v17  ;;  %v99_v8 = vld [vmem:[%s1656_s0 + $0x2a8] sm:$0xff]  ;;  %v102_v12 = vld [vmem:[%s1656_s0 + $0x2c0] sm:$0xff]  ;;  %v33_v15 = vld [vmem:[%s1656_s0 + $0x98] sm:$0xff] }
  0x15   :  { %908 = vmatprep.subr.bf16.mxu0 %v982_v0  ;;  %954 = vmatprep.subr.bf16.mxu1 %v982_v0  ;;  %v105_v16 = vld [vmem:[%s1656_s0 + $0x2d8] sm:$0xff]  ;;  %v32_v17 = vld [vmem:[%s1656_s0 + $0x90] sm:$0xff]  ;;  %v35_v21 = vld [vmem:[%s1656_s0 + $0xa8] sm:$0xff] }
  0x16   :  { %v104_v18 = vld [vmem:[%s1656_s0 + $0x2d0] sm:$0xff]  ;;  %v107_v22 = vld [vmem:[%s1656_s0 + $0x2e8] sm:$0xff]  ;;  %v38_v25 = vld [vmem:[%s1656_s0 + $0xc0] sm:$0xff] }
  0x17   :  { %v36_v19 = vld [vmem:[%s1656_s0 + $0xb0] sm:$0xff]  ;;  %v42_v27 = vld [vmem:[%s1656_s0 + $0xe0] sm:$0xff]  ;;  %v25_v30 = vld [vmem:[%s1656_s0 + $0x58] sm:$0xff] }
  0x18   :  { %910 = vmatpush1.bf16.msra.mxu0 %v909_v20  ;;  %970 = vmatpush1.bf16.msra.mxu1 %v909_v20  ;;  %v108_v20 = vld [vmem:[%s1656_s0 + $0x2f0] sm:$0xff]  ;;  %v22_v28 = vld [vmem:[%s1656_s0 + $0x40] sm:$0xff]  ;;  %v45_v31 = vld [vmem:[%s1656_s0 + $0xf8] sm:$0xff] }
  0x19   :  { %911 = vmatprep.subr.bf16.mxu0 %v982_v0  ;;  %955 = vmatprep.subr.bf16.mxu1 %v982_v0  ;;  %v16_v24 = vld [vmem:[%s1656_s0 + $0x10] sm:$0xff]  ;;  %v31_v34 = vld [vmem:[%s1656_s0 + $0x88] sm:$0xff]  ;;  %v34_v36 = vld [vmem:[%s1656_s0 + $0xa0] sm:$0xff] }
  0x1a   :  { %v44_v33 = vld [vmem:[%s1656_s0 + $0xf0] sm:$0xff]  ;;  %v47_v37 = vld [vmem:[%s1656_s0 + $0x108] sm:$0xff]  ;;  %v54_v43 = vld [vmem:[%s1656_s0 + $0x140] sm:$0xff] }
  0x1b   :  { %v51_v39 = vld [vmem:[%s1656_s0 + $0x128] sm:$0xff]  ;;  %v40_v40 = vld [vmem:[%s1656_s0 + $0xd0] sm:$0xff]  ;;  %v53_v45 = vld [vmem:[%s1656_s0 + $0x138] sm:$0xff] }
  0x1c   :  { %913 = vmatpush1.bf16.msra.mxu0 %v912_v23  ;;  %971 = vmatpush1.bf16.msra.mxu1 %v912_v23  ;;  %v39_v23 = vld [vmem:[%s1656_s0 + $0xc8] sm:$0xff]  ;;  %v49_v46 = vld [vmem:[%s1656_s0 + $0x118] sm:$0xff]  ;;  %v52_v48 = vld [vmem:[%s1656_s0 + $0x130] sm:$0xff] }
  0x1d   :  { %914 = vmatprep.subr.bf16.mxu0 %v982_v0  ;;  %956 = vmatprep.subr.bf16.mxu1 %v982_v0  ;;  %v43_v42 = vld [vmem:[%s1656_s0 + $0xe8] sm:$0xff]  ;;  %v56_v49 = vld [vmem:[%s1656_s0 + $0x150] sm:$0xff]  ;;  %v61_v54 = vld [vmem:[%s1656_s0 + $0x178] sm:$0xff] }
  0x1e   :  { %v55_v50 = vld [vmem:[%s1656_s0 + $0x148] sm:$0xff]  ;;  %v60_v51 = vld [vmem:[%s1656_s0 + $0x170] sm:$0xff] }
  0x1f   :  { %v63_v55 = vld [vmem:[%s1656_s0 + $0x188] sm:$0xff] }
  0x20   :  { %916 = vmatpush1.bf16.msra.mxu0 %v915_v26  ;;  %972 = vmatpush1.bf16.msra.mxu1 %v915_v26  ;;  %v19_v26 = vld [vmem:[%s1656_s0 + $0x28] sm:$0xff] }
  0x21   :  { %917 = vmatprep.subr.bf16.mxu0 %v982_v0  ;;  %957 = vmatprep.subr.bf16.mxu1 %v982_v0 }
  0x24   :  { %919 = vmatpush1.bf16.msra.mxu0 %v918_v29  ;;  %973 = vmatpush1.bf16.msra.mxu1 %v918_v29  ;;  %v41_v29 = vld [vmem:[%s1656_s0 + $0xd8] sm:$0xff] }
  0x25   :  { %920 = vmatprep.subr.bf16.mxu0 %v982_v0  ;;  %958 = vmatprep.subr.bf16.mxu1 %v982_v0 }
  0x28   :  { %922 = vmatpush1.bf16.msra.mxu0 %v921_v32  ;;  %974 = vmatpush1.bf16.msra.mxu1 %v921_v32  ;;  %v28_v32 = vld [vmem:[%s1656_s0 + $0x70] sm:$0xff] }
  0x29   :  { %923 = vmatprep.subr.bf16.mxu0 %v982_v0  ;;  %959 = vmatprep.subr.bf16.mxu1 %v982_v0 }
  0x2c   :  { %925 = vmatpush1.bf16.msra.mxu0 %v924_v35  ;;  %975 = vmatpush1.bf16.msra.mxu1 %v924_v35  ;;  %v48_v35 = vld [vmem:[%s1656_s0 + $0x110] sm:$0xff] }
  0x2d   :  { %926 = vmatprep.subr.bf16.mxu0 %v982_v0  ;;  %960 = vmatprep.subr.bf16.mxu1 %v982_v0 }
  0x30   :  { %928 = vmatpush1.bf16.msra.mxu0 %v927_v38  ;;  %976 = vmatpush1.bf16.msra.mxu1 %v927_v38  ;;  %v37_v38 = vld [vmem:[%s1656_s0 + $0xb8] sm:$0xff] }
  0x31   :  { %929 = vmatprep.subr.bf16.mxu0 %v982_v0  ;;  %961 = vmatprep.subr.bf16.mxu1 %v982_v0 }
  0x34   :  { %931 = vmatpush1.bf16.msra.mxu0 %v930_v41  ;;  %977 = vmatpush1.bf16.msra.mxu1 %v930_v41  ;;  %v50_v41 = vld [vmem:[%s1656_s0 + $0x120] sm:$0xff] }
  0x35   :  { %932 = vmatprep.subr.bf16.mxu0 %v982_v0  ;;  %962 = vmatprep.subr.bf16.mxu1 %v982_v0 }
  0x38   :  { %934 = vmatpush1.bf16.msra.mxu0 %v933_v44  ;;  %978 = vmatpush1.bf16.msra.mxu1 %v933_v44  ;;  %v46_v44 = vld [vmem:[%s1656_s0 + $0x100] sm:$0xff] }
  0x39   :  { %935 = vmatprep.subr.bf16.mxu0 %v982_v0  ;;  %963 = vmatprep.subr.bf16.mxu1 %v982_v0 }
  0x3c   :  { %937 = vmatpush1.bf16.msra.mxu0 %v936_v47  ;;  %979 = vmatpush1.bf16.msra.mxu1 %v936_v47  ;;  %v57_v47 = vld [vmem:[%s1656_s0 + $0x158] sm:$0xff] }
  0x3d   :  { %938 = vmatprep.subr.bf16.mxu0 %v982_v0  ;;  %964 = vmatprep.subr.bf16.mxu1 %v982_v0  ;;  %v93_v0 = vld [vmem:[%s1656_s0 + $0x278] sm:$0xff] }
  0x40   :  { %940 = vmatpush1.bf16.msra.mxu0 %v939_v52  ;;  %980 = vmatpush1.bf16.msra.mxu1 %v939_v52  ;;  %v58_v52 = vld [vmem:[%s1656_s0 + $0x160] sm:$0xff] }
  0x41   :  { %942 = vmatprep.subr.bf16.mxu1 %v941_v53 }
  0x43   :  { %315 = vmatmul.mubr.f32.vlgmr.msra.gmra.mrb[0].mxu0 %v14_v56  ;;  %435 = vmatmul.mubr.f32.vlgmr.msra.gmra.mrb[0].mxu1 %v86_v57  ;;  %v64_v56 = vld [vmem:[%s1656_s0 + $0x190] sm:$0xff]  ;;  %v62_v57 = vld [vmem:[%s1656_s0 + $0x180] sm:$0xff] }
  0x44   :  { %944 = vmatpush3.bf16.msra.mxu1 %v941_v53  ;;  %319 = vmatprep.mubr.f32.mxu0 %v18_v58  ;;  %v59_v53 = vld [vmem:[%s1656_s0 + $0x168] sm:$0xff] }
  0x45   :  { %439 = vmatprep.mubr.f32.mxu1 %v90_v60  ;;  %946 = vmatprep.subr.bf16.mxu1 %v945_v59  ;;  %v67_v58 = vld [vmem:[%s1656_s0 + $0x1a8] sm:$0xff]  ;;  %v70_v60 = vld [vmem:[%s1656_s0 + $0x1c0] sm:$0xff] }
  0x47   :  { %320 = vmatmul.mubr.f32.gmra.mrb[2].mxu0 %v17_v61  ;;  %440 = vmatmul.mubr.f32.gmra.mrb[2].mxu1 %v89_v62  ;;  %v65_v61 = vld [vmem:[%s1656_s0 + $0x198] sm:$0xff] }
  0x48   :  { %324 = vmatprep.mubr.f32.mxu0 %v21_v63  ;;  %444 = vmatprep.mubr.f32.mxu1 %v93_v0  ;;  %v73_v62 = vld [vmem:[%s1656_s0 + $0x1d8] sm:$0xff]  ;;  %v76_v0 = vld [vmem:[%s1656_s0 + $0x1f0] sm:$0xff] }
  0x49   :  { %948 = vmatpush3.bf16.msra.mxu1 %v945_v59  ;;  %v66_v59 = vld [vmem:[%s1656_s0 + $0x1a0] sm:$0xff]  ;;  %v69_v63 = vld [vmem:[%s1656_s0 + $0x1b8] sm:$0xff] }
  0x4b   :  { %325 = vmatmul.mubr.f32.gmra.mrb[4].mxu0 %v20_v1  ;;  %445 = vmatmul.mubr.f32.gmra.mrb[4].mxu1 %v92_v2  ;;  %v68_v1 = vld [vmem:[%s1656_s0 + $0x1b0] sm:$0xff]  ;;  %v79_v2 = vld [vmem:[%s1656_s0 + $0x208] sm:$0xff] }
  0x4c   :  { %329 = vmatprep.mubr.f32.mxu0 %v24_v3  ;;  %449 = vmatprep.mubr.f32.mxu1 %v96_v4  ;;  %v72_v3 = vld [vmem:[%s1656_s0 + $0x1d0] sm:$0xff]  ;;  %v82_v4 = vld [vmem:[%s1656_s0 + $0x220] sm:$0xff] }
  0x4f   :  { %330 = vmatmul.mubr.f32.gmra.mrb[6].mxu0 %v23_v5  ;;  %450 = vmatmul.mubr.f32.gmra.mrb[6].mxu1 %v95_v6  ;;  %v71_v5 = vld [vmem:[%s1656_s0 + $0x1c8] sm:$0xff]  ;;  %v85_v6 = vld [vmem:[%s1656_s0 + $0x238] sm:$0xff] }
  0x50   :  { %334 = vmatprep.mubr.f32.mxu0 %v27_v7  ;;  %454 = vmatprep.mubr.f32.mxu1 %v99_v8  ;;  %v75_v7 = vld [vmem:[%s1656_s0 + $0x1e8] sm:$0xff]  ;;  %v88_v8 = vld [vmem:[%s1656_s0 + $0x250] sm:$0xff] }
  0x53   :  { %335 = vmatmul.mubr.f32.gmra.mrb[8].mxu0 %v26_v9  ;;  %455 = vmatmul.mubr.f32.gmra.mrb[8].mxu1 %v98_v10  ;;  %v74_v9 = vld [vmem:[%s1656_s0 + $0x1e0] sm:$0xff]  ;;  %v91_v10 = vld [vmem:[%s1656_s0 + $0x268] sm:$0xff] }
  0x54   :  { %339 = vmatprep.mubr.f32.mxu0 %v30_v11  ;;  %459 = vmatprep.mubr.f32.mxu1 %v102_v12  ;;  %v78_v11 = vld [vmem:[%s1656_s0 + $0x200] sm:$0xff] }
  0x55   :  { %v94_v12 = vld [vmem:[%s1656_s0 + $0x280] sm:$0xff] }
  0x57   :  { %340 = vmatmul.mubr.f32.gmra.mrb[10].mxu0 %v29_v13  ;;  %460 = vmatmul.mubr.f32.gmra.mrb[10].mxu1 %v101_v14  ;;  %v77_v13 = vld [vmem:[%s1656_s0 + $0x1f8] sm:$0xff] }
  0x58   :  { %344 = vmatprep.mubr.f32.mxu0 %v33_v15  ;;  %464 = vmatprep.mubr.f32.mxu1 %v105_v16  ;;  %v97_v14 = vld [vmem:[%s1656_s0 + $0x298] sm:$0xff]  ;;  %v100_v16 = vld [vmem:[%s1656_s0 + $0x2b0] sm:$0xff] }
  0x59   :  { %v81_v15 = vld [vmem:[%s1656_s0 + $0x218] sm:$0xff] }
  0x5b   :  { %345 = vmatmul.mubr.f32.gmra.mrb[12].mxu0 %v32_v17  ;;  %465 = vmatmul.mubr.f32.gmra.mrb[12].mxu1 %v104_v18  ;;  %v80_v17 = vld [vmem:[%s1656_s0 + $0x210] sm:$0xff]  ;;  %v103_v18 = vld [vmem:[%s1656_s0 + $0x2c8] sm:$0xff] }
  0x5c   :  { %349 = vmatprep.mubr.f32.mxu0 %v36_v19  ;;  %469 = vmatprep.mubr.f32.mxu1 %v108_v20  ;;  %v84_v19 = vld [vmem:[%s1656_s0 + $0x230] sm:$0xff]  ;;  %v106_v20 = vld [vmem:[%s1656_s0 + $0x2e0] sm:$0xff] }
  0x5f   :  { %350 = vmatmul.mubr.f32.gmra.mrb[14].mxu0 %v35_v21  ;;  %470 = vmatmul.mubr.f32.gmra.mrb[14].mxu1 %v107_v22  ;;  %v83_v21 = vld [vmem:[%s1656_s0 + $0x228] sm:$0xff]  ;;  %v109_v22 = vld [vmem:[%s1656_s0 + $0x2f8] sm:$0xff] }
  0x60   :  { %354 = vmatprep.mubr.f32.mxu0 %v39_v23  ;;  %845 = vmatprep.mubr.msk.f32.mxu1 %vm153_vm0, %v16_v24 }
  0x63   :  { %355 = vmatmul.mubr.f32.gmra.mrb[16].mxu0 %v38_v25  ;;  %846 = vmatmul.mubr.msk.f32.vlgmr.msra.gmra.mrb[16].mxu1 %vm153_vm0, %v19_v26 }
  0x64   :  { %359 = vmatprep.mubr.f32.mxu0 %v42_v27  ;;  %848 = vmatprep.mubr.msk.f32.mxu1 %vm153_vm0, %v22_v28 }
  0x67   :  { %360 = vmatmul.mubr.f32.gmra.mrb[18].mxu0 %v41_v29  ;;  %849 = vmatmul.mubr.msk.f32.gmra.mrb[18].mxu1 %vm153_vm0, %v25_v30 }
  0x68   :  { %364 = vmatprep.mubr.f32.mxu0 %v45_v31  ;;  %851 = vmatprep.mubr.msk.f32.mxu1 %vm153_vm0, %v28_v32 }
  0x6b   :  { %365 = vmatmul.mubr.f32.gmra.mrb[20].mxu0 %v44_v33  ;;  %852 = vmatmul.mubr.msk.f32.gmra.mrb[20].mxu1 %vm153_vm0, %v31_v34 }
  0x6c   :  { %369 = vmatprep.mubr.f32.mxu0 %v48_v35  ;;  %854 = vmatprep.mubr.msk.f32.mxu1 %vm153_vm0, %v34_v36 }
  0x6f   :  { %370 = vmatmul.mubr.f32.gmra.mrb[22].mxu0 %v47_v37  ;;  %855 = vmatmul.mubr.msk.f32.gmra.mrb[22].mxu1 %vm153_vm0, %v37_v38 }
  0x70   :  { %374 = vmatprep.mubr.f32.mxu0 %v51_v39  ;;  %857 = vmatprep.mubr.msk.f32.mxu1 %vm153_vm0, %v40_v40 }
  0x73   :  { %375 = vmatmul.mubr.f32.gmra.mrb[24].mxu0 %v50_v41  ;;  %858 = vmatmul.mubr.msk.f32.gmra.mrb[24].mxu1 %vm153_vm0, %v43_v42 }
  0x74   :  { %379 = vmatprep.mubr.f32.mxu0 %v54_v43  ;;  %860 = vmatprep.mubr.msk.f32.mxu1 %vm153_vm0, %v46_v44 }
  0x77   :  { %380 = vmatmul.mubr.f32.gmra.mrb[26].mxu0 %v53_v45  ;;  %861 = vmatmul.mubr.msk.f32.gmra.mrb[26].mxu1 %vm153_vm0, %v49_v46 }
  0x78   :  { %384 = vmatprep.mubr.f32.mxu0 %v57_v47  ;;  %863 = vmatprep.mubr.msk.f32.mxu1 %vm153_vm0, %v52_v48 }
  0x7b   :  { %385 = vmatmul.mubr.f32.gmra.mrb[28].mxu0 %v56_v49  ;;  %864 = vmatmul.mubr.msk.f32.gmra.mrb[28].mxu1 %vm153_vm0, %v55_v50 }
  0x7c   :  { %389 = vmatprep.mubr.f32.mxu0 %v60_v51  ;;  %866 = vmatprep.mubr.msk.f32.mxu1 %vm153_vm0, %v58_v52 }
  0x7f   :  { %390 = vmatmul.mubr.f32.gmra.mrb[30].mxu0 %v59_v53  ;;  %867 = vmatmul.mubr.msk.f32.gmra.mrb[30].mxu1 %vm153_vm0, %v61_v54  ;;  %v1482_v53 = vld [vmem:[%s1657_s2] ss:$0 sm:$0xff] }
  0x80   :  { %394 = vmatprep.mubr.f32.mxu0 %v63_v55  ;;  %869 = vmatprep.mubr.msk.f32.mxu1 %vm153_vm0, %v64_v56 }
  0x83   :  { %395 = vmatmul.mubr.f32.gmra.mrb[32].mxu0 %v62_v57  ;;  %870 = vmatmul.mubr.msk.f32.gmra.mrb[32].mxu1 %vm153_vm0, %v67_v58 }
  0x84   :  { %399 = vmatprep.mubr.f32.mxu0 %v66_v59  ;;  %872 = vmatprep.mubr.msk.f32.mxu1 %vm153_vm0, %v70_v60 }
  0x87   :  { %400 = vmatmul.mubr.f32.gmra.mrb[34].mxu0 %v65_v61  ;;  %873 = vmatmul.mubr.msk.f32.gmra.mrb[34].mxu1 %vm153_vm0, %v73_v62 }
  0x88   :  { %404 = vmatprep.mubr.f32.mxu0 %v69_v63  ;;  %875 = vmatprep.mubr.msk.f32.mxu1 %vm153_vm0, %v76_v0 }
  0x8b   :  { %405 = vmatmul.mubr.f32.gmra.mrb[36].mxu0 %v68_v1  ;;  %876 = vmatmul.mubr.msk.f32.gmra.mrb[36].mxu1 %vm153_vm0, %v79_v2 }
  0x8c   :  { %409 = vmatprep.mubr.f32.mxu0 %v72_v3  ;;  %878 = vmatprep.mubr.msk.f32.mxu1 %vm153_vm0, %v82_v4 }
  0x8f   :  { %410 = vmatmul.mubr.f32.gmra.mrb[38].mxu0 %v71_v5  ;;  %879 = vmatmul.mubr.msk.f32.gmra.mrb[38].mxu1 %vm153_vm0, %v85_v6 }
  0x90   :  { %414 = vmatprep.mubr.f32.mxu0 %v75_v7  ;;  %881 = vmatprep.mubr.msk.f32.mxu1 %vm153_vm0, %v88_v8 }
  0x93   :  { %415 = vmatmul.mubr.f32.gmra.mrb[40].mxu0 %v74_v9  ;;  %882 = vmatmul.mubr.msk.f32.gmra.mrb[40].mxu1 %vm153_vm0, %v91_v10 }
  0x94   :  { %419 = vmatprep.mubr.f32.mxu0 %v78_v11  ;;  %884 = vmatprep.mubr.msk.f32.mxu1 %vm153_vm0, %v94_v12 }
  0x97   :  { %420 = vmatmul.mubr.f32.gmra.mrb[42].mxu0 %v77_v13  ;;  %885 = vmatmul.mubr.msk.f32.gmra.mrb[42].mxu1 %vm153_vm0, %v97_v14 }
  0x98   :  { %424 = vmatprep.mubr.f32.mxu0 %v81_v15  ;;  %887 = vmatprep.mubr.msk.f32.mxu1 %vm153_vm0, %v100_v16 }
  0x9b   :  { %425 = vmatmul.mubr.f32.gmra.mrb[44].mxu0 %v80_v17  ;;  %888 = vmatmul.mubr.msk.f32.gmra.mrb[44].mxu1 %vm153_vm0, %v103_v18 }
  0x9c   :  { %429 = vmatprep.mubr.f32.mxu0 %v84_v19  ;;  %890 = vmatprep.mubr.msk.f32.mxu1 %vm153_vm0, %v106_v20 }
  0x9f   :  { %430 = vmatmul.mubr.f32.gmra.mrb[46].mxu0 %v83_v21  ;;  %891 = vmatmul.mubr.msk.f32.gmra.mrb[46].mxu1 %vm153_vm0, %v109_v22 }
 0x116   :  { %v316_v23 = vpop.f32.mrb[0].mxu0  ;;  %v1463_v24 = vpop.f32.mrb[0].mxu1 }
 0x117   :  { %v318_v25 = vpop.f32.mrb[1].mxu0  ;;  %v438_v26 = vpop.f32.mrb[1].mxu1  ;;  %v317_v57 = vadd.f32 %v1482_v53, %v316_v23 }
 0x11a   :  { %v321_v27 = vpop.f32.mrb[2].mxu0  ;;  %v1465_v28 = vpop.f32.mrb[2].mxu1 }
 0x11b   :  { %v323_v29 = vpop.f32.mrb[3].mxu0  ;;  %v443_v30 = vpop.f32.mrb[3].mxu1  ;;  %v322_v56 = vadd.f32 %v1482_v53, %v321_v27 }
 0x11e   :  { %v326_v31 = vpop.f32.mrb[4].mxu0  ;;  %v1467_v32 = vpop.f32.mrb[4].mxu1 }
 0x11f   :  { %v328_v33 = vpop.f32.mrb[5].mxu0  ;;  %v448_v34 = vpop.f32.mrb[5].mxu1  ;;  %v327_v2 = vadd.f32 %v1482_v53, %v326_v31 }
 0x122   :  { %v331_v35 = vpop.f32.mrb[6].mxu0  ;;  %v1469_v36 = vpop.f32.mrb[6].mxu1 }
 0x123   :  { %v333_v37 = vpop.f32.mrb[7].mxu0  ;;  %v453_v38 = vpop.f32.mrb[7].mxu1  ;;  %v332_v0 = vadd.f32 %v1482_v53, %v331_v35 }
 0x126   :  { %v336_v39 = vpop.f32.mrb[8].mxu0  ;;  %v1471_v40 = vpop.f32.mrb[8].mxu1 }
 0x127   :  { %v338_v41 = vpop.f32.mrb[9].mxu0  ;;  %v458_v42 = vpop.f32.mrb[9].mxu1  ;;  %v337_v12 = vadd.f32 %v1482_v53, %v336_v39 }
 0x12a   :  { %v341_v43 = vpop.f32.mrb[10].mxu0  ;;  %v1473_v44 = vpop.f32.mrb[10].mxu1 }
 0x12b   :  { %v343_v45 = vpop.f32.mrb[11].mxu0  ;;  %v463_v46 = vpop.f32.mrb[11].mxu1  ;;  %v342_v10 = vadd.f32 %v1482_v53, %v341_v43 }
 0x12e   :  { %v346_v47 = vpop.f32.mrb[12].mxu0  ;;  %v1475_v48 = vpop.f32.mrb[12].mxu1 }
 0x12f   :  { %v348_v49 = vpop.f32.mrb[13].mxu0  ;;  %v468_v50 = vpop.f32.mrb[13].mxu1  ;;  %v347_v22 = vadd.f32 %v1482_v53, %v346_v47 }
 0x132   :  { %v351_v51 = vpop.f32.mrb[14].mxu0  ;;  %v1477_v52 = vpop.f32.mrb[14].mxu1 }
 0x133   :  { %v353_v54 = vpop.f32.mrb[15].mxu0  ;;  %v473_v55 = vpop.f32.mrb[15].mxu1  ;;  %v352_v20 = vadd.f32 %v1482_v53, %v351_v51 }
 0x136   :  { %v356_v58 = vpop.f32.mrb[16].mxu0  ;;  %v847_v59 = vpop.f32.mrb[16].mxu1 }
 0x137   :  { %v547_v60 = vadd.f32 %v847_v59, %v322_v56  ;;  %v358_v61 = vpop.f32.mrb[17].mxu0  ;;  %v541_v62 = vpop.f32.mrb[17].mxu1  ;;  %v357_v35 = vadd.f32 %v1482_v53, %v356_v58 }
 0x138   :  { %v542_v63 = vadd.f32 %v541_v62, %v317_v57 }
 0x139   :  { %v701_v1 = vmax.f32 %v547_v60, 0.0 }
 0x13a   :  { %v700_v3 = vmax.f32 %v542_v63, 0.0  ;;  %v361_v4 = vpop.f32.mrb[18].mxu0  ;;  %v850_v5 = vpop.f32.mrb[18].mxu1 }
 0x13b   :  { %733 = vst.msk [vmem:[%s1658_s3 + $0x8] sm:$0xff] %vm153_vm0, %v701_v1  ;;  %v557_v6 = vadd.f32 %v850_v5, %v332_v0  ;;  %v363_v7 = vpop.f32.mrb[19].mxu0  ;;  %v551_v8 = vpop.f32.mrb[19].mxu1  ;;  %v362_v33 = vadd.f32 %v1482_v53, %v361_v4 }
 0x13c   :  { %732 = vst.msk [vmem:[%s1658_s3] sm:$0xff] %vm153_vm0, %v700_v3  ;;  %v552_v9 = vadd.f32 %v551_v8, %v327_v2 }
 0x13d   :  { %v703_v11 = vmax.f32 %v557_v6, 0.0 }
 0x13e   :  { %v702_v13 = vmax.f32 %v552_v9, 0.0  ;;  %v366_v14 = vpop.f32.mrb[20].mxu0  ;;  %v853_v15 = vpop.f32.mrb[20].mxu1 }
 0x13f   :  { %735 = vst.msk [vmem:[%s1658_s3 + $0x18] sm:$0xff] %vm153_vm0, %v703_v11  ;;  %v567_v16 = vadd.f32 %v853_v15, %v342_v10  ;;  %v368_v17 = vpop.f32.mrb[21].mxu0  ;;  %v561_v18 = vpop.f32.mrb[21].mxu1  ;;  %v367_v49 = vadd.f32 %v1482_v53, %v366_v14 }
 0x140   :  { %734 = vst.msk [vmem:[%s1658_s3 + $0x10] sm:$0xff] %vm153_vm0, %v702_v13  ;;  %v562_v19 = vadd.f32 %v561_v18, %v337_v12 }
 0x141   :  { %v705_v21 = vmax.f32 %v567_v16, 0.0 }
 0x142   :  { %v704_v23 = vmax.f32 %v562_v19, 0.0  ;;  %v371_v25 = vpop.f32.mrb[22].mxu0  ;;  %v856_v26 = vpop.f32.mrb[22].mxu1 }
 0x143   :  { %737 = vst.msk [vmem:[%s1658_s3 + $0x28] sm:$0xff] %vm153_vm0, %v705_v21  ;;  %v577_v27 = vadd.f32 %v856_v26, %v352_v20  ;;  %v373_v29 = vpop.f32.mrb[23].mxu0  ;;  %v571_v30 = vpop.f32.mrb[23].mxu1  ;;  %v372_v46 = vadd.f32 %v1482_v53, %v371_v25 }
 0x144   :  { %736 = vst.msk [vmem:[%s1658_s3 + $0x20] sm:$0xff] %vm153_vm0, %v704_v23  ;;  %v572_v31 = vadd.f32 %v571_v30, %v347_v22 }
 0x145   :  { %v707_v34 = vmax.f32 %v577_v27, 0.0 }
 0x146   :  { %v706_v37 = vmax.f32 %v572_v31, 0.0  ;;  %v376_v38 = vpop.f32.mrb[24].mxu0  ;;  %v859_v39 = vpop.f32.mrb[24].mxu1 }
 0x147   :  { %739 = vst.msk [vmem:[%s1658_s3 + $0x38] sm:$0xff] %vm153_vm0, %v707_v34  ;;  %v587_v41 = vadd.f32 %v859_v39, %v362_v33  ;;  %v378_v42 = vpop.f32.mrb[25].mxu0  ;;  %v581_v43 = vpop.f32.mrb[25].mxu1  ;;  %v377_v61 = vadd.f32 %v1482_v53, %v376_v38 }
 0x148   :  { %738 = vst.msk [vmem:[%s1658_s3 + $0x30] sm:$0xff] %vm153_vm0, %v706_v37  ;;  %v582_v45 = vadd.f32 %v581_v43, %v357_v35 }
 0x149   :  { %v709_v47 = vmax.f32 %v587_v41, 0.0 }
 0x14a   :  { %v708_v50 = vmax.f32 %v582_v45, 0.0  ;;  %v381_v51 = vpop.f32.mrb[26].mxu0  ;;  %v862_v54 = vpop.f32.mrb[26].mxu1 }
 0x14b   :  { %741 = vst.msk [vmem:[%s1658_s3 + $0x48] sm:$0xff] %vm153_vm0, %v709_v47  ;;  %v597_v55 = vadd.f32 %v862_v54, %v372_v46  ;;  %v383_v56 = vpop.f32.mrb[27].mxu0  ;;  %v591_v57 = vpop.f32.mrb[27].mxu1  ;;  %v382_v59 = vadd.f32 %v1482_v53, %v381_v51  ;;  %v437_v54 = vadd.f32 %v1482_v53, %v1463_v24  ;;  %v447_v24 = vadd.f32 %v1482_v53, %v1467_v32 }
 0x14c   :  { %740 = vst.msk [vmem:[%s1658_s3 + $0x40] sm:$0xff] %vm153_vm0, %v708_v50  ;;  %v592_v58 = vadd.f32 %v591_v57, %v367_v49  ;;  %v442_v50 = vadd.f32 %v1482_v53, %v1465_v28  ;;  %v452_v28 = vadd.f32 %v1482_v53, %v1469_v36 }
 0x14d   :  { %v711_v60 = vmax.f32 %v597_v55, 0.0 }
 0x14e   :  { %v710_v62 = vmax.f32 %v592_v58, 0.0  ;;  %v386_v63 = vpop.f32.mrb[28].mxu0  ;;  %v865_v0 = vpop.f32.mrb[28].mxu1 }
 0x14f   :  { %743 = vst.msk [vmem:[%s1658_s3 + $0x58] sm:$0xff] %vm153_vm0, %v711_v60  ;;  %v607_v1 = vadd.f32 %v865_v0, %v382_v59  ;;  %v388_v2 = vpop.f32.mrb[29].mxu0  ;;  %v601_v3 = vpop.f32.mrb[29].mxu1  ;;  %v387_v6 = vadd.f32 %v1482_v53, %v386_v63 }
 0x150   :  { %742 = vst.msk [vmem:[%s1658_s3 + $0x50] sm:$0xff] %vm153_vm0, %v710_v62  ;;  %v602_v4 = vadd.f32 %v601_v3, %v377_v61 }
 0x151   :  { %v713_v5 = vmax.f32 %v607_v1, 0.0 }
 0x152   :  { %v712_v7 = vmax.f32 %v602_v4, 0.0  ;;  %v391_v8 = vpop.f32.mrb[30].mxu0  ;;  %v868_v9 = vpop.f32.mrb[30].mxu1 }
 0x153   :  { %745 = vst.msk [vmem:[%s1658_s3 + $0x68] sm:$0xff] %vm153_vm0, %v713_v5  ;;  %v392_v10 = vadd.f32 %v1482_v53, %v391_v8  ;;  %v393_v11 = vpop.f32.mrb[31].mxu0  ;;  %v611_v12 = vpop.f32.mrb[31].mxu1  ;;  %v462_v8 = vadd.f32 %v1482_v53, %v1473_v44 }
 0x154   :  { %744 = vst.msk [vmem:[%s1658_s3 + $0x60] sm:$0xff] %vm153_vm0, %v712_v7  ;;  %v612_v13 = vadd.f32 %v611_v12, %v387_v6  ;;  %v457_v11 = vadd.f32 %v1482_v53, %v1471_v40 }
 0x155   :  { %v617_v14 = vadd.f32 %v868_v9, %v392_v10 }
 0x156   :  { %v714_v15 = vmax.f32 %v612_v13, 0.0  ;;  %v396_v16 = vpop.f32.mrb[32].mxu0  ;;  %v871_v17 = vpop.f32.mrb[32].mxu1 }
 0x157   :  { %v715_v18 = vmax.f32 %v617_v14, 0.0  ;;  %v397_v19 = vadd.f32 %v1482_v53, %v396_v16  ;;  %v398_v20 = vpop.f32.mrb[33].mxu0  ;;  %v621_v21 = vpop.f32.mrb[33].mxu1 }
 0x158   :  { %746 = vst.msk [vmem:[%s1658_s3 + $0x70] sm:$0xff] %vm153_vm0, %v714_v15 }
 0x159   :  { %747 = vst.msk [vmem:[%s1658_s3 + $0x78] sm:$0xff] %vm153_vm0, %v715_v18  ;;  %v622_v22 = vadd.f32 %v621_v21, %v397_v19  ;;  %v472_v19 = vadd.f32 %v1482_v53, %v1477_v52 }
 0x15a   :  { %v401_v23 = vpop.f32.mrb[34].mxu0  ;;  %v874_v25 = vpop.f32.mrb[34].mxu1 }
 0x15b   :  { %v716_v26 = vmax.f32 %v622_v22, 0.0  ;;  %v402_v27 = vadd.f32 %v1482_v53, %v401_v23  ;;  %v403_v29 = vpop.f32.mrb[35].mxu0  ;;  %v631_v30 = vpop.f32.mrb[35].mxu1  ;;  %v467_v22 = vadd.f32 %v1482_v53, %v1475_v48 }
 0x15d   :  { %748 = vst.msk [vmem:[%s1658_s3 + $0x80] sm:$0xff] %vm153_vm0, %v716_v26  ;;  %v627_v31 = vadd.f32 %v871_v17, %v402_v27 }
 0x15e   :  { %v406_v33 = vpop.f32.mrb[36].mxu0  ;;  %v877_v34 = vpop.f32.mrb[36].mxu1 }
 0x15f   :  { %v717_v35 = vmax.f32 %v627_v31, 0.0  ;;  %v407_v37 = vadd.f32 %v1482_v53, %v406_v33  ;;  %v408_v38 = vpop.f32.mrb[37].mxu0  ;;  %v641_v39 = vpop.f32.mrb[37].mxu1 }
 0x161   :  { %749 = vst.msk [vmem:[%s1658_s3 + $0x88] sm:$0xff] %vm153_vm0, %v717_v35  ;;  %v632_v41 = vadd.f32 %v631_v30, %v407_v37 }
 0x162   :  { %v411_v42 = vpop.f32.mrb[38].mxu0  ;;  %v1575_v43 = vpop.f32.mrb[38].mxu1 }
 0x163   :  { %v718_v45 = vmax.f32 %v632_v41, 0.0  ;;  %v412_v46 = vadd.f32 %v1482_v53, %v411_v42  ;;  %v413_v47 = vpop.f32.mrb[39].mxu0  ;;  %v651_v49 = vpop.f32.mrb[39].mxu1 }
 0x165   :  { %750 = vst.msk [vmem:[%s1658_s3 + $0x90] sm:$0xff] %vm153_vm0, %v718_v45  ;;  %v637_v51 = vadd.f32 %v874_v25, %v412_v46 }
 0x166   :  { %v416_v55 = vpop.f32.mrb[40].mxu0  ;;  %v883_v56 = vpop.f32.mrb[40].mxu1 }
 0x167   :  { %v719_v57 = vmax.f32 %v637_v51, 0.0  ;;  %v417_v58 = vadd.f32 %v1482_v53, %v416_v55  ;;  %v667_v59 = vadd.f32 %v883_v56, %v442_v50  ;;  %v418_v60 = vpop.f32.mrb[41].mxu0  ;;  %v661_v61 = vpop.f32.mrb[41].mxu1 }
 0x168   :  { %v662_v62 = vadd.f32 %v661_v61, %v437_v54 }
 0x169   :  { %751 = vst.msk [vmem:[%s1658_s3 + $0x98] sm:$0xff] %vm153_vm0, %v719_v57  ;;  %v642_v63 = vadd.f32 %v641_v39, %v417_v58  ;;  %v725_v0 = vmax.f32 %v667_v59, 0.0 }
 0x16a   :  { %v724_v1 = vmax.f32 %v662_v62, 0.0  ;;  %v421_v2 = vpop.f32.mrb[42].mxu0  ;;  %v886_v3 = vpop.f32.mrb[42].mxu1 }
 0x16b   :  { %v720_v4 = vmax.f32 %v642_v63, 0.0  ;;  %757 = vst.msk [vmem:[%s1658_s3 + $0xc8] sm:$0xff] %vm153_vm0, %v725_v0  ;;  %v422_v36 = vadd.f32 %v1482_v53, %v421_v2  ;;  %v677_v5 = vadd.f32 %v886_v3, %v452_v28  ;;  %v423_v6 = vpop.f32.mrb[43].mxu0  ;;  %v671_v7 = vpop.f32.mrb[43].mxu1 }
 0x16c   :  { %756 = vst.msk [vmem:[%s1658_s3 + $0xc0] sm:$0xff] %vm153_vm0, %v724_v1  ;;  %v672_v32 = vadd.f32 %v671_v7, %v447_v24 }
 0x16d   :  { %752 = vst.msk [vmem:[%s1658_s3 + $0xa0] sm:$0xff] %vm153_vm0, %v720_v4  ;;  %v647_v9 = vadd.f32 %v877_v34, %v422_v36  ;;  %v727_v10 = vmax.f32 %v677_v5, 0.0 }
 0x16e   :  { %v726_v12 = vmax.f32 %v672_v32, 0.0  ;;  %v426_v13 = vpop.f32.mrb[44].mxu0  ;;  %v889_v14 = vpop.f32.mrb[44].mxu1 }
 0x16f   :  { %v721_v15 = vmax.f32 %v647_v9, 0.0  ;;  %759 = vst.msk [vmem:[%s1658_s3 + $0xd8] sm:$0xff] %vm153_vm0, %v727_v10  ;;  %v427_v44 = vadd.f32 %v1482_v53, %v426_v13  ;;  %v687_v16 = vadd.f32 %v889_v14, %v462_v8  ;;  %v428_v17 = vpop.f32.mrb[45].mxu0  ;;  %v681_v18 = vpop.f32.mrb[45].mxu1 }
 0x170   :  { %758 = vst.msk [vmem:[%s1658_s3 + $0xd0] sm:$0xff] %vm153_vm0, %v726_v12  ;;  %v682_v40 = vadd.f32 %v681_v18, %v457_v11 }
 0x171   :  { %753 = vst.msk [vmem:[%s1658_s3 + $0xa8] sm:$0xff] %vm153_vm0, %v721_v15  ;;  %v652_v20 = vadd.f32 %v651_v49, %v427_v44  ;;  %v729_v21 = vmax.f32 %v687_v16, 0.0 }
 0x172   :  { %v728_v23 = vmax.f32 %v682_v40, 0.0  ;;  %v431_v25 = vpop.f32.mrb[46].mxu0  ;;  %v892_v26 = vpop.f32.mrb[46].mxu1 }
 0x173   :  { %v722_v27 = vmax.f32 %v652_v20, 0.0  ;;  %761 = vst.msk [vmem:[%s1658_s3 + $0xe8] sm:$0xff] %vm153_vm0, %v729_v21  ;;  %v432_v52 = vadd.f32 %v1482_v53, %v431_v25  ;;  %v697_v29 = vadd.f32 %v892_v26, %v472_v19  ;;  %v433_v30 = vpop.f32.mrb[47].mxu0  ;;  %v691_v31 = vpop.f32.mrb[47].mxu1 }
 0x174   :  { %760 = vst.msk [vmem:[%s1658_s3 + $0xe0] sm:$0xff] %vm153_vm0, %v728_v23  ;;  %v692_v48 = vadd.f32 %v691_v31, %v467_v22 }
 0x175   :  { %754 = vst.msk [vmem:[%s1658_s3 + $0xb0] sm:$0xff] %vm153_vm0, %v722_v27  ;;  %v657_v33 = vadd.f32 %v1575_v43, %v432_v52  ;;  %v731_v34 = vmax.f32 %v697_v29, 0.0 }
 0x176   :  { %v730_v35 = vmax.f32 %v692_v48, 0.0 }
 0x177   :  { %v723_v37 = vmax.f32 %v657_v33, 0.0  ;;  %763 = vst.msk [vmem:[%s1658_s3 + $0xf8] sm:$0xff] %vm153_vm0, %v731_v34 }
 0x178   :  { %762 = vst.msk [vmem:[%s1658_s3 + $0xf0] sm:$0xff] %vm153_vm0, %v730_v35 }
 0x179   :  { %755 = vst.msk [vmem:[%s1658_s3 + $0xb8] sm:$0xff] %vm153_vm0, %v723_v37 }

// kernel: cifar10trans_forward.6
= control target key start
LH: loop header
LB: loop body
LE: loop exit
PB: predicated region body
PF: predicated region fallthrough
CT: control target
= control target key end

     0   :  { %vm308_vm0 = vcmask 261120   ;;  %vm4090_vm1 = vmmov 0   ;;  %vm727_vm2 = vcmask 64512   ;;  %s5767_s19 = inlined_call_operand.vmem [shape: f32[512,32], index: 19, kind: input, shape index: {}]   ;;  %s5768_s0 = inlined_call_operand.vmem [shape: f32[16,512], index: 0, kind: input, shape index: {}]   ;;  %s5769_s1 = inlined_call_operand.vmem [shape: f32[32,32], index: 1, kind: input, shape index: {}]   ;;  %s5770_s2 = inlined_call_operand.vmem [shape: f32[32,32], index: 2, kind: input, shape index: {}]   ;;  %s5771_s3 = inlined_call_operand.vmem [shape: f32[32,32], index: 3, kind: input, shape index: {}]   ;;  %s5772_s20 = inlined_call_operand.vmem [shape: f32[1,32], index: 20, kind: input, shape index: {}]   ;;  %s5773_s7 = inlined_call_operand.vmem [shape: f32[32,8], index: 7, kind: input, shape index: {}]   ;;  %s5774_s4 = inlined_call_operand.vmem [shape: f32[1,32], index: 4, kind: input, shape index: {}]   ;;  %s5775_s5 = inlined_call_operand.vmem [shape: f32[1,32], index: 5, kind: input, shape index: {}]   ;;  %s5776_s8 = inlined_call_operand.vmem [shape: f32[8,32], index: 8, kind: input, shape index: {}]   ;;  %s5777_s6 = inlined_call_operand.vmem [shape: f32[1,32], index: 6, kind: input, shape index: {}]   ;;  %s5778_s9 = inlined_call_operand.vmem [shape: f32[32,32], index: 9, kind: input, shape index: {}]   ;;  %s5779_s10 = inlined_call_operand.vmem [shape: f32[1,32], index: 10, kind: input, shape index: {}]   ;;  %s5780_s13 = inlined_call_operand.vmem [shape: f32[32,2048], index: 13, kind: input, shape index: {}]   ;;  %s5781_s11 = inlined_call_operand.vmem [shape: f32[1,32], index: 11, kind: input, shape index: {}]   ;;  %s5782_s12 = inlined_call_operand.vmem [shape: f32[1,32], index: 12, kind: input, shape index: {}]   ;;  %s5783_s15 = inlined_call_operand.vmem [shape: f32[2048,32], index: 15, kind: input, shape index: {}]   ;;  %s5784_s14 = inlined_call_operand.vmem [shape: f32[1,2048], index: 14, kind: input, shape index: {}]   ;;  %s5785_s16 = inlined_call_operand.vmem [shape: f32[1,32], index: 16, kind: input, shape index: {}]   ;;  %s5786_s17 = inlined_call_operand.vmem [shape: f32[1,32], index: 17, kind: input, shape index: {}]   ;;  %s5787_s18 = inlined_call_operand.vmem [shape: f32[1,32], index: 18, kind: input, shape index: {}]   ;;  %s5788_s21 = inlined_call_operand.vmem [shape: f32[16,32], index: 21, kind: output, shape index: {}]  }
   0x1   :  { %5794 = sst [smem:[#allocation2_spill]] %s5767_s19 }
   0x2   :  { %5795 = sst [smem:[#allocation3_spill]] %s5768_s0  ;;  %s5800_s26 = sld [smem:[#allocation2_spill]] }
   0x3   :  { %5796 = sst [smem:[#allocation4_spill]] %s5769_s1  ;;  %s5801_s27 = sld [smem:[#allocation3_spill]] }
   0x4   :  { %5797 = sst [smem:[#allocation5_spill]] %s5770_s2  ;;  %s5802_s30 = sld [smem:[#allocation4_spill]] }
   0x5   :  { %5798 = sst [smem:[#allocation6_spill]] %s5771_s3  ;;  %s5803_s24 = sld [smem:[#allocation5_spill]] }
   0x6   :  { %5799 = sst [smem:[#allocation7_spill]] %s5772_s20  ;;  %s5804_s0 = sld [smem:[#allocation6_spill]] }
   0x8   :  { %v92_v0 = vld [vmem:[%s5800_s26 + $0x80] sm:$0xff]  ;;  %v93_v1 = vld [vmem:[%s5800_s26 + $0x88] sm:$0xff]  ;;  %v94_v11 = vld [vmem:[%s5800_s26 + $0x90] sm:$0xff] }
   0x9   :  { %v76_v2 = vld [vmem:[%s5800_s26] sm:$0xff]  ;;  %v3626_v3 = vpack.c.bf16 %v93_v1, %v92_v0  ;;  %v77_v4 = vld [vmem:[%s5800_s26 + $0x8] sm:$0xff]  ;;  %v95_v13 = vld [vmem:[%s5800_s26 + $0x98] sm:$0xff] }
   0xa   :  { %v124_v5 = vld [vmem:[%s5800_s26 + $0x180] sm:$0xff]  ;;  %v125_v6 = vld [vmem:[%s5800_s26 + $0x188] sm:$0xff]  ;;  %v3628_v7 = vpack.c.bf16 %v77_v4, %v76_v2  ;;  %v78_v14 = vld [vmem:[%s5800_s26 + $0x10] sm:$0xff]  ;;  %v3630_v16 = vpack.c.bf16 %v95_v13, %v94_v11 }
   0xb   :  { %v3658_v8 = vpack.c.bf16 %v125_v6, %v124_v5  ;;  %v108_v9 = vld [vmem:[%s5800_s26 + $0x100] sm:$0xff]  ;;  %v109_v10 = vld [vmem:[%s5800_s26 + $0x108] sm:$0xff]  ;;  %3627 = vmatprep.subr.bf16.mxu0 %v3626_v3  ;;  %v79_v15 = vld [vmem:[%s5800_s26 + $0x18] sm:$0xff] }
   0xc   :  { %v3660_v12 = vpack.c.bf16 %v109_v10, %v108_v9  ;;  %3629 = vmatpush3.bf16.msra.mxu0 %v3628_v7  ;;  %v3632_v17 = vpack.c.bf16 %v79_v15, %v78_v14  ;;  %v126_v18 = vld [vmem:[%s5800_s26 + $0x190] sm:$0xff]  ;;  %v127_v19 = vld [vmem:[%s5800_s26 + $0x198] sm:$0xff]  ;;  %v96_v23 = vld [vmem:[%s5800_s26 + $0xa0] sm:$0xff] }
   0xd   :  { %3659 = vmatprep.subr.bf16.mxu1 %v3658_v8  ;;  %v110_v20 = vld [vmem:[%s5800_s26 + $0x110] sm:$0xff]  ;;  %v3662_v21 = vpack.c.bf16 %v127_v19, %v126_v18  ;;  %v111_v22 = vld [vmem:[%s5800_s26 + $0x118] sm:$0xff]  ;;  %v97_v24 = vld [vmem:[%s5800_s26 + $0xa8] sm:$0xff]  ;;  %3631 = vmatprep.subr.bf16.mxu0 %v3630_v16 }
   0xe   :  { %3661 = vmatpush3.bf16.msra.mxu1 %v3660_v12  ;;  %v3664_v25 = vpack.c.bf16 %v111_v22, %v110_v20  ;;  %v3634_v26 = vpack.c.bf16 %v97_v24, %v96_v23  ;;  %v80_v27 = vld [vmem:[%s5800_s26 + $0x20] sm:$0xff]  ;;  %v81_v28 = vld [vmem:[%s5800_s26 + $0x28] sm:$0xff]  ;;  %v98_v35 = vld [vmem:[%s5800_s26 + $0xb0] sm:$0xff] }
   0xf   :  { %v128_v29 = vld [vmem:[%s5800_s26 + $0x1a0] sm:$0xff]  ;;  %3663 = vmatprep.subr.bf16.mxu1 %v3662_v21  ;;  %v129_v30 = vld [vmem:[%s5800_s26 + $0x1a8] sm:$0xff]  ;;  %v3636_v33 = vpack.c.bf16 %v81_v28, %v80_v27  ;;  %v99_v36 = vld [vmem:[%s5800_s26 + $0xb8] sm:$0xff] }
  0x10   :  { %v112_v31 = vld [vmem:[%s5800_s26 + $0x120] sm:$0xff]  ;;  %v113_v32 = vld [vmem:[%s5800_s26 + $0x128] sm:$0xff]  ;;  %3633 = vmatpush3.bf16.msra.mxu0 %v3632_v17  ;;  %v3666_v34 = vpack.c.bf16 %v129_v30, %v128_v29  ;;  %v82_v37 = vld [vmem:[%s5800_s26 + $0x30] sm:$0xff]  ;;  %v3638_v39 = vpack.c.bf16 %v99_v36, %v98_v35 }
  0x11   :  { %3635 = vmatprep.subr.bf16.mxu0 %v3634_v26  ;;  %v3668_v38 = vpack.c.bf16 %v113_v32, %v112_v31  ;;  %v83_v40 = vld [vmem:[%s5800_s26 + $0x38] sm:$0xff]  ;;  %v130_v41 = vld [vmem:[%s5800_s26 + $0x1b0] sm:$0xff]  ;;  %v100_v46 = vld [vmem:[%s5800_s26 + $0xc0] sm:$0xff] }
  0x12   :  { %3665 = vmatpush3.bf16.msra.mxu1 %v3664_v25  ;;  %v131_v42 = vld [vmem:[%s5800_s26 + $0x1b8] sm:$0xff]  ;;  %v114_v44 = vld [vmem:[%s5800_s26 + $0x130] sm:$0xff]  ;;  %v101_v47 = vld [vmem:[%s5800_s26 + $0xc8] sm:$0xff]  ;;  %v3640_v48 = vpack.c.bf16 %v83_v40, %v82_v37 }
  0x13   :  { %3667 = vmatprep.subr.bf16.mxu1 %v3666_v34  ;;  %v3670_v43 = vpack.c.bf16 %v131_v42, %v130_v41  ;;  %v115_v45 = vld [vmem:[%s5800_s26 + $0x138] sm:$0xff]  ;;  %v132_v49 = vld [vmem:[%s5800_s26 + $0x1c0] sm:$0xff]  ;;  %v133_v50 = vld [vmem:[%s5800_s26 + $0x1c8] sm:$0xff]  ;;  %v3642_v52 = vpack.c.bf16 %v101_v47, %v100_v46 }
  0x14   :  { %3637 = vmatpush3.bf16.msra.mxu0 %v3636_v33  ;;  %v3672_v51 = vpack.c.bf16 %v115_v45, %v114_v44  ;;  %v84_v53 = vld [vmem:[%s5800_s26 + $0x40] sm:$0xff]  ;;  %v85_v54 = vld [vmem:[%s5800_s26 + $0x48] sm:$0xff]  ;;  %v3674_v56 = vpack.c.bf16 %v133_v50, %v132_v49  ;;  %v102_v58 = vld [vmem:[%s5800_s26 + $0xd0] sm:$0xff] }
  0x15   :  { %3639 = vmatprep.subr.bf16.mxu0 %v3638_v39  ;;  %v116_v55 = vld [vmem:[%s5800_s26 + $0x140] sm:$0xff]  ;;  %v117_v57 = vld [vmem:[%s5800_s26 + $0x148] sm:$0xff]  ;;  %v103_v59 = vld [vmem:[%s5800_s26 + $0xd8] sm:$0xff]  ;;  %v3644_v62 = vpack.c.bf16 %v85_v54, %v84_v53 }
  0x16   :  { %3669 = vmatpush3.bf16.msra.mxu1 %v3668_v38  ;;  %v134_v60 = vld [vmem:[%s5800_s26 + $0x1d0] sm:$0xff]  ;;  %v135_v61 = vld [vmem:[%s5800_s26 + $0x1d8] sm:$0xff]  ;;  %v3676_v63 = vpack.c.bf16 %v117_v57, %v116_v55  ;;  %v3646_v0 = vpack.c.bf16 %v103_v59, %v102_v58  ;;  %v104_v6 = vld [vmem:[%s5800_s26 + $0xe0] sm:$0xff]  ;;  %v4089_v55 = vmov 0.0|0.0  }
  0x17   :  { %3671 = vmatprep.subr.bf16.mxu1 %v3670_v43  ;;  %v86_v1 = vld [vmem:[%s5800_s26 + $0x50] sm:$0xff]  ;;  %v87_v2 = vld [vmem:[%s5800_s26 + $0x58] sm:$0xff]  ;;  %v3678_v4 = vpack.c.bf16 %v135_v61, %v134_v60  ;;  %v105_v7 = vld [vmem:[%s5800_s26 + $0xe8] sm:$0xff] }
  0x18   :  { %3641 = vmatpush3.bf16.msra.mxu0 %v3640_v48  ;;  %v118_v3 = vld [vmem:[%s5800_s26 + $0x150] sm:$0xff]  ;;  %v119_v5 = vld [vmem:[%s5800_s26 + $0x158] sm:$0xff]  ;;  %v136_v8 = vld [vmem:[%s5800_s26 + $0x1e0] sm:$0xff]  ;;  %v3648_v10 = vpack.c.bf16 %v87_v2, %v86_v1  ;;  %v3650_v14 = vpack.c.bf16 %v105_v7, %v104_v6 }
  0x19   :  { %3643 = vmatprep.subr.bf16.mxu0 %v3642_v52  ;;  %v137_v9 = vld [vmem:[%s5800_s26 + $0x1e8] sm:$0xff]  ;;  %v88_v11 = vld [vmem:[%s5800_s26 + $0x60] sm:$0xff]  ;;  %v3680_v13 = vpack.c.bf16 %v119_v5, %v118_v3  ;;  %v106_v19 = vld [vmem:[%s5800_s26 + $0xf0] sm:$0xff] }
  0x1a   :  { %3673 = vmatpush3.bf16.msra.mxu1 %v3672_v51  ;;  %v89_v12 = vld [vmem:[%s5800_s26 + $0x68] sm:$0xff]  ;;  %v120_v15 = vld [vmem:[%s5800_s26 + $0x160] sm:$0xff]  ;;  %v3682_v18 = vpack.c.bf16 %v137_v9, %v136_v8  ;;  %v107_v20 = vld [vmem:[%s5800_s26 + $0xf8] sm:$0xff] }
  0x1b   :  { %3675 = vmatprep.subr.bf16.mxu1 %v3674_v56  ;;  %v121_v16 = vld [vmem:[%s5800_s26 + $0x168] sm:$0xff]  ;;  %v71_v21 = vld [vmem:[%s5801_s27 + $0x18] sm:$0xff]  ;;  %v138_v22 = vld [vmem:[%s5800_s26 + $0x1f0] sm:$0xff]  ;;  %v3652_v24 = vpack.c.bf16 %v89_v12, %v88_v11  ;;  %v3654_v26 = vpack.c.bf16 %v107_v20, %v106_v19 }
  0x1c   :  { %3645 = vmatpush3.bf16.msra.mxu0 %v3644_v62  ;;  %v69_v17 = vld [vmem:[%s5801_s27 + $0x8] sm:$0xff]  ;;  %v139_v23 = vld [vmem:[%s5800_s26 + $0x1f8] sm:$0xff]  ;;  %286 = vmatprep.mubr.f32.mxu1 %v71_v21  ;;  %v3684_v25 = vpack.c.bf16 %v121_v16, %v120_v15  ;;  %v90_v27 = vld [vmem:[%s5800_s26 + $0x70] sm:$0xff] }
  0x1d   :  { %3647 = vmatprep.subr.bf16.mxu0 %v3646_v0  ;;  %211 = vmatprep.mubr.f32.mxu0 %v69_v17  ;;  %v91_v28 = vld [vmem:[%s5800_s26 + $0x78] sm:$0xff]  ;;  %v3686_v29 = vpack.c.bf16 %v139_v23, %v138_v22  ;;  %v122_v30 = vld [vmem:[%s5800_s26 + $0x170] sm:$0xff]  ;;  %v68_v34 = vld [vmem:[%s5801_s27] sm:$0xff] }
  0x1e   :  { %3677 = vmatpush3.bf16.msra.mxu1 %v3676_v63  ;;  %v123_v31 = vld [vmem:[%s5800_s26 + $0x178] sm:$0xff]  ;;  %v3656_v32 = vpack.c.bf16 %v91_v28, %v90_v27  ;;  %v70_v35 = vld [vmem:[%s5801_s27 + $0x10] sm:$0xff]  ;;  %v73_v36 = vld [vmem:[%s5801_s27 + $0x28] sm:$0xff] }
  0x1f   :  { %3679 = vmatprep.subr.bf16.mxu1 %v3678_v4  ;;  %v3688_v33 = vpack.c.bf16 %v123_v31, %v122_v30  ;;  %v75_v37 = vld [vmem:[%s5801_s27 + $0x38] sm:$0xff]  ;;  %v72_v38 = vld [vmem:[%s5801_s27 + $0x20] sm:$0xff]  ;;  %v74_v39 = vld [vmem:[%s5801_s27 + $0x30] sm:$0xff]  ;;  %s5805_s27 = sld [smem:[#allocation7_spill]] }
  0x20   :  { %3649 = vmatpush3.bf16.msra.mxu0 %v3648_v10  ;;  %v297_v40 = vld [vmem:[%s5802_s30] sm:$0xff]  ;;  %v298_v41 = vld [vmem:[%s5802_s30 + $0x8] sm:$0xff]  ;;  %v299_v46 = vld [vmem:[%s5802_s30 + $0x10] sm:$0xff] }
  0x21   :  { %3651 = vmatprep.subr.bf16.mxu0 %v3650_v14  ;;  %v3690_v42 = vpack.c.bf16 %v298_v41, %v297_v40  ;;  %v390_v43 = vld [vmem:[%s5803_s24] sm:$0xff]  ;;  %v391_v44 = vld [vmem:[%s5803_s24 + $0x8] sm:$0xff]  ;;  %v300_v47 = vld [vmem:[%s5802_s30 + $0x18] sm:$0xff] }
  0x22   :  { %3681 = vmatpush3.bf16.msra.mxu1 %v3680_v13  ;;  %v3698_v45 = vpack.c.bf16 %v391_v44, %v390_v43  ;;  %v3694_v48 = vpack.c.bf16 %v300_v47, %v299_v46  ;;  %v392_v49 = vld [vmem:[%s5803_s24 + $0x10] sm:$0xff]  ;;  %v393_v50 = vld [vmem:[%s5803_s24 + $0x18] sm:$0xff]  ;;  %v476_v52 = vld [vmem:[%s5804_s0] sm:$0xff] }
  0x23   :  { %3683 = vmatprep.subr.bf16.mxu1 %v3682_v18  ;;  %v3702_v51 = vpack.c.bf16 %v393_v50, %v392_v49  ;;  %v477_v53 = vld [vmem:[%s5804_s0 + $0x8] sm:$0xff]  ;;  %v478_v6 = vld [vmem:[%s5804_s0 + $0x10] sm:$0xff]  ;;  %v479_v8 = vld [vmem:[%s5804_s0 + $0x18] sm:$0xff]  ;;  %v4091_v18 = vmov 0.0  }
  0x24   :  { %3653 = vmatpush3.bf16.msra.mxu0 %v3652_v24  ;;  %v3706_v54 = vpack.c.bf16 %v477_v53, %v476_v52  ;;  %v562_v9 = vld [vmem:[%s5773_s7] sm:$0xff]  ;;  %v563_v10 = vld [vmem:[%s5773_s7 + $0x8] sm:$0xff]  ;;  %v3710_v13 = vpack.c.bf16 %v479_v8, %v478_v6  ;;  %v564_v15 = vld [vmem:[%s5773_s7 + $0x10] sm:$0xff] }
  0x25   :  { %3655 = vmatprep.subr.bf16.mxu0 %v3654_v26  ;;  %v3044_v57 = vld [vmem:[%s5805_s27] ss:$0 sm:$0xff]  ;;  %v4472_v14 = vpack.c.bf16 %v563_v10, %v562_v9  ;;  %v565_v16 = vld [vmem:[%s5773_s7 + $0x18] sm:$0xff] }
  0x26   :  { %3685 = vmatpush3.bf16.msra.mxu1 %v3684_v25  ;;  %v4493_v17 = vpack.c.bf16 %v565_v16, %v564_v15  ;;  %v3045_v19 = vld [vmem:[%s5774_s4] ss:$0 sm:$0xff] }
  0x27   :  { %3687 = vmatprep.subr.bf16.mxu1 %v3686_v29  ;;  %v3048_v20 = vld [vmem:[%s5775_s5] ss:$0 sm:$0xff] }
  0x28   :  { %3657 = vmatpush3.bf16.msra.mxu0 %v3656_v32 }
  0x29   :  { %3691 = vmatprep.subr.bf16.mxu0 %v3690_v42 }
  0x2a   :  { %3689 = vmatpush3.bf16.msra.mxu1 %v3688_v33 }
  0x2b   :  { %212 = vmatmul.mubr.f32.vlgmr.msra.gmra.mrb[0].mxu0 %v68_v34  ;;  %3699 = vmatprep.subr.bf16.mxu1 %v3698_v45 }
  0x2c   :  { %216 = vmatprep.mubr.f32.mxu0 %v73_v36  ;;  %3693 = vmatpush3.bf16.msra.mxu0 %v3690_v42 }
  0x2d   :  { %287 = vmatmul.mubr.f32.vlgmr.msra.gmra.mrb[0].mxu1 %v70_v35  ;;  %3695 = vmatprep.subr.bf16.mxu0 %v3694_v48  ;;  %v4522_v35 = vld [vmem:[%s5776_s8] sm:$0xff] }
  0x2e   :  { %291 = vmatprep.mubr.f32.mxu1 %v75_v37  ;;  %3701 = vmatpush3.bf16.msra.mxu1 %v3698_v45 }
  0x2f   :  { %217 = vmatmul.mubr.f32.gmra.mrb[2].mxu0 %v72_v38  ;;  %3703 = vmatprep.subr.bf16.mxu1 %v3702_v51 }
  0x30   :  { %3697 = vmatpush3.bf16.msra.mxu0 %v3694_v48 }
  0x31   :  { %292 = vmatmul.mubr.f32.gmra.mrb[2].mxu1 %v74_v39  ;;  %3707 = vmatprep.subr.bf16.mxu0 %v3706_v54 }
  0x32   :  { %3705 = vmatpush3.bf16.msra.mxu1 %v3702_v51 }
  0x33   :  { %3714 = vmatprep.subr.bf16.mxu1 %v4089_v55 }
  0xfe   :  { %v3118_v56 = vpop.f32.mrb[0].mxu0 }
  0xff   :  { %v3119_v58 = vpop.f32.mrb[1].mxu0 }
 0x100   :  { %v3156_v59 = vpop.f32.mrb[0].mxu1  ;;  %v3120_v60 = vadd.f32 %v3119_v58, %v3118_v56  ;;  %v3051_v56 = vld [vmem:[%s5777_s6] ss:$0 sm:$0xff] }
 0x101   :  { %v3157_v61 = vpop.f32.mrb[1].mxu1 }
 0x102   :  { %v3158_v62 = vadd.f32 %v3157_v61, %v3156_v59  ;;  %v214_v63 = vadd.f32 %v3120_v60, %v3044_v57  ;;  %v3121_v0 = vpop.f32.mrb[2].mxu0 }
 0x103   :  { %v3122_v1 = vpop.f32.mrb[3].mxu0 }
 0x104   :  { %v3159_v2 = vpop.f32.mrb[2].mxu1  ;;  %v4452_v3 = vadd.f32 %v3158_v62, %v214_v63  ;;  %v3123_v4 = vadd.f32 %v3122_v1, %v3121_v0 }
 0x105   :  { %v3160_v5 = vpop.f32.mrb[3].mxu1 }
 0x106   :  { %v3161_v7 = vadd.f32 %v3160_v5, %v3159_v2  ;;  %v219_v11 = vadd.f32 %v3123_v4, %v3044_v57  ;;  %3526 = vmatprep.mubr.msk.f32.mxu0 %vm308_vm0, %v4452_v3  ;;  %3537 = vmatprep.mubr.msk.f32.mxu1 %vm308_vm0, %v4452_v3 }
 0x108   :  { %v4470_v12 = vadd.f32 %v3161_v7, %v219_v11 }
 0x10a   :  { %3527 = vmatmul.mubr.msk.f32.vlgmr.msra.gmra.mrb[4].mxu0 %vm308_vm0, %v4470_v12  ;;  %3538 = vmatmul.mubr.msk.f32.vlgmr.msra.gmra.mrb[4].mxu1 %vm308_vm0, %v4470_v12 }
 0x10b   :  { %3709 = vmatpush3.bf16.msra.mxu0 %v3706_v54  ;;  %3548 = vmatprep.mubr.msk.f32.mxu0 %vm308_vm0, %v4452_v3 }
 0x10c   :  { %3711 = vmatprep.subr.bf16.mxu0 %v3710_v13  ;;  %3716 = vmatpush3.bf16.msra.mxu1 %v4472_v14 }
 0x10d   :  { %3717 = vmatprep.subr.bf16.mxu1 %v4089_v55  ;;  %3559 = vmatprep.mubr.msk.f32.mxu1 %vm4090_vm1, %v4091_v18 }
 0x10f   :  { %3713 = vmatpush3.bf16.msra.mxu0 %v3710_v13 }
 0x110   :  { %3720 = vmatprep.subr.bf16.mxu0 %v4089_v55  ;;  %3719 = vmatpush3.bf16.msra.mxu1 %v4493_v17 }
 0x111   :  { %3573 = vmatprep.subr.mxu1 %v4091_v18 }
 0x112   :  { %3549 = vmatmul.mubr.msk.f32.vlgmr.msra.gmra.mrb[6].mxu0 %vm308_vm0, %v4470_v12 }
 0x113   :  { %3722 = vmatpush3.bf16.msra.mxu0 %v4472_v14  ;;  %3570 = vmatprep.mubr.msk.f32.mxu0 %vm4090_vm1, %v4091_v18 }
 0x114   :  { %3723 = vmatprep.subr.bf16.mxu0 %v4089_v55 }
 0x117   :  { %3725 = vmatpush3.bf16.msra.mxu0 %v4493_v17 }
 0x118   :  { %3726 = vmatprep.subr.bf16.mxu0 %v4089_v55 }
 0x1dd   :  { %v3528_v21 = vpop.f32.mrb[4].mxu0  ;;  %v3539_v22 = vpop.f32.mrb[4].mxu1 }
 0x1de   :  { %v387_v23 = vadd.f32 %v3528_v21, %v3045_v19  ;;  %v473_v24 = vadd.f32 %v3539_v22, %v3048_v20  ;;  %v381_v25 = vpop.f32.mrb[5].mxu0  ;;  %v467_v26 = vpop.f32.mrb[5].mxu1  ;;  %v1190_v22 = vld [vmem:[%s5778_s9 + $0x10] sm:$0xff] }
 0x1df   :  { %v382_v27 = vadd.f32 %v3045_v19, %v381_v25  ;;  %v468_v28 = vadd.f32 %v3048_v20, %v467_v26  ;;  %v1188_v19 = vld [vmem:[%s5778_s9] sm:$0xff]  ;;  %v1189_v20 = vld [vmem:[%s5778_s9 + $0x8] sm:$0xff] }
 0x1e0   :  { %v953_v29 = vmul.f32 %v473_v24, %v387_v23  ;;  %v3738_v21 = vpack.c.bf16 %v1189_v20, %v1188_v19 }
 0x1e1   :  { %v642_v30 = vmul.f32 %v473_v24, %v382_v27  ;;  %v567_v31 = vmul.f32 %v468_v28, %v382_v27  ;;  %v878_v32 = vmul.f32 %v468_v28, %v387_v23  ;;  %v1191_v23 = vld [vmem:[%s5778_s9 + $0x18] sm:$0xff] }
 0x1e2   :  { %v3742_v24 = vpack.c.bf16 %v1191_v23, %v1190_v22 }
 0x1e3   :  { %3560 = vmatmul.mubr.msk.f32.vlgmr.msra.gmra.mrb[6].mxu1 %vm308_vm0, %v567_v31  ;;  %3571 = vmatmul.mubr.msk.f32.vlgmr.msra.gmra.mrb[8].mxu0 %vm308_vm0, %v642_v30 }
 0x1e4   :  { %3728 = vmatpush3.bf16.msra.mxu0 %v4472_v14  ;;  %3591 = vmatprep.mubr.msk.f32.mxu0 %vm4090_vm1, %v4091_v18 }
 0x1e5   :  { %v3550_v33 = vpop.f32.mrb[6].mxu0  ;;  %3729 = vmatprep.subr.bf16.mxu0 %v4089_v55  ;;  %3575 = vmatprep.mubr.msk.f32.mxu1 %vm4090_vm1, %v4091_v18 }
 0x1e6   :  { %v553_v34 = vpop.f32.mrb[7].mxu0  ;;  %3574 = vmatpush3.msra.mxu1 %v4522_v35 }
 0x1e7   :  { %3578 = vmatprep.subr.mxu1 %v4091_v18  ;;  %v554_v59 = vadd.f32 %v3051_v56, %v553_v34 }
 0x1e8   :  { %3731 = vmatpush3.bf16.msra.mxu0 %v4493_v17 }
 0x1e9   :  { %3739 = vmatprep.subr.bf16.mxu0 %v3738_v21 }
 0x1eb   :  { %3592 = vmatmul.mubr.msk.f32.vlgmr.msra.gmra.mrb[10].mxu0 %vm308_vm0, %v878_v32  ;;  %v3062_v32 = vld [vmem:[%s5779_s10] ss:$0 sm:$0xff] }
 0x1ec   :  { %3741 = vmatpush3.bf16.msra.mxu0 %v3738_v21 }
 0x1ed   :  { %3743 = vmatprep.subr.bf16.mxu0 %v3742_v24 }
 0x1f0   :  { %3745 = vmatpush3.bf16.msra.mxu0 %v3742_v24 }
 0x2b6   :  { %v637_v36 = vpop.f32.mrb[6].mxu1  ;;  %v712_v37 = vpop.f32.mrb[8].mxu0 }
 0x2b7   :  { %v641_v38 = vmul.f32 0.5, %v637_v36  ;;  %v716_v39 = vmul.f32 0.5, %v712_v37  ;;  %v3561_v40 = vpop.f32.mrb[7].mxu1  ;;  %v3572_v41 = vpop.f32.mrb[9].mxu0 }
 0x2b9   :  { %v717_v42 = vmax.f32 %v641_v38, %v716_v39 }
 0x2bb   :  { %v718_v43 = vsub.f32 %v641_v38, %v717_v42  ;;  %v721_v44 = vsub.f32 %v716_v39, %v717_v42 }
 0x2bd   :  { %v719_v45 = vmul.f32 1.442695, %v718_v43  ;;  %v722_v46 = vmul.f32 1.442695, %v721_v44 }
 0x2be   :  { %v948_v47 = vpop.f32.mrb[10].mxu0 }
 0x2bf   :  { %4069 = vpow2.f32 %v719_v45  ;;  %v3593_v48 = vpop.f32.mrb[11].mxu0  ;;  %v952_v2 = vmul.f32 0.5, %v948_v47 }
 0x2c0   :  { %4071 = vpow2.f32 %v722_v46 }
 0x2c9   :  { %v4070_v49 = vpop.eup %4069 }
 0x2ca   :  { %v4072_v50 = vpop.eup %4071 }
 0x2cb   :  { %v724_v51 = vadd.f32 %v4072_v50, %v4070_v49 }
 0x2cd   :  { %4073 = vrcp.f32 %v724_v51  ;;  %v1330_v51 = vld [vmem:[%s5780_s13 + $0x18] sm:$0xff] }
 0x2d7   :  { %v4074_v52 = vpop.eup %4073 }
 0x2d8   :  { %v726_v53 = vmul.f32 %v4074_v52, %v4070_v49  ;;  %v802_v54 = vmul.f32 %v4074_v52, %v4072_v50  ;;  %v1328_v49 = vld [vmem:[%s5780_s13 + $0x8] sm:$0xff] }
 0x2d9   :  { %v1344_v50 = vld [vmem:[%s5780_s13 + $0x88] sm:$0xff] }
 0x2da   :  { %3576 = vmatmul.mubr.msk.f32.vlgmr.msra.gmra.mrb[8].mxu1 %vm727_vm2, %v726_v53  ;;  %v3746_v52 = vpack.c.bf16 %v1344_v50, %v1328_v49  ;;  %v1346_v53 = vld [vmem:[%s5780_s13 + $0x98] sm:$0xff] }
 0x2db   :  { %3579 = vmatpush3.msra.mxu1 %v4522_v35  ;;  %3580 = vmatprep.mubr.msk.f32.mxu1 %vm4090_vm1, %v4091_v18  ;;  %v1338_v49 = vld [vmem:[%s5780_s13 + $0x58] sm:$0xff] }
 0x2dc   :  { %3732 = vmatprep.subr.bf16.mxu1 %v4089_v55  ;;  %v1354_v50 = vld [vmem:[%s5780_s13 + $0xd8] sm:$0xff] }
 0x2de   :  { %3581 = vmatmul.mubr.msk.f32.vlgmr.msra.gmra.mrb[10].mxu1 %vm727_vm2, %v802_v54  ;;  %v1327_v54 = vld [vmem:[%s5780_s13] sm:$0xff] }
 0x2df   :  { %3734 = vmatpush3.bf16.msra.mxu1 %v4472_v14  ;;  %3602 = vmatprep.mubr.msk.f32.mxu1 %vm4090_vm1, %v4091_v18 }
 0x2e0   :  { %3735 = vmatprep.subr.bf16.mxu1 %v4089_v55  ;;  %v559_v55 = vadd.f32 %v3550_v33, %v3051_v56  ;;  %v1343_v56 = vld [vmem:[%s5780_s13 + $0x80] sm:$0xff] }
 0x2e3   :  { %3737 = vmatpush3.bf16.msra.mxu1 %v4493_v17 }
 0x2e4   :  { %3605 = vmatprep.subr.mxu1 %v4091_v18 }
 0x2e6   :  { %3603 = vmatmul.mubr.msk.f32.vlgmr.msra.gmra.mrb[12].mxu1 %vm308_vm0, %v953_v29 }
 0x2e7   :  { %3606 = vmatpush3.msra.mxu1 %v4522_v35  ;;  %3607 = vmatprep.mubr.msk.f32.mxu1 %vm4090_vm1, %v4091_v18 }
 0x2e8   :  { %3610 = vmatprep.subr.mxu1 %v4091_v18 }
 0x3ad   :  { %v797_v57 = vpop.f32.mrb[8].mxu1 }
 0x3ae   :  { %v3577_v58 = vpop.f32.mrb[9].mxu1  ;;  %v801_v61 = vmul.f32 %v797_v57, %v554_v59  ;;  %v3754_v57 = vpack.c.bf16 %v1346_v53, %v1330_v51  ;;  %v1335_v53 = vld [vmem:[%s5780_s13 + $0x40] sm:$0xff] }
 0x3af   :  { %v3748_v58 = vpack.c.bf16 %v1343_v56, %v1327_v54  ;;  %v1351_v56 = vld [vmem:[%s5780_s13 + $0xc0] sm:$0xff] }
 0x3b0   :  { %3755 = vmatprep.subr.bf16.mxu0 %v3754_v57  ;;  %v1337_v57 = vld [vmem:[%s5780_s13 + $0x50] sm:$0xff] }
 0x3b1   :  { %v872_v60 = vpop.f32.mrb[10].mxu1 }
 0x3b2   :  { %v876_v62 = vmul.f32 %v872_v60, %v559_v55  ;;  %v3582_v63 = vpop.f32.mrb[11].mxu1 }
 0x3b3   :  { %v1362_v63 = vld [vmem:[%s5780_s13 + $0x118] sm:$0xff] }
 0x3b4   :  { %v877_v0 = vadd.f32 %v876_v62, %v801_v61  ;;  %v1360_v61 = vld [vmem:[%s5780_s13 + $0x108] sm:$0xff] }
 0x3b5   :  { %v1376_v62 = vld [vmem:[%s5780_s13 + $0x188] sm:$0xff] }
 0x3b6   :  { %3623 = vmatprep.mubr.msk.f32.mxu0 %vm308_vm0, %v877_v0  ;;  %v3750_v0 = vpack.c.bf16 %v1376_v62, %v1360_v61  ;;  %v1384_v61 = vld [vmem:[%s5780_s13 + $0x1c8] sm:$0xff]  ;;  %v1370_v62 = vld [vmem:[%s5780_s13 + $0x158] sm:$0xff] }
 0x3b9   :  { %v1023_v1 = vpop.f32.mrb[12].mxu1 }
 0x3ba   :  { %v1027_v4 = vmul.f32 0.5, %v1023_v1  ;;  %v3604_v5 = vpop.f32.mrb[13].mxu1  ;;  %v1378_v1 = vld [vmem:[%s5780_s13 + $0x198] sm:$0xff] }
 0x3bb   :  { %v3758_v5 = vpack.c.bf16 %v1378_v1, %v1362_v63  ;;  %v1386_v63 = vld [vmem:[%s5780_s13 + $0x1d8] sm:$0xff] }
 0x3bc   :  { %v1028_v6 = vmax.f32 %v952_v2, %v1027_v4 }
 0x3be   :  { %v1029_v7 = vsub.f32 %v952_v2, %v1028_v6  ;;  %v1032_v8 = vsub.f32 %v1027_v4, %v1028_v6  ;;  %v1359_v2 = vld [vmem:[%s5780_s13 + $0x100] sm:$0xff] }
 0x3bf   :  { %v1375_v4 = vld [vmem:[%s5780_s13 + $0x180] sm:$0xff] }
 0x3c0   :  { %v1030_v9 = vmul.f32 1.442695, %v1029_v7  ;;  %v1033_v10 = vmul.f32 1.442695, %v1032_v8  ;;  %v3752_v6 = vpack.c.bf16 %v1375_v4, %v1359_v2  ;;  %v1361_v7 = vld [vmem:[%s5780_s13 + $0x110] sm:$0xff]  ;;  %v1367_v2 = vld [vmem:[%s5780_s13 + $0x140] sm:$0xff] }
 0x3c1   :  { %v1377_v8 = vld [vmem:[%s5780_s13 + $0x190] sm:$0xff]  ;;  %v1383_v4 = vld [vmem:[%s5780_s13 + $0x1c0] sm:$0xff] }
 0x3c2   :  { %4075 = vpow2.f32 %v1030_v9  ;;  %v3760_v9 = vpack.c.bf16 %v1377_v8, %v1361_v7  ;;  %v3790_v8 = vpack.c.bf16 %v1386_v63, %v1370_v62  ;;  %v2182_v62 = vld [vmem:[%s5783_s15 + $0x1a8] sm:$0xff] }
 0x3c3   :  { %4077 = vpow2.f32 %v1033_v10  ;;  %v1332_v10 = vld [vmem:[%s5780_s13 + $0x28] sm:$0xff] }
 0x3cc   :  { %v4076_v11 = vpop.eup %4075 }
 0x3cd   :  { %v4078_v13 = vpop.eup %4077 }
 0x3ce   :  { %v1035_v14 = vadd.f32 %v4078_v13, %v4076_v11 }
 0x3d0   :  { %4079 = vrcp.f32 %v1035_v14 }
 0x3da   :  { %v4080_v15 = vpop.eup %4079 }
 0x3db   :  { %v1037_v16 = vmul.f32 %v4080_v15, %v4076_v11  ;;  %v1112_v17 = vmul.f32 %v4080_v15, %v4078_v13  ;;  %v1348_v11 = vld [vmem:[%s5780_s13 + $0xa8] sm:$0xff]  ;;  %v1334_v13 = vld [vmem:[%s5780_s13 + $0x38] sm:$0xff] }
 0x3dc   :  { %v3762_v14 = vpack.c.bf16 %v1348_v11, %v1332_v10  ;;  %v1350_v15 = vld [vmem:[%s5780_s13 + $0xb8] sm:$0xff]  ;;  %v1356_v10 = vld [vmem:[%s5780_s13 + $0xe8] sm:$0xff] }
 0x3dd   :  { %3608 = vmatmul.mubr.msk.f32.vlgmr.msra.gmra.mrb[14].mxu1 %vm727_vm2, %v1037_v16  ;;  %v3770_v16 = vpack.c.bf16 %v1350_v15, %v1334_v13  ;;  %v1342_v11 = vld [vmem:[%s5780_s13 + $0x78] sm:$0xff] }
 0x3de   :  { %3611 = vmatpush3.msra.mxu1 %v4522_v35  ;;  %3612 = vmatprep.mubr.msk.f32.mxu1 %vm4090_vm1, %v4091_v18  ;;  %v1358_v13 = vld [vmem:[%s5780_s13 + $0xf8] sm:$0xff] }
 0x3df   :  { %3747 = vmatprep.subr.bf16.mxu1 %v3746_v52 }
 0x3e1   :  { %3613 = vmatmul.mubr.msk.f32.vlgmr.msra.gmra.mrb[16].mxu1 %vm727_vm2, %v1112_v17 }
 0x3e2   :  { %1545 = vmatprep.mubr.f32.mxu1 %v4091_v18  ;;  %3749 = vmatpush1.bf16.msra.mxu1 %v3748_v58  ;;  %v1353_v58 = vld [vmem:[%s5780_s13 + $0xd0] sm:$0xff] }
 0x3e3   :  { %3751 = vmatprep.subr.bf16.mxu1 %v3750_v0  ;;  %v3780_v0 = vpack.c.bf16 %v1351_v56, %v1335_v53  ;;  %v3788_v1 = vpack.c.bf16 %v1353_v58, %v1337_v57  ;;  %v2132_v53 = vld [vmem:[%s5783_s15 + $0x18] sm:$0xff]  ;;  %v2163_v58 = vld [vmem:[%s5783_s15 + $0x110] sm:$0xff] }
 0x3e6   :  { %3753 = vmatpush1.bf16.msra.mxu1 %v3752_v6  ;;  %v1385_v6 = vld [vmem:[%s5780_s13 + $0x1d0] sm:$0xff] }
 0x3e7   :  { %3763 = vmatprep.subr.bf16.mxu1 %v3762_v14  ;;  %v3784_v14 = vpack.c.bf16 %v1383_v4, %v1367_v2  ;;  %v2134_v2 = vld [vmem:[%s5783_s15 + $0x28] sm:$0xff] }
 0x4b0   :  { %v1107_v25 = vpop.f32.mrb[14].mxu1 }
 0x4b1   :  { %v3609_v26 = vpop.f32.mrb[15].mxu1  ;;  %v1111_v28 = vmul.f32 %v1107_v25, %v554_v59  ;;  %v1345_v59 = vld [vmem:[%s5780_s13 + $0x90] sm:$0xff]  ;;  %v3065_v25 = vld [vmem:[%s5781_s11] ss:$0 sm:$0xff] }
 0x4b2   :  { %v1331_v26 = vld [vmem:[%s5780_s13 + $0x20] sm:$0xff] }
 0x4b4   :  { %v1182_v27 = vpop.f32.mrb[16].mxu1 }
 0x4b5   :  { %v1186_v29 = vmul.f32 %v1182_v27, %v559_v55  ;;  %v3614_v30 = vpop.f32.mrb[17].mxu1  ;;  %v1329_v55 = vld [vmem:[%s5780_s13 + $0x10] sm:$0xff] }
 0x4b6   :  { %v3756_v60 = vpack.c.bf16 %v1345_v59, %v1329_v55  ;;  %v1349_v30 = vld [vmem:[%s5780_s13 + $0xb0] sm:$0xff]  ;;  %v3786_v59 = vpack.c.bf16 %v1354_v50, %v1338_v49  ;;  %v2180_v49 = vld [vmem:[%s5783_s15 + $0x198] sm:$0xff] }
 0x4b7   :  { %v1187_v31 = vadd.f32 %v1186_v29, %v1111_v28  ;;  %v1347_v28 = vld [vmem:[%s5780_s13 + $0xa0] sm:$0xff]  ;;  %v1333_v29 = vld [vmem:[%s5780_s13 + $0x30] sm:$0xff] }
 0x4b9   :  { %3624 = vmatmul.mubr.msk.f32.vlgmr.msra.gmra.mrb[12].mxu0 %vm308_vm0, %v1187_v31  ;;  %v3066_v31 = vld [vmem:[%s5782_s12] ss:$0 sm:$0xff] }
 0x4ba   :  { %1622 = vmatprep.mubr.f32.mxu0 %v4091_v18  ;;  %3757 = vmatpush1.bf16.msra.mxu0 %v3756_v60  ;;  %v1368_v60 = vld [vmem:[%s5780_s13 + $0x148] sm:$0xff] }
 0x4bb   :  { %3759 = vmatprep.subr.bf16.mxu0 %v3758_v5  ;;  %v1369_v5 = vld [vmem:[%s5780_s13 + $0x150] sm:$0xff]  ;;  %v3782_v7 = vpack.c.bf16 %v1384_v61, %v1368_v60  ;;  %v2150_v60 = vld [vmem:[%s5783_s15 + $0xa8] sm:$0xff]  ;;  %v2181_v61 = vld [vmem:[%s5783_s15 + $0x1a0] sm:$0xff] }
 0x4bc   :  { %v3792_v15 = vpack.c.bf16 %v1385_v6, %v1369_v5  ;;  %v3850_v5 = vpack.c.bf16 %v2182_v62, %v2181_v61  ;;  %v2166_v6 = vld [vmem:[%s5783_s15 + $0x128] sm:$0xff]  ;;  %v2191_v61 = vld [vmem:[%s5783_s15 + $0x1f0] sm:$0xff] }
 0x4be   :  { %3761 = vmatpush1.bf16.msra.mxu0 %v3760_v9  ;;  %v1340_v9 = vld [vmem:[%s5780_s13 + $0x68] sm:$0xff] }
 0x4bf   :  { %3771 = vmatprep.subr.bf16.mxu0 %v3770_v16  ;;  %v1339_v16 = vld [vmem:[%s5780_s13 + $0x60] sm:$0xff] }
 0x58c   :  { %v3625_v33 = vpop.f32.mrb[12].mxu0 }
 0x58d   :  { %v1271_v34 = vpop.f32.mrb[13].mxu0  ;;  %v1277_v35 = vadd.f32 %v3625_v33, %v3062_v32 }
 0x58e   :  { %v1272_v36 = vadd.f32 %v3062_v32, %v1271_v34  ;;  %v1364_v32 = vld [vmem:[%s5780_s13 + $0x128] sm:$0xff] }
 0x58f   :  { %v1281_v39 = vadd.f32 %v1277_v35, %v4470_v12  ;;  %v1380_v34 = vld [vmem:[%s5780_s13 + $0x1a8] sm:$0xff]  ;;  %v1366_v35 = vld [vmem:[%s5780_s13 + $0x138] sm:$0xff] }
 0x590   :  { %v1280_v37 = vadd.f32 %v1272_v36, %v4452_v3  ;;  %v1382_v36 = vld [vmem:[%s5780_s13 + $0x1b8] sm:$0xff] }
 0x591   :  { %v1285_v40 = vsel %vm308_vm0, %v1281_v39, 0.0 }
 0x592   :  { %v1282_v38 = vsel %vm308_vm0, %v1280_v37, 0.0 }
 0x593   :  { %1283 = vadd.xlane.f32.xlu0 %v1282_v38  ;;  %v3764_v38 = vpack.c.bf16 %v1347_v28, %v1331_v26  ;;  %v1390_v26 = vld [vmem:[%s5780_s13 + $0x1f8] sm:$0xff] }
 0x597   :  { %1286 = vadd.xlane.f32.xlu0 %v1285_v40  ;;  %v1363_v40 = vld [vmem:[%s5780_s13 + $0x120] sm:$0xff] }
 0x620   :  { %v1284_v41 = vpop.xlane.xlu0 %1283 }
 0x621   :  { %v1289_v42 = vmul.f32 0.03125, %v1284_v41 }
 0x623   :  { %v4574_v43 = vsub.f32 %v1280_v37, %v1289_v42 }
 0x624   :  { %v1287_v44 = vpop.xlane.xlu0 %1286 }
 0x625   :  { %v1290_v45 = vmul.f32 0.03125, %v1287_v44  ;;  %v1293_v46 = vmul.f32 %v4574_v43, %v4574_v43  ;;  %v1365_v44 = vld [vmem:[%s5780_s13 + $0x130] sm:$0xff] }
 0x627   :  { %v4578_v47 = vsub.f32 %v1281_v39, %v1290_v45  ;;  %v1295_v3 = vsel %vm308_vm0, %v1293_v46, 0.0  ;;  %v3772_v39 = vpack.c.bf16 %v1349_v30, %v1333_v29  ;;  %v1381_v45 = vld [vmem:[%s5780_s13 + $0x1b0] sm:$0xff]  ;;  %v3766_v46 = vpack.c.bf16 %v1380_v34, %v1364_v32  ;;  %v1371_v29 = vld [vmem:[%s5780_s13 + $0x160] sm:$0xff] }
 0x628   :  { %1296 = vadd.xlane.f32.xlu1 %v1295_v3  ;;  %v3774_v3 = vpack.c.bf16 %v1382_v36, %v1366_v35  ;;  %v3776_v52 = vpack.c.bf16 %v1381_v45, %v1365_v44  ;;  %v1387_v30 = vld [vmem:[%s5780_s13 + $0x1e0] sm:$0xff]  ;;  %v1389_v32 = vld [vmem:[%s5780_s13 + $0x1f0] sm:$0xff]  ;;  %v2146_v36 = vld [vmem:[%s5783_s15 + $0x88] sm:$0xff] }
 0x629   :  { %v1294_v12 = vmul.f32 %v4578_v47, %v4578_v47  ;;  %v2145_v35 = vld [vmem:[%s5783_s15 + $0x80] sm:$0xff] }
 0x62a   :  { %v3810_v44 = vpack.c.bf16 %v2146_v36, %v2145_v35  ;;  %v2187_v35 = vld [vmem:[%s5783_s15 + $0x1d0] sm:$0xff]  ;;  %v2188_v36 = vld [vmem:[%s5783_s15 + $0x1d8] sm:$0xff] }
 0x62b   :  { %v1298_v48 = vsel %vm308_vm0, %v1294_v12, 0.0  ;;  %v1336_v12 = vld [vmem:[%s5780_s13 + $0x48] sm:$0xff] }
 0x62c   :  { %1299 = vadd.xlane.f32.xlu1 %v1298_v48 }
 0x6b5   :  { %v1297_v17 = vpop.xlane.xlu1 %1296 }
 0x6b6   :  { %v1301_v19 = vmul.f32 0.03125, %v1297_v17  ;;  %v1355_v17 = vld [vmem:[%s5780_s13 + $0xe0] sm:$0xff] }
 0x6b8   :  { %v1303_v20 = vadd.f32 1e-05, %v1301_v19  ;;  %v1341_v19 = vld [vmem:[%s5780_s13 + $0x70] sm:$0xff] }
 0x6b9   :  { %v1300_v21 = vpop.xlane.xlu1 %1299 }
 0x6ba   :  { %4081 = vrsqrt.f32 %v1303_v20  ;;  %v1302_v22 = vmul.f32 0.03125, %v1300_v21  ;;  %v1357_v20 = vld [vmem:[%s5780_s13 + $0xf0] sm:$0xff]  ;;  %v3794_v21 = vpack.c.bf16 %v1356_v10, %v1340_v9  ;;  %v2184_v10 = vld [vmem:[%s5783_s15 + $0x1b8] sm:$0xff] }
 0x6bb   :  { %v3804_v28 = vpack.c.bf16 %v1357_v20, %v1341_v19  ;;  %v2183_v9 = vld [vmem:[%s5783_s15 + $0x1b0] sm:$0xff]  ;;  %v2168_v20 = vld [vmem:[%s5783_s15 + $0x138] sm:$0xff] }
 0x6bc   :  { %v1304_v23 = vadd.f32 1e-05, %v1302_v22  ;;  %v3802_v22 = vpack.c.bf16 %v1358_v13, %v1342_v11  ;;  %v2167_v19 = vld [vmem:[%s5783_s15 + $0x130] sm:$0xff] }
 0x6be   :  { %4083 = vrsqrt.f32 %v1304_v23  ;;  %v1372_v23 = vld [vmem:[%s5780_s13 + $0x168] sm:$0xff] }
 0x6c4   :  { %v4082_v24 = vpop.eup %4081 }
 0x6c5   :  { %v1307_v27 = vmul.f32 %v4082_v24, %v4574_v43  ;;  %v1379_v43 = vld [vmem:[%s5780_s13 + $0x1a0] sm:$0xff]  ;;  %v1388_v24 = vld [vmem:[%s5780_s13 + $0x1e8] sm:$0xff] }
 0x6c6   :  { %v3768_v51 = vpack.c.bf16 %v1379_v43, %v1363_v40  ;;  %v2130_v43 = vld [vmem:[%s5783_s15 + $0x8] sm:$0xff] }
 0x6c7   :  { %v1316_v33 = vmul.f32 %v3065_v25, %v1307_v27  ;;  %v3796_v27 = vpack.c.bf16 %v1355_v17, %v1339_v16  ;;  %v3854_v17 = vpack.c.bf16 %v2184_v10, %v2183_v9  ;;  %v2241_v9 = vld [vmem:[%s5783_s15 + $0x380] sm:$0xff] }
 0x6c8   :  { %v4084_v37 = vpop.eup %4083 }
 0x6c9   :  { %v4678_v41 = vadd.f32 %v3066_v31, %v1316_v33  ;;  %v1308_v42 = vmul.f32 %v4084_v37, %v4578_v47  ;;  %v1352_v47 = vld [vmem:[%s5780_s13 + $0xc8] sm:$0xff]  ;;  %v3798_v33 = vpack.c.bf16 %v1388_v24, %v1372_v23  ;;  %v2177_v37 = vld [vmem:[%s5783_s15 + $0x180] sm:$0xff] }
 0x6ca   :  { %v3778_v55 = vpack.c.bf16 %v1352_v47, %v1336_v12  ;;  %v2147_v12 = vld [vmem:[%s5783_s15 + $0x90] sm:$0xff]  ;;  %v2185_v23 = vld [vmem:[%s5783_s15 + $0x1c0] sm:$0xff]  ;;  %v2186_v24 = vld [vmem:[%s5783_s15 + $0x1c8] sm:$0xff] }
 0x6cb   :  { %v1317_v48 = vmul.f32 %v3065_v25, %v1308_v42  ;;  %3067 = vmatmul.mubr.msk.f32.vlgmr.msra.gmra.mrb[18].mxu1 %vm308_vm0, %v4678_v41  ;;  %3069 = vmatmul.mubr.msk.f32.vlgmr.msra.gmra.mrb[14].mxu0 %vm308_vm0, %v4678_v41  ;;  %v1374_v25 = vld [vmem:[%s5780_s13 + $0x178] sm:$0xff]  ;;  %v2129_v42 = vld [vmem:[%s5783_s15] sm:$0xff]  ;;  %v2179_v47 = vld [vmem:[%s5783_s15 + $0x190] sm:$0xff] }
 0x6cc   :  { %3765 = vmatpush1.bf16.msra.mxu1 %v3764_v38  ;;  %3773 = vmatpush1.bf16.msra.mxu0 %v3772_v39  ;;  %v3806_v34 = vpack.c.bf16 %v1390_v26, %v1374_v25  ;;  %v2178_v38 = vld [vmem:[%s5783_s15 + $0x188] sm:$0xff]  ;;  %v3800_v39 = vpack.c.bf16 %v1387_v30, %v1371_v29  ;;  %v3812_v50 = vpack.c.bf16 %v2130_v43, %v2129_v42 }
 0x6cd   :  { %v4709_v54 = vadd.f32 %v3066_v31, %v1317_v48  ;;  %1551 = vmatprep.mubr.f32.mxu1 %v4091_v18  ;;  %1628 = vmatprep.mubr.f32.mxu0 %v4091_v18  ;;  %v1373_v31 = vld [vmem:[%s5780_s13 + $0x170] sm:$0xff]  ;;  %v3842_v45 = vpack.c.bf16 %v2178_v38, %v2177_v37  ;;  %v2148_v48 = vld [vmem:[%s5783_s15 + $0x98] sm:$0xff]  ;;  %v3846_v57 = vpack.c.bf16 %v2180_v49, %v2179_v47 }
 0x6ce   :  { %3767 = vmatprep.subr.bf16.mxu1 %v3766_v46  ;;  %3775 = vmatprep.subr.bf16.mxu0 %v3774_v3  ;;  %v3808_v40 = vpack.c.bf16 %v1389_v32, %v1373_v31  ;;  %v2161_v46 = vld [vmem:[%s5783_s15 + $0x100] sm:$0xff]  ;;  %v2162_v3 = vld [vmem:[%s5783_s15 + $0x108] sm:$0xff]  ;;  %v3814_v56 = vpack.c.bf16 %v2148_v48, %v2147_v12  ;;  %v3856_v26 = vpack.c.bf16 %v2168_v20, %v2167_v19 }
 0x6cf   :  { %3068 = vmatmul.mubr.msk.f32.gmra.mrb[20].mxu1 %vm308_vm0, %v4709_v54  ;;  %3070 = vmatmul.mubr.msk.f32.gmra.mrb[16].mxu0 %vm308_vm0, %v4709_v54  ;;  %v3858_v30 = vpack.c.bf16 %v2186_v24, %v2185_v23  ;;  %v2169_v31 = vld [vmem:[%s5783_s15 + $0x140] sm:$0xff]  ;;  %v2170_v32 = vld [vmem:[%s5783_s15 + $0x148] sm:$0xff]  ;;  %v3862_v43 = vpack.c.bf16 %v2188_v36, %v2187_v35 }
 0x6d0   :  { %3769 = vmatpush1.bf16.msra.mxu1 %v3768_v51  ;;  %3777 = vmatpush1.bf16.msra.mxu0 %v3776_v52  ;;  %v3844_v51 = vpack.c.bf16 %v2162_v3, %v2161_v46  ;;  %v2131_v52 = vld [vmem:[%s5783_s15 + $0x10] sm:$0xff]  ;;  %v3860_v38 = vpack.c.bf16 %v2170_v32, %v2169_v31  ;;  %v2157_v46 = vld [vmem:[%s5783_s15 + $0xe0] sm:$0xff]  ;;  %v2158_v3 = vld [vmem:[%s5783_s15 + $0xe8] sm:$0xff] }
 0x6d1   :  { %1699 = vmatprep.mubr.f32.mxu1 %v4091_v18  ;;  %1776 = vmatprep.mubr.f32.mxu0 %v4091_v18  ;;  %v3816_v63 = vpack.c.bf16 %v2132_v53, %v2131_v52  ;;  %v2189_v12 = vld [vmem:[%s5783_s15 + $0x1e0] sm:$0xff]  ;;  %v2190_v48 = vld [vmem:[%s5783_s15 + $0x1e8] sm:$0xff] }
 0x6d2   :  { %3779 = vmatprep.subr.bf16.mxu1 %v3778_v55  ;;  %3787 = vmatprep.subr.bf16.mxu0 %v3786_v59  ;;  %v2164_v55 = vld [vmem:[%s5783_s15 + $0x118] sm:$0xff]  ;;  %v2149_v59 = vld [vmem:[%s5783_s15 + $0xa0] sm:$0xff]  ;;  %v3866_v52 = vpack.c.bf16 %v2190_v48, %v2189_v12  ;;  %v2142_v53 = vld [vmem:[%s5783_s15 + $0x68] sm:$0xff] }
 0x6d3   :  { %3071 = vmatmul.mubr.msk.f32.vlgmr.msra.gmra.mrb[22].mxu1 %vm308_vm0, %v4678_v41  ;;  %3073 = vmatmul.mubr.msk.f32.vlgmr.msra.gmra.mrb[18].mxu0 %vm308_vm0, %v4678_v41  ;;  %v3818_v4 = vpack.c.bf16 %v2150_v60, %v2149_v59  ;;  %v2159_v59 = vld [vmem:[%s5783_s15 + $0xf0] sm:$0xff]  ;;  %v2160_v60 = vld [vmem:[%s5783_s15 + $0xf8] sm:$0xff]  ;;  %v5045_v19 = vld [vmem:[%s5784_s14] sm:$0xff] }
 0x6d4   :  { %3781 = vmatpush1.bf16.msra.mxu1 %v3780_v0  ;;  %3789 = vmatpush1.bf16.msra.mxu0 %v3788_v1  ;;  %v3848_v0 = vpack.c.bf16 %v2164_v55, %v2163_v58  ;;  %v2133_v1 = vld [vmem:[%s5783_s15 + $0x20] sm:$0xff]  ;;  %v3838_v62 = vpack.c.bf16 %v2160_v60, %v2159_v59  ;;  %v2226_v32 = vld [vmem:[%s5783_s15 + $0x308] sm:$0xff]  ;;  %v2195_v12 = vld [vmem:[%s5783_s15 + $0x210] sm:$0xff] }
 0x6d5   :  { %1705 = vmatprep.mubr.f32.mxu1 %v4091_v18  ;;  %1782 = vmatprep.mubr.f32.mxu0 %v4091_v18  ;;  %v3820_v11 = vpack.c.bf16 %v2134_v2, %v2133_v1  ;;  %v2144_v1 = vld [vmem:[%s5783_s15 + $0x78] sm:$0xff]  ;;  %v2225_v31 = vld [vmem:[%s5783_s15 + $0x300] sm:$0xff] }
 0x6d6   :  { %3783 = vmatprep.subr.bf16.mxu1 %v3782_v7  ;;  %3791 = vmatprep.subr.bf16.mxu0 %v3790_v8  ;;  %v2151_v7 = vld [vmem:[%s5783_s15 + $0xb0] sm:$0xff]  ;;  %v2152_v8 = vld [vmem:[%s5783_s15 + $0xb8] sm:$0xff] }
 0x6d7   :  { %3072 = vmatmul.mubr.msk.f32.gmra.mrb[24].mxu1 %vm308_vm0, %v4709_v54  ;;  %3074 = vmatmul.mubr.msk.f32.gmra.mrb[20].mxu0 %vm308_vm0, %v4709_v54  ;;  %v3822_v16 = vpack.c.bf16 %v2152_v8, %v2151_v7  ;;  %v2209_v7 = vld [vmem:[%s5783_s15 + $0x280] sm:$0xff]  ;;  %v2210_v8 = vld [vmem:[%s5783_s15 + $0x288] sm:$0xff] }
 0x6d8   :  { %3785 = vmatpush1.bf16.msra.mxu1 %v3784_v14  ;;  %3793 = vmatpush1.bf16.msra.mxu0 %v3792_v15  ;;  %v2135_v14 = vld [vmem:[%s5783_s15 + $0x30] sm:$0xff]  ;;  %v2136_v15 = vld [vmem:[%s5783_s15 + $0x38] sm:$0xff]  ;;  %v3874_v10 = vpack.c.bf16 %v2210_v8, %v2209_v7  ;;  %v2198_v7 = vld [vmem:[%s5783_s15 + $0x228] sm:$0xff] }
 0x6d9   :  { %1853 = vmatprep.mubr.f32.mxu1 %v4091_v18  ;;  %1930 = vmatprep.mubr.f32.mxu0 %v4091_v18  ;;  %v3824_v25 = vpack.c.bf16 %v2136_v15, %v2135_v14  ;;  %v1395_v14 = vlaneseq }
 0x6da   :  { %3795 = vmatprep.subr.bf16.mxu1 %v3794_v21  ;;  %3803 = vmatprep.subr.bf16.mxu0 %v3802_v22  ;;  %v2153_v21 = vld [vmem:[%s5783_s15 + $0xc0] sm:$0xff]  ;;  %v2154_v22 = vld [vmem:[%s5783_s15 + $0xc8] sm:$0xff] }
 0x6db   :  { %3075 = vmatmul.mubr.msk.f32.vlgmr.msra.gmra.mrb[26].mxu1 %vm308_vm0, %v4678_v41  ;;  %3077 = vmatmul.mubr.msk.f32.vlgmr.msra.gmra.mrb[22].mxu0 %vm308_vm0, %v4678_v41  ;;  %v3826_v29 = vpack.c.bf16 %v2154_v22, %v2153_v21  ;;  %v5038_v15 = vshrl.u32 %v1395_v14, 7 }
 0x6dc   :  { %3797 = vmatpush1.bf16.msra.mxu1 %v3796_v27  ;;  %3805 = vmatpush1.bf16.msra.mxu0 %v3804_v28  ;;  %v2137_v27 = vld [vmem:[%s5783_s15 + $0x40] sm:$0xff]  ;;  %v2138_v28 = vld [vmem:[%s5783_s15 + $0x48] sm:$0xff] }
 0x6dd   :  { %1859 = vmatprep.mubr.f32.mxu1 %v4091_v18  ;;  %1936 = vmatprep.mubr.f32.mxu0 %v4091_v18  ;;  %v3828_v37 = vpack.c.bf16 %v2138_v28, %v2137_v27  ;;  %v1401_v20 = vsub.s32 1, %v5038_v15  ;;  %v1409_v21 = vsub.s32 3, %v5038_v15  ;;  %v2194_v27 = vld [vmem:[%s5783_s15 + $0x208] sm:$0xff]  ;;  %v1417_v28 = vsub.s32 5, %v5038_v15 }
 0x6de   :  { %3799 = vmatprep.subr.bf16.mxu1 %v3798_v33  ;;  %3807 = vmatprep.subr.bf16.mxu0 %v3806_v34  ;;  %v2155_v33 = vld [vmem:[%s5783_s15 + $0xd0] sm:$0xff]  ;;  %v2156_v34 = vld [vmem:[%s5783_s15 + $0xd8] sm:$0xff] }
 0x6df   :  { %3076 = vmatmul.mubr.msk.f32.gmra.mrb[28].mxu1 %vm308_vm0, %v4709_v54  ;;  %3078 = vmatmul.mubr.msk.f32.gmra.mrb[24].mxu0 %vm308_vm0, %v4709_v54  ;;  %v3830_v42 = vpack.c.bf16 %v2156_v34, %v2155_v33  ;;  %v1402_v24 = vrot.slane %v5045_v19, %v1401_v20  ;;  %v2211_v33 = vld [vmem:[%s5783_s15 + $0x290] sm:$0xff] }
 0x6e0   :  { %3801 = vmatpush1.bf16.msra.mxu1 %v3800_v39  ;;  %3809 = vmatpush1.bf16.msra.mxu0 %v3808_v40  ;;  %v2139_v39 = vld [vmem:[%s5783_s15 + $0x50] sm:$0xff]  ;;  %v2140_v40 = vld [vmem:[%s5783_s15 + $0x58] sm:$0xff] }
 0x6e1   :  { %2007 = vmatprep.mubr.f32.mxu1 %v4091_v18  ;;  %2084 = vmatprep.mubr.f32.mxu0 %v4091_v18  ;;  %v3832_v47 = vpack.c.bf16 %v2140_v40, %v2139_v39  ;;  %v2243_v39 = vld [vmem:[%s5783_s15 + $0x390] sm:$0xff]  ;;  %v2244_v40 = vld [vmem:[%s5783_s15 + $0x398] sm:$0xff] }
 0x6e2   :  { %3811 = vmatprep.subr.bf16.mxu1 %v3810_v44  ;;  %3843 = vmatprep.subr.bf16.mxu0 %v3842_v45  ;;  %v2171_v44 = vld [vmem:[%s5783_s15 + $0x150] sm:$0xff]  ;;  %v2172_v45 = vld [vmem:[%s5783_s15 + $0x158] sm:$0xff] }
 0x6e3   :  { %3079 = vmatmul.mubr.msk.f32.vlgmr.msra.gmra.mrb[30].mxu1 %vm308_vm0, %v4678_v41  ;;  %3081 = vmatmul.mubr.msk.f32.vlgmr.msra.gmra.mrb[26].mxu0 %vm308_vm0, %v4678_v41  ;;  %v3864_v49 = vpack.c.bf16 %v2172_v45, %v2171_v44  ;;  %v1425_v44 = vsub.s32 7, %v5038_v15 }
 0x6e4   :  { %2013 = vmatprep.mubr.f32.mxu1 %v4091_v18  ;;  %2090 = vmatprep.mubr.f32.mxu0 %v4091_v18  ;;  %v2165_v18 = vld [vmem:[%s5783_s15 + $0x120] sm:$0xff] }
 0x6e5   :  { %3813 = vmatpush3.bf16.msra.mxu1 %v3812_v50  ;;  %3845 = vmatpush3.bf16.msra.mxu0 %v3844_v51  ;;  %v3852_v13 = vpack.c.bf16 %v2166_v6, %v2165_v18  ;;  %v2141_v50 = vld [vmem:[%s5783_s15 + $0x60] sm:$0xff]  ;;  %v3834_v51 = vpack.c.bf16 %v2158_v3, %v2157_v46  ;;  %v2176_v18 = vld [vmem:[%s5783_s15 + $0x178] sm:$0xff]  ;;  %v3908_v46 = vpack.c.bf16 %v2226_v32, %v2225_v31  ;;  %v5140_v31 = vld [vmem:[%s5784_s14 + $0x8] sm:$0xff] }
 0x6e6   :  { %3815 = vmatprep.subr.bf16.mxu1 %v3814_v56  ;;  %3847 = vmatprep.subr.bf16.mxu0 %v3846_v57  ;;  %v2173_v56 = vld [vmem:[%s5783_s15 + $0x160] sm:$0xff]  ;;  %v2174_v57 = vld [vmem:[%s5783_s15 + $0x168] sm:$0xff]  ;;  %v3836_v58 = vpack.c.bf16 %v2142_v53, %v2141_v50  ;;  %v5090_v3 = vrot.slane %v5045_v19, %v1417_v28  ;;  %v2196_v53 = vld [vmem:[%s5783_s15 + $0x218] sm:$0xff] }
 0x6e7   :  { %3080 = vmatmul.mubr.msk.f32.gmra.mrb[32].mxu1 %vm308_vm0, %v4709_v54  ;;  %3082 = vmatmul.mubr.msk.f32.gmra.mrb[28].mxu0 %vm308_vm0, %v4709_v54  ;;  %v3868_v55 = vpack.c.bf16 %v2174_v57, %v2173_v56  ;;  %v2227_v56 = vld [vmem:[%s5783_s15 + $0x310] sm:$0xff] }
 0x6e8   :  { %v2215_v32 = vld [vmem:[%s5783_s15 + $0x2b0] sm:$0xff] }
 0x6e9   :  { %3817 = vmatpush3.bf16.msra.mxu1 %v3816_v63  ;;  %3849 = vmatpush3.bf16.msra.mxu0 %v3848_v0  ;;  %v2192_v63 = vld [vmem:[%s5783_s15 + $0x1f8] sm:$0xff]  ;;  %v2143_v0 = vld [vmem:[%s5783_s15 + $0x70] sm:$0xff] }
 0x6ea   :  { %3819 = vmatprep.subr.bf16.mxu1 %v3818_v4  ;;  %3851 = vmatprep.subr.bf16.mxu0 %v3850_v5  ;;  %v3870_v2 = vpack.c.bf16 %v2192_v63, %v2191_v61  ;;  %v3840_v4 = vpack.c.bf16 %v2144_v1, %v2143_v0  ;;  %v2175_v5 = vld [vmem:[%s5783_s15 + $0x170] sm:$0xff]  ;;  %v2213_v63 = vld [vmem:[%s5783_s15 + $0x2a0] sm:$0xff] }
 0x6eb   :  { %v3872_v6 = vpack.c.bf16 %v2176_v18, %v2175_v5  ;;  %v2245_v5 = vld [vmem:[%s5783_s15 + $0x3a0] sm:$0xff]  ;;  %v2246_v18 = vld [vmem:[%s5783_s15 + $0x3a8] sm:$0xff] }
 0x6ed   :  { %3821 = vmatpush3.bf16.msra.mxu1 %v3820_v11  ;;  %3853 = vmatpush3.bf16.msra.mxu0 %v3852_v13  ;;  %v2242_v11 = vld [vmem:[%s5783_s15 + $0x388] sm:$0xff] }
 0x6ee   :  { %3823 = vmatprep.subr.bf16.mxu1 %v3822_v16  ;;  %3855 = vmatprep.subr.bf16.mxu0 %v3854_v17  ;;  %v3906_v13 = vpack.c.bf16 %v2242_v11, %v2241_v9  ;;  %v1397_v16 = vsub.s32 0, %v5038_v15  ;;  %v1405_v17 = vsub.s32 2, %v5038_v15 }
 0x6f0   :  { %v1398_v22 = vrot.slane %v5045_v19, %v1397_v16  ;;  %v1406_v23 = vrot.slane %v5045_v19, %v1405_v17 }
 0x6f1   :  { %3825 = vmatpush3.bf16.msra.mxu1 %v3824_v25  ;;  %3857 = vmatpush3.bf16.msra.mxu0 %v3856_v26  ;;  %v1410_v25 = vrot.slane %v5045_v19, %v1409_v21  ;;  %v2193_v26 = vld [vmem:[%s5783_s15 + $0x200] sm:$0xff] }
 0x6f2   :  { %3827 = vmatprep.subr.bf16.mxu1 %v3826_v29  ;;  %3859 = vmatprep.subr.bf16.mxu0 %v3858_v30  ;;  %v3876_v45 = vpack.c.bf16 %v2194_v27, %v2193_v26 }
 0x6f5   :  { %3829 = vmatpush3.bf16.msra.mxu1 %v3828_v37  ;;  %3861 = vmatpush3.bf16.msra.mxu0 %v3860_v38  ;;  %v2212_v38 = vld [vmem:[%s5783_s15 + $0x298] sm:$0xff] }
 0x6f6   :  { %3831 = vmatprep.subr.bf16.mxu1 %v3830_v42  ;;  %3863 = vmatprep.subr.bf16.mxu0 %v3862_v43 }
 0x6f9   :  { %3833 = vmatpush3.bf16.msra.mxu1 %v3832_v47  ;;  %3865 = vmatpush3.bf16.msra.mxu0 %v3864_v49 }
 0x6fa   :  { %3835 = vmatprep.subr.bf16.mxu1 %v3834_v51  ;;  %3867 = vmatprep.subr.bf16.mxu0 %v3866_v52  ;;  %v3878_v51 = vpack.c.bf16 %v2212_v38, %v2211_v33  ;;  %v3910_v52 = vpack.c.bf16 %v2244_v40, %v2243_v39 }
 0x6fd   :  { %3837 = vmatpush3.bf16.msra.mxu1 %v3836_v58  ;;  %3869 = vmatpush3.bf16.msra.mxu0 %v3868_v55 }
 0x6fe   :  { %3839 = vmatprep.subr.bf16.mxu1 %v3838_v62  ;;  %3871 = vmatprep.subr.bf16.mxu0 %v3870_v2  ;;  %v2228_v62 = vld [vmem:[%s5783_s15 + $0x318] sm:$0xff]  ;;  %v5110_v2 = vrot.slane %v5045_v19, %v1425_v44 }
 0x6ff   :  { %v3912_v14 = vpack.c.bf16 %v2228_v62, %v2227_v56  ;;  %v2217_v56 = vld [vmem:[%s5783_s15 + $0x2c0] sm:$0xff] }
 0x700   :  { %v2201_v62 = vld [vmem:[%s5783_s15 + $0x240] sm:$0xff] }
 0x701   :  { %3841 = vmatpush3.bf16.msra.mxu1 %v3840_v4  ;;  %3873 = vmatpush3.bf16.msra.mxu0 %v3872_v6  ;;  %v2214_v4 = vld [vmem:[%s5783_s15 + $0x2a8] sm:$0xff]  ;;  %v2197_v6 = vld [vmem:[%s5783_s15 + $0x220] sm:$0xff] }
 0x702   :  { %3875 = vmatprep.subr.bf16.mxu1 %v3874_v10  ;;  %3907 = vmatprep.subr.bf16.mxu0 %v3906_v13  ;;  %v3880_v13 = vpack.c.bf16 %v2196_v53, %v2195_v12  ;;  %v2200_v12 = vld [vmem:[%s5783_s15 + $0x238] sm:$0xff] }
 0x703   :  { %v2232_v53 = vld [vmem:[%s5783_s15 + $0x338] sm:$0xff] }
 0x79e   :  { %v1547_v29 = vpop.f32.mrb[18].mxu1  ;;  %v1624_v30 = vpop.f32.mrb[14].mxu0 }
 0x79f   :  { %v1548_v34 = vadd.f32 %v1547_v29, %v1398_v22  ;;  %v1625_v35 = vadd.f32 %v1624_v30, %v1406_v23  ;;  %v1549_v36 = vpop.f32.mrb[19].mxu1  ;;  %v1626_v37 = vpop.f32.mrb[15].mxu0  ;;  %v3882_v29 = vpack.c.bf16 %v2214_v4, %v2213_v63  ;;  %v3914_v30 = vpack.c.bf16 %v2246_v18, %v2245_v5  ;;  %v2202_v63 = vld [vmem:[%s5783_s15 + $0x248] sm:$0xff] }
 0x7a0   :  { %v1550_v42 = vadd.f32 %v1549_v36, %v1402_v24  ;;  %v1627_v43 = vadd.f32 %v1626_v37, %v1410_v25  ;;  %v2247_v36 = vld [vmem:[%s5783_s15 + $0x3b0] sm:$0xff]  ;;  %v2248_v37 = vld [vmem:[%s5783_s15 + $0x3b8] sm:$0xff] }
 0x7a1   :  { %v2097_v57 = vmax.f32 %v1548_v34, 0.0  ;;  %v2099_v58 = vmax.f32 %v1625_v35, 0.0  ;;  %v2216_v35 = vld [vmem:[%s5783_s15 + $0x2b8] sm:$0xff] }
 0x7a2   :  { %v2098_v48 = vmax.f32 %v1550_v42, 0.0  ;;  %v2100_v47 = vmax.f32 %v1627_v43, 0.0  ;;  %v1553_v49 = vpop.f32.mrb[20].mxu1  ;;  %v1630_v50 = vpop.f32.mrb[16].mxu0  ;;  %v3884_v43 = vpack.c.bf16 %v2198_v7, %v2197_v6  ;;  %v2233_v6 = vld [vmem:[%s5783_s15 + $0x340] sm:$0xff]  ;;  %v2234_v7 = vld [vmem:[%s5783_s15 + $0x348] sm:$0xff] }
 0x7a3   :  { %v1554_v55 = vadd.f32 %v1553_v49, %v1398_v22  ;;  %v1631_v59 = vadd.f32 %v1630_v50, %v1406_v23  ;;  %v1555_v60 = vpop.f32.mrb[21].mxu1  ;;  %v1632_v61 = vpop.f32.mrb[17].mxu0  ;;  %v2229_v22 = vld [vmem:[%s5783_s15 + $0x320] sm:$0xff]  ;;  %v2230_v23 = vld [vmem:[%s5783_s15 + $0x328] sm:$0xff]  ;;  %v1438_v49 = vrot.slane %v5140_v31, %v1405_v17  ;;  %v3886_v50 = vpack.c.bf16 %v2216_v35, %v2215_v32  ;;  %v2203_v32 = vld [vmem:[%s5783_s15 + $0x250] sm:$0xff] }
 0x7a4   :  { %v1556_v0 = vadd.f32 %v1555_v60, %v1402_v24  ;;  %v1633_v1 = vadd.f32 %v1632_v61, %v1410_v25  ;;  %2456 = vmatprep.mubr.f32.mxu1 %v2098_v48  ;;  %2531 = vmatprep.mubr.f32.mxu0 %v2100_v47  ;;  %v2218_v17 = vld [vmem:[%s5783_s15 + $0x2c8] sm:$0xff] }
 0x7a5   :  { %2457 = vmatmul.mubr.f32.vlgmr.msra.gmra.mrb[34].mxu1 %v2097_v57  ;;  %2532 = vmatmul.mubr.f32.vlgmr.msra.gmra.mrb[30].mxu0 %v2099_v58  ;;  %v2113_v24 = vmax.f32 %v1554_v55, 0.0  ;;  %v2115_v25 = vmax.f32 %v1631_v59, 0.0  ;;  %v2249_v57 = vld [vmem:[%s5783_s15 + $0x3c0] sm:$0xff]  ;;  %v2250_v58 = vld [vmem:[%s5783_s15 + $0x3c8] sm:$0xff]  ;;  %v3890_v5 = vpack.c.bf16 %v2218_v17, %v2217_v56 }
 0x7a6   :  { %v2114_v8 = vmax.f32 %v1556_v0, 0.0  ;;  %v2116_v9 = vmax.f32 %v1633_v1, 0.0  ;;  %3877 = vmatpush3.bf16.msra.mxu1 %v3876_v45  ;;  %3909 = vmatpush3.bf16.msra.mxu0 %v3908_v46  ;;  %v5127_v10 = vpop.f32.mrb[22].mxu1  ;;  %v5129_v11 = vpop.f32.mrb[18].mxu0  ;;  %v3916_v45 = vpack.c.bf16 %v2230_v23, %v2229_v22  ;;  %v2199_v46 = vld [vmem:[%s5783_s15 + $0x230] sm:$0xff]  ;;  %v3922_v18 = vpack.c.bf16 %v2250_v58, %v2249_v57  ;;  %v2252_v23 = vld [vmem:[%s5783_s15 + $0x3d8] sm:$0xff] }
 0x7a7   :  { %v1703_v26 = vpop.f32.mrb[23].mxu1  ;;  %v1780_v27 = vpop.f32.mrb[19].mxu0  ;;  %3879 = vmatprep.subr.bf16.mxu1 %v3878_v51  ;;  %3911 = vmatprep.subr.bf16.mxu0 %v3910_v52  ;;  %v3918_v51 = vpack.c.bf16 %v2248_v37, %v2247_v36  ;;  %v2231_v52 = vld [vmem:[%s5783_s15 + $0x330] sm:$0xff]  ;;  %v3888_v60 = vpack.c.bf16 %v2200_v12, %v2199_v46  ;;  %v2222_v46 = vld [vmem:[%s5783_s15 + $0x2e8] sm:$0xff]  ;;  %v1450_v12 = vrot.slane %v5140_v31, %v1417_v28  ;;  %v2205_v28 = vld [vmem:[%s5783_s15 + $0x260] sm:$0xff] }
 0x7a8   :  { %v1704_v33 = vadd.f32 %v1703_v26, %v5090_v3  ;;  %v1781_v34 = vadd.f32 %v1780_v27, %v5110_v2  ;;  %2461 = vmatprep.mubr.f32.mxu1 %v2114_v8  ;;  %2536 = vmatprep.mubr.f32.mxu0 %v2116_v9  ;;  %v3920_v61 = vpack.c.bf16 %v2232_v53, %v2231_v52  ;;  %v2219_v8 = vld [vmem:[%s5783_s15 + $0x2d0] sm:$0xff]  ;;  %v1413_v9 = vsub.s32 4, %v5038_v15  ;;  %v2237_v58 = vld [vmem:[%s5783_s15 + $0x360] sm:$0xff] }
 0x7a9   :  { %2462 = vmatmul.mubr.f32.gmra.mrb[36].mxu1 %v2113_v24  ;;  %2537 = vmatmul.mubr.f32.gmra.mrb[32].mxu0 %v2115_v25  ;;  %v2251_v22 = vld [vmem:[%s5783_s15 + $0x3d0] sm:$0xff]  ;;  %v3892_v24 = vpack.c.bf16 %v2202_v63, %v2201_v62  ;;  %v3924_v27 = vpack.c.bf16 %v2234_v7, %v2233_v6  ;;  %v2224_v6 = vld [vmem:[%s5783_s15 + $0x2f8] sm:$0xff] }
 0x7aa   :  { %v2102_v38 = vmax.f32 %v1704_v33, 0.0  ;;  %v2104_v39 = vmax.f32 %v1781_v34, 0.0  ;;  %3881 = vmatpush3.bf16.msra.mxu1 %v3880_v13  ;;  %3913 = vmatpush3.bf16.msra.mxu0 %v3912_v14  ;;  %v5156_v40 = vpop.f32.mrb[24].mxu1  ;;  %v5158_v42 = vpop.f32.mrb[20].mxu0  ;;  %v1421_v13 = vsub.s32 6, %v5038_v15  ;;  %v2220_v14 = vld [vmem:[%s5783_s15 + $0x2d8] sm:$0xff] }
 0x7ab   :  { %v5166_v48 = vpop.f32.mrb[25].mxu1  ;;  %v5168_v47 = vpop.f32.mrb[21].mxu0  ;;  %3883 = vmatprep.subr.bf16.mxu1 %v3882_v29  ;;  %3915 = vmatprep.subr.bf16.mxu0 %v3914_v30  ;;  %v1446_v29 = vrot.slane %v5140_v31, %v1413_v9  ;;  %v2204_v33 = vld [vmem:[%s5783_s15 + $0x258] sm:$0xff]  ;;  %v2235_v34 = vld [vmem:[%s5783_s15 + $0x350] sm:$0xff]  ;;  %v2338_v15 = vld [vmem:[%s5783_s15 + $0x688] sm:$0xff] }
 0x7ac   :  { %2606 = vmatprep.mubr.f32.mxu1 %v2102_v38  ;;  %2681 = vmatprep.mubr.f32.mxu0 %v2104_v39  ;;  %v1454_v30 = vrot.slane %v5140_v31, %v1421_v13  ;;  %v3894_v38 = vpack.c.bf16 %v2220_v14, %v2219_v8  ;;  %v3926_v39 = vpack.c.bf16 %v2252_v23, %v2251_v22  ;;  %v2255_v14 = vld [vmem:[%s5783_s15 + $0x3f0] sm:$0xff]  ;;  %v2256_v22 = vld [vmem:[%s5783_s15 + $0x3f8] sm:$0xff] }
 0x7ad   :  { %v3896_v56 = vpack.c.bf16 %v2204_v33, %v2203_v32  ;;  %v1414_v23 = vrot.slane %v5045_v19, %v1413_v9  ;;  %v2239_v9 = vld [vmem:[%s5783_s15 + $0x370] sm:$0xff] }
 0x7ae   :  { %3885 = vmatpush3.bf16.msra.mxu1 %v3884_v43  ;;  %3917 = vmatpush3.bf16.msra.mxu0 %v3916_v45  ;;  %v5191_v55 = vpop.f32.mrb[26].mxu1  ;;  %v1932_v59 = vpop.f32.mrb[22].mxu0  ;;  %v2236_v43 = vld [vmem:[%s5783_s15 + $0x358] sm:$0xff]  ;;  %v2221_v45 = vld [vmem:[%s5783_s15 + $0x2e0] sm:$0xff] }
 0x7af   :  { %v5199_v0 = vadd.f32 %v1932_v59, %v1438_v49  ;;  %v5201_v1 = vpop.f32.mrb[27].mxu1  ;;  %v5203_v4 = vpop.f32.mrb[23].mxu0  ;;  %3887 = vmatprep.subr.bf16.mxu1 %v3886_v50  ;;  %3919 = vmatprep.subr.bf16.mxu0 %v3918_v51  ;;  %v2253_v50 = vld [vmem:[%s5783_s15 + $0x3e0] sm:$0xff]  ;;  %v2254_v51 = vld [vmem:[%s5783_s15 + $0x3e8] sm:$0xff]  ;;  %v3928_v17 = vpack.c.bf16 %v2236_v43, %v2235_v34  ;;  %v3898_v57 = vpack.c.bf16 %v2222_v46, %v2221_v45 }
 0x7b0   :  { %v3930_v63 = vpack.c.bf16 %v2254_v51, %v2253_v50  ;;  %v3934_v46 = vpack.c.bf16 %v2256_v22, %v2255_v14  ;;  %v2240_v50 = vld [vmem:[%s5783_s15 + $0x378] sm:$0xff]  ;;  %v2273_v51 = vld [vmem:[%s5783_s15 + $0x480] sm:$0xff]  ;;  %v5364_v22 = vrot.slane %v5140_v31, %v1401_v20  ;;  %v2259_v20 = vld [vmem:[%s5783_s15 + $0x410] sm:$0xff] }
 0x7b1   :  { %v2308_v14 = vld [vmem:[%s5783_s15 + $0x598] sm:$0xff] }
 0x7b2   :  { %3889 = vmatpush3.bf16.msra.mxu1 %v3888_v60  ;;  %3921 = vmatpush3.bf16.msra.mxu0 %v3920_v61  ;;  %v5225_v25 = vpop.f32.mrb[28].mxu1  ;;  %v1938_v26 = vpop.f32.mrb[24].mxu0 }
 0x7b3   :  { %v5238_v35 = vadd.f32 %v1938_v26, %v1438_v49  ;;  %v5240_v36 = vpop.f32.mrb[29].mxu1  ;;  %v5242_v37 = vpop.f32.mrb[25].mxu0  ;;  %3891 = vmatprep.subr.bf16.mxu1 %v3890_v5  ;;  %3923 = vmatprep.subr.bf16.mxu0 %v3922_v18  ;;  %v1458_v49 = vrot.slane %v5140_v31, %v1425_v44  ;;  %v2206_v44 = vld [vmem:[%s5783_s15 + $0x268] sm:$0xff]  ;;  %v2223_v18 = vld [vmem:[%s5783_s15 + $0x2f0] sm:$0xff] }
 0x7b4   :  { %v2238_v5 = vld [vmem:[%s5783_s15 + $0x368] sm:$0xff]  ;;  %v3900_v32 = vpack.c.bf16 %v2206_v44, %v2205_v28  ;;  %v3902_v34 = vpack.c.bf16 %v2224_v6, %v2223_v18  ;;  %v2289_v44 = vld [vmem:[%s5783_s15 + $0x500] sm:$0xff]  ;;  %v2276_v18 = vld [vmem:[%s5783_s15 + $0x498] sm:$0xff] }
 0x7b5   :  { %v3932_v33 = vpack.c.bf16 %v2238_v5, %v2237_v58  ;;  %v2290_v58 = vld [vmem:[%s5783_s15 + $0x508] sm:$0xff]  ;;  %v2307_v6 = vld [vmem:[%s5783_s15 + $0x590] sm:$0xff] }
 0x7b6   :  { %3893 = vmatpush3.bf16.msra.mxu1 %v3892_v24  ;;  %3925 = vmatpush3.bf16.msra.mxu0 %v3924_v27  ;;  %v2009_v52 = vpop.f32.mrb[30].mxu1  ;;  %v2086_v53 = vpop.f32.mrb[26].mxu0  ;;  %v1422_v24 = vrot.slane %v5045_v19, %v1421_v13 }
 0x7b7   :  { %v5274_v59 = vadd.f32 %v2009_v52, %v1446_v29  ;;  %v5276_v60 = vadd.f32 %v2086_v53, %v1454_v30  ;;  %v2011_v61 = vpop.f32.mrb[31].mxu1  ;;  %v2088_v62 = vpop.f32.mrb[27].mxu0  ;;  %3895 = vmatprep.subr.bf16.mxu1 %v3894_v38  ;;  %3927 = vmatprep.subr.bf16.mxu0 %v3926_v39  ;;  %v2207_v38 = vld [vmem:[%s5783_s15 + $0x270] sm:$0xff]  ;;  %v2208_v39 = vld [vmem:[%s5783_s15 + $0x278] sm:$0xff]  ;;  %v2305_v53 = vld [vmem:[%s5783_s15 + $0x580] sm:$0xff] }
 0x7b8   :  { %v5287_v7 = vadd.f32 %v2011_v61, %v1450_v12  ;;  %v5289_v8 = vadd.f32 %v2088_v62, %v1458_v49  ;;  %v2275_v61 = vld [vmem:[%s5783_s15 + $0x490] sm:$0xff]  ;;  %v1702_v62 = vadd.f32 %v5127_v10, %v1414_v23  ;;  %v1710_v10 = vadd.f32 %v5166_v48, %v5090_v3 }
 0x7ba   :  { %3897 = vmatpush3.bf16.msra.mxu1 %v3896_v56  ;;  %3929 = vmatpush3.bf16.msra.mxu0 %v3928_v17  ;;  %v2015_v26 = vpop.f32.mrb[32].mxu1  ;;  %v2092_v27 = vpop.f32.mrb[28].mxu0  ;;  %v2306_v56 = vld [vmem:[%s5783_s15 + $0x588] sm:$0xff]  ;;  %v2257_v17 = vld [vmem:[%s5783_s15 + $0x400] sm:$0xff]  ;;  %v2101_v3 = vmax.f32 %v1702_v62, 0.0  ;;  %v2312_v62 = vld [vmem:[%s5783_s15 + $0x5b8] sm:$0xff] }
 0x7bb   :  { %v5308_v19 = vadd.f32 %v2015_v26, %v1446_v29  ;;  %v5310_v13 = vadd.f32 %v2092_v27, %v1454_v30  ;;  %v2017_v43 = vpop.f32.mrb[33].mxu1  ;;  %v2094_v45 = vpop.f32.mrb[29].mxu0  ;;  %3899 = vmatprep.subr.bf16.mxu1 %v3898_v57  ;;  %3931 = vmatprep.subr.bf16.mxu0 %v3930_v63  ;;  %v2274_v29 = vld [vmem:[%s5783_s15 + $0x488] sm:$0xff]  ;;  %v1779_v63 = vadd.f32 %v5129_v11, %v1422_v24 }
 0x7bc   :  { %v5321_v52 = vadd.f32 %v2017_v43, %v1450_v12  ;;  %v5323_v30 = vadd.f32 %v2094_v45, %v1458_v49  ;;  %v2258_v57 = vld [vmem:[%s5783_s15 + $0x408] sm:$0xff]  ;;  %v3904_v12 = vpack.c.bf16 %v2208_v39, %v2207_v38  ;;  %v3936_v49 = vpack.c.bf16 %v2240_v50, %v2239_v9 }
 0x7bd   :  { %v3938_v28 = vpack.c.bf16 %v2274_v29, %v2273_v51  ;;  %v3970_v5 = vpack.c.bf16 %v2306_v56, %v2305_v53  ;;  %v1787_v11 = vadd.f32 %v5168_v47, %v5110_v2  ;;  %v5369_v26 = vrot.slane %v5140_v31, %v1409_v21  ;;  %v2260_v21 = vld [vmem:[%s5783_s15 + $0x418] sm:$0xff]  ;;  %v2310_v43 = vld [vmem:[%s5783_s15 + $0x5a8] sm:$0xff]  ;;  %v2261_v29 = vld [vmem:[%s5783_s15 + $0x420] sm:$0xff] }
 0x7be   :  { %3901 = vmatpush3.bf16.msra.mxu1 %v3900_v32  ;;  %3933 = vmatpush3.bf16.msra.mxu0 %v3932_v33  ;;  %v3940_v27 = vpack.c.bf16 %v2258_v57, %v2257_v17  ;;  %v3972_v32 = vpack.c.bf16 %v2290_v58, %v2289_v44  ;;  %v3942_v33 = vpack.c.bf16 %v2276_v18, %v2275_v61  ;;  %v2103_v48 = vmax.f32 %v1779_v63, 0.0  ;;  %v2262_v53 = vld [vmem:[%s5783_s15 + $0x428] sm:$0xff]  ;;  %v2279_v44 = vld [vmem:[%s5783_s15 + $0x4b0] sm:$0xff]  ;;  %v2280_v58 = vld [vmem:[%s5783_s15 + $0x4b8] sm:$0xff] }
 0x7bf   :  { %3903 = vmatprep.subr.bf16.mxu1 %v3902_v34  ;;  %3935 = vmatprep.subr.bf16.mxu0 %v3934_v46  ;;  %v3974_v34 = vpack.c.bf16 %v2308_v14, %v2307_v6  ;;  %v1708_v2 = vadd.f32 %v5156_v40, %v1414_v23  ;;  %v1785_v47 = vadd.f32 %v5158_v42, %v1422_v24  ;;  %v2118_v38 = vmax.f32 %v1710_v10, 0.0  ;;  %v2291_v42 = vld [vmem:[%s5783_s15 + $0x510] sm:$0xff]  ;;  %v2292_v23 = vld [vmem:[%s5783_s15 + $0x518] sm:$0xff]  ;;  %v2277_v24 = vld [vmem:[%s5783_s15 + $0x4a0] sm:$0xff] }
 0x7c0   :  { %v2120_v39 = vmax.f32 %v1787_v11, 0.0  ;;  %v1858_v9 = vadd.f32 %v5201_v1, %v5364_v22  ;;  %v1935_v40 = vadd.f32 %v5203_v4, %v5369_v26  ;;  %v2278_v1 = vld [vmem:[%s5783_s15 + $0x4a8] sm:$0xff]  ;;  %v2309_v4 = vld [vmem:[%s5783_s15 + $0x5a0] sm:$0xff]  ;;  %v3944_v50 = vpack.c.bf16 %v2260_v21, %v2259_v20  ;;  %v2311_v61 = vld [vmem:[%s5783_s15 + $0x5b0] sm:$0xff] }
 0x7c1   :  { %v2117_v45 = vmax.f32 %v1708_v2, 0.0  ;;  %v2119_v46 = vmax.f32 %v1785_v47, 0.0  ;;  %v3976_v51 = vpack.c.bf16 %v2292_v23, %v2291_v42  ;;  %v3946_v57 = vpack.c.bf16 %v2278_v1, %v2277_v24  ;;  %v2263_v18 = vld [vmem:[%s5783_s15 + $0x430] sm:$0xff]  ;;  %v2264_v6 = vld [vmem:[%s5783_s15 + $0x438] sm:$0xff]  ;;  %v2265_v47 = vld [vmem:[%s5783_s15 + $0x440] sm:$0xff] }
 0x7c2   :  { %3905 = vmatpush3.bf16.msra.mxu1 %v3904_v12  ;;  %3937 = vmatpush3.bf16.msra.mxu0 %v3936_v49  ;;  %v2106_v56 = vmax.f32 %v1858_v9, 0.0  ;;  %v2108_v17 = vmax.f32 %v1935_v40, 0.0  ;;  %v3978_v12 = vpack.c.bf16 %v2310_v43, %v2309_v4  ;;  %v2293_v49 = vld [vmem:[%s5783_s15 + $0x520] sm:$0xff]  ;;  %v3948_v63 = vpack.c.bf16 %v2262_v53, %v2261_v29  ;;  %v2295_v11 = vld [vmem:[%s5783_s15 + $0x530] sm:$0xff]  ;;  %v2266_v20 = vld [vmem:[%s5783_s15 + $0x448] sm:$0xff] }
 0x7c3   :  { %3939 = vmatprep.subr.bf16.mxu1 %v3938_v28  ;;  %3971 = vmatprep.subr.bf16.mxu0 %v3970_v5  ;;  %v2294_v28 = vld [vmem:[%s5783_s15 + $0x528] sm:$0xff]  ;;  %v3950_v14 = vpack.c.bf16 %v2280_v58, %v2279_v44  ;;  %v3982_v10 = vpack.c.bf16 %v2312_v62, %v2311_v61  ;;  %v2283_v40 = vld [vmem:[%s5783_s15 + $0x4d0] sm:$0xff]  ;;  %v2284_v42 = vld [vmem:[%s5783_s15 + $0x4d8] sm:$0xff]  ;;  %v3956_v1 = vpack.c.bf16 %v2266_v20, %v2265_v47 }
 0x7c4   :  { %v3980_v5 = vpack.c.bf16 %v2294_v28, %v2293_v49  ;;  %v2298_v9 = vld [vmem:[%s5783_s15 + $0x548] sm:$0xff]  ;;  %v2315_v23 = vld [vmem:[%s5783_s15 + $0x5d0] sm:$0xff]  ;;  %v2316_v24 = vld [vmem:[%s5783_s15 + $0x5d8] sm:$0xff] }
 0x7c5   :  { %2607 = vmatmul.mubr.f32.vlgmr.msra.gmra.mrb[38].mxu1 %v2101_v3  ;;  %2682 = vmatmul.mubr.f32.vlgmr.msra.gmra.mrb[34].mxu0 %v2103_v48  ;;  %v2314_v3 = vld [vmem:[%s5783_s15 + $0x5c8] sm:$0xff]  ;;  %v3952_v48 = vpack.c.bf16 %v2264_v6, %v2263_v18  ;;  %v2267_v43 = vld [vmem:[%s5783_s15 + $0x450] sm:$0xff]  ;;  %v2300_v29 = vld [vmem:[%s5783_s15 + $0x558] sm:$0xff] }
 0x7c6   :  { %2611 = vmatprep.mubr.f32.mxu1 %v2118_v38  ;;  %2686 = vmatprep.mubr.f32.mxu0 %v2120_v39  ;;  %v2297_v39 = vld [vmem:[%s5783_s15 + $0x540] sm:$0xff]  ;;  %v2270_v44 = vld [vmem:[%s5783_s15 + $0x468] sm:$0xff]  ;;  %v2288_v18 = vld [vmem:[%s5783_s15 + $0x4f8] sm:$0xff] }
 0x7c7   :  { %3941 = vmatpush3.bf16.msra.mxu1 %v3940_v27  ;;  %3973 = vmatpush3.bf16.msra.mxu0 %v3972_v32  ;;  %v2296_v27 = vld [vmem:[%s5783_s15 + $0x538] sm:$0xff]  ;;  %v2281_v32 = vld [vmem:[%s5783_s15 + $0x4c0] sm:$0xff]  ;;  %v3988_v4 = vpack.c.bf16 %v2298_v9, %v2297_v39  ;;  %v2319_v6 = vld [vmem:[%s5783_s15 + $0x5f0] sm:$0xff] }
 0x7c8   :  { %3943 = vmatprep.subr.bf16.mxu1 %v3942_v33  ;;  %3975 = vmatprep.subr.bf16.mxu0 %v3974_v34  ;;  %v2282_v33 = vld [vmem:[%s5783_s15 + $0x4c8] sm:$0xff]  ;;  %v2313_v34 = vld [vmem:[%s5783_s15 + $0x5c0] sm:$0xff]  ;;  %v3984_v2 = vpack.c.bf16 %v2296_v27, %v2295_v11  ;;  %v2271_v27 = vld [vmem:[%s5783_s15 + $0x470] sm:$0xff] }
 0x7c9   :  { %2612 = vmatmul.mubr.f32.gmra.mrb[40].mxu1 %v2117_v45  ;;  %2687 = vmatmul.mubr.f32.gmra.mrb[36].mxu0 %v2119_v46  ;;  %v3954_v21 = vpack.c.bf16 %v2282_v33, %v2281_v32  ;;  %v3986_v38 = vpack.c.bf16 %v2314_v3, %v2313_v34  ;;  %v2268_v45 = vld [vmem:[%s5783_s15 + $0x458] sm:$0xff]  ;;  %v3958_v46 = vpack.c.bf16 %v2284_v42, %v2283_v40  ;;  %v2285_v53 = vld [vmem:[%s5783_s15 + $0x4e0] sm:$0xff]  ;;  %v2322_v42 = vld [vmem:[%s5783_s15 + $0x608] sm:$0xff] }
 0x7ca   :  { %2756 = vmatprep.mubr.f32.mxu1 %v2106_v56  ;;  %2831 = vmatprep.mubr.f32.mxu0 %v2108_v17  ;;  %v2286_v56 = vld [vmem:[%s5783_s15 + $0x4e8] sm:$0xff]  ;;  %v2317_v17 = vld [vmem:[%s5783_s15 + $0x5e0] sm:$0xff]  ;;  %v2272_v32 = vld [vmem:[%s5783_s15 + $0x478] sm:$0xff]  ;;  %v1430_v33 = vrot.slane %v5140_v31, %v1397_v16 }
 0x7cb   :  { %3945 = vmatpush3.bf16.msra.mxu1 %v3944_v50  ;;  %3977 = vmatpush3.bf16.msra.mxu0 %v3976_v51  ;;  %v3990_v50 = vpack.c.bf16 %v2316_v24, %v2315_v23  ;;  %v2299_v51 = vld [vmem:[%s5783_s15 + $0x550] sm:$0xff]  ;;  %v2269_v28 = vld [vmem:[%s5783_s15 + $0x460] sm:$0xff]  ;;  %v3962_v58 = vpack.c.bf16 %v2286_v56, %v2285_v53  ;;  %v2370_v31 = vld [vmem:[%s5783_s15 + $0x788] sm:$0xff]  ;;  %v3968_v20 = vpack.c.bf16 %v2272_v32, %v2271_v27 }
 0x7cc   :  { %3947 = vmatprep.subr.bf16.mxu1 %v3946_v57  ;;  %3979 = vmatprep.subr.bf16.mxu0 %v3978_v12  ;;  %v2318_v57 = vld [vmem:[%s5783_s15 + $0x5e8] sm:$0xff]  ;;  %v3960_v12 = vpack.c.bf16 %v2268_v45, %v2267_v43  ;;  %v3992_v49 = vpack.c.bf16 %v2300_v29, %v2299_v51  ;;  %v2301_v62 = vld [vmem:[%s5783_s15 + $0x560] sm:$0xff]  ;;  %v1864_v23 = vadd.f32 %v5240_v36, %v5364_v22  ;;  %v2340_v43 = vld [vmem:[%s5783_s15 + $0x698] sm:$0xff]  ;;  %v2107_v45 = vmax.f32 %v5199_v0, 0.0 }
 0x7cd   :  { %v3994_v61 = vpack.c.bf16 %v2318_v57, %v2317_v17  ;;  %v2337_v47 = vld [vmem:[%s5783_s15 + $0x680] sm:$0xff]  ;;  %v1941_v24 = vadd.f32 %v5242_v37, %v5369_v26  ;;  %v2371_v36 = vld [vmem:[%s5783_s15 + $0x790] sm:$0xff]  ;;  %v2372_v37 = vld [vmem:[%s5783_s15 + $0x798] sm:$0xff] }
 0x7ce   :  { %v2369_v16 = vld [vmem:[%s5783_s15 + $0x780] sm:$0xff]  ;;  %v4002_v39 = vpack.c.bf16 %v2338_v15, %v2337_v47  ;;  %v2323_v51 = vld [vmem:[%s5783_s15 + $0x610] sm:$0xff]  ;;  %v2324_v29 = vld [vmem:[%s5783_s15 + $0x618] sm:$0xff]  ;;  %v2122_v53 = vmax.f32 %v1864_v23, 0.0  ;;  %v4038_v57 = vpack.c.bf16 %v2372_v37, %v2371_v36 }
 0x7cf   :  { %3949 = vmatpush3.bf16.msra.mxu1 %v3948_v63  ;;  %3981 = vmatpush3.bf16.msra.mxu0 %v3980_v5  ;;  %v2302_v63 = vld [vmem:[%s5783_s15 + $0x568] sm:$0xff]  ;;  %v2287_v5 = vld [vmem:[%s5783_s15 + $0x4f0] sm:$0xff]  ;;  %v4034_v9 = vpack.c.bf16 %v2370_v31, %v2369_v16  ;;  %v2321_v40 = vld [vmem:[%s5783_s15 + $0x600] sm:$0xff]  ;;  %v2124_v56 = vmax.f32 %v1941_v24, 0.0 }
 0x7d0   :  { %3951 = vmatprep.subr.bf16.mxu1 %v3950_v14  ;;  %3983 = vmatprep.subr.bf16.mxu0 %v3982_v10  ;;  %v2320_v14 = vld [vmem:[%s5783_s15 + $0x5f8] sm:$0xff]  ;;  %v3964_v10 = vpack.c.bf16 %v2270_v44, %v2269_v28  ;;  %v3996_v11 = vpack.c.bf16 %v2302_v63, %v2301_v62  ;;  %v3966_v34 = vpack.c.bf16 %v2288_v18, %v2287_v5  ;;  %v2355_v0 = vld [vmem:[%s5783_s15 + $0x710] sm:$0xff]  ;;  %v2373_v28 = vld [vmem:[%s5783_s15 + $0x7a0] sm:$0xff] }
 0x7d1   :  { %v3998_v3 = vpack.c.bf16 %v2320_v14, %v2319_v6  ;;  %v4004_v22 = vpack.c.bf16 %v2322_v42, %v2321_v40  ;;  %v2374_v44 = vld [vmem:[%s5783_s15 + $0x7a8] sm:$0xff]  ;;  %v4008_v62 = vpack.c.bf16 %v2324_v29, %v2323_v51  ;;  %v2325_v5 = vld [vmem:[%s5783_s15 + $0x620] sm:$0xff]  ;;  %v2110_v6 = vmax.f32 %v5287_v7, 0.0  ;;  %v2343_v32 = vld [vmem:[%s5783_s15 + $0x6b0] sm:$0xff] }
 0x7d2   :  { %v2326_v18 = vld [vmem:[%s5783_s15 + $0x628] sm:$0xff]  ;;  %v2112_v14 = vmax.f32 %v5289_v8, 0.0  ;;  %v2344_v7 = vld [vmem:[%s5783_s15 + $0x6b8] sm:$0xff]  ;;  %v2375_v8 = vld [vmem:[%s5783_s15 + $0x7b0] sm:$0xff] }
 0x7d3   :  { %3953 = vmatpush3.bf16.msra.mxu1 %v3952_v48  ;;  %3985 = vmatpush3.bf16.msra.mxu0 %v3984_v2  ;;  %v2303_v48 = vld [vmem:[%s5783_s15 + $0x570] sm:$0xff]  ;;  %v2304_v2 = vld [vmem:[%s5783_s15 + $0x578] sm:$0xff]  ;;  %v2358_v27 = vld [vmem:[%s5783_s15 + $0x728] sm:$0xff]  ;;  %v4014_v47 = vpack.c.bf16 %v2344_v7, %v2343_v32 }
 0x7d4   :  { %3955 = vmatprep.subr.bf16.mxu1 %v3954_v21  ;;  %3987 = vmatprep.subr.bf16.mxu0 %v3986_v38  ;;  %v4000_v21 = vpack.c.bf16 %v2304_v2, %v2303_v48  ;;  %v1856_v38 = vadd.f32 %v5191_v55, %v1430_v33  ;;  %v2353_v55 = vld [vmem:[%s5783_s15 + $0x700] sm:$0xff]  ;;  %v2327_v48 = vld [vmem:[%s5783_s15 + $0x630] sm:$0xff]  ;;  %v2328_v2 = vld [vmem:[%s5783_s15 + $0x638] sm:$0xff] }
 0x7d5   :  { %v2359_v16 = vld [vmem:[%s5783_s15 + $0x730] sm:$0xff]  ;;  %v2360_v31 = vld [vmem:[%s5783_s15 + $0x738] sm:$0xff]  ;;  %v2329_v42 = vld [vmem:[%s5783_s15 + $0x640] sm:$0xff] }
 0x7d6   :  { %v2105_v26 = vmax.f32 %v1856_v38, 0.0  ;;  %v2377_v38 = vld [vmem:[%s5783_s15 + $0x7c0] sm:$0xff]  ;;  %v4048_v40 = vpack.c.bf16 %v2360_v31, %v2359_v16  ;;  %v2330_v23 = vld [vmem:[%s5783_s15 + $0x648] sm:$0xff]  ;;  %v2348_v36 = vld [vmem:[%s5783_s15 + $0x6d8] sm:$0xff]  ;;  %v2125_v16 = vmax.f32 %v5308_v19, 0.0  ;;  %v2127_v31 = vmax.f32 %v5310_v13, 0.0 }
 0x7d7   :  { %3957 = vmatpush3.bf16.msra.mxu1 %v3956_v1  ;;  %3989 = vmatpush3.bf16.msra.mxu0 %v3988_v4  ;;  %v2354_v1 = vld [vmem:[%s5783_s15 + $0x708] sm:$0xff]  ;;  %v2339_v4 = vld [vmem:[%s5783_s15 + $0x690] sm:$0xff]  ;;  %v2336_v7 = vld [vmem:[%s5783_s15 + $0x678] sm:$0xff] }
 0x7d8   :  { %3959 = vmatprep.subr.bf16.mxu1 %v3958_v46  ;;  %3991 = vmatprep.subr.bf16.mxu0 %v3990_v50  ;;  %v1862_v46 = vadd.f32 %v5225_v25, %v1430_v33  ;;  %v4036_v50 = vpack.c.bf16 %v2354_v1, %v2353_v55  ;;  %v4006_v17 = vpack.c.bf16 %v2340_v43, %v2339_v4  ;;  %v2356_v25 = vld [vmem:[%s5783_s15 + $0x718] sm:$0xff]  ;;  %v2361_v1 = vld [vmem:[%s5783_s15 + $0x740] sm:$0xff]  ;;  %v2362_v4 = vld [vmem:[%s5783_s15 + $0x748] sm:$0xff] }
 0x7d9   :  { %v4040_v63 = vpack.c.bf16 %v2356_v25, %v2355_v0  ;;  %v2376_v33 = vld [vmem:[%s5783_s15 + $0x7b8] sm:$0xff]  ;;  %v2347_v43 = vld [vmem:[%s5783_s15 + $0x6d0] sm:$0xff]  ;;  %v2381_v0 = vld [vmem:[%s5783_s15 + $0x7e0] sm:$0xff] }
 0x7da   :  { %v4046_v15 = vpack.c.bf16 %v2376_v33, %v2375_v8  ;;  %v2379_v37 = vld [vmem:[%s5783_s15 + $0x7d0] sm:$0xff]  ;;  %v4022_v51 = vpack.c.bf16 %v2348_v36, %v2347_v43  ;;  %v2382_v25 = vld [vmem:[%s5783_s15 + $0x7e8] sm:$0xff]  ;;  %v2368_v33 = vld [vmem:[%s5783_s15 + $0x778] sm:$0xff] }
 0x7db   :  { %3961 = vmatpush3.bf16.msra.mxu1 %v3960_v12  ;;  %3993 = vmatpush3.bf16.msra.mxu0 %v3992_v49  ;;  %v2341_v12 = vld [vmem:[%s5783_s15 + $0x6a0] sm:$0xff]  ;;  %v2342_v49 = vld [vmem:[%s5783_s15 + $0x6a8] sm:$0xff]  ;;  %v2367_v8 = vld [vmem:[%s5783_s15 + $0x770] sm:$0xff] }
 0x7dc   :  { %3963 = vmatprep.subr.bf16.mxu1 %v3962_v58  ;;  %3995 = vmatprep.subr.bf16.mxu0 %v3994_v61  ;;  %v2121_v58 = vmax.f32 %v1862_v46, 0.0  ;;  %v2123_v61 = vmax.f32 %v5238_v35, 0.0  ;;  %v4042_v35 = vpack.c.bf16 %v2374_v44, %v2373_v28  ;;  %v2331_v46 = vld [vmem:[%s5783_s15 + $0x650] sm:$0xff]  ;;  %v2333_v28 = vld [vmem:[%s5783_s15 + $0x660] sm:$0xff]  ;;  %v2334_v44 = vld [vmem:[%s5783_s15 + $0x668] sm:$0xff] }
 0x7df   :  { %3965 = vmatpush3.bf16.msra.mxu1 %v3964_v10  ;;  %3997 = vmatpush3.bf16.msra.mxu0 %v3996_v11  ;;  %v4010_v10 = vpack.c.bf16 %v2342_v49, %v2341_v12  ;;  %v2357_v11 = vld [vmem:[%s5783_s15 + $0x720] sm:$0xff] }
 0x7e0   :  { %3967 = vmatprep.subr.bf16.mxu1 %v3966_v34  ;;  %3999 = vmatprep.subr.bf16.mxu0 %v3998_v3  ;;  %v4012_v34 = vpack.c.bf16 %v2326_v18, %v2325_v5  ;;  %v4044_v3 = vpack.c.bf16 %v2358_v27, %v2357_v11  ;;  %v2351_v5 = vld [vmem:[%s5783_s15 + $0x6f0] sm:$0xff]  ;;  %v2352_v18 = vld [vmem:[%s5783_s15 + $0x6f8] sm:$0xff] }
 0x7e1   :  { %v2335_v11 = vld [vmem:[%s5783_s15 + $0x670] sm:$0xff]  ;;  %v4030_v27 = vpack.c.bf16 %v2352_v18, %v2351_v5 }
 0x7e3   :  { %3969 = vmatpush3.bf16.msra.mxu1 %v3968_v20  ;;  %4001 = vmatpush3.bf16.msra.mxu0 %v4000_v21  ;;  %v2345_v20 = vld [vmem:[%s5783_s15 + $0x6c0] sm:$0xff]  ;;  %v2346_v21 = vld [vmem:[%s5783_s15 + $0x6c8] sm:$0xff] }
 0x7e4   :  { %4003 = vmatprep.subr.bf16.mxu1 %v4002_v39  ;;  %4035 = vmatprep.subr.bf16.mxu0 %v4034_v9  ;;  %v2378_v39 = vld [vmem:[%s5783_s15 + $0x7c8] sm:$0xff]  ;;  %v4016_v9 = vpack.c.bf16 %v2328_v2, %v2327_v48  ;;  %v4018_v24 = vpack.c.bf16 %v2346_v21, %v2345_v20  ;;  %v2109_v48 = vmax.f32 %v5274_v59, 0.0  ;;  %v2111_v2 = vmax.f32 %v5276_v60, 0.0  ;;  %v3083_v59 = vld [vmem:[%s5785_s16] ss:$0 sm:$0xff] }
 0x7e5   :  { %v4050_v55 = vpack.c.bf16 %v2378_v39, %v2377_v38 }
 0x7e6   :  { %2757 = vmatmul.mubr.f32.vlgmr.msra.gmra.mrb[42].mxu1 %v2105_v26  ;;  %2832 = vmatmul.mubr.f32.vlgmr.msra.gmra.mrb[38].mxu0 %v2107_v45  ;;  %v4020_v26 = vpack.c.bf16 %v2330_v23, %v2329_v42  ;;  %v4052_v45 = vpack.c.bf16 %v2362_v4, %v2361_v1 }
 0x7e7   :  { %2761 = vmatprep.mubr.f32.mxu1 %v2122_v53  ;;  %2836 = vmatprep.mubr.f32.mxu0 %v2124_v56  ;;  %v2363_v53 = vld [vmem:[%s5783_s15 + $0x750] sm:$0xff]  ;;  %v2364_v56 = vld [vmem:[%s5783_s15 + $0x758] sm:$0xff] }
 0x7e8   :  { %4005 = vmatpush3.bf16.msra.mxu1 %v4004_v22  ;;  %4037 = vmatpush3.bf16.msra.mxu0 %v4036_v50  ;;  %v2380_v22 = vld [vmem:[%s5783_s15 + $0x7d8] sm:$0xff]  ;;  %v4056_v49 = vpack.c.bf16 %v2364_v56, %v2363_v53 }
 0x7e9   :  { %4007 = vmatprep.subr.bf16.mxu1 %v4006_v17  ;;  %4039 = vmatprep.subr.bf16.mxu0 %v4038_v57  ;;  %v2332_v50 = vld [vmem:[%s5783_s15 + $0x658] sm:$0xff]  ;;  %v4054_v29 = vpack.c.bf16 %v2380_v22, %v2379_v37  ;;  %v2349_v17 = vld [vmem:[%s5783_s15 + $0x6e0] sm:$0xff]  ;;  %v2350_v57 = vld [vmem:[%s5783_s15 + $0x6e8] sm:$0xff] }
 0x7ea   :  { %2762 = vmatmul.mubr.f32.gmra.mrb[44].mxu1 %v2121_v58  ;;  %2837 = vmatmul.mubr.f32.gmra.mrb[40].mxu0 %v2123_v61  ;;  %v4024_v12 = vpack.c.bf16 %v2332_v50, %v2331_v46  ;;  %v4026_v58 = vpack.c.bf16 %v2350_v57, %v2349_v17  ;;  %v4058_v61 = vpack.c.bf16 %v2382_v25, %v2381_v0 }
 0x7eb   :  { %2906 = vmatprep.mubr.f32.mxu1 %v2110_v6  ;;  %2981 = vmatprep.mubr.f32.mxu0 %v2112_v14  ;;  %v2383_v6 = vld [vmem:[%s5783_s15 + $0x7f0] sm:$0xff]  ;;  %v2384_v14 = vld [vmem:[%s5783_s15 + $0x7f8] sm:$0xff] }
 0x7ec   :  { %4009 = vmatpush3.bf16.msra.mxu1 %v4008_v62  ;;  %4041 = vmatpush3.bf16.msra.mxu0 %v4040_v63  ;;  %v2365_v62 = vld [vmem:[%s5783_s15 + $0x760] sm:$0xff]  ;;  %v2366_v63 = vld [vmem:[%s5783_s15 + $0x768] sm:$0xff]  ;;  %v4062_v32 = vpack.c.bf16 %v2384_v14, %v2383_v6 }
 0x7ed   :  { %4011 = vmatprep.subr.bf16.mxu1 %v4010_v10  ;;  %4043 = vmatprep.subr.bf16.mxu0 %v4042_v35  ;;  %v4028_v10 = vpack.c.bf16 %v2334_v44, %v2333_v28  ;;  %v4060_v35 = vpack.c.bf16 %v2366_v63, %v2365_v62 }
 0x7f0   :  { %4013 = vmatpush3.bf16.msra.mxu1 %v4012_v34  ;;  %4045 = vmatpush3.bf16.msra.mxu0 %v4044_v3  ;;  %v4032_v34 = vpack.c.bf16 %v2336_v7, %v2335_v11  ;;  %v4064_v3 = vpack.c.bf16 %v2368_v33, %v2367_v8 }
 0x7f1   :  { %4015 = vmatprep.subr.bf16.mxu1 %v4014_v47  ;;  %4047 = vmatprep.subr.bf16.mxu0 %v4046_v15  ;;  %v2126_v47 = vmax.f32 %v5321_v52, 0.0  ;;  %v2128_v15 = vmax.f32 %v5323_v30, 0.0 }
 0x7f4   :  { %4017 = vmatpush3.bf16.msra.mxu1 %v4016_v9  ;;  %4049 = vmatpush3.bf16.msra.mxu0 %v4048_v40 }
 0x7f5   :  { %4019 = vmatprep.subr.bf16.mxu1 %v4018_v24  ;;  %4051 = vmatprep.subr.bf16.mxu0 %v4050_v55 }
 0x7f8   :  { %4021 = vmatpush3.bf16.msra.mxu1 %v4020_v26  ;;  %4053 = vmatpush3.bf16.msra.mxu0 %v4052_v45 }
 0x7f9   :  { %4023 = vmatprep.subr.bf16.mxu1 %v4022_v51  ;;  %4055 = vmatprep.subr.bf16.mxu0 %v4054_v29 }
 0x7fc   :  { %4025 = vmatpush3.bf16.msra.mxu1 %v4024_v12  ;;  %4057 = vmatpush3.bf16.msra.mxu0 %v4056_v49 }
 0x7fd   :  { %4027 = vmatprep.subr.bf16.mxu1 %v4026_v58  ;;  %4059 = vmatprep.subr.bf16.mxu0 %v4058_v61 }
 0x800   :  { %4029 = vmatpush3.bf16.msra.mxu1 %v4028_v10  ;;  %4061 = vmatpush3.bf16.msra.mxu0 %v4060_v35 }
 0x801   :  { %4031 = vmatprep.subr.bf16.mxu1 %v4030_v27  ;;  %4063 = vmatprep.subr.bf16.mxu0 %v4062_v32 }
 0x804   :  { %4033 = vmatpush3.bf16.msra.mxu1 %v4032_v34  ;;  %4065 = vmatpush3.bf16.msra.mxu0 %v4064_v3 }
 0x807   :  { %2907 = vmatmul.mubr.f32.vlgmr.msra.gmra.mrb[46].mxu1 %v2109_v48  ;;  %2982 = vmatmul.mubr.f32.vlgmr.msra.gmra.mrb[42].mxu0 %v2111_v2 }
 0x808   :  { %2911 = vmatprep.mubr.f32.mxu1 %v2126_v47  ;;  %2986 = vmatprep.mubr.f32.mxu0 %v2128_v15 }
 0x80b   :  { %2912 = vmatmul.mubr.f32.gmra.mrb[48].mxu1 %v2125_v16  ;;  %2987 = vmatmul.mubr.f32.gmra.mrb[44].mxu0 %v2127_v31 }
 0x878   :  { %v3246_v20 = vpop.f32.mrb[34].mxu1  ;;  %v3284_v21 = vpop.f32.mrb[30].mxu0 }
 0x879   :  { %v3247_v60 = vpop.f32.mrb[35].mxu1  ;;  %v3285_v52 = vpop.f32.mrb[31].mxu0 }
 0x87a   :  { %v3248_v38 = vadd.f32 %v3247_v60, %v3246_v20  ;;  %v3286_v30 = vadd.f32 %v3285_v52, %v3284_v21 }
 0x87c   :  { %v2459_v39 = vadd.f32 %v3248_v38, %v3083_v59  ;;  %v3249_v9 = vpop.f32.mrb[36].mxu1  ;;  %v3287_v40 = vpop.f32.mrb[32].mxu0 }
 0x87d   :  { %v3250_v42 = vpop.f32.mrb[37].mxu1  ;;  %v3288_v23 = vpop.f32.mrb[33].mxu0 }
 0x87e   :  { %v2534_v19 = vadd.f32 %v3286_v30, %v2459_v39  ;;  %v3251_v24 = vadd.f32 %v3250_v42, %v3249_v9  ;;  %v3289_v13 = vadd.f32 %v3288_v23, %v3287_v40 }
 0x880   :  { %v2464_v55 = vadd.f32 %v3251_v24, %v3083_v59 }
 0x882   :  { %v2539_v1 = vadd.f32 %v3289_v13, %v2464_v55 }
 0x898   :  { %v3322_v4 = vpop.f32.mrb[38].mxu1  ;;  %v3360_v43 = vpop.f32.mrb[34].mxu0 }
 0x899   :  { %v3323_v36 = vpop.f32.mrb[39].mxu1  ;;  %v3361_v37 = vpop.f32.mrb[35].mxu0 }
 0x89a   :  { %v3324_v22 = vadd.f32 %v3323_v36, %v3322_v4  ;;  %v3362_v26 = vadd.f32 %v3361_v37, %v3360_v43 }
 0x89c   :  { %v2609_v45 = vadd.f32 %v3324_v22, %v2534_v19  ;;  %v3325_v46 = vpop.f32.mrb[40].mxu1  ;;  %v3363_v50 = vpop.f32.mrb[36].mxu0 }
 0x89d   :  { %v3326_v51 = vpop.f32.mrb[41].mxu1  ;;  %v3364_v29 = vpop.f32.mrb[37].mxu0 }
 0x89e   :  { %v2684_v53 = vadd.f32 %v3362_v26, %v2609_v45  ;;  %v3327_v56 = vadd.f32 %v3326_v51, %v3325_v46  ;;  %v3365_v17 = vadd.f32 %v3364_v29, %v3363_v50  ;;  %v3084_v26 = vld [vmem:[%s5786_s17] ss:$0 sm:$0xff] }
 0x89f   :  { %v3085_v46 = vld [vmem:[%s5787_s18] ss:$0 sm:$0xff] }
 0x8a0   :  { %v2614_v57 = vadd.f32 %v3327_v56, %v2539_v1 }
 0x8a2   :  { %v2689_v0 = vadd.f32 %v3365_v17, %v2614_v57 }
 0x8b9   :  { %v3398_v25 = vpop.f32.mrb[42].mxu1  ;;  %v3436_v12 = vpop.f32.mrb[38].mxu0 }
 0x8ba   :  { %v3399_v49 = vpop.f32.mrb[43].mxu1  ;;  %v3437_v28 = vpop.f32.mrb[39].mxu0 }
 0x8bb   :  { %v3400_v44 = vadd.f32 %v3399_v49, %v3398_v25  ;;  %v3438_v58 = vadd.f32 %v3437_v28, %v3436_v12 }
 0x8bd   :  { %v2759_v61 = vadd.f32 %v3400_v44, %v2684_v53  ;;  %v3401_v62 = vpop.f32.mrb[44].mxu1  ;;  %v3439_v63 = vpop.f32.mrb[40].mxu0 }
 0x8be   :  { %v3402_v5 = vpop.f32.mrb[45].mxu1  ;;  %v3440_v18 = vpop.f32.mrb[41].mxu0 }
 0x8bf   :  { %v2834_v6 = vadd.f32 %v3438_v58, %v2759_v61  ;;  %v3403_v14 = vadd.f32 %v3402_v5, %v3401_v62  ;;  %v3441_v10 = vadd.f32 %v3440_v18, %v3439_v63 }
 0x8c1   :  { %v2764_v35 = vadd.f32 %v3403_v14, %v2689_v0 }
 0x8c3   :  { %v2839_v11 = vadd.f32 %v3441_v10, %v2764_v35 }
 0x8da   :  { %v3474_v27 = vpop.f32.mrb[46].mxu1  ;;  %v3512_v32 = vpop.f32.mrb[42].mxu0 }
 0x8db   :  { %v3475_v7 = vpop.f32.mrb[47].mxu1  ;;  %v3513_v8 = vpop.f32.mrb[43].mxu0 }
 0x8dc   :  { %v3476_v33 = vadd.f32 %v3475_v7, %v3474_v27  ;;  %v3514_v34 = vadd.f32 %v3513_v8, %v3512_v32 }
 0x8de   :  { %v2909_v3 = vadd.f32 %v3476_v33, %v2834_v6  ;;  %v3477_v48 = vpop.f32.mrb[48].mxu1  ;;  %v3515_v2 = vpop.f32.mrb[44].mxu0 }
 0x8df   :  { %v3478_v47 = vpop.f32.mrb[49].mxu1  ;;  %v3516_v15 = vpop.f32.mrb[45].mxu0 }
 0x8e0   :  { %v2984_v16 = vadd.f32 %v3514_v34, %v2909_v3  ;;  %v3479_v31 = vadd.f32 %v3478_v47, %v3477_v48  ;;  %v3517_v20 = vadd.f32 %v3516_v15, %v3515_v2 }
 0x8e2   :  { %v2914_v21 = vadd.f32 %v3479_v31, %v2839_v11  ;;  %v2992_v59 = vadd.f32 %v2984_v16, %v4678_v41 }
 0x8e4   :  { %v2989_v60 = vadd.f32 %v3517_v20, %v2914_v21  ;;  %v2994_v52 = vsel %vm308_vm0, %v2992_v59, 0.0 }
 0x8e5   :  { %2995 = vadd.xlane.f32.xlu0 %v2994_v52 }
 0x8e6   :  { %v2993_v38 = vadd.f32 %v2989_v60, %v4709_v54 }
 0x8e8   :  { %v2997_v30 = vsel %vm308_vm0, %v2993_v38, 0.0 }
 0x8e9   :  { %2998 = vadd.xlane.f32.xlu1 %v2997_v30 }
 0x972   :  { %v2996_v39 = vpop.xlane.xlu0 %2995 }
 0x973   :  { %v3000_v9 = vmul.f32 0.03125, %v2996_v39 }
 0x975   :  { %v3002_v40 = vsub.f32 %v2992_v59, %v3000_v9 }
 0x976   :  { %v2999_v42 = vpop.xlane.xlu1 %2998 }
 0x977   :  { %v3001_v23 = vmul.f32 0.03125, %v2999_v42  ;;  %v3004_v19 = vmul.f32 %v3002_v40, %v3002_v40 }
 0x979   :  { %v3003_v24 = vsub.f32 %v2993_v38, %v3001_v23  ;;  %v3006_v13 = vsel %vm308_vm0, %v3004_v19, 0.0 }
 0x97a   :  { %3007 = vadd.xlane.f32.xlu0 %v3006_v13 }
 0x97b   :  { %v3005_v41 = vmul.f32 %v3003_v24, %v3003_v24 }
 0x97d   :  { %v3009_v55 = vsel %vm308_vm0, %v3005_v41, 0.0 }
 0x97e   :  { %3010 = vadd.xlane.f32.xlu1 %v3009_v55 }
 0xa07   :  { %v3008_v1 = vpop.xlane.xlu0 %3007 }
 0xa08   :  { %v3012_v4 = vmul.f32 0.03125, %v3008_v1 }
 0xa0a   :  { %v3014_v54 = vadd.f32 1e-05, %v3012_v4 }
 0xa0b   :  { %v3011_v43 = vpop.xlane.xlu1 %3010 }
 0xa0c   :  { %4085 = vrsqrt.f32 %v3014_v54  ;;  %v3013_v36 = vmul.f32 0.03125, %v3011_v43 }
 0xa0e   :  { %v3015_v37 = vadd.f32 1e-05, %v3013_v36 }
 0xa10   :  { %4087 = vrsqrt.f32 %v3015_v37 }
 0xa16   :  { %v4086_v22 = vpop.eup %4085 }
 0xa17   :  { %v3018_v45 = vmul.f32 %v4086_v22, %v3002_v40 }
 0xa19   :  { %v3027_v50 = vmul.f32 %v3084_v26, %v3018_v45 }
 0xa1a   :  { %v4088_v51 = vpop.eup %4087 }
 0xa1b   :  { %v3036_v29 = vadd.f32 %v3085_v46, %v3027_v50  ;;  %v3019_v53 = vmul.f32 %v4088_v51, %v3003_v24 }
 0xa1d   :  { %3038 = vst.msk [vmem:[%s5788_s21] sm:$0xff] %vm308_vm0, %v3036_v29  ;;  %v3028_v56 = vmul.f32 %v3084_v26, %v3019_v53 }
 0xa1f   :  { %v3037_v17 = vadd.f32 %v3085_v46, %v3028_v56 }
 0xa21   :  { %3039 = vst.msk [vmem:[%s5788_s21 + $0x8] sm:$0xff] %vm308_vm0, %v3037_v17 }

// kernel: cifar10trans_forward.7
= control target key start
LH: loop header
LB: loop body
LE: loop exit
PB: predicated region body
PF: predicated region fallthrough
CT: control target
= control target key end

     0   :  { %vm83_vm0 = vcmask 261120   ;;  %v3752_v22 = vmov 0.0|0.0   ;;  %vm3753_vm1 = vmmov 0   ;;  %v3754_v27 = vmov 0.0   ;;  %s5223_s1 = inlined_call_operand.vmem [shape: f32[32,32], index: 1, kind: input, shape index: {}]   ;;  %s5224_s2 = inlined_call_operand.vmem [shape: f32[32,32], index: 2, kind: input, shape index: {}]   ;;  %s5225_s0 = inlined_call_operand.vmem [shape: f32[16,32], index: 0, kind: input, shape index: {}]   ;;  %s5226_s3 = inlined_call_operand.vmem [shape: f32[32,32], index: 3, kind: input, shape index: {}]   ;;  %s5227_s7 = inlined_call_operand.vmem [shape: f32[32,8], index: 7, kind: input, shape index: {}]   ;;  %s5228_s4 = inlined_call_operand.vmem [shape: f32[1,32], index: 4, kind: input, shape index: {}]   ;;  %s5229_s5 = inlined_call_operand.vmem [shape: f32[1,32], index: 5, kind: input, shape index: {}]   ;;  %s5230_s8 = inlined_call_operand.vmem [shape: f32[8,32], index: 8, kind: input, shape index: {}]   ;;  %s5231_s6 = inlined_call_operand.vmem [shape: f32[1,32], index: 6, kind: input, shape index: {}]   ;;  %s5232_s9 = inlined_call_operand.vmem [shape: f32[32,32], index: 9, kind: input, shape index: {}]   ;;  %s5233_s10 = inlined_call_operand.vmem [shape: f32[1,32], index: 10, kind: input, shape index: {}]   ;;  %s5234_s13 = inlined_call_operand.vmem [shape: f32[32,2048], index: 13, kind: input, shape index: {}]   ;;  %s5235_s11 = inlined_call_operand.vmem [shape: f32[1,32], index: 11, kind: input, shape index: {}]   ;;  %s5236_s12 = inlined_call_operand.vmem [shape: f32[1,32], index: 12, kind: input, shape index: {}]   ;;  %s5237_s15 = inlined_call_operand.vmem [shape: f32[2048,32], index: 15, kind: input, shape index: {}]   ;;  %s5238_s14 = inlined_call_operand.vmem [shape: f32[1,2048], index: 14, kind: input, shape index: {}]   ;;  %s5239_s16 = inlined_call_operand.vmem [shape: f32[1,32], index: 16, kind: input, shape index: {}]   ;;  %s5240_s20 = inlined_call_operand.<no memory space> [shape: f32[1,1], index: 20, kind: input, shape index: {}]   ;;  %s5241_s17 = inlined_call_operand.vmem [shape: f32[1,32], index: 17, kind: input, shape index: {}]   ;;  %s5242_s18 = inlined_call_operand.vmem [shape: f32[1,32], index: 18, kind: input, shape index: {}]   ;;  %s5243_s19 = inlined_call_operand.vmem [shape: f32[1,32], index: 19, kind: input, shape index: {}]   ;;  %s5244_s21 = inlined_call_operand.vmem [shape: f32[16,1], index: 21, kind: output, shape index: {}]  }
   0x1   :  { %5250 = sst [smem:[#allocation3_spill]] %s5223_s1  ;;  %v2849_v29 = vld [vmem:[%s5229_s5] ss:$0 sm:$0xff]  ;;  %vm502_vm2 = vcmask 64512   ;;  %vm2839_vm3 = vcmask 7168  }
   0x2   :  { %5251 = sst [smem:[#allocation4_spill]] %s5224_s2  ;;  %s5256_s26 = sld [smem:[#allocation3_spill]]  ;;  %v3972_v44 = vld [vmem:[%s5230_s8] sm:$0xff] }
   0x3   :  { %5252 = sst [smem:[#allocation5_spill]] %s5225_s0  ;;  %s5257_s1 = sld [smem:[#allocation4_spill]] }
   0x4   :  { %5253 = sst [smem:[#allocation6_spill]] %s5226_s3  ;;  %s5258_s29 = sld [smem:[#allocation5_spill]] }
   0x5   :  { %5254 = sst [smem:[#allocation7_spill]] %s5227_s7  ;;  %s5259_s30 = sld [smem:[#allocation6_spill]] }
   0x6   :  { %5255 = sst [smem:[#allocation8_spill]] %s5228_s4  ;;  %s5260_s27 = sld [smem:[#allocation7_spill]] }
   0x7   :  { %s5261_s2 = sld [smem:[#allocation8_spill]] }
   0x8   :  { %v72_v0 = vld [vmem:[%s5256_s26] sm:$0xff]  ;;  %v73_v1 = vld [vmem:[%s5256_s26 + $0x8] sm:$0xff]  ;;  %v74_v5 = vld [vmem:[%s5256_s26 + $0x10] sm:$0xff] }
   0x9   :  { %v165_v2 = vld [vmem:[%s5257_s1] sm:$0xff]  ;;  %v3353_v3 = vpack.c.bf16 %v73_v1, %v72_v0  ;;  %v166_v4 = vld [vmem:[%s5257_s1 + $0x8] sm:$0xff]  ;;  %v75_v6 = vld [vmem:[%s5256_s26 + $0x18] sm:$0xff] }
   0xa   :  { %v3361_v7 = vpack.c.bf16 %v166_v4, %v165_v2  ;;  %v3357_v8 = vpack.c.bf16 %v75_v6, %v74_v5  ;;  %v167_v9 = vld [vmem:[%s5257_s1 + $0x10] sm:$0xff]  ;;  %v168_v10 = vld [vmem:[%s5257_s1 + $0x18] sm:$0xff]  ;;  %v3892_v11 = vld [vmem:[%s5258_s29] sm:$0xff] }
   0xb   :  { %3354 = vmatprep.subr.bf16.mxu0 %v3353_v3  ;;  %v3365_v12 = vpack.c.bf16 %v168_v10, %v167_v9  ;;  %3253 = vmatprep.mubr.msk.f32.mxu0 %vm83_vm0, %v3892_v11  ;;  %v251_v13 = vld [vmem:[%s5259_s30] sm:$0xff]  ;;  %v252_v14 = vld [vmem:[%s5259_s30 + $0x8] sm:$0xff]  ;;  %v253_v16 = vld [vmem:[%s5259_s30 + $0x10] sm:$0xff] }
   0xc   :  { %3362 = vmatprep.subr.bf16.mxu1 %v3361_v7  ;;  %3356 = vmatpush3.bf16.msra.mxu0 %v3353_v3  ;;  %v3369_v15 = vpack.c.bf16 %v252_v14, %v251_v13  ;;  %v254_v17 = vld [vmem:[%s5259_s30 + $0x18] sm:$0xff]  ;;  %v337_v18 = vld [vmem:[%s5260_s27] sm:$0xff]  ;;  %v338_v19 = vld [vmem:[%s5260_s27 + $0x8] sm:$0xff] }
   0xd   :  { %3364 = vmatpush3.bf16.msra.mxu1 %v3361_v7  ;;  %3358 = vmatprep.subr.bf16.mxu0 %v3357_v8  ;;  %v3919_v20 = vld [vmem:[%s5258_s29 + $0x8] sm:$0xff]  ;;  %v3373_v21 = vpack.c.bf16 %v254_v17, %v253_v16  ;;  %v3922_v23 = vpack.c.bf16 %v338_v19, %v337_v18  ;;  %v339_v24 = vld [vmem:[%s5260_s27 + $0x10] sm:$0xff]  ;;  %v340_v25 = vld [vmem:[%s5260_s27 + $0x18] sm:$0xff] }
   0xe   :  { %3366 = vmatprep.subr.bf16.mxu1 %v3365_v12  ;;  %3264 = vmatprep.mubr.msk.f32.mxu1 %vm83_vm0, %v3892_v11  ;;  %v3943_v26 = vpack.c.bf16 %v340_v25, %v339_v24  ;;  %v2846_v28 = vld [vmem:[%s5261_s2] ss:$0 sm:$0xff] }
   0xf   :  { %v2852_v0 = vld [vmem:[%s5231_s6] ss:$0 sm:$0xff] }
  0x10   :  { %3360 = vmatpush3.bf16.msra.mxu0 %v3357_v8 }
  0x11   :  { %3368 = vmatpush3.bf16.msra.mxu1 %v3365_v12  ;;  %3370 = vmatprep.subr.bf16.mxu0 %v3369_v15 }
  0x12   :  { %3377 = vmatprep.subr.bf16.mxu1 %v3752_v22 }
  0x13   :  { %3254 = vmatmul.mubr.msk.f32.vlgmr.msra.gmra.mrb[0].mxu0 %vm83_vm0, %v3919_v20 }
  0x14   :  { %3265 = vmatmul.mubr.msk.f32.vlgmr.msra.gmra.mrb[0].mxu1 %vm83_vm0, %v3919_v20  ;;  %3372 = vmatpush3.bf16.msra.mxu0 %v3369_v15 }
  0x15   :  { %3374 = vmatprep.subr.bf16.mxu0 %v3373_v21  ;;  %3275 = vmatprep.mubr.msk.f32.mxu0 %vm83_vm0, %v3892_v11 }
  0x16   :  { %3379 = vmatpush3.bf16.msra.mxu1 %v3922_v23  ;;  %3286 = vmatprep.mubr.msk.f32.mxu1 %vm3753_vm1, %v3754_v27 }
  0x17   :  { %3380 = vmatprep.subr.bf16.mxu1 %v3752_v22 }
  0x18   :  { %3376 = vmatpush3.bf16.msra.mxu0 %v3373_v21 }
  0x19   :  { %3383 = vmatprep.subr.bf16.mxu0 %v3752_v22 }
  0x1a   :  { %3382 = vmatpush3.bf16.msra.mxu1 %v3943_v26 }
  0x1b   :  { %3276 = vmatmul.mubr.msk.f32.vlgmr.msra.gmra.mrb[2].mxu0 %vm83_vm0, %v3919_v20  ;;  %3300 = vmatprep.subr.mxu1 %v3754_v27 }
  0x1c   :  { %3385 = vmatpush3.bf16.msra.mxu0 %v3922_v23  ;;  %3297 = vmatprep.mubr.msk.f32.mxu0 %vm3753_vm1, %v3754_v27 }
  0x1d   :  { %3386 = vmatprep.subr.bf16.mxu0 %v3752_v22 }
  0x20   :  { %3388 = vmatpush3.bf16.msra.mxu0 %v3943_v26 }
  0x21   :  { %3389 = vmatprep.subr.bf16.mxu0 %v3752_v22 }
  0xe6   :  { %v3255_v30 = vpop.f32.mrb[0].mxu0 }
  0xe7   :  { %v162_v31 = vadd.f32 %v3255_v30, %v2846_v28  ;;  %v3266_v32 = vpop.f32.mrb[0].mxu1  ;;  %v156_v33 = vpop.f32.mrb[1].mxu0 }
  0xe8   :  { %v248_v34 = vadd.f32 %v3266_v32, %v2849_v29  ;;  %v157_v35 = vadd.f32 %v2846_v28, %v156_v33  ;;  %v242_v36 = vpop.f32.mrb[1].mxu1  ;;  %v963_v28 = vld [vmem:[%s5232_s9] sm:$0xff]  ;;  %v966_v32 = vld [vmem:[%s5232_s9 + $0x18] sm:$0xff] }
  0xe9   :  { %v243_v37 = vadd.f32 %v2849_v29, %v242_v36  ;;  %v964_v29 = vld [vmem:[%s5232_s9 + $0x8] sm:$0xff] }
  0xea   :  { %v728_v38 = vmul.f32 %v248_v34, %v162_v31  ;;  %v417_v39 = vmul.f32 %v248_v34, %v157_v35  ;;  %v3401_v30 = vpack.c.bf16 %v964_v29, %v963_v28 }
  0xeb   :  { %v342_v40 = vmul.f32 %v243_v37, %v157_v35  ;;  %v653_v41 = vmul.f32 %v243_v37, %v162_v31  ;;  %v965_v31 = vld [vmem:[%s5232_s9 + $0x10] sm:$0xff] }
  0xec   :  { %3298 = vmatmul.mubr.msk.f32.vlgmr.msra.gmra.mrb[4].mxu0 %vm83_vm0, %v417_v39  ;;  %v3405_v33 = vpack.c.bf16 %v966_v32, %v965_v31 }
  0xed   :  { %3287 = vmatmul.mubr.msk.f32.vlgmr.msra.gmra.mrb[2].mxu1 %vm83_vm0, %v342_v40  ;;  %3391 = vmatpush3.bf16.msra.mxu0 %v3922_v23 }
  0xee   :  { %3392 = vmatprep.subr.bf16.mxu0 %v3752_v22  ;;  %3318 = vmatprep.mubr.msk.f32.mxu0 %vm3753_vm1, %v3754_v27  ;;  %v3277_v42 = vpop.f32.mrb[2].mxu0 }
  0xef   :  { %v328_v43 = vpop.f32.mrb[3].mxu0  ;;  %3302 = vmatprep.mubr.msk.f32.mxu1 %vm3753_vm1, %v3754_v27  ;;  %3301 = vmatpush3.msra.mxu1 %v3972_v44  ;;  %v334_v3 = vadd.f32 %v3277_v42, %v2852_v0 }
  0xf0   :  { %3305 = vmatprep.subr.mxu1 %v3754_v27  ;;  %v329_v4 = vadd.f32 %v2852_v0, %v328_v43  ;;  %v1118_v0 = vld [vmem:[%s5234_s13 + $0x80] sm:$0xff] }
  0xf1   :  { %3394 = vmatpush3.bf16.msra.mxu0 %v3943_v26 }
  0xf2   :  { %3402 = vmatprep.subr.bf16.mxu0 %v3401_v30 }
  0xf4   :  { %3319 = vmatmul.mubr.msk.f32.vlgmr.msra.gmra.mrb[6].mxu0 %vm83_vm0, %v653_v41  ;;  %v2863_v41 = vld [vmem:[%s5233_s10] ss:$0 sm:$0xff] }
  0xf5   :  { %3404 = vmatpush3.bf16.msra.mxu0 %v3401_v30 }
  0xf6   :  { %3406 = vmatprep.subr.bf16.mxu0 %v3405_v33 }
  0xf9   :  { %3408 = vmatpush3.bf16.msra.mxu0 %v3405_v33 }
 0x1bf   :  { %v487_v45 = vpop.f32.mrb[4].mxu0 }
 0x1c0   :  { %v412_v46 = vpop.f32.mrb[2].mxu1  ;;  %v491_v47 = vmul.f32 0.5, %v487_v45  ;;  %v3299_v48 = vpop.f32.mrb[5].mxu0 }
 0x1c1   :  { %v416_v49 = vmul.f32 0.5, %v412_v46  ;;  %v3288_v50 = vpop.f32.mrb[3].mxu1 }
 0x1c3   :  { %v492_v51 = vmax.f32 %v416_v49, %v491_v47 }
 0x1c5   :  { %v493_v52 = vsub.f32 %v416_v49, %v492_v51  ;;  %v496_v53 = vsub.f32 %v491_v47, %v492_v51 }
 0x1c7   :  { %v494_v54 = vmul.f32 1.442695, %v493_v52  ;;  %v497_v55 = vmul.f32 1.442695, %v496_v53  ;;  %v723_v56 = vpop.f32.mrb[6].mxu0 }
 0x1c8   :  { %v3320_v57 = vpop.f32.mrb[7].mxu0  ;;  %v727_v12 = vmul.f32 0.5, %v723_v56 }
 0x1c9   :  { %3732 = vpow2.f32 %v494_v54 }
 0x1ca   :  { %3734 = vpow2.f32 %v497_v55 }
 0x1d3   :  { %v3733_v58 = vpop.eup %3732 }
 0x1d4   :  { %v3735_v59 = vpop.eup %3734 }
 0x1d5   :  { %v499_v60 = vadd.f32 %v3735_v59, %v3733_v58 }
 0x1d7   :  { %3736 = vrcp.f32 %v499_v60  ;;  %v1105_v60 = vld [vmem:[%s5234_s13 + $0x18] sm:$0xff] }
 0x1e1   :  { %v3737_v61 = vpop.eup %3736 }
 0x1e2   :  { %v501_v62 = vmul.f32 %v3737_v61, %v3733_v58  ;;  %v577_v63 = vmul.f32 %v3737_v61, %v3735_v59  ;;  %v1103_v58 = vld [vmem:[%s5234_s13 + $0x8] sm:$0xff] }
 0x1e3   :  { %v1119_v59 = vld [vmem:[%s5234_s13 + $0x88] sm:$0xff] }
 0x1e4   :  { %3303 = vmatmul.mubr.msk.f32.vlgmr.msra.gmra.mrb[4].mxu1 %vm502_vm2, %v501_v62  ;;  %v3409_v61 = vpack.c.bf16 %v1119_v59, %v1103_v58  ;;  %v1121_v62 = vld [vmem:[%s5234_s13 + $0x98] sm:$0xff] }
 0x1e5   :  { %3306 = vmatpush3.msra.mxu1 %v3972_v44  ;;  %3307 = vmatprep.mubr.msk.f32.mxu1 %vm3753_vm1, %v3754_v27  ;;  %v1113_v58 = vld [vmem:[%s5234_s13 + $0x58] sm:$0xff] }
 0x1e6   :  { %3395 = vmatprep.subr.bf16.mxu1 %v3752_v22  ;;  %v1129_v59 = vld [vmem:[%s5234_s13 + $0xd8] sm:$0xff] }
 0x1e8   :  { %3308 = vmatmul.mubr.msk.f32.vlgmr.msra.gmra.mrb[6].mxu1 %vm502_vm2, %v577_v63  ;;  %v1102_v63 = vld [vmem:[%s5234_s13] sm:$0xff] }
 0x1e9   :  { %3397 = vmatpush3.bf16.msra.mxu1 %v3922_v23  ;;  %3329 = vmatprep.mubr.msk.f32.mxu1 %vm3753_vm1, %v3754_v27 }
 0x1ea   :  { %3398 = vmatprep.subr.bf16.mxu1 %v3752_v22 }
 0x1ed   :  { %3400 = vmatpush3.bf16.msra.mxu1 %v3943_v26 }
 0x1ee   :  { %3332 = vmatprep.subr.mxu1 %v3754_v27 }
 0x1f0   :  { %3330 = vmatmul.mubr.msk.f32.vlgmr.msra.gmra.mrb[8].mxu1 %vm83_vm0, %v728_v38 }
 0x1f1   :  { %3333 = vmatpush3.msra.mxu1 %v3972_v44  ;;  %3334 = vmatprep.mubr.msk.f32.mxu1 %vm3753_vm1, %v3754_v27 }
 0x1f2   :  { %3337 = vmatprep.subr.mxu1 %v3754_v27 }
 0x2b7   :  { %v572_v1 = vpop.f32.mrb[4].mxu1 }
 0x2b8   :  { %v3304_v2 = vpop.f32.mrb[5].mxu1  ;;  %v576_v6 = vmul.f32 %v572_v1, %v329_v4  ;;  %v3417_v1 = vpack.c.bf16 %v1121_v62, %v1105_v60  ;;  %v1110_v62 = vld [vmem:[%s5234_s13 + $0x40] sm:$0xff] }
 0x2b9   :  { %v3411_v2 = vpack.c.bf16 %v1118_v0, %v1102_v63  ;;  %v1126_v0 = vld [vmem:[%s5234_s13 + $0xc0] sm:$0xff] }
 0x2ba   :  { %3418 = vmatprep.subr.bf16.mxu0 %v3417_v1  ;;  %v1112_v1 = vld [vmem:[%s5234_s13 + $0x50] sm:$0xff] }
 0x2bb   :  { %v647_v5 = vpop.f32.mrb[6].mxu1 }
 0x2bc   :  { %v651_v7 = vmul.f32 %v647_v5, %v334_v3  ;;  %v3309_v8 = vpop.f32.mrb[7].mxu1 }
 0x2bd   :  { %v1137_v8 = vld [vmem:[%s5234_s13 + $0x118] sm:$0xff] }
 0x2be   :  { %v652_v9 = vadd.f32 %v651_v7, %v576_v6  ;;  %v1135_v6 = vld [vmem:[%s5234_s13 + $0x108] sm:$0xff] }
 0x2bf   :  { %v1151_v7 = vld [vmem:[%s5234_s13 + $0x188] sm:$0xff] }
 0x2c0   :  { %3350 = vmatprep.mubr.msk.f32.mxu0 %vm83_vm0, %v652_v9  ;;  %v3413_v9 = vpack.c.bf16 %v1151_v7, %v1135_v6  ;;  %v1159_v6 = vld [vmem:[%s5234_s13 + $0x1c8] sm:$0xff]  ;;  %v1145_v7 = vld [vmem:[%s5234_s13 + $0x158] sm:$0xff] }
 0x2c3   :  { %v798_v10 = vpop.f32.mrb[8].mxu1 }
 0x2c4   :  { %v802_v13 = vmul.f32 0.5, %v798_v10  ;;  %v3331_v14 = vpop.f32.mrb[9].mxu1  ;;  %v1153_v10 = vld [vmem:[%s5234_s13 + $0x198] sm:$0xff] }
 0x2c5   :  { %v3421_v14 = vpack.c.bf16 %v1153_v10, %v1137_v8  ;;  %v1161_v8 = vld [vmem:[%s5234_s13 + $0x1d8] sm:$0xff] }
 0x2c6   :  { %v803_v15 = vmax.f32 %v727_v12, %v802_v13 }
 0x2c8   :  { %v804_v16 = vsub.f32 %v727_v12, %v803_v15  ;;  %v807_v17 = vsub.f32 %v802_v13, %v803_v15  ;;  %v1134_v12 = vld [vmem:[%s5234_s13 + $0x100] sm:$0xff] }
 0x2c9   :  { %v1150_v13 = vld [vmem:[%s5234_s13 + $0x180] sm:$0xff] }
 0x2ca   :  { %v805_v18 = vmul.f32 1.442695, %v804_v16  ;;  %v808_v19 = vmul.f32 1.442695, %v807_v17  ;;  %v3415_v15 = vpack.c.bf16 %v1150_v13, %v1134_v12  ;;  %v1136_v16 = vld [vmem:[%s5234_s13 + $0x110] sm:$0xff]  ;;  %v1142_v12 = vld [vmem:[%s5234_s13 + $0x140] sm:$0xff] }
 0x2cb   :  { %v1152_v17 = vld [vmem:[%s5234_s13 + $0x190] sm:$0xff]  ;;  %v1158_v13 = vld [vmem:[%s5234_s13 + $0x1c0] sm:$0xff] }
 0x2cc   :  { %3738 = vpow2.f32 %v805_v18  ;;  %v3423_v18 = vpack.c.bf16 %v1152_v17, %v1136_v16  ;;  %v3453_v17 = vpack.c.bf16 %v1161_v8, %v1145_v7  ;;  %v1957_v7 = vld [vmem:[%s5237_s15 + $0x1a8] sm:$0xff] }
 0x2cd   :  { %3740 = vpow2.f32 %v808_v19  ;;  %v1107_v19 = vld [vmem:[%s5234_s13 + $0x28] sm:$0xff] }
 0x2d6   :  { %v3739_v21 = vpop.eup %3738 }
 0x2d7   :  { %v3741_v22 = vpop.eup %3740 }
 0x2d8   :  { %v810_v23 = vadd.f32 %v3741_v22, %v3739_v21 }
 0x2da   :  { %3742 = vrcp.f32 %v810_v23 }
 0x2e4   :  { %v3743_v24 = vpop.eup %3742 }
 0x2e5   :  { %v812_v25 = vmul.f32 %v3743_v24, %v3739_v21  ;;  %v887_v26 = vmul.f32 %v3743_v24, %v3741_v22  ;;  %v1123_v21 = vld [vmem:[%s5234_s13 + $0xa8] sm:$0xff]  ;;  %v1109_v22 = vld [vmem:[%s5234_s13 + $0x38] sm:$0xff] }
 0x2e6   :  { %v3425_v23 = vpack.c.bf16 %v1123_v21, %v1107_v19  ;;  %v1125_v24 = vld [vmem:[%s5234_s13 + $0xb8] sm:$0xff]  ;;  %v1131_v19 = vld [vmem:[%s5234_s13 + $0xe8] sm:$0xff] }
 0x2e7   :  { %3335 = vmatmul.mubr.msk.f32.vlgmr.msra.gmra.mrb[10].mxu1 %vm502_vm2, %v812_v25  ;;  %v3433_v25 = vpack.c.bf16 %v1125_v24, %v1109_v22  ;;  %v1117_v21 = vld [vmem:[%s5234_s13 + $0x78] sm:$0xff] }
 0x2e8   :  { %3338 = vmatpush3.msra.mxu1 %v3972_v44  ;;  %3339 = vmatprep.mubr.msk.f32.mxu1 %vm3753_vm1, %v3754_v27  ;;  %v1133_v22 = vld [vmem:[%s5234_s13 + $0xf8] sm:$0xff] }
 0x2e9   :  { %3410 = vmatprep.subr.bf16.mxu1 %v3409_v61 }
 0x2eb   :  { %3340 = vmatmul.mubr.msk.f32.vlgmr.msra.gmra.mrb[12].mxu1 %vm502_vm2, %v887_v26 }
 0x2ec   :  { %1320 = vmatprep.mubr.f32.mxu1 %v3754_v27  ;;  %3412 = vmatpush1.bf16.msra.mxu1 %v3411_v2  ;;  %v1128_v2 = vld [vmem:[%s5234_s13 + $0xd0] sm:$0xff] }
 0x2ed   :  { %3414 = vmatprep.subr.bf16.mxu1 %v3413_v9  ;;  %v3443_v9 = vpack.c.bf16 %v1126_v0, %v1110_v62  ;;  %v3451_v10 = vpack.c.bf16 %v1128_v2, %v1112_v1  ;;  %v1907_v62 = vld [vmem:[%s5237_s15 + $0x18] sm:$0xff]  ;;  %v1938_v2 = vld [vmem:[%s5237_s15 + $0x110] sm:$0xff] }
 0x2f0   :  { %3416 = vmatpush1.bf16.msra.mxu1 %v3415_v15  ;;  %v1160_v15 = vld [vmem:[%s5234_s13 + $0x1d0] sm:$0xff] }
 0x2f1   :  { %3426 = vmatprep.subr.bf16.mxu1 %v3425_v23  ;;  %v3447_v23 = vpack.c.bf16 %v1158_v13, %v1142_v12  ;;  %v1909_v12 = vld [vmem:[%s5237_s15 + $0x28] sm:$0xff] }
 0x3ba   :  { %v882_v34 = vpop.f32.mrb[10].mxu1 }
 0x3bb   :  { %v3336_v35 = vpop.f32.mrb[11].mxu1  ;;  %v886_v37 = vmul.f32 %v882_v34, %v329_v4  ;;  %v1120_v4 = vld [vmem:[%s5234_s13 + $0x90] sm:$0xff]  ;;  %v2866_v34 = vld [vmem:[%s5235_s11] ss:$0 sm:$0xff] }
 0x3bc   :  { %v1106_v35 = vld [vmem:[%s5234_s13 + $0x20] sm:$0xff] }
 0x3be   :  { %v957_v36 = vpop.f32.mrb[12].mxu1 }
 0x3bf   :  { %v961_v38 = vmul.f32 %v957_v36, %v334_v3  ;;  %v3341_v39 = vpop.f32.mrb[13].mxu1  ;;  %v1104_v3 = vld [vmem:[%s5234_s13 + $0x10] sm:$0xff] }
 0x3c0   :  { %v3419_v5 = vpack.c.bf16 %v1120_v4, %v1104_v3  ;;  %v1124_v39 = vld [vmem:[%s5234_s13 + $0xb0] sm:$0xff]  ;;  %v3449_v4 = vpack.c.bf16 %v1129_v59, %v1113_v58  ;;  %v1955_v58 = vld [vmem:[%s5237_s15 + $0x198] sm:$0xff] }
 0x3c1   :  { %v962_v40 = vadd.f32 %v961_v38, %v886_v37  ;;  %v1122_v37 = vld [vmem:[%s5234_s13 + $0xa0] sm:$0xff]  ;;  %v1108_v38 = vld [vmem:[%s5234_s13 + $0x30] sm:$0xff] }
 0x3c3   :  { %3351 = vmatmul.mubr.msk.f32.vlgmr.msra.gmra.mrb[8].mxu0 %vm83_vm0, %v962_v40  ;;  %v2867_v40 = vld [vmem:[%s5236_s12] ss:$0 sm:$0xff] }
 0x3c4   :  { %1397 = vmatprep.mubr.f32.mxu0 %v3754_v27  ;;  %3420 = vmatpush1.bf16.msra.mxu0 %v3419_v5  ;;  %v1143_v5 = vld [vmem:[%s5234_s13 + $0x148] sm:$0xff] }
 0x3c5   :  { %3422 = vmatprep.subr.bf16.mxu0 %v3421_v14  ;;  %v1144_v14 = vld [vmem:[%s5234_s13 + $0x150] sm:$0xff]  ;;  %v3445_v16 = vpack.c.bf16 %v1159_v6, %v1143_v5  ;;  %v1925_v5 = vld [vmem:[%s5237_s15 + $0xa8] sm:$0xff]  ;;  %v1956_v6 = vld [vmem:[%s5237_s15 + $0x1a0] sm:$0xff] }
 0x3c6   :  { %v3455_v24 = vpack.c.bf16 %v1160_v15, %v1144_v14  ;;  %v3513_v14 = vpack.c.bf16 %v1957_v7, %v1956_v6  ;;  %v1941_v15 = vld [vmem:[%s5237_s15 + $0x128] sm:$0xff]  ;;  %v1966_v6 = vld [vmem:[%s5237_s15 + $0x1f0] sm:$0xff] }
 0x3c8   :  { %3424 = vmatpush1.bf16.msra.mxu0 %v3423_v18  ;;  %v1115_v18 = vld [vmem:[%s5234_s13 + $0x68] sm:$0xff] }
 0x3c9   :  { %3434 = vmatprep.subr.bf16.mxu0 %v3433_v25  ;;  %v1114_v25 = vld [vmem:[%s5234_s13 + $0x60] sm:$0xff] }
 0x496   :  { %v3352_v42 = vpop.f32.mrb[8].mxu0 }
 0x497   :  { %v1046_v43 = vpop.f32.mrb[9].mxu0  ;;  %v1052_v44 = vadd.f32 %v3352_v42, %v2863_v41 }
 0x498   :  { %v1047_v45 = vadd.f32 %v2863_v41, %v1046_v43  ;;  %v1139_v41 = vld [vmem:[%s5234_s13 + $0x128] sm:$0xff] }
 0x499   :  { %v1056_v48 = vadd.f32 %v1052_v44, %v3919_v20  ;;  %v1155_v43 = vld [vmem:[%s5234_s13 + $0x1a8] sm:$0xff]  ;;  %v1141_v44 = vld [vmem:[%s5234_s13 + $0x138] sm:$0xff] }
 0x49a   :  { %v1055_v46 = vadd.f32 %v1047_v45, %v3892_v11  ;;  %v1157_v45 = vld [vmem:[%s5234_s13 + $0x1b8] sm:$0xff] }
 0x49b   :  { %v1060_v49 = vsel %vm83_vm0, %v1056_v48, 0.0 }
 0x49c   :  { %v1057_v47 = vsel %vm83_vm0, %v1055_v46, 0.0 }
 0x49d   :  { %1058 = vadd.xlane.f32.xlu0 %v1057_v47  ;;  %v3427_v47 = vpack.c.bf16 %v1122_v37, %v1106_v35  ;;  %v1165_v35 = vld [vmem:[%s5234_s13 + $0x1f8] sm:$0xff] }
 0x4a1   :  { %1061 = vadd.xlane.f32.xlu0 %v1060_v49  ;;  %v1138_v49 = vld [vmem:[%s5234_s13 + $0x120] sm:$0xff] }
 0x52a   :  { %v1059_v50 = vpop.xlane.xlu0 %1058 }
 0x52b   :  { %v1064_v51 = vmul.f32 0.03125, %v1059_v50 }
 0x52d   :  { %v4024_v52 = vsub.f32 %v1055_v46, %v1064_v51 }
 0x52e   :  { %v1062_v53 = vpop.xlane.xlu0 %1061 }
 0x52f   :  { %v1065_v54 = vmul.f32 0.03125, %v1062_v53  ;;  %v1068_v55 = vmul.f32 %v4024_v52, %v4024_v52  ;;  %v1140_v53 = vld [vmem:[%s5234_s13 + $0x130] sm:$0xff] }
 0x531   :  { %v4028_v56 = vsub.f32 %v1056_v48, %v1065_v54  ;;  %v1070_v11 = vsel %vm83_vm0, %v1068_v55, 0.0  ;;  %v3435_v48 = vpack.c.bf16 %v1124_v39, %v1108_v38  ;;  %v1156_v54 = vld [vmem:[%s5234_s13 + $0x1b0] sm:$0xff]  ;;  %v3429_v55 = vpack.c.bf16 %v1155_v43, %v1139_v41  ;;  %v1146_v38 = vld [vmem:[%s5234_s13 + $0x160] sm:$0xff] }
 0x532   :  { %1071 = vadd.xlane.f32.xlu1 %v1070_v11  ;;  %v3437_v11 = vpack.c.bf16 %v1157_v45, %v1141_v44  ;;  %v3439_v61 = vpack.c.bf16 %v1156_v54, %v1140_v53  ;;  %v1162_v39 = vld [vmem:[%s5234_s13 + $0x1e0] sm:$0xff]  ;;  %v1164_v41 = vld [vmem:[%s5234_s13 + $0x1f0] sm:$0xff]  ;;  %v1921_v45 = vld [vmem:[%s5237_s15 + $0x88] sm:$0xff] }
 0x533   :  { %v1069_v20 = vmul.f32 %v4028_v56, %v4028_v56  ;;  %v1920_v44 = vld [vmem:[%s5237_s15 + $0x80] sm:$0xff] }
 0x534   :  { %v3473_v53 = vpack.c.bf16 %v1921_v45, %v1920_v44  ;;  %v1962_v44 = vld [vmem:[%s5237_s15 + $0x1d0] sm:$0xff]  ;;  %v1963_v45 = vld [vmem:[%s5237_s15 + $0x1d8] sm:$0xff] }
 0x535   :  { %v1073_v57 = vsel %vm83_vm0, %v1069_v20, 0.0  ;;  %v1111_v20 = vld [vmem:[%s5234_s13 + $0x48] sm:$0xff] }
 0x536   :  { %1074 = vadd.xlane.f32.xlu1 %v1073_v57 }
 0x5bf   :  { %v1072_v26 = vpop.xlane.xlu1 %1071 }
 0x5c0   :  { %v1076_v28 = vmul.f32 0.03125, %v1072_v26  ;;  %v1130_v26 = vld [vmem:[%s5234_s13 + $0xe0] sm:$0xff] }
 0x5c2   :  { %v1078_v29 = vadd.f32 1e-05, %v1076_v28  ;;  %v1116_v28 = vld [vmem:[%s5234_s13 + $0x70] sm:$0xff] }
 0x5c3   :  { %v1075_v30 = vpop.xlane.xlu1 %1074 }
 0x5c4   :  { %3744 = vrsqrt.f32 %v1078_v29  ;;  %v1077_v31 = vmul.f32 0.03125, %v1075_v30  ;;  %v1132_v29 = vld [vmem:[%s5234_s13 + $0xf0] sm:$0xff]  ;;  %v3457_v30 = vpack.c.bf16 %v1131_v19, %v1115_v18  ;;  %v1959_v19 = vld [vmem:[%s5237_s15 + $0x1b8] sm:$0xff] }
 0x5c5   :  { %v3467_v37 = vpack.c.bf16 %v1132_v29, %v1116_v28  ;;  %v1958_v18 = vld [vmem:[%s5237_s15 + $0x1b0] sm:$0xff]  ;;  %v1943_v29 = vld [vmem:[%s5237_s15 + $0x138] sm:$0xff] }
 0x5c6   :  { %v1079_v32 = vadd.f32 1e-05, %v1077_v31  ;;  %v3465_v31 = vpack.c.bf16 %v1133_v22, %v1117_v21  ;;  %v1942_v28 = vld [vmem:[%s5237_s15 + $0x130] sm:$0xff] }
 0x5c8   :  { %3746 = vrsqrt.f32 %v1079_v32  ;;  %v1147_v32 = vld [vmem:[%s5234_s13 + $0x168] sm:$0xff] }
 0x5ce   :  { %v3745_v33 = vpop.eup %3744 }
 0x5cf   :  { %v1082_v36 = vmul.f32 %v3745_v33, %v4024_v52  ;;  %v1154_v52 = vld [vmem:[%s5234_s13 + $0x1a0] sm:$0xff]  ;;  %v1163_v33 = vld [vmem:[%s5234_s13 + $0x1e8] sm:$0xff] }
 0x5d0   :  { %v3431_v60 = vpack.c.bf16 %v1154_v52, %v1138_v49  ;;  %v1905_v52 = vld [vmem:[%s5237_s15 + $0x8] sm:$0xff] }
 0x5d1   :  { %v1091_v42 = vmul.f32 %v2866_v34, %v1082_v36  ;;  %v3459_v36 = vpack.c.bf16 %v1130_v26, %v1114_v25  ;;  %v3517_v26 = vpack.c.bf16 %v1959_v19, %v1958_v18  ;;  %v2016_v18 = vld [vmem:[%s5237_s15 + $0x380] sm:$0xff] }
 0x5d2   :  { %v3747_v46 = vpop.eup %3746 }
 0x5d3   :  { %v4128_v50 = vadd.f32 %v2867_v40, %v1091_v42  ;;  %v1083_v51 = vmul.f32 %v3747_v46, %v4028_v56  ;;  %v1127_v56 = vld [vmem:[%s5234_s13 + $0xc8] sm:$0xff]  ;;  %v3461_v42 = vpack.c.bf16 %v1163_v33, %v1147_v32  ;;  %v1952_v46 = vld [vmem:[%s5237_s15 + $0x180] sm:$0xff] }
 0x5d4   :  { %v3441_v3 = vpack.c.bf16 %v1127_v56, %v1111_v20  ;;  %v1922_v20 = vld [vmem:[%s5237_s15 + $0x90] sm:$0xff]  ;;  %v1960_v32 = vld [vmem:[%s5237_s15 + $0x1c0] sm:$0xff]  ;;  %v1961_v33 = vld [vmem:[%s5237_s15 + $0x1c8] sm:$0xff] }
 0x5d5   :  { %v1092_v57 = vmul.f32 %v2866_v34, %v1083_v51  ;;  %2868 = vmatmul.mubr.msk.f32.vlgmr.msra.gmra.mrb[14].mxu1 %vm83_vm0, %v4128_v50  ;;  %2870 = vmatmul.mubr.msk.f32.vlgmr.msra.gmra.mrb[10].mxu0 %vm83_vm0, %v4128_v50  ;;  %v1149_v34 = vld [vmem:[%s5234_s13 + $0x178] sm:$0xff]  ;;  %v1904_v51 = vld [vmem:[%s5237_s15] sm:$0xff]  ;;  %v1954_v56 = vld [vmem:[%s5237_s15 + $0x190] sm:$0xff] }
 0x5d6   :  { %3428 = vmatpush1.bf16.msra.mxu1 %v3427_v47  ;;  %3436 = vmatpush1.bf16.msra.mxu0 %v3435_v48  ;;  %v3469_v43 = vpack.c.bf16 %v1165_v35, %v1149_v34  ;;  %v1953_v47 = vld [vmem:[%s5237_s15 + $0x188] sm:$0xff]  ;;  %v3463_v48 = vpack.c.bf16 %v1162_v39, %v1146_v38  ;;  %v3475_v59 = vpack.c.bf16 %v1905_v52, %v1904_v51 }
 0x5d7   :  { %v4159_v63 = vadd.f32 %v2867_v40, %v1092_v57  ;;  %1326 = vmatprep.mubr.f32.mxu1 %v3754_v27  ;;  %1403 = vmatprep.mubr.f32.mxu0 %v3754_v27  ;;  %v1148_v40 = vld [vmem:[%s5234_s13 + $0x170] sm:$0xff]  ;;  %v3505_v54 = vpack.c.bf16 %v1953_v47, %v1952_v46  ;;  %v1923_v57 = vld [vmem:[%s5237_s15 + $0x98] sm:$0xff]  ;;  %v3509_v1 = vpack.c.bf16 %v1955_v58, %v1954_v56 }
 0x5d8   :  { %3430 = vmatprep.subr.bf16.mxu1 %v3429_v55  ;;  %3438 = vmatprep.subr.bf16.mxu0 %v3437_v11  ;;  %v3471_v49 = vpack.c.bf16 %v1164_v41, %v1148_v40  ;;  %v1936_v55 = vld [vmem:[%s5237_s15 + $0x100] sm:$0xff]  ;;  %v1937_v11 = vld [vmem:[%s5237_s15 + $0x108] sm:$0xff]  ;;  %v3477_v0 = vpack.c.bf16 %v1923_v57, %v1922_v20  ;;  %v3519_v35 = vpack.c.bf16 %v1943_v29, %v1942_v28 }
 0x5d9   :  { %2869 = vmatmul.mubr.msk.f32.gmra.mrb[16].mxu1 %vm83_vm0, %v4159_v63  ;;  %2871 = vmatmul.mubr.msk.f32.gmra.mrb[12].mxu0 %vm83_vm0, %v4159_v63  ;;  %v3521_v39 = vpack.c.bf16 %v1961_v33, %v1960_v32  ;;  %v1944_v40 = vld [vmem:[%s5237_s15 + $0x140] sm:$0xff]  ;;  %v1945_v41 = vld [vmem:[%s5237_s15 + $0x148] sm:$0xff]  ;;  %v3525_v52 = vpack.c.bf16 %v1963_v45, %v1962_v44 }
 0x5da   :  { %3432 = vmatpush1.bf16.msra.mxu1 %v3431_v60  ;;  %3440 = vmatpush1.bf16.msra.mxu0 %v3439_v61  ;;  %v3507_v60 = vpack.c.bf16 %v1937_v11, %v1936_v55  ;;  %v1906_v61 = vld [vmem:[%s5237_s15 + $0x10] sm:$0xff]  ;;  %v3523_v47 = vpack.c.bf16 %v1945_v41, %v1944_v40  ;;  %v1932_v55 = vld [vmem:[%s5237_s15 + $0xe0] sm:$0xff]  ;;  %v1933_v11 = vld [vmem:[%s5237_s15 + $0xe8] sm:$0xff] }
 0x5db   :  { %1474 = vmatprep.mubr.f32.mxu1 %v3754_v27  ;;  %1551 = vmatprep.mubr.f32.mxu0 %v3754_v27  ;;  %v3479_v8 = vpack.c.bf16 %v1907_v62, %v1906_v61  ;;  %v1964_v20 = vld [vmem:[%s5237_s15 + $0x1e0] sm:$0xff]  ;;  %v1965_v57 = vld [vmem:[%s5237_s15 + $0x1e8] sm:$0xff] }
 0x5dc   :  { %3442 = vmatprep.subr.bf16.mxu1 %v3441_v3  ;;  %3450 = vmatprep.subr.bf16.mxu0 %v3449_v4  ;;  %v1939_v3 = vld [vmem:[%s5237_s15 + $0x118] sm:$0xff]  ;;  %v1924_v4 = vld [vmem:[%s5237_s15 + $0xa0] sm:$0xff]  ;;  %v3529_v61 = vpack.c.bf16 %v1965_v57, %v1964_v20  ;;  %v1917_v62 = vld [vmem:[%s5237_s15 + $0x68] sm:$0xff] }
 0x5dd   :  { %2872 = vmatmul.mubr.msk.f32.vlgmr.msra.gmra.mrb[18].mxu1 %vm83_vm0, %v4128_v50  ;;  %2874 = vmatmul.mubr.msk.f32.vlgmr.msra.gmra.mrb[14].mxu0 %vm83_vm0, %v4128_v50  ;;  %v3481_v13 = vpack.c.bf16 %v1925_v5, %v1924_v4  ;;  %v1934_v4 = vld [vmem:[%s5237_s15 + $0xf0] sm:$0xff]  ;;  %v1935_v5 = vld [vmem:[%s5237_s15 + $0xf8] sm:$0xff]  ;;  %v4495_v28 = vld [vmem:[%s5238_s14] sm:$0xff] }
 0x5de   :  { %3444 = vmatpush1.bf16.msra.mxu1 %v3443_v9  ;;  %3452 = vmatpush1.bf16.msra.mxu0 %v3451_v10  ;;  %v3511_v9 = vpack.c.bf16 %v1939_v3, %v1938_v2  ;;  %v1908_v10 = vld [vmem:[%s5237_s15 + $0x20] sm:$0xff]  ;;  %v3501_v7 = vpack.c.bf16 %v1935_v5, %v1934_v4  ;;  %v2001_v41 = vld [vmem:[%s5237_s15 + $0x308] sm:$0xff]  ;;  %v1970_v20 = vld [vmem:[%s5237_s15 + $0x210] sm:$0xff] }
 0x5df   :  { %1480 = vmatprep.mubr.f32.mxu1 %v3754_v27  ;;  %1557 = vmatprep.mubr.f32.mxu0 %v3754_v27  ;;  %v3483_v21 = vpack.c.bf16 %v1909_v12, %v1908_v10  ;;  %v1919_v10 = vld [vmem:[%s5237_s15 + $0x78] sm:$0xff]  ;;  %v2000_v40 = vld [vmem:[%s5237_s15 + $0x300] sm:$0xff] }
 0x5e0   :  { %3446 = vmatprep.subr.bf16.mxu1 %v3445_v16  ;;  %3454 = vmatprep.subr.bf16.mxu0 %v3453_v17  ;;  %v1926_v16 = vld [vmem:[%s5237_s15 + $0xb0] sm:$0xff]  ;;  %v1927_v17 = vld [vmem:[%s5237_s15 + $0xb8] sm:$0xff] }
 0x5e1   :  { %2873 = vmatmul.mubr.msk.f32.gmra.mrb[20].mxu1 %vm83_vm0, %v4159_v63  ;;  %2875 = vmatmul.mubr.msk.f32.gmra.mrb[16].mxu0 %vm83_vm0, %v4159_v63  ;;  %v3485_v25 = vpack.c.bf16 %v1927_v17, %v1926_v16  ;;  %v1984_v16 = vld [vmem:[%s5237_s15 + $0x280] sm:$0xff]  ;;  %v1985_v17 = vld [vmem:[%s5237_s15 + $0x288] sm:$0xff] }
 0x5e2   :  { %3448 = vmatpush1.bf16.msra.mxu1 %v3447_v23  ;;  %3456 = vmatpush1.bf16.msra.mxu0 %v3455_v24  ;;  %v1910_v23 = vld [vmem:[%s5237_s15 + $0x30] sm:$0xff]  ;;  %v1911_v24 = vld [vmem:[%s5237_s15 + $0x38] sm:$0xff]  ;;  %v3537_v19 = vpack.c.bf16 %v1985_v17, %v1984_v16  ;;  %v1973_v16 = vld [vmem:[%s5237_s15 + $0x228] sm:$0xff] }
 0x5e3   :  { %1628 = vmatprep.mubr.f32.mxu1 %v3754_v27  ;;  %1705 = vmatprep.mubr.f32.mxu0 %v3754_v27  ;;  %v3487_v34 = vpack.c.bf16 %v1911_v24, %v1910_v23  ;;  %v1170_v23 = vlaneseq }
 0x5e4   :  { %3458 = vmatprep.subr.bf16.mxu1 %v3457_v30  ;;  %3466 = vmatprep.subr.bf16.mxu0 %v3465_v31  ;;  %v1928_v30 = vld [vmem:[%s5237_s15 + $0xc0] sm:$0xff]  ;;  %v1929_v31 = vld [vmem:[%s5237_s15 + $0xc8] sm:$0xff] }
 0x5e5   :  { %2876 = vmatmul.mubr.msk.f32.vlgmr.msra.gmra.mrb[22].mxu1 %vm83_vm0, %v4128_v50  ;;  %2878 = vmatmul.mubr.msk.f32.vlgmr.msra.gmra.mrb[18].mxu0 %vm83_vm0, %v4128_v50  ;;  %v3489_v38 = vpack.c.bf16 %v1929_v31, %v1928_v30  ;;  %v4488_v24 = vshrl.u32 %v1170_v23, 7 }
 0x5e6   :  { %3460 = vmatpush1.bf16.msra.mxu1 %v3459_v36  ;;  %3468 = vmatpush1.bf16.msra.mxu0 %v3467_v37  ;;  %v1912_v36 = vld [vmem:[%s5237_s15 + $0x40] sm:$0xff]  ;;  %v1913_v37 = vld [vmem:[%s5237_s15 + $0x48] sm:$0xff] }
 0x5e7   :  { %1634 = vmatprep.mubr.f32.mxu1 %v3754_v27  ;;  %1711 = vmatprep.mubr.f32.mxu0 %v3754_v27  ;;  %v3491_v46 = vpack.c.bf16 %v1913_v37, %v1912_v36  ;;  %v1176_v29 = vsub.s32 1, %v4488_v24  ;;  %v1184_v30 = vsub.s32 3, %v4488_v24  ;;  %v1969_v36 = vld [vmem:[%s5237_s15 + $0x208] sm:$0xff]  ;;  %v1192_v37 = vsub.s32 5, %v4488_v24 }
 0x5e8   :  { %3462 = vmatprep.subr.bf16.mxu1 %v3461_v42  ;;  %3470 = vmatprep.subr.bf16.mxu0 %v3469_v43  ;;  %v1930_v42 = vld [vmem:[%s5237_s15 + $0xd0] sm:$0xff]  ;;  %v1931_v43 = vld [vmem:[%s5237_s15 + $0xd8] sm:$0xff] }
 0x5e9   :  { %2877 = vmatmul.mubr.msk.f32.gmra.mrb[24].mxu1 %vm83_vm0, %v4159_v63  ;;  %2879 = vmatmul.mubr.msk.f32.gmra.mrb[20].mxu0 %vm83_vm0, %v4159_v63  ;;  %v3493_v51 = vpack.c.bf16 %v1931_v43, %v1930_v42  ;;  %v1177_v33 = vrot.slane %v4495_v28, %v1176_v29  ;;  %v1986_v42 = vld [vmem:[%s5237_s15 + $0x290] sm:$0xff] }
 0x5ea   :  { %3464 = vmatpush1.bf16.msra.mxu1 %v3463_v48  ;;  %3472 = vmatpush1.bf16.msra.mxu0 %v3471_v49  ;;  %v1914_v48 = vld [vmem:[%s5237_s15 + $0x50] sm:$0xff]  ;;  %v1915_v49 = vld [vmem:[%s5237_s15 + $0x58] sm:$0xff] }
 0x5eb   :  { %1782 = vmatprep.mubr.f32.mxu1 %v3754_v27  ;;  %1859 = vmatprep.mubr.f32.mxu0 %v3754_v27  ;;  %v3495_v56 = vpack.c.bf16 %v1915_v49, %v1914_v48  ;;  %v2018_v48 = vld [vmem:[%s5237_s15 + $0x390] sm:$0xff]  ;;  %v2019_v49 = vld [vmem:[%s5237_s15 + $0x398] sm:$0xff] }
 0x5ec   :  { %3474 = vmatprep.subr.bf16.mxu1 %v3473_v53  ;;  %3506 = vmatprep.subr.bf16.mxu0 %v3505_v54  ;;  %v1946_v53 = vld [vmem:[%s5237_s15 + $0x150] sm:$0xff]  ;;  %v1947_v54 = vld [vmem:[%s5237_s15 + $0x158] sm:$0xff] }
 0x5ed   :  { %2880 = vmatmul.mubr.msk.f32.vlgmr.msra.gmra.mrb[26].mxu1 %vm83_vm0, %v4128_v50  ;;  %2882 = vmatmul.mubr.msk.f32.vlgmr.msra.gmra.mrb[22].mxu0 %vm83_vm0, %v4128_v50  ;;  %v3527_v58 = vpack.c.bf16 %v1947_v54, %v1946_v53  ;;  %v1200_v53 = vsub.s32 7, %v4488_v24 }
 0x5ee   :  { %1788 = vmatprep.mubr.f32.mxu1 %v3754_v27  ;;  %1865 = vmatprep.mubr.f32.mxu0 %v3754_v27  ;;  %v1940_v27 = vld [vmem:[%s5237_s15 + $0x120] sm:$0xff] }
 0x5ef   :  { %3476 = vmatpush3.bf16.msra.mxu1 %v3475_v59  ;;  %3508 = vmatpush3.bf16.msra.mxu0 %v3507_v60  ;;  %v3515_v22 = vpack.c.bf16 %v1941_v15, %v1940_v27  ;;  %v1916_v59 = vld [vmem:[%s5237_s15 + $0x60] sm:$0xff]  ;;  %v3497_v60 = vpack.c.bf16 %v1933_v11, %v1932_v55  ;;  %v1951_v27 = vld [vmem:[%s5237_s15 + $0x178] sm:$0xff]  ;;  %v3571_v55 = vpack.c.bf16 %v2001_v41, %v2000_v40  ;;  %v4590_v40 = vld [vmem:[%s5238_s14 + $0x8] sm:$0xff] }
 0x5f0   :  { %3478 = vmatprep.subr.bf16.mxu1 %v3477_v0  ;;  %3510 = vmatprep.subr.bf16.mxu0 %v3509_v1  ;;  %v1948_v0 = vld [vmem:[%s5237_s15 + $0x160] sm:$0xff]  ;;  %v1949_v1 = vld [vmem:[%s5237_s15 + $0x168] sm:$0xff]  ;;  %v3499_v2 = vpack.c.bf16 %v1917_v62, %v1916_v59  ;;  %v4540_v11 = vrot.slane %v4495_v28, %v1192_v37  ;;  %v1971_v62 = vld [vmem:[%s5237_s15 + $0x218] sm:$0xff] }
 0x5f1   :  { %2881 = vmatmul.mubr.msk.f32.gmra.mrb[28].mxu1 %vm83_vm0, %v4159_v63  ;;  %2883 = vmatmul.mubr.msk.f32.gmra.mrb[24].mxu0 %vm83_vm0, %v4159_v63  ;;  %v3531_v3 = vpack.c.bf16 %v1949_v1, %v1948_v0  ;;  %v2002_v0 = vld [vmem:[%s5237_s15 + $0x310] sm:$0xff] }
 0x5f2   :  { %v1990_v41 = vld [vmem:[%s5237_s15 + $0x2b0] sm:$0xff] }
 0x5f3   :  { %3480 = vmatpush3.bf16.msra.mxu1 %v3479_v8  ;;  %3512 = vmatpush3.bf16.msra.mxu0 %v3511_v9  ;;  %v1967_v8 = vld [vmem:[%s5237_s15 + $0x1f8] sm:$0xff]  ;;  %v1918_v9 = vld [vmem:[%s5237_s15 + $0x70] sm:$0xff] }
 0x5f4   :  { %3482 = vmatprep.subr.bf16.mxu1 %v3481_v13  ;;  %3514 = vmatprep.subr.bf16.mxu0 %v3513_v14  ;;  %v3533_v12 = vpack.c.bf16 %v1967_v8, %v1966_v6  ;;  %v3503_v13 = vpack.c.bf16 %v1919_v10, %v1918_v9  ;;  %v1950_v14 = vld [vmem:[%s5237_s15 + $0x170] sm:$0xff]  ;;  %v1988_v8 = vld [vmem:[%s5237_s15 + $0x2a0] sm:$0xff] }
 0x5f5   :  { %v3535_v15 = vpack.c.bf16 %v1951_v27, %v1950_v14  ;;  %v2020_v14 = vld [vmem:[%s5237_s15 + $0x3a0] sm:$0xff]  ;;  %v2021_v27 = vld [vmem:[%s5237_s15 + $0x3a8] sm:$0xff] }
 0x5f7   :  { %3484 = vmatpush3.bf16.msra.mxu1 %v3483_v21  ;;  %3516 = vmatpush3.bf16.msra.mxu0 %v3515_v22  ;;  %v2017_v21 = vld [vmem:[%s5237_s15 + $0x388] sm:$0xff] }
 0x5f8   :  { %3486 = vmatprep.subr.bf16.mxu1 %v3485_v25  ;;  %3518 = vmatprep.subr.bf16.mxu0 %v3517_v26  ;;  %v3569_v22 = vpack.c.bf16 %v2017_v21, %v2016_v18  ;;  %v1172_v25 = vsub.s32 0, %v4488_v24  ;;  %v1180_v26 = vsub.s32 2, %v4488_v24 }
 0x5fa   :  { %v1173_v31 = vrot.slane %v4495_v28, %v1172_v25  ;;  %v1181_v32 = vrot.slane %v4495_v28, %v1180_v26 }
 0x5fb   :  { %3488 = vmatpush3.bf16.msra.mxu1 %v3487_v34  ;;  %3520 = vmatpush3.bf16.msra.mxu0 %v3519_v35  ;;  %v1185_v34 = vrot.slane %v4495_v28, %v1184_v30  ;;  %v1968_v35 = vld [vmem:[%s5237_s15 + $0x200] sm:$0xff] }
 0x5fc   :  { %3490 = vmatprep.subr.bf16.mxu1 %v3489_v38  ;;  %3522 = vmatprep.subr.bf16.mxu0 %v3521_v39  ;;  %v3539_v54 = vpack.c.bf16 %v1969_v36, %v1968_v35 }
 0x5ff   :  { %3492 = vmatpush3.bf16.msra.mxu1 %v3491_v46  ;;  %3524 = vmatpush3.bf16.msra.mxu0 %v3523_v47  ;;  %v1987_v47 = vld [vmem:[%s5237_s15 + $0x298] sm:$0xff] }
 0x600   :  { %3494 = vmatprep.subr.bf16.mxu1 %v3493_v51  ;;  %3526 = vmatprep.subr.bf16.mxu0 %v3525_v52 }
 0x603   :  { %3496 = vmatpush3.bf16.msra.mxu1 %v3495_v56  ;;  %3528 = vmatpush3.bf16.msra.mxu0 %v3527_v58 }
 0x604   :  { %3498 = vmatprep.subr.bf16.mxu1 %v3497_v60  ;;  %3530 = vmatprep.subr.bf16.mxu0 %v3529_v61  ;;  %v3541_v60 = vpack.c.bf16 %v1987_v47, %v1986_v42  ;;  %v3573_v61 = vpack.c.bf16 %v2019_v49, %v2018_v48 }
 0x607   :  { %3500 = vmatpush3.bf16.msra.mxu1 %v3499_v2  ;;  %3532 = vmatpush3.bf16.msra.mxu0 %v3531_v3 }
 0x608   :  { %3502 = vmatprep.subr.bf16.mxu1 %v3501_v7  ;;  %3534 = vmatprep.subr.bf16.mxu0 %v3533_v12  ;;  %v2003_v7 = vld [vmem:[%s5237_s15 + $0x318] sm:$0xff]  ;;  %v4560_v12 = vrot.slane %v4495_v28, %v1200_v53 }
 0x609   :  { %v3575_v23 = vpack.c.bf16 %v2003_v7, %v2002_v0  ;;  %v1992_v0 = vld [vmem:[%s5237_s15 + $0x2c0] sm:$0xff] }
 0x60a   :  { %v1976_v7 = vld [vmem:[%s5237_s15 + $0x240] sm:$0xff] }
 0x60b   :  { %3504 = vmatpush3.bf16.msra.mxu1 %v3503_v13  ;;  %3536 = vmatpush3.bf16.msra.mxu0 %v3535_v15  ;;  %v1989_v13 = vld [vmem:[%s5237_s15 + $0x2a8] sm:$0xff]  ;;  %v1972_v15 = vld [vmem:[%s5237_s15 + $0x220] sm:$0xff] }
 0x60c   :  { %3538 = vmatprep.subr.bf16.mxu1 %v3537_v19  ;;  %3570 = vmatprep.subr.bf16.mxu0 %v3569_v22  ;;  %v3543_v22 = vpack.c.bf16 %v1971_v62, %v1970_v20  ;;  %v1975_v20 = vld [vmem:[%s5237_s15 + $0x238] sm:$0xff] }
 0x60d   :  { %v2007_v62 = vld [vmem:[%s5237_s15 + $0x338] sm:$0xff] }
 0x6a8   :  { %v1322_v38 = vpop.f32.mrb[14].mxu1  ;;  %v1399_v39 = vpop.f32.mrb[10].mxu0 }
 0x6a9   :  { %v1323_v43 = vadd.f32 %v1322_v38, %v1173_v31  ;;  %v1400_v44 = vadd.f32 %v1399_v39, %v1181_v32  ;;  %v1324_v45 = vpop.f32.mrb[15].mxu1  ;;  %v1401_v46 = vpop.f32.mrb[11].mxu0  ;;  %v3545_v38 = vpack.c.bf16 %v1989_v13, %v1988_v8  ;;  %v3577_v39 = vpack.c.bf16 %v2021_v27, %v2020_v14  ;;  %v1977_v8 = vld [vmem:[%s5237_s15 + $0x248] sm:$0xff] }
 0x6aa   :  { %v1325_v51 = vadd.f32 %v1324_v45, %v1177_v33  ;;  %v1402_v52 = vadd.f32 %v1401_v46, %v1185_v34  ;;  %v2022_v45 = vld [vmem:[%s5237_s15 + $0x3b0] sm:$0xff]  ;;  %v2023_v46 = vld [vmem:[%s5237_s15 + $0x3b8] sm:$0xff] }
 0x6ab   :  { %v1872_v1 = vmax.f32 %v1323_v43, 0.0  ;;  %v1874_v2 = vmax.f32 %v1400_v44, 0.0  ;;  %v1991_v44 = vld [vmem:[%s5237_s15 + $0x2b8] sm:$0xff] }
 0x6ac   :  { %v1873_v57 = vmax.f32 %v1325_v51, 0.0  ;;  %v1875_v56 = vmax.f32 %v1402_v52, 0.0  ;;  %v1328_v58 = vpop.f32.mrb[16].mxu1  ;;  %v1405_v59 = vpop.f32.mrb[12].mxu0  ;;  %v3547_v52 = vpack.c.bf16 %v1973_v16, %v1972_v15  ;;  %v2008_v15 = vld [vmem:[%s5237_s15 + $0x340] sm:$0xff]  ;;  %v2009_v16 = vld [vmem:[%s5237_s15 + $0x348] sm:$0xff] }
 0x6ad   :  { %v1329_v3 = vadd.f32 %v1328_v58, %v1173_v31  ;;  %v1406_v4 = vadd.f32 %v1405_v59, %v1181_v32  ;;  %v1330_v5 = vpop.f32.mrb[17].mxu1  ;;  %v1407_v6 = vpop.f32.mrb[13].mxu0  ;;  %v2004_v31 = vld [vmem:[%s5237_s15 + $0x320] sm:$0xff]  ;;  %v2005_v32 = vld [vmem:[%s5237_s15 + $0x328] sm:$0xff]  ;;  %v1213_v58 = vrot.slane %v4590_v40, %v1180_v26  ;;  %v3549_v59 = vpack.c.bf16 %v1991_v44, %v1990_v41  ;;  %v1978_v41 = vld [vmem:[%s5237_s15 + $0x250] sm:$0xff] }
 0x6ae   :  { %v1331_v9 = vadd.f32 %v1330_v5, %v1177_v33  ;;  %v1408_v10 = vadd.f32 %v1407_v6, %v1185_v34  ;;  %2231 = vmatprep.mubr.f32.mxu1 %v1873_v57  ;;  %2306 = vmatprep.mubr.f32.mxu0 %v1875_v56  ;;  %v1993_v26 = vld [vmem:[%s5237_s15 + $0x2c8] sm:$0xff] }
 0x6af   :  { %2232 = vmatmul.mubr.f32.vlgmr.msra.gmra.mrb[30].mxu1 %v1872_v1  ;;  %2307 = vmatmul.mubr.f32.vlgmr.msra.gmra.mrb[26].mxu0 %v1874_v2  ;;  %v1888_v33 = vmax.f32 %v1329_v3, 0.0  ;;  %v1890_v34 = vmax.f32 %v1406_v4, 0.0  ;;  %v2024_v1 = vld [vmem:[%s5237_s15 + $0x3c0] sm:$0xff]  ;;  %v2025_v2 = vld [vmem:[%s5237_s15 + $0x3c8] sm:$0xff]  ;;  %v3553_v14 = vpack.c.bf16 %v1993_v26, %v1992_v0 }
 0x6b0   :  { %v1889_v17 = vmax.f32 %v1331_v9, 0.0  ;;  %v1891_v18 = vmax.f32 %v1408_v10, 0.0  ;;  %3540 = vmatpush3.bf16.msra.mxu1 %v3539_v54  ;;  %3572 = vmatpush3.bf16.msra.mxu0 %v3571_v55  ;;  %v4577_v19 = vpop.f32.mrb[18].mxu1  ;;  %v4579_v21 = vpop.f32.mrb[14].mxu0  ;;  %v3579_v54 = vpack.c.bf16 %v2005_v32, %v2004_v31  ;;  %v1974_v55 = vld [vmem:[%s5237_s15 + $0x230] sm:$0xff]  ;;  %v3585_v27 = vpack.c.bf16 %v2025_v2, %v2024_v1  ;;  %v2027_v32 = vld [vmem:[%s5237_s15 + $0x3d8] sm:$0xff] }
 0x6b1   :  { %v1478_v35 = vpop.f32.mrb[19].mxu1  ;;  %v1555_v36 = vpop.f32.mrb[15].mxu0  ;;  %3542 = vmatprep.subr.bf16.mxu1 %v3541_v60  ;;  %3574 = vmatprep.subr.bf16.mxu0 %v3573_v61  ;;  %v3581_v60 = vpack.c.bf16 %v2023_v46, %v2022_v45  ;;  %v2006_v61 = vld [vmem:[%s5237_s15 + $0x330] sm:$0xff]  ;;  %v3551_v5 = vpack.c.bf16 %v1975_v20, %v1974_v55  ;;  %v1997_v55 = vld [vmem:[%s5237_s15 + $0x2e8] sm:$0xff]  ;;  %v1225_v20 = vrot.slane %v4590_v40, %v1192_v37  ;;  %v1980_v37 = vld [vmem:[%s5237_s15 + $0x260] sm:$0xff] }
 0x6b2   :  { %v1479_v42 = vadd.f32 %v1478_v35, %v4540_v11  ;;  %v1556_v43 = vadd.f32 %v1555_v36, %v4560_v12  ;;  %2236 = vmatprep.mubr.f32.mxu1 %v1889_v17  ;;  %2311 = vmatprep.mubr.f32.mxu0 %v1891_v18  ;;  %v3583_v6 = vpack.c.bf16 %v2007_v62, %v2006_v61  ;;  %v1994_v17 = vld [vmem:[%s5237_s15 + $0x2d0] sm:$0xff]  ;;  %v1188_v18 = vsub.s32 4, %v4488_v24  ;;  %v2012_v2 = vld [vmem:[%s5237_s15 + $0x360] sm:$0xff] }
 0x6b3   :  { %2237 = vmatmul.mubr.f32.gmra.mrb[32].mxu1 %v1888_v33  ;;  %2312 = vmatmul.mubr.f32.gmra.mrb[28].mxu0 %v1890_v34  ;;  %v2026_v31 = vld [vmem:[%s5237_s15 + $0x3d0] sm:$0xff]  ;;  %v3555_v33 = vpack.c.bf16 %v1977_v8, %v1976_v7  ;;  %v3587_v36 = vpack.c.bf16 %v2009_v16, %v2008_v15  ;;  %v1999_v15 = vld [vmem:[%s5237_s15 + $0x2f8] sm:$0xff] }
 0x6b4   :  { %v1877_v47 = vmax.f32 %v1479_v42, 0.0  ;;  %v1879_v48 = vmax.f32 %v1556_v43, 0.0  ;;  %3544 = vmatpush3.bf16.msra.mxu1 %v3543_v22  ;;  %3576 = vmatpush3.bf16.msra.mxu0 %v3575_v23  ;;  %v4606_v49 = vpop.f32.mrb[20].mxu1  ;;  %v4608_v51 = vpop.f32.mrb[16].mxu0  ;;  %v1196_v22 = vsub.s32 6, %v4488_v24  ;;  %v1995_v23 = vld [vmem:[%s5237_s15 + $0x2d8] sm:$0xff] }
 0x6b5   :  { %v4616_v57 = vpop.f32.mrb[21].mxu1  ;;  %v4618_v56 = vpop.f32.mrb[17].mxu0  ;;  %3546 = vmatprep.subr.bf16.mxu1 %v3545_v38  ;;  %3578 = vmatprep.subr.bf16.mxu0 %v3577_v39  ;;  %v1221_v38 = vrot.slane %v4590_v40, %v1188_v18  ;;  %v1979_v42 = vld [vmem:[%s5237_s15 + $0x258] sm:$0xff]  ;;  %v2010_v43 = vld [vmem:[%s5237_s15 + $0x350] sm:$0xff]  ;;  %v2113_v24 = vld [vmem:[%s5237_s15 + $0x688] sm:$0xff] }
 0x6b6   :  { %2381 = vmatprep.mubr.f32.mxu1 %v1877_v47  ;;  %2456 = vmatprep.mubr.f32.mxu0 %v1879_v48  ;;  %v1229_v39 = vrot.slane %v4590_v40, %v1196_v22  ;;  %v3557_v47 = vpack.c.bf16 %v1995_v23, %v1994_v17  ;;  %v3589_v48 = vpack.c.bf16 %v2027_v32, %v2026_v31  ;;  %v2030_v23 = vld [vmem:[%s5237_s15 + $0x3f0] sm:$0xff]  ;;  %v2031_v31 = vld [vmem:[%s5237_s15 + $0x3f8] sm:$0xff] }
 0x6b7   :  { %v3559_v0 = vpack.c.bf16 %v1979_v42, %v1978_v41  ;;  %v1189_v32 = vrot.slane %v4495_v28, %v1188_v18  ;;  %v2014_v18 = vld [vmem:[%s5237_s15 + $0x370] sm:$0xff] }
 0x6b8   :  { %3548 = vmatpush3.bf16.msra.mxu1 %v3547_v52  ;;  %3580 = vmatpush3.bf16.msra.mxu0 %v3579_v54  ;;  %v4641_v3 = vpop.f32.mrb[22].mxu1  ;;  %v1707_v4 = vpop.f32.mrb[18].mxu0  ;;  %v2011_v52 = vld [vmem:[%s5237_s15 + $0x358] sm:$0xff]  ;;  %v1996_v54 = vld [vmem:[%s5237_s15 + $0x2e0] sm:$0xff] }
 0x6b9   :  { %v4649_v9 = vadd.f32 %v1707_v4, %v1213_v58  ;;  %v4651_v10 = vpop.f32.mrb[23].mxu1  ;;  %v4653_v13 = vpop.f32.mrb[19].mxu0  ;;  %3550 = vmatprep.subr.bf16.mxu1 %v3549_v59  ;;  %3582 = vmatprep.subr.bf16.mxu0 %v3581_v60  ;;  %v2028_v59 = vld [vmem:[%s5237_s15 + $0x3e0] sm:$0xff]  ;;  %v2029_v60 = vld [vmem:[%s5237_s15 + $0x3e8] sm:$0xff]  ;;  %v3591_v26 = vpack.c.bf16 %v2011_v52, %v2010_v43  ;;  %v3561_v1 = vpack.c.bf16 %v1997_v55, %v1996_v54 }
 0x6ba   :  { %v3593_v8 = vpack.c.bf16 %v2029_v60, %v2028_v59  ;;  %v3597_v55 = vpack.c.bf16 %v2031_v31, %v2030_v23  ;;  %v2015_v59 = vld [vmem:[%s5237_s15 + $0x378] sm:$0xff]  ;;  %v2048_v60 = vld [vmem:[%s5237_s15 + $0x480] sm:$0xff]  ;;  %v4814_v31 = vrot.slane %v4590_v40, %v1176_v29  ;;  %v2034_v29 = vld [vmem:[%s5237_s15 + $0x410] sm:$0xff] }
 0x6bb   :  { %v2083_v23 = vld [vmem:[%s5237_s15 + $0x598] sm:$0xff] }
 0x6bc   :  { %3552 = vmatpush3.bf16.msra.mxu1 %v3551_v5  ;;  %3584 = vmatpush3.bf16.msra.mxu0 %v3583_v6  ;;  %v4675_v34 = vpop.f32.mrb[24].mxu1  ;;  %v1713_v35 = vpop.f32.mrb[20].mxu0 }
 0x6bd   :  { %v4688_v44 = vadd.f32 %v1713_v35, %v1213_v58  ;;  %v4690_v45 = vpop.f32.mrb[25].mxu1  ;;  %v4692_v46 = vpop.f32.mrb[21].mxu0  ;;  %3554 = vmatprep.subr.bf16.mxu1 %v3553_v14  ;;  %3586 = vmatprep.subr.bf16.mxu0 %v3585_v27  ;;  %v1233_v58 = vrot.slane %v4590_v40, %v1200_v53  ;;  %v1981_v53 = vld [vmem:[%s5237_s15 + $0x268] sm:$0xff]  ;;  %v1998_v27 = vld [vmem:[%s5237_s15 + $0x2f0] sm:$0xff] }
 0x6be   :  { %v2013_v14 = vld [vmem:[%s5237_s15 + $0x368] sm:$0xff]  ;;  %v3563_v41 = vpack.c.bf16 %v1981_v53, %v1980_v37  ;;  %v3565_v43 = vpack.c.bf16 %v1999_v15, %v1998_v27  ;;  %v2064_v53 = vld [vmem:[%s5237_s15 + $0x500] sm:$0xff]  ;;  %v2051_v27 = vld [vmem:[%s5237_s15 + $0x498] sm:$0xff] }
 0x6bf   :  { %v3595_v42 = vpack.c.bf16 %v2013_v14, %v2012_v2  ;;  %v2065_v2 = vld [vmem:[%s5237_s15 + $0x508] sm:$0xff]  ;;  %v2082_v15 = vld [vmem:[%s5237_s15 + $0x590] sm:$0xff] }
 0x6c0   :  { %3556 = vmatpush3.bf16.msra.mxu1 %v3555_v33  ;;  %3588 = vmatpush3.bf16.msra.mxu0 %v3587_v36  ;;  %v1784_v61 = vpop.f32.mrb[26].mxu1  ;;  %v1861_v62 = vpop.f32.mrb[22].mxu0  ;;  %v1197_v33 = vrot.slane %v4495_v28, %v1196_v22 }
 0x6c1   :  { %v4724_v4 = vadd.f32 %v1784_v61, %v1221_v38  ;;  %v4726_v5 = vadd.f32 %v1861_v62, %v1229_v39  ;;  %v1786_v6 = vpop.f32.mrb[27].mxu1  ;;  %v1863_v7 = vpop.f32.mrb[23].mxu0  ;;  %3558 = vmatprep.subr.bf16.mxu1 %v3557_v47  ;;  %3590 = vmatprep.subr.bf16.mxu0 %v3589_v48  ;;  %v1982_v47 = vld [vmem:[%s5237_s15 + $0x270] sm:$0xff]  ;;  %v1983_v48 = vld [vmem:[%s5237_s15 + $0x278] sm:$0xff]  ;;  %v2080_v62 = vld [vmem:[%s5237_s15 + $0x580] sm:$0xff] }
 0x6c2   :  { %v4737_v16 = vadd.f32 %v1786_v6, %v1225_v20  ;;  %v4739_v17 = vadd.f32 %v1863_v7, %v1233_v58  ;;  %v2050_v6 = vld [vmem:[%s5237_s15 + $0x490] sm:$0xff]  ;;  %v1477_v7 = vadd.f32 %v4577_v19, %v1189_v32  ;;  %v1485_v19 = vadd.f32 %v4616_v57, %v4540_v11 }
 0x6c4   :  { %3560 = vmatpush3.bf16.msra.mxu1 %v3559_v0  ;;  %3592 = vmatpush3.bf16.msra.mxu0 %v3591_v26  ;;  %v1790_v35 = vpop.f32.mrb[28].mxu1  ;;  %v1867_v36 = vpop.f32.mrb[24].mxu0  ;;  %v2081_v0 = vld [vmem:[%s5237_s15 + $0x588] sm:$0xff]  ;;  %v2032_v26 = vld [vmem:[%s5237_s15 + $0x400] sm:$0xff]  ;;  %v1876_v11 = vmax.f32 %v1477_v7, 0.0  ;;  %v2087_v7 = vld [vmem:[%s5237_s15 + $0x5b8] sm:$0xff] }
 0x6c5   :  { %v4758_v28 = vadd.f32 %v1790_v35, %v1221_v38  ;;  %v4760_v22 = vadd.f32 %v1867_v36, %v1229_v39  ;;  %v1792_v52 = vpop.f32.mrb[29].mxu1  ;;  %v1869_v54 = vpop.f32.mrb[25].mxu0  ;;  %3562 = vmatprep.subr.bf16.mxu1 %v3561_v1  ;;  %3594 = vmatprep.subr.bf16.mxu0 %v3593_v8  ;;  %v2049_v38 = vld [vmem:[%s5237_s15 + $0x488] sm:$0xff]  ;;  %v1554_v8 = vadd.f32 %v4579_v21, %v1197_v33 }
 0x6c6   :  { %v4771_v61 = vadd.f32 %v1792_v52, %v1225_v20  ;;  %v4773_v39 = vadd.f32 %v1869_v54, %v1233_v58  ;;  %v2033_v1 = vld [vmem:[%s5237_s15 + $0x408] sm:$0xff]  ;;  %v3567_v20 = vpack.c.bf16 %v1983_v48, %v1982_v47  ;;  %v3599_v58 = vpack.c.bf16 %v2015_v59, %v2014_v18 }
 0x6c7   :  { %v3601_v37 = vpack.c.bf16 %v2049_v38, %v2048_v60  ;;  %v3633_v14 = vpack.c.bf16 %v2081_v0, %v2080_v62  ;;  %v1562_v21 = vadd.f32 %v4618_v56, %v4560_v12  ;;  %v4819_v35 = vrot.slane %v4590_v40, %v1184_v30  ;;  %v2035_v30 = vld [vmem:[%s5237_s15 + $0x418] sm:$0xff]  ;;  %v2085_v52 = vld [vmem:[%s5237_s15 + $0x5a8] sm:$0xff]  ;;  %v2036_v38 = vld [vmem:[%s5237_s15 + $0x420] sm:$0xff] }
 0x6c8   :  { %3564 = vmatpush3.bf16.msra.mxu1 %v3563_v41  ;;  %3596 = vmatpush3.bf16.msra.mxu0 %v3595_v42  ;;  %v3603_v36 = vpack.c.bf16 %v2033_v1, %v2032_v26  ;;  %v3635_v41 = vpack.c.bf16 %v2065_v2, %v2064_v53  ;;  %v3605_v42 = vpack.c.bf16 %v2051_v27, %v2050_v6  ;;  %v1878_v57 = vmax.f32 %v1554_v8, 0.0  ;;  %v2037_v62 = vld [vmem:[%s5237_s15 + $0x428] sm:$0xff]  ;;  %v2054_v53 = vld [vmem:[%s5237_s15 + $0x4b0] sm:$0xff]  ;;  %v2055_v2 = vld [vmem:[%s5237_s15 + $0x4b8] sm:$0xff] }
 0x6c9   :  { %3566 = vmatprep.subr.bf16.mxu1 %v3565_v43  ;;  %3598 = vmatprep.subr.bf16.mxu0 %v3597_v55  ;;  %v3637_v43 = vpack.c.bf16 %v2083_v23, %v2082_v15  ;;  %v1483_v12 = vadd.f32 %v4606_v49, %v1189_v32  ;;  %v1560_v56 = vadd.f32 %v4608_v51, %v1197_v33  ;;  %v1893_v47 = vmax.f32 %v1485_v19, 0.0  ;;  %v2066_v51 = vld [vmem:[%s5237_s15 + $0x510] sm:$0xff]  ;;  %v2067_v32 = vld [vmem:[%s5237_s15 + $0x518] sm:$0xff]  ;;  %v2052_v33 = vld [vmem:[%s5237_s15 + $0x4a0] sm:$0xff] }
 0x6ca   :  { %v1895_v48 = vmax.f32 %v1562_v21, 0.0  ;;  %v1633_v18 = vadd.f32 %v4651_v10, %v4814_v31  ;;  %v1710_v49 = vadd.f32 %v4653_v13, %v4819_v35  ;;  %v2053_v10 = vld [vmem:[%s5237_s15 + $0x4a8] sm:$0xff]  ;;  %v2084_v13 = vld [vmem:[%s5237_s15 + $0x5a0] sm:$0xff]  ;;  %v3607_v59 = vpack.c.bf16 %v2035_v30, %v2034_v29  ;;  %v2086_v6 = vld [vmem:[%s5237_s15 + $0x5b0] sm:$0xff] }
 0x6cb   :  { %v1892_v54 = vmax.f32 %v1483_v12, 0.0  ;;  %v1894_v55 = vmax.f32 %v1560_v56, 0.0  ;;  %v3639_v60 = vpack.c.bf16 %v2067_v32, %v2066_v51  ;;  %v3609_v1 = vpack.c.bf16 %v2053_v10, %v2052_v33  ;;  %v2038_v27 = vld [vmem:[%s5237_s15 + $0x430] sm:$0xff]  ;;  %v2039_v15 = vld [vmem:[%s5237_s15 + $0x438] sm:$0xff]  ;;  %v2040_v56 = vld [vmem:[%s5237_s15 + $0x440] sm:$0xff] }
 0x6cc   :  { %3568 = vmatpush3.bf16.msra.mxu1 %v3567_v20  ;;  %3600 = vmatpush3.bf16.msra.mxu0 %v3599_v58  ;;  %v1881_v0 = vmax.f32 %v1633_v18, 0.0  ;;  %v1883_v26 = vmax.f32 %v1710_v49, 0.0  ;;  %v3641_v20 = vpack.c.bf16 %v2085_v52, %v2084_v13  ;;  %v2068_v58 = vld [vmem:[%s5237_s15 + $0x520] sm:$0xff]  ;;  %v3611_v8 = vpack.c.bf16 %v2037_v62, %v2036_v38  ;;  %v2070_v21 = vld [vmem:[%s5237_s15 + $0x530] sm:$0xff]  ;;  %v2041_v29 = vld [vmem:[%s5237_s15 + $0x448] sm:$0xff] }
 0x6cd   :  { %3602 = vmatprep.subr.bf16.mxu1 %v3601_v37  ;;  %3634 = vmatprep.subr.bf16.mxu0 %v3633_v14  ;;  %v2069_v37 = vld [vmem:[%s5237_s15 + $0x528] sm:$0xff]  ;;  %v3613_v23 = vpack.c.bf16 %v2055_v2, %v2054_v53  ;;  %v3645_v19 = vpack.c.bf16 %v2087_v7, %v2086_v6  ;;  %v2058_v49 = vld [vmem:[%s5237_s15 + $0x4d0] sm:$0xff]  ;;  %v2059_v51 = vld [vmem:[%s5237_s15 + $0x4d8] sm:$0xff]  ;;  %v3619_v10 = vpack.c.bf16 %v2041_v29, %v2040_v56 }
 0x6ce   :  { %v3643_v14 = vpack.c.bf16 %v2069_v37, %v2068_v58  ;;  %v2073_v18 = vld [vmem:[%s5237_s15 + $0x548] sm:$0xff]  ;;  %v2090_v32 = vld [vmem:[%s5237_s15 + $0x5d0] sm:$0xff]  ;;  %v2091_v33 = vld [vmem:[%s5237_s15 + $0x5d8] sm:$0xff] }
 0x6cf   :  { %2382 = vmatmul.mubr.f32.vlgmr.msra.gmra.mrb[34].mxu1 %v1876_v11  ;;  %2457 = vmatmul.mubr.f32.vlgmr.msra.gmra.mrb[30].mxu0 %v1878_v57  ;;  %v2089_v11 = vld [vmem:[%s5237_s15 + $0x5c8] sm:$0xff]  ;;  %v3615_v57 = vpack.c.bf16 %v2039_v15, %v2038_v27  ;;  %v2042_v52 = vld [vmem:[%s5237_s15 + $0x450] sm:$0xff]  ;;  %v2075_v38 = vld [vmem:[%s5237_s15 + $0x558] sm:$0xff] }
 0x6d0   :  { %2386 = vmatprep.mubr.f32.mxu1 %v1893_v47  ;;  %2461 = vmatprep.mubr.f32.mxu0 %v1895_v48  ;;  %v2072_v48 = vld [vmem:[%s5237_s15 + $0x540] sm:$0xff]  ;;  %v2045_v53 = vld [vmem:[%s5237_s15 + $0x468] sm:$0xff]  ;;  %v2063_v27 = vld [vmem:[%s5237_s15 + $0x4f8] sm:$0xff] }
 0x6d1   :  { %3604 = vmatpush3.bf16.msra.mxu1 %v3603_v36  ;;  %3636 = vmatpush3.bf16.msra.mxu0 %v3635_v41  ;;  %v2071_v36 = vld [vmem:[%s5237_s15 + $0x538] sm:$0xff]  ;;  %v2056_v41 = vld [vmem:[%s5237_s15 + $0x4c0] sm:$0xff]  ;;  %v3651_v13 = vpack.c.bf16 %v2073_v18, %v2072_v48  ;;  %v2094_v15 = vld [vmem:[%s5237_s15 + $0x5f0] sm:$0xff] }
 0x6d2   :  { %3606 = vmatprep.subr.bf16.mxu1 %v3605_v42  ;;  %3638 = vmatprep.subr.bf16.mxu0 %v3637_v43  ;;  %v2057_v42 = vld [vmem:[%s5237_s15 + $0x4c8] sm:$0xff]  ;;  %v2088_v43 = vld [vmem:[%s5237_s15 + $0x5c0] sm:$0xff]  ;;  %v3647_v12 = vpack.c.bf16 %v2071_v36, %v2070_v21  ;;  %v2046_v36 = vld [vmem:[%s5237_s15 + $0x470] sm:$0xff] }
 0x6d3   :  { %2387 = vmatmul.mubr.f32.gmra.mrb[36].mxu1 %v1892_v54  ;;  %2462 = vmatmul.mubr.f32.gmra.mrb[32].mxu0 %v1894_v55  ;;  %v3617_v30 = vpack.c.bf16 %v2057_v42, %v2056_v41  ;;  %v3649_v47 = vpack.c.bf16 %v2089_v11, %v2088_v43  ;;  %v2043_v54 = vld [vmem:[%s5237_s15 + $0x458] sm:$0xff]  ;;  %v3621_v55 = vpack.c.bf16 %v2059_v51, %v2058_v49  ;;  %v2060_v62 = vld [vmem:[%s5237_s15 + $0x4e0] sm:$0xff]  ;;  %v2097_v51 = vld [vmem:[%s5237_s15 + $0x608] sm:$0xff] }
 0x6d4   :  { %2531 = vmatprep.mubr.f32.mxu1 %v1881_v0  ;;  %2606 = vmatprep.mubr.f32.mxu0 %v1883_v26  ;;  %v2061_v0 = vld [vmem:[%s5237_s15 + $0x4e8] sm:$0xff]  ;;  %v2092_v26 = vld [vmem:[%s5237_s15 + $0x5e0] sm:$0xff]  ;;  %v2047_v41 = vld [vmem:[%s5237_s15 + $0x478] sm:$0xff]  ;;  %v1205_v42 = vrot.slane %v4590_v40, %v1172_v25 }
 0x6d5   :  { %3608 = vmatpush3.bf16.msra.mxu1 %v3607_v59  ;;  %3640 = vmatpush3.bf16.msra.mxu0 %v3639_v60  ;;  %v3653_v59 = vpack.c.bf16 %v2091_v33, %v2090_v32  ;;  %v2074_v60 = vld [vmem:[%s5237_s15 + $0x550] sm:$0xff]  ;;  %v2044_v37 = vld [vmem:[%s5237_s15 + $0x460] sm:$0xff]  ;;  %v3625_v2 = vpack.c.bf16 %v2061_v0, %v2060_v62  ;;  %v2145_v40 = vld [vmem:[%s5237_s15 + $0x788] sm:$0xff]  ;;  %v3631_v29 = vpack.c.bf16 %v2047_v41, %v2046_v36 }
 0x6d6   :  { %3610 = vmatprep.subr.bf16.mxu1 %v3609_v1  ;;  %3642 = vmatprep.subr.bf16.mxu0 %v3641_v20  ;;  %v2093_v1 = vld [vmem:[%s5237_s15 + $0x5e8] sm:$0xff]  ;;  %v3623_v20 = vpack.c.bf16 %v2043_v54, %v2042_v52  ;;  %v3655_v58 = vpack.c.bf16 %v2075_v38, %v2074_v60  ;;  %v2076_v7 = vld [vmem:[%s5237_s15 + $0x560] sm:$0xff]  ;;  %v1639_v32 = vadd.f32 %v4690_v45, %v4814_v31  ;;  %v2115_v52 = vld [vmem:[%s5237_s15 + $0x698] sm:$0xff]  ;;  %v1882_v54 = vmax.f32 %v4649_v9, 0.0 }
 0x6d7   :  { %v3657_v6 = vpack.c.bf16 %v2093_v1, %v2092_v26  ;;  %v2112_v56 = vld [vmem:[%s5237_s15 + $0x680] sm:$0xff]  ;;  %v1716_v33 = vadd.f32 %v4692_v46, %v4819_v35  ;;  %v2146_v45 = vld [vmem:[%s5237_s15 + $0x790] sm:$0xff]  ;;  %v2147_v46 = vld [vmem:[%s5237_s15 + $0x798] sm:$0xff] }
 0x6d8   :  { %v2144_v25 = vld [vmem:[%s5237_s15 + $0x780] sm:$0xff]  ;;  %v3665_v48 = vpack.c.bf16 %v2113_v24, %v2112_v56  ;;  %v2098_v60 = vld [vmem:[%s5237_s15 + $0x610] sm:$0xff]  ;;  %v2099_v38 = vld [vmem:[%s5237_s15 + $0x618] sm:$0xff]  ;;  %v1897_v62 = vmax.f32 %v1639_v32, 0.0  ;;  %v3701_v1 = vpack.c.bf16 %v2147_v46, %v2146_v45 }
 0x6d9   :  { %3612 = vmatpush3.bf16.msra.mxu1 %v3611_v8  ;;  %3644 = vmatpush3.bf16.msra.mxu0 %v3643_v14  ;;  %v2077_v8 = vld [vmem:[%s5237_s15 + $0x568] sm:$0xff]  ;;  %v2062_v14 = vld [vmem:[%s5237_s15 + $0x4f0] sm:$0xff]  ;;  %v3697_v18 = vpack.c.bf16 %v2145_v40, %v2144_v25  ;;  %v2096_v49 = vld [vmem:[%s5237_s15 + $0x600] sm:$0xff]  ;;  %v1899_v0 = vmax.f32 %v1716_v33, 0.0 }
 0x6da   :  { %3614 = vmatprep.subr.bf16.mxu1 %v3613_v23  ;;  %3646 = vmatprep.subr.bf16.mxu0 %v3645_v19  ;;  %v2095_v23 = vld [vmem:[%s5237_s15 + $0x5f8] sm:$0xff]  ;;  %v3627_v19 = vpack.c.bf16 %v2045_v53, %v2044_v37  ;;  %v3659_v21 = vpack.c.bf16 %v2077_v8, %v2076_v7  ;;  %v3629_v43 = vpack.c.bf16 %v2063_v27, %v2062_v14  ;;  %v2130_v9 = vld [vmem:[%s5237_s15 + $0x710] sm:$0xff]  ;;  %v2148_v37 = vld [vmem:[%s5237_s15 + $0x7a0] sm:$0xff] }
 0x6db   :  { %v3661_v11 = vpack.c.bf16 %v2095_v23, %v2094_v15  ;;  %v3667_v31 = vpack.c.bf16 %v2097_v51, %v2096_v49  ;;  %v2149_v53 = vld [vmem:[%s5237_s15 + $0x7a8] sm:$0xff]  ;;  %v3671_v7 = vpack.c.bf16 %v2099_v38, %v2098_v60  ;;  %v2100_v14 = vld [vmem:[%s5237_s15 + $0x620] sm:$0xff]  ;;  %v1885_v15 = vmax.f32 %v4737_v16, 0.0  ;;  %v2118_v41 = vld [vmem:[%s5237_s15 + $0x6b0] sm:$0xff] }
 0x6dc   :  { %v2101_v27 = vld [vmem:[%s5237_s15 + $0x628] sm:$0xff]  ;;  %v1887_v23 = vmax.f32 %v4739_v17, 0.0  ;;  %v2119_v16 = vld [vmem:[%s5237_s15 + $0x6b8] sm:$0xff]  ;;  %v2150_v17 = vld [vmem:[%s5237_s15 + $0x7b0] sm:$0xff] }
 0x6dd   :  { %3616 = vmatpush3.bf16.msra.mxu1 %v3615_v57  ;;  %3648 = vmatpush3.bf16.msra.mxu0 %v3647_v12  ;;  %v2078_v57 = vld [vmem:[%s5237_s15 + $0x570] sm:$0xff]  ;;  %v2079_v12 = vld [vmem:[%s5237_s15 + $0x578] sm:$0xff]  ;;  %v2133_v36 = vld [vmem:[%s5237_s15 + $0x728] sm:$0xff]  ;;  %v3677_v56 = vpack.c.bf16 %v2119_v16, %v2118_v41 }
 0x6de   :  { %3618 = vmatprep.subr.bf16.mxu1 %v3617_v30  ;;  %3650 = vmatprep.subr.bf16.mxu0 %v3649_v47  ;;  %v3663_v30 = vpack.c.bf16 %v2079_v12, %v2078_v57  ;;  %v1631_v47 = vadd.f32 %v4641_v3, %v1205_v42  ;;  %v2128_v3 = vld [vmem:[%s5237_s15 + $0x700] sm:$0xff]  ;;  %v2102_v57 = vld [vmem:[%s5237_s15 + $0x630] sm:$0xff]  ;;  %v2103_v12 = vld [vmem:[%s5237_s15 + $0x638] sm:$0xff] }
 0x6df   :  { %v2134_v25 = vld [vmem:[%s5237_s15 + $0x730] sm:$0xff]  ;;  %v2135_v40 = vld [vmem:[%s5237_s15 + $0x738] sm:$0xff]  ;;  %v2104_v51 = vld [vmem:[%s5237_s15 + $0x640] sm:$0xff] }
 0x6e0   :  { %v1880_v35 = vmax.f32 %v1631_v47, 0.0  ;;  %v2152_v47 = vld [vmem:[%s5237_s15 + $0x7c0] sm:$0xff]  ;;  %v3711_v49 = vpack.c.bf16 %v2135_v40, %v2134_v25  ;;  %v2105_v32 = vld [vmem:[%s5237_s15 + $0x648] sm:$0xff]  ;;  %v2123_v45 = vld [vmem:[%s5237_s15 + $0x6d8] sm:$0xff]  ;;  %v1900_v25 = vmax.f32 %v4758_v28, 0.0  ;;  %v1902_v40 = vmax.f32 %v4760_v22, 0.0 }
 0x6e1   :  { %3620 = vmatpush3.bf16.msra.mxu1 %v3619_v10  ;;  %3652 = vmatpush3.bf16.msra.mxu0 %v3651_v13  ;;  %v2129_v10 = vld [vmem:[%s5237_s15 + $0x708] sm:$0xff]  ;;  %v2114_v13 = vld [vmem:[%s5237_s15 + $0x690] sm:$0xff]  ;;  %v2111_v16 = vld [vmem:[%s5237_s15 + $0x678] sm:$0xff] }
 0x6e2   :  { %3622 = vmatprep.subr.bf16.mxu1 %v3621_v55  ;;  %3654 = vmatprep.subr.bf16.mxu0 %v3653_v59  ;;  %v1637_v55 = vadd.f32 %v4675_v34, %v1205_v42  ;;  %v3699_v59 = vpack.c.bf16 %v2129_v10, %v2128_v3  ;;  %v3669_v26 = vpack.c.bf16 %v2115_v52, %v2114_v13  ;;  %v2131_v34 = vld [vmem:[%s5237_s15 + $0x718] sm:$0xff]  ;;  %v2136_v10 = vld [vmem:[%s5237_s15 + $0x740] sm:$0xff]  ;;  %v2137_v13 = vld [vmem:[%s5237_s15 + $0x748] sm:$0xff] }
 0x6e3   :  { %v3703_v8 = vpack.c.bf16 %v2131_v34, %v2130_v9  ;;  %v2151_v42 = vld [vmem:[%s5237_s15 + $0x7b8] sm:$0xff]  ;;  %v2122_v52 = vld [vmem:[%s5237_s15 + $0x6d0] sm:$0xff]  ;;  %v2156_v9 = vld [vmem:[%s5237_s15 + $0x7e0] sm:$0xff] }
 0x6e4   :  { %v3709_v24 = vpack.c.bf16 %v2151_v42, %v2150_v17  ;;  %v2154_v46 = vld [vmem:[%s5237_s15 + $0x7d0] sm:$0xff]  ;;  %v3685_v60 = vpack.c.bf16 %v2123_v45, %v2122_v52  ;;  %v2157_v34 = vld [vmem:[%s5237_s15 + $0x7e8] sm:$0xff]  ;;  %v2143_v42 = vld [vmem:[%s5237_s15 + $0x778] sm:$0xff] }
 0x6e5   :  { %3624 = vmatpush3.bf16.msra.mxu1 %v3623_v20  ;;  %3656 = vmatpush3.bf16.msra.mxu0 %v3655_v58  ;;  %v2116_v20 = vld [vmem:[%s5237_s15 + $0x6a0] sm:$0xff]  ;;  %v2117_v58 = vld [vmem:[%s5237_s15 + $0x6a8] sm:$0xff]  ;;  %v2142_v17 = vld [vmem:[%s5237_s15 + $0x770] sm:$0xff] }
 0x6e6   :  { %3626 = vmatprep.subr.bf16.mxu1 %v3625_v2  ;;  %3658 = vmatprep.subr.bf16.mxu0 %v3657_v6  ;;  %v1896_v2 = vmax.f32 %v1637_v55, 0.0  ;;  %v1898_v6 = vmax.f32 %v4688_v44, 0.0  ;;  %v3705_v44 = vpack.c.bf16 %v2149_v53, %v2148_v37  ;;  %v2106_v55 = vld [vmem:[%s5237_s15 + $0x650] sm:$0xff]  ;;  %v2108_v37 = vld [vmem:[%s5237_s15 + $0x660] sm:$0xff]  ;;  %v2109_v53 = vld [vmem:[%s5237_s15 + $0x668] sm:$0xff] }
 0x6e9   :  { %3628 = vmatpush3.bf16.msra.mxu1 %v3627_v19  ;;  %3660 = vmatpush3.bf16.msra.mxu0 %v3659_v21  ;;  %v3673_v19 = vpack.c.bf16 %v2117_v58, %v2116_v20  ;;  %v2132_v21 = vld [vmem:[%s5237_s15 + $0x720] sm:$0xff] }
 0x6ea   :  { %3630 = vmatprep.subr.bf16.mxu1 %v3629_v43  ;;  %3662 = vmatprep.subr.bf16.mxu0 %v3661_v11  ;;  %v3675_v43 = vpack.c.bf16 %v2101_v27, %v2100_v14  ;;  %v3707_v11 = vpack.c.bf16 %v2133_v36, %v2132_v21  ;;  %v2126_v14 = vld [vmem:[%s5237_s15 + $0x6f0] sm:$0xff]  ;;  %v2127_v27 = vld [vmem:[%s5237_s15 + $0x6f8] sm:$0xff] }
 0x6eb   :  { %v2110_v21 = vld [vmem:[%s5237_s15 + $0x670] sm:$0xff]  ;;  %v3693_v36 = vpack.c.bf16 %v2127_v27, %v2126_v14 }
 0x6ed   :  { %3632 = vmatpush3.bf16.msra.mxu1 %v3631_v29  ;;  %3664 = vmatpush3.bf16.msra.mxu0 %v3663_v30  ;;  %v2120_v29 = vld [vmem:[%s5237_s15 + $0x6c0] sm:$0xff]  ;;  %v2121_v30 = vld [vmem:[%s5237_s15 + $0x6c8] sm:$0xff] }
 0x6ee   :  { %3666 = vmatprep.subr.bf16.mxu1 %v3665_v48  ;;  %3698 = vmatprep.subr.bf16.mxu0 %v3697_v18  ;;  %v2153_v48 = vld [vmem:[%s5237_s15 + $0x7c8] sm:$0xff]  ;;  %v3679_v18 = vpack.c.bf16 %v2103_v12, %v2102_v57  ;;  %v3681_v33 = vpack.c.bf16 %v2121_v30, %v2120_v29  ;;  %v1884_v57 = vmax.f32 %v4724_v4, 0.0  ;;  %v1886_v12 = vmax.f32 %v4726_v5, 0.0  ;;  %v2884_v4 = vld [vmem:[%s5239_s16] ss:$0 sm:$0xff] }
 0x6ef   :  { %v3713_v3 = vpack.c.bf16 %v2153_v48, %v2152_v47 }
 0x6f0   :  { %2532 = vmatmul.mubr.f32.vlgmr.msra.gmra.mrb[38].mxu1 %v1880_v35  ;;  %2607 = vmatmul.mubr.f32.vlgmr.msra.gmra.mrb[34].mxu0 %v1882_v54  ;;  %v3683_v35 = vpack.c.bf16 %v2105_v32, %v2104_v51  ;;  %v3715_v54 = vpack.c.bf16 %v2137_v13, %v2136_v10 }
 0x6f1   :  { %2536 = vmatprep.mubr.f32.mxu1 %v1897_v62  ;;  %2611 = vmatprep.mubr.f32.mxu0 %v1899_v0  ;;  %v2138_v62 = vld [vmem:[%s5237_s15 + $0x750] sm:$0xff]  ;;  %v2139_v0 = vld [vmem:[%s5237_s15 + $0x758] sm:$0xff] }
 0x6f2   :  { %3668 = vmatpush3.bf16.msra.mxu1 %v3667_v31  ;;  %3700 = vmatpush3.bf16.msra.mxu0 %v3699_v59  ;;  %v2155_v31 = vld [vmem:[%s5237_s15 + $0x7d8] sm:$0xff]  ;;  %v3719_v58 = vpack.c.bf16 %v2139_v0, %v2138_v62 }
 0x6f3   :  { %3670 = vmatprep.subr.bf16.mxu1 %v3669_v26  ;;  %3702 = vmatprep.subr.bf16.mxu0 %v3701_v1  ;;  %v2107_v59 = vld [vmem:[%s5237_s15 + $0x658] sm:$0xff]  ;;  %v3717_v38 = vpack.c.bf16 %v2155_v31, %v2154_v46  ;;  %v2124_v26 = vld [vmem:[%s5237_s15 + $0x6e0] sm:$0xff]  ;;  %v2125_v1 = vld [vmem:[%s5237_s15 + $0x6e8] sm:$0xff] }
 0x6f4   :  { %2537 = vmatmul.mubr.f32.gmra.mrb[40].mxu1 %v1896_v2  ;;  %2612 = vmatmul.mubr.f32.gmra.mrb[36].mxu0 %v1898_v6  ;;  %v3687_v20 = vpack.c.bf16 %v2107_v59, %v2106_v55  ;;  %v3689_v2 = vpack.c.bf16 %v2125_v1, %v2124_v26  ;;  %v3721_v6 = vpack.c.bf16 %v2157_v34, %v2156_v9 }
 0x6f5   :  { %2681 = vmatprep.mubr.f32.mxu1 %v1885_v15  ;;  %2756 = vmatprep.mubr.f32.mxu0 %v1887_v23  ;;  %v2158_v15 = vld [vmem:[%s5237_s15 + $0x7f0] sm:$0xff]  ;;  %v2159_v23 = vld [vmem:[%s5237_s15 + $0x7f8] sm:$0xff] }
 0x6f6   :  { %3672 = vmatpush3.bf16.msra.mxu1 %v3671_v7  ;;  %3704 = vmatpush3.bf16.msra.mxu0 %v3703_v8  ;;  %v2140_v7 = vld [vmem:[%s5237_s15 + $0x760] sm:$0xff]  ;;  %v2141_v8 = vld [vmem:[%s5237_s15 + $0x768] sm:$0xff]  ;;  %v3725_v41 = vpack.c.bf16 %v2159_v23, %v2158_v15 }
 0x6f7   :  { %3674 = vmatprep.subr.bf16.mxu1 %v3673_v19  ;;  %3706 = vmatprep.subr.bf16.mxu0 %v3705_v44  ;;  %v3691_v19 = vpack.c.bf16 %v2109_v53, %v2108_v37  ;;  %v3723_v44 = vpack.c.bf16 %v2141_v8, %v2140_v7 }
 0x6fa   :  { %3676 = vmatpush3.bf16.msra.mxu1 %v3675_v43  ;;  %3708 = vmatpush3.bf16.msra.mxu0 %v3707_v11  ;;  %v3695_v43 = vpack.c.bf16 %v2111_v16, %v2110_v21  ;;  %v3727_v11 = vpack.c.bf16 %v2143_v42, %v2142_v17 }
 0x6fb   :  { %3678 = vmatprep.subr.bf16.mxu1 %v3677_v56  ;;  %3710 = vmatprep.subr.bf16.mxu0 %v3709_v24  ;;  %v1901_v56 = vmax.f32 %v4771_v61, 0.0  ;;  %v1903_v24 = vmax.f32 %v4773_v39, 0.0 }
 0x6fe   :  { %3680 = vmatpush3.bf16.msra.mxu1 %v3679_v18  ;;  %3712 = vmatpush3.bf16.msra.mxu0 %v3711_v49 }
 0x6ff   :  { %3682 = vmatprep.subr.bf16.mxu1 %v3681_v33  ;;  %3714 = vmatprep.subr.bf16.mxu0 %v3713_v3 }
 0x702   :  { %3684 = vmatpush3.bf16.msra.mxu1 %v3683_v35  ;;  %3716 = vmatpush3.bf16.msra.mxu0 %v3715_v54 }
 0x703   :  { %3686 = vmatprep.subr.bf16.mxu1 %v3685_v60  ;;  %3718 = vmatprep.subr.bf16.mxu0 %v3717_v38 }
 0x706   :  { %3688 = vmatpush3.bf16.msra.mxu1 %v3687_v20  ;;  %3720 = vmatpush3.bf16.msra.mxu0 %v3719_v58 }
 0x707   :  { %3690 = vmatprep.subr.bf16.mxu1 %v3689_v2  ;;  %3722 = vmatprep.subr.bf16.mxu0 %v3721_v6 }
 0x70a   :  { %3692 = vmatpush3.bf16.msra.mxu1 %v3691_v19  ;;  %3724 = vmatpush3.bf16.msra.mxu0 %v3723_v44 }
 0x70b   :  { %3694 = vmatprep.subr.bf16.mxu1 %v3693_v36  ;;  %3726 = vmatprep.subr.bf16.mxu0 %v3725_v41 }
 0x70e   :  { %3696 = vmatpush3.bf16.msra.mxu1 %v3695_v43  ;;  %3728 = vmatpush3.bf16.msra.mxu0 %v3727_v11 }
 0x711   :  { %2682 = vmatmul.mubr.f32.vlgmr.msra.gmra.mrb[42].mxu1 %v1884_v57  ;;  %2757 = vmatmul.mubr.f32.vlgmr.msra.gmra.mrb[38].mxu0 %v1886_v12 }
 0x712   :  { %2686 = vmatprep.mubr.f32.mxu1 %v1901_v56  ;;  %2761 = vmatprep.mubr.f32.mxu0 %v1903_v24 }
 0x715   :  { %2687 = vmatmul.mubr.f32.gmra.mrb[44].mxu1 %v1900_v25  ;;  %2762 = vmatmul.mubr.f32.gmra.mrb[40].mxu0 %v1902_v40 }
 0x782   :  { %v2973_v29 = vpop.f32.mrb[30].mxu1  ;;  %v3011_v30 = vpop.f32.mrb[26].mxu0 }
 0x783   :  { %v2974_v5 = vpop.f32.mrb[31].mxu1  ;;  %v3012_v61 = vpop.f32.mrb[27].mxu0 }
 0x784   :  { %v2975_v47 = vadd.f32 %v2974_v5, %v2973_v29  ;;  %v3013_v39 = vadd.f32 %v3012_v61, %v3011_v30 }
 0x786   :  { %v2234_v48 = vadd.f32 %v2975_v47, %v2884_v4  ;;  %v2976_v18 = vpop.f32.mrb[32].mxu1  ;;  %v3014_v49 = vpop.f32.mrb[28].mxu0 }
 0x787   :  { %v2977_v51 = vpop.f32.mrb[33].mxu1  ;;  %v3015_v32 = vpop.f32.mrb[29].mxu0 }
 0x788   :  { %v2309_v28 = vadd.f32 %v3013_v39, %v2234_v48  ;;  %v2978_v33 = vadd.f32 %v2977_v51, %v2976_v18  ;;  %v3016_v22 = vadd.f32 %v3015_v32, %v3014_v49 }
 0x78a   :  { %v2239_v3 = vadd.f32 %v2978_v33, %v2884_v4 }
 0x78c   :  { %v2314_v10 = vadd.f32 %v3016_v22, %v2239_v3 }
 0x7a2   :  { %v3049_v13 = vpop.f32.mrb[34].mxu1  ;;  %v3087_v52 = vpop.f32.mrb[30].mxu0 }
 0x7a3   :  { %v3050_v45 = vpop.f32.mrb[35].mxu1  ;;  %v3088_v46 = vpop.f32.mrb[31].mxu0 }
 0x7a4   :  { %v3051_v31 = vadd.f32 %v3050_v45, %v3049_v13  ;;  %v3089_v35 = vadd.f32 %v3088_v46, %v3087_v52 }
 0x7a6   :  { %v2384_v54 = vadd.f32 %v3051_v31, %v2309_v28  ;;  %v3052_v55 = vpop.f32.mrb[36].mxu1  ;;  %v3090_v59 = vpop.f32.mrb[32].mxu0 }
 0x7a7   :  { %v3053_v60 = vpop.f32.mrb[37].mxu1  ;;  %v3091_v38 = vpop.f32.mrb[33].mxu0 }
 0x7a8   :  { %v2459_v62 = vadd.f32 %v3089_v35, %v2384_v54  ;;  %v3054_v0 = vadd.f32 %v3053_v60, %v3052_v55  ;;  %v3092_v26 = vadd.f32 %v3091_v38, %v3090_v59  ;;  %v2885_v54 = vld [vmem:[%s5241_s17] ss:$0 sm:$0xff] }
 0x7a9   :  { %v2886_v59 = vld [vmem:[%s5242_s18] ss:$0 sm:$0xff] }
 0x7aa   :  { %v2389_v1 = vadd.f32 %v3054_v0, %v2314_v10 }
 0x7ac   :  { %v2464_v9 = vadd.f32 %v3092_v26, %v2389_v1  ;;  %v2887_v26 = vld [vmem:[%s5243_s19] ss:$0 sm:$0xff] }
 0x7c3   :  { %v3125_v34 = vpop.f32.mrb[38].mxu1  ;;  %v3163_v20 = vpop.f32.mrb[34].mxu0 }
 0x7c4   :  { %v3126_v58 = vpop.f32.mrb[39].mxu1  ;;  %v3164_v37 = vpop.f32.mrb[35].mxu0 }
 0x7c5   :  { %v3127_v53 = vadd.f32 %v3126_v58, %v3125_v34  ;;  %v3165_v2 = vadd.f32 %v3164_v37, %v3163_v20 }
 0x7c7   :  { %v2534_v6 = vadd.f32 %v3127_v53, %v2459_v62  ;;  %v3128_v7 = vpop.f32.mrb[40].mxu1  ;;  %v3166_v8 = vpop.f32.mrb[36].mxu0 }
 0x7c8   :  { %v3129_v14 = vpop.f32.mrb[41].mxu1  ;;  %v3167_v27 = vpop.f32.mrb[37].mxu0 }
 0x7c9   :  { %v2609_v15 = vadd.f32 %v3165_v2, %v2534_v6  ;;  %v3130_v23 = vadd.f32 %v3129_v14, %v3128_v7  ;;  %v3168_v19 = vadd.f32 %v3167_v27, %v3166_v8 }
 0x7cb   :  { %v2539_v44 = vadd.f32 %v3130_v23, %v2464_v9 }
 0x7cd   :  { %v2614_v21 = vadd.f32 %v3168_v19, %v2539_v44 }
 0x7e4   :  { %v3201_v36 = vpop.f32.mrb[42].mxu1  ;;  %v3239_v41 = vpop.f32.mrb[38].mxu0 }
 0x7e5   :  { %v3202_v16 = vpop.f32.mrb[43].mxu1  ;;  %v3240_v17 = vpop.f32.mrb[39].mxu0 }
 0x7e6   :  { %v3203_v42 = vadd.f32 %v3202_v16, %v3201_v36  ;;  %v3241_v43 = vadd.f32 %v3240_v17, %v3239_v41 }
 0x7e8   :  { %v2684_v11 = vadd.f32 %v3203_v42, %v2609_v15  ;;  %v3204_v57 = vpop.f32.mrb[44].mxu1  ;;  %v3242_v12 = vpop.f32.mrb[40].mxu0 }
 0x7e9   :  { %v3205_v56 = vpop.f32.mrb[45].mxu1  ;;  %v3243_v24 = vpop.f32.mrb[41].mxu0 }
 0x7ea   :  { %v2759_v25 = vadd.f32 %v3241_v43, %v2684_v11  ;;  %v3206_v40 = vadd.f32 %v3205_v56, %v3204_v57  ;;  %v3244_v29 = vadd.f32 %v3243_v24, %v3242_v12 }
 0x7ec   :  { %v2689_v30 = vadd.f32 %v3206_v40, %v2614_v21  ;;  %v2767_v4 = vadd.f32 %v2759_v25, %v4128_v50 }
 0x7ee   :  { %v2764_v5 = vadd.f32 %v3244_v29, %v2689_v30  ;;  %v2769_v61 = vsel %vm83_vm0, %v2767_v4, 0.0 }
 0x7ef   :  { %2770 = vadd.xlane.f32.xlu0 %v2769_v61 }
 0x7f0   :  { %v2768_v47 = vadd.f32 %v2764_v5, %v4159_v63  ;;  %v26_v63 = vstv %s5240_s20 }
 0x7f1   :  { %27 = vst [vmem:[#allocation2] sm:$0x1] %v26_v63 }
 0x7f2   :  { %v2772_v39 = vsel %vm83_vm0, %v2768_v47, 0.0 }
 0x7f3   :  { %2773 = vadd.xlane.f32.xlu1 %v2772_v39 }
 0x7f8   :  { %v2888_v6 = vld [vmem:[#allocation2] ss:$0 sm:$0xff] }
 0x87c   :  { %v2771_v48 = vpop.xlane.xlu0 %2770 }
 0x87d   :  { %v2775_v18 = vmul.f32 0.03125, %v2771_v48 }
 0x87f   :  { %v2777_v49 = vsub.f32 %v2767_v4, %v2775_v18 }
 0x880   :  { %v2774_v51 = vpop.xlane.xlu1 %2773 }
 0x881   :  { %v2776_v32 = vmul.f32 0.03125, %v2774_v51  ;;  %v2779_v28 = vmul.f32 %v2777_v49, %v2777_v49 }
 0x883   :  { %v2778_v33 = vsub.f32 %v2768_v47, %v2776_v32  ;;  %v2781_v22 = vsel %vm83_vm0, %v2779_v28, 0.0 }
 0x884   :  { %2782 = vadd.xlane.f32.xlu0 %v2781_v22 }
 0x885   :  { %v2780_v50 = vmul.f32 %v2778_v33, %v2778_v33 }
 0x887   :  { %v2784_v3 = vsel %vm83_vm0, %v2780_v50, 0.0 }
 0x888   :  { %2785 = vadd.xlane.f32.xlu1 %v2784_v3 }
 0x911   :  { %v2783_v10 = vpop.xlane.xlu0 %2782 }
 0x912   :  { %v2787_v13 = vmul.f32 0.03125, %v2783_v10 }
 0x914   :  { %v2789_v52 = vadd.f32 1e-05, %v2787_v13 }
 0x915   :  { %v2786_v45 = vpop.xlane.xlu1 %2785 }
 0x916   :  { %3748 = vrsqrt.f32 %v2789_v52  ;;  %v2788_v46 = vmul.f32 0.03125, %v2786_v45 }
 0x918   :  { %v2790_v31 = vadd.f32 1e-05, %v2788_v46 }
 0x91a   :  { %3750 = vrsqrt.f32 %v2790_v31 }
 0x920   :  { %v3749_v35 = vpop.eup %3748 }
 0x921   :  { %v2793_v55 = vmul.f32 %v3749_v35, %v2777_v49 }
 0x923   :  { %v2802_v60 = vmul.f32 %v2885_v54, %v2793_v55 }
 0x924   :  { %v3751_v38 = vpop.eup %3750 }
 0x925   :  { %v2811_v62 = vadd.f32 %v2886_v59, %v2802_v60  ;;  %v2794_v0 = vmul.f32 %v3751_v38, %v2778_v33 }
 0x927   :  { %v2813_v1 = vmax.f32 %v2811_v62, 0.0  ;;  %v2803_v9 = vmul.f32 %v2885_v54, %v2794_v0 }
 0x929   :  { %v2822_v34 = vmul.f32 %v2887_v26, %v2813_v1  ;;  %v2812_v20 = vadd.f32 %v2886_v59, %v2803_v9 }
 0x92b   :  { %v2824_v58 = vsel %vm83_vm0, %v2822_v34, 0.0  ;;  %v2814_v37 = vmax.f32 %v2812_v20, 0.0 }
 0x92c   :  { %2825 = vadd.xlane.f32.xlu0 %v2824_v58 }
 0x92d   :  { %v2823_v53 = vmul.f32 %v2887_v26, %v2814_v37 }
 0x92f   :  { %v2827_v2 = vsel %vm83_vm0, %v2823_v53, 0.0 }
 0x930   :  { %2828 = vadd.xlane.f32.xlu1 %v2827_v2 }
 0x9b9   :  { %v2826_v7 = vpop.xlane.xlu0 %2825 }
 0x9ba   :  { %v2837_v8 = vadd.f32 %v2888_v6, %v2826_v7 }
 0x9bc   :  { %2840 = vst.msk [vmem:[%s5244_s21] sm:$0xff] %vm2839_vm3, %v2837_v8 }
 0x9bd   :  { %v2829_v14 = vpop.xlane.xlu1 %2828 }
 0x9be   :  { %v2838_v27 = vadd.f32 %v2888_v6, %v2829_v14 }
 0x9c0   :  { %2841 = vst.msk [vmem:[%s5244_s21 + $0x8] sm:$0xff] %vm2839_vm3, %v2838_v27 }

</bundles_post_ra>
